<compile_context>
chip_gen: v7x
topology: tpu7x:2x2x1
jax: 0.10.0
libtpu: 0.0.40
codegen_flags: <defaults>
</compile_context>

<pallas_src>
import functools

import jax
import jax.numpy as jnp
from jax.experimental import pallas as pl
from jax.experimental.pallas import tpu as pltpu


# ----------------------------- Pallas kernels -----------------------------

def _conv_block_kernel(x_ref, w_ref, b_ref, feat_ref, pool_ref,
                       *, H, W, S, S_next, Nb):
    """Fused 3x3 conv (single K=9*Cin GEMM) + folded-BN bias + ReLU + 2x2 pool.

    x_ref   : (Nb, H*W + 2*S, Cin)   zero-padded flattened NHWC slabs (bf16)
    w_ref   : (9*Cin, Cout)          BN-folded weights, bf16, rows (kh,kw,cin)
    b_ref   : (1, Cout)              BN-folded bias, f32
    feat_ref: (Nb, H*W, Cout)        f32 pre-pool activation (for `feat`)
    pool_ref: (Nb, Ho*Wo + 2*S_next, Cout)  bf16 pooled slab (next layer input,
              interior at [S_next : S_next+Ho*Wo], halos zeroed here)
    """
    HW = H * W
    Cout = w_ref.shape[-1]
    Ho, Wo = H // 2, W // 2
    HWp = Ho * Wo

    # Column wrap-around masks (row/dh masks are redundant: the S=W+1 zero
    # padding already supplies zeros for out-of-range rows).
    ww = jax.lax.broadcasted_iota(jnp.int32, (HW, 1), 0) % W
    m_left = ww >= 1            # valid positions for the dw = -1 tap
    m_right = ww < (W - 1)      # valid positions for the dw = +1 tap

    # Build the (Nb*HW, 9*Cin) operand: 9 shifted slices concatenated on lanes.
    per_img = []
    for n in range(Nb):
        taps = []
        for dh in (-1, 0, 1):
            for dw in (-1, 0, 1):
                shift = dh * W + dw
                sl = x_ref[n, pl.ds(S + shift, HW), :]        # (HW, Cin)
                if dw == -1:
                    sl = jnp.where(m_left, sl, jnp.zeros_like(sl))
                elif dw == 1:
                    sl = jnp.where(m_right, sl, jnp.zeros_like(sl))
                taps.append(sl)
        per_img.append(jnp.concatenate(taps, axis=-1))         # (HW, 9*Cin)
    lhs = per_img[0] if Nb == 1 else jnp.concatenate(per_img, axis=0)

    # One MXU GEMM (K = 9*Cin), f32 accumulation, bias + ReLU epilogue.
    acc = jnp.dot(lhs.astype(w_ref.dtype), w_ref[...],
                  preferred_element_type=jnp.float32)           # (Nb*HW, Cout)
    y = jnp.maximum(acc + b_ref[...], 0.0)

    # Pre-pool activation for the feat list.
    feat_ref[...] = y.reshape(Nb, HW, Cout).astype(feat_ref.dtype)

    # Fused 2x2 max-pool, written directly into the padded slab the next
    # conv consumes (halos zeroed, interior = pooled activation).
    halo = jnp.zeros((Nb, S_next, Cout), pool_ref.dtype)
    pool_ref[:, pl.ds(0, S_next), :] = halo
    pool_ref[:, pl.ds(S_next + HWp, S_next), :] = halo
    for n in range(Nb):
        yi = y[n * HW:(n + 1) * HW]                             # (HW, Cout)
        p = jnp.max(yi.reshape(HW // 2, 2, Cout), axis=1)       # max over w pairs
        p = jnp.max(p.reshape(Ho, 2, Wo, Cout), axis=1)         # max over h pairs
        pool_ref[n, pl.ds(S_next, HWp), :] = (
            p.reshape(HWp, Cout).astype(pool_ref.dtype))


def _classifier_kernel(x_ref, w1_ref, b1_ref, w2_ref, b2_ref, w3_ref, b3_ref,
                       o_ref):
    """Linear+ReLU -> Linear+ReLU -> Linear, all intermediates in VMEM.
    (Dropout is identity in eval mode.)"""
    x = x_ref[...].astype(w1_ref.dtype)
    h = jnp.dot(x, w1_ref[...], preferred_element_type=jnp.float32) + b1_ref[...]
    h = jnp.maximum(h, 0.0)
    h = jnp.dot(h.astype(w2_ref.dtype), w2_ref[...],
                preferred_element_type=jnp.float32) + b2_ref[...]
    h = jnp.maximum(h, 0.0)
    o = jnp.dot(h.astype(w3_ref.dtype), w3_ref[...],
                preferred_element_type=jnp.float32) + b3_ref[...]
    o_ref[...] = o.astype(o_ref.dtype)


# ------------------------------ layer wrappers -----------------------------

def _pick_nb(N, HW):
    """Batch images per grid step: feed the MXU a taller M, keep >=2 programs."""
    if N <= 1:
        return 1
    nb = max(1, min(N // 2, 256 // max(HW, 1)))
    while N % nb:
        nb -= 1
    return max(nb, 1)


def pallas_conv_block(slab, layer, H, W, Cin_slab, eps=1e-5):
    """Fused Conv2d(3x3,pad=1) + BatchNorm2d(eval) + ReLU + MaxPool2d(2).

    slab: (N, H*W + 2*(W+1), Cin_slab) bf16 zero-haloed activation slab.
    Returns (prepool (N, H*W, Cout) f32,
             pooled slab (N, Ho*Wo + 2*(Wo+1), Cout) bf16,
             (Ho, Wo)).
    """
    N = slab.shape[0]
    w, b = layer["w"], layer["b"]
    gamma, beta = layer["gamma"], layer["beta"]
    mean, var = layer["mean"], layer["var"]
    Cin = w.shape[2]
    Cout = w.shape[-1]

    # Fold BN (eval) into conv weights / bias.
    scale = gamma / jnp.sqrt(var + eps)
    w_f = (w * scale).astype(jnp.bfloat16)                     # (3,3,Cin,Cout)
    b_f = ((b - mean) * scale + beta).astype(jnp.float32).reshape(1, Cout)
    if Cin_slab != Cin:                                        # first layer: 3 -> 8
        w_f = jnp.pad(w_f, ((0, 0), (0, 0), (0, Cin_slab - Cin), (0, 0)))
    w2d = w_f.reshape(9 * Cin_slab, Cout)                      # rows (kh,kw,cin)

    HW = H * W
    S = W + 1
    Ho, Wo = H // 2, W // 2
    HWp = Ho * Wo
    S_next = Wo + 1

    Nb = _pick_nb(N, HW)
    grid = (N // Nb,)

    kernel = functools.partial(_conv_block_kernel, H=H, W=W, S=S,
                               S_next=S_next, Nb=Nb)
    prepool, pooled_slab = pl.pallas_call(
        kernel,
        grid=grid,
        in_specs=[
            pl.BlockSpec((Nb, HW + 2 * S, Cin_slab), lambda i: (i, 0, 0)),
            pl.BlockSpec((9 * Cin_slab, Cout), lambda i: (0, 0)),
            pl.BlockSpec((1, Cout), lambda i: (0, 0)),
        ],
        out_specs=(
            pl.BlockSpec((Nb, HW, Cout), lambda i: (i, 0, 0)),
            pl.BlockSpec((Nb, HWp + 2 * S_next, Cout), lambda i: (i, 0, 0)),
        ),
        out_shape=(
            jax.ShapeDtypeStruct((N, HW, Cout), jnp.float32),
            jax.ShapeDtypeStruct((N, HWp + 2 * S_next, Cout), jnp.bfloat16),
        ),
        compiler_params=pltpu.CompilerParams(dimension_semantics=("parallel",)),
    )(slab, w2d, b_f)
    return prepool, pooled_slab, (Ho, Wo)


def pallas_classifier(x, cls_params):
    """Fused Linear(512,512)+ReLU+Dropout+Linear(512,512)+ReLU+Dropout+Linear."""
    w1, b1 = cls_params[0]["w"], cls_params[0]["b"]
    w2, b2 = cls_params[1]["w"], cls_params[1]["b"]
    w3, b3 = cls_params[2]["w"], cls_params[2]["b"]
    M = x.shape[0]
    num_classes = w3.shape[1]
    return pl.pallas_call(
        _classifier_kernel,
        out_shape=jax.ShapeDtypeStruct((M, num_classes), jnp.float32),
    )(x,
      w1.astype(jnp.bfloat16), b1.astype(jnp.float32).reshape(1, -1),
      w2.astype(jnp.bfloat16), b2.astype(jnp.float32).reshape(1, -1),
      w3.astype(jnp.bfloat16), b3.astype(jnp.float32).reshape(1, -1))


# ------------------------------- parameters --------------------------------

# Feature config: conv(+BN+ReLU) blocks each followed by an 'M' max-pool.
# With a 16x16 input, 4 pools give 1x1 spatial and 512 channels => flatten=512.
CFG = [32, "M", 64, "M", 128, "M", 512, "M"]


def init_params(key, num_classes=10, in_ch=3, dtype=jnp.float32):
    params = {"features": [], "classifier": []}
    c_in = in_ch
    for v in CFG:
        if v == "M":
            params["features"].append({"kind": "maxpool"})
            continue
        c_out = int(v)
        key, kw = jax.random.split(key)
        # Conv2d: kaiming_normal_(mode='fan_out', nonlinearity='relu'), bias=0
        std = (2.0 / (c_out * 3 * 3)) ** 0.5
        w = std * jax.random.normal(kw, (3, 3, c_in, c_out), dtype)
        # BatchNorm2d: weight=1, bias=0, running_mean=0, running_var=1
        params["features"].append({
            "kind": "conv_bn_relu",
            "w": w,
            "b": jnp.zeros((c_out,), dtype),
            "gamma": jnp.ones((c_out,), dtype),
            "beta": jnp.zeros((c_out,), dtype),
            "mean": jnp.zeros((c_out,), dtype),
            "var": jnp.ones((c_out,), dtype),
        })
        c_in = c_out

    # Classifier Linear init: normal(0, 0.01), bias=0.
    dims = [(512, 512), (512, 512), (512, num_classes)]
    for fin, fout in dims:
        key, kw = jax.random.split(key)
        w = 0.01 * jax.random.normal(kw, (fin, fout), dtype)
        params["classifier"].append({"w": w, "b": jnp.zeros((fout,), dtype)})
    return params


# -------------------------------- forward ----------------------------------

def vgg_forward(params, x_nchw, is_feat=True):
    """Matches VGG.forward(x, is_feat=True) in eval mode."""
    x = jnp.transpose(x_nchw, (0, 2, 3, 1))          # NCHW -> NHWC
    N, H, W, Cin = x.shape

    # Build the first zero-haloed bf16 activation slab once (only XLA pad in
    # the whole network); pad Cin to a multiple of 8 for clean lane layout.
    Cin_p = ((Cin + 7) // 8) * 8
    if Cin_p != Cin:
        x = jnp.pad(x, ((0, 0), (0, 0), (0, 0), (0, Cin_p - Cin)))
    S = W + 1
    slab = jnp.pad(x.reshape(N, H * W, Cin_p),
                   ((0, 0), (S, S), (0, 0))).astype(jnp.bfloat16)

    layers = params["features"]
    feat_nhwc = []
    i = 0
    while i < len(layers):
        conv = layers[i]
        assert conv["kind"] == "conv_bn_relu"
        assert i + 1 < len(layers) and layers[i + 1]["kind"] == "maxpool", (
            "this fused kernel assumes every conv is followed by a max-pool")
        Cout = conv["w"].shape[-1]

        prepool, slab_next, (Ho, Wo) = pallas_conv_block(slab, conv, H, W, Cin_p)

        # feat entry for the conv(+BN+ReLU) block (pre-pool), NHWC, f32.
        feat_nhwc.append(prepool.reshape(N, H, W, Cout))
        # feat entry for the max-pool layer: interior of the padded slab.
        S_next = Wo + 1
        pooled = slab_next[:, S_next:S_next + Ho * Wo, :].astype(jnp.float32)
        feat_nhwc.append(pooled.reshape(N, Ho, Wo, Cout))

        slab = slab_next
        H, W, Cin_p = Ho, Wo, Cout
        i += 2

    # torch.flatten(x, 1) on NCHW (exact here; spatial is 1x1 after the pools).
    last = feat_nhwc[-1]
    xf = jnp.transpose(last, (0, 3, 1, 2)).reshape(N, -1)
    logits = pallas_classifier(xf, params["classifier"])

    if is_feat:
        feat = [jnp.transpose(f, (0, 3, 1, 2)) for f in feat_nhwc]   # NCHW
        return feat, logits
    return logits


# ---------------------------------- main ------------------------------------

if __name__ == "__main__":
    key = jax.random.PRNGKey(0)
    kparams, kx = jax.random.split(key)
    params = init_params(kparams, num_classes=10, in_ch=3)

    x = jax.random.normal(kx, (2, 3, 16, 16), jnp.float32)  # NCHW, like torch

    fwd = jax.jit(functools.partial(vgg_forward, params))
    feat, logits = fwd(x)
    logits = jax.block_until_ready(logits)
    feat = jax.block_until_ready(feat)

    assert logits.shape == (2, 10), logits.shape
    assert len(feat) == len(params["features"]), len(feat)
    assert feat[0].shape == (2, 32, 16, 16), feat[0].shape
    assert feat[-1].shape == (2, 512, 1, 1), feat[-1].shape
    assert bool(jnp.all(jnp.isfinite(logits)))
    print("KERNEL_OK")
</pallas_src>

<mosaic_0001>
module attributes {stable_mosaic.version = 11 : i64} {
  func.func @_conv_block_kernel(%arg0: i32, %arg1: memref<1x290x8xbf16, #tpu.memory_space<vmem>>, %arg2: memref<72x32xbf16, #tpu.memory_space<vmem>>, %arg3: memref<1x32xf32, #tpu.memory_space<vmem>>, %arg4: memref<1x256x32xf32, #tpu.memory_space<vmem>>, %arg5: memref<1x82x32xbf16, #tpu.memory_space<vmem>>) attributes {dimension_semantics = [#tpu.dimension_semantics<parallel>], iteration_bounds = array<i64: 2>, scalar_prefetch = 0 : i64, scratch_operands = 0 : i64, tpu.core_type = #tpu.core_type<tc>, window_params = [{transform_indices = @transform_0, window_bounds = array<i64: 1, 290, 8>}, {pipeline_mode = #tpu.pipeline_mode<synchronous>, transform_indices = @transform_1, window_bounds = array<i64: 72, 32>}, {pipeline_mode = #tpu.pipeline_mode<synchronous>, transform_indices = @transform_2, window_bounds = array<i64: 1, 32>}, {transform_indices = @transform_3, window_bounds = array<i64: 1, 256, 32>}, {transform_indices = @transform_4, window_bounds = array<i64: 1, 82, 32>}]} {
    %0 = tpu.iota {dimensions = array<i32: 0>} : vector<256x1xi32>
    %c16_i32 = arith.constant 16 : i32
    %c0_i32 = arith.constant 0 : i32
    %1 = arith.cmpi eq, %c16_i32, %c0_i32 : i32
    %c1_i32 = arith.constant 1 : i32
    %2 = arith.select %1, %c1_i32, %c16_i32 : i32
    %3 = vector.broadcast %2 : i32 to vector<256x1xi32>
    %4 = arith.remsi %0, %3 : vector<256x1xi32>
    %c0_i32_0 = arith.constant 0 : i32
    %5 = vector.broadcast %c0_i32_0 : i32 to vector<256x1xi32>
    %6 = arith.cmpi ne, %4, %5 : vector<256x1xi32>
    %c0_i32_1 = arith.constant 0 : i32
    %7 = vector.broadcast %c0_i32_1 : i32 to vector<256x1xi32>
    %8 = arith.cmpi slt, %4, %7 : vector<256x1xi32>
    %c0_i32_2 = arith.constant 0 : i32
    %9 = arith.cmpi slt, %2, %c0_i32_2 : i32
    %10 = vector.broadcast %9 : i1 to vector<256x1xi1>
    %11 = vector.broadcast %10 : vector<256x1xi1> to vector<256x1xi1>
    %12 = arith.xori %8, %11 : vector<256x1xi1>
    %13 = arith.andi %12, %6 : vector<256x1xi1>
    %14 = vector.broadcast %2 : i32 to vector<256x1xi32>
    %15 = arith.addi %4, %14 : vector<256x1xi32>
    %16 = arith.select %13, %15, %4 : vector<256x1xi1>, vector<256x1xi32>
    %c1_i32_3 = arith.constant 1 : i32
    %17 = vector.broadcast %c1_i32_3 : i32 to vector<256x1xi32>
    %18 = arith.cmpi sge, %16, %17 : vector<256x1xi32>
    %c15_i32 = arith.constant 15 : i32
    %19 = vector.broadcast %c15_i32 : i32 to vector<256x1xi32>
    %20 = arith.cmpi slt, %16, %19 : vector<256x1xi32>
    %c0 = arith.constant 0 : index
    %c0_4 = arith.constant 0 : index
    %c0_5 = arith.constant 0 : index
    %21 = vector.load %arg1[%c0, %c0_4, %c0_5] : memref<1x290x8xbf16, #tpu.memory_space<vmem>>, vector<1x256x8xbf16>
    %22 = vector.shape_cast %21 : vector<1x256x8xbf16> to vector<256x8xbf16>
    %cst = arith.constant 0.000000e+00 : bf16
    %23 = vector.broadcast %cst : bf16 to vector<256x8xbf16>
    %24 = vector.shape_cast %18 : vector<256x1xi1> to vector<256x1xi1>
    %25 = vector.broadcast %24 : vector<256x1xi1> to vector<256x8xi1>
    %26 = arith.select %25, %22, %23 : vector<256x8xi1>, vector<256x8xbf16>
    %c0_6 = arith.constant 0 : index
    %c1 = arith.constant 1 : index
    %c0_7 = arith.constant 0 : index
    %27 = vector.load %arg1[%c0_6, %c1, %c0_7] : memref<1x290x8xbf16, #tpu.memory_space<vmem>>, vector<1x256x8xbf16>
    %28 = vector.shape_cast %27 : vector<1x256x8xbf16> to vector<256x8xbf16>
    %c0_8 = arith.constant 0 : index
    %c2 = arith.constant 2 : index
    %c0_9 = arith.constant 0 : index
    %29 = vector.load %arg1[%c0_8, %c2, %c0_9] : memref<1x290x8xbf16, #tpu.memory_space<vmem>>, vector<1x256x8xbf16>
    %30 = vector.shape_cast %29 : vector<1x256x8xbf16> to vector<256x8xbf16>
    %cst_10 = arith.constant 0.000000e+00 : bf16
    %31 = vector.broadcast %cst_10 : bf16 to vector<256x8xbf16>
    %32 = vector.shape_cast %20 : vector<256x1xi1> to vector<256x1xi1>
    %33 = vector.broadcast %32 : vector<256x1xi1> to vector<256x8xi1>
    %34 = arith.select %33, %30, %31 : vector<256x8xi1>, vector<256x8xbf16>
    %c0_11 = arith.constant 0 : index
    %c16 = arith.constant 16 : index
    %c0_12 = arith.constant 0 : index
    %35 = vector.load %arg1[%c0_11, %c16, %c0_12] : memref<1x290x8xbf16, #tpu.memory_space<vmem>>, vector<1x256x8xbf16>
    %36 = vector.shape_cast %35 : vector<1x256x8xbf16> to vector<256x8xbf16>
    %cst_13 = arith.constant 0.000000e+00 : bf16
    %37 = vector.broadcast %cst_13 : bf16 to vector<256x8xbf16>
    %38 = vector.shape_cast %18 : vector<256x1xi1> to vector<256x1xi1>
    %39 = vector.broadcast %38 : vector<256x1xi1> to vector<256x8xi1>
    %40 = arith.select %39, %36, %37 : vector<256x8xi1>, vector<256x8xbf16>
    %c0_14 = arith.constant 0 : index
    %c17 = arith.constant 17 : index
    %c0_15 = arith.constant 0 : index
    %41 = vector.load %arg1[%c0_14, %c17, %c0_15] : memref<1x290x8xbf16, #tpu.memory_space<vmem>>, vector<1x256x8xbf16>
    %42 = vector.shape_cast %41 : vector<1x256x8xbf16> to vector<256x8xbf16>
    %c0_16 = arith.constant 0 : index
    %c18 = arith.constant 18 : index
    %c0_17 = arith.constant 0 : index
    %43 = vector.load %arg1[%c0_16, %c18, %c0_17] : memref<1x290x8xbf16, #tpu.memory_space<vmem>>, vector<1x256x8xbf16>
    %44 = vector.shape_cast %43 : vector<1x256x8xbf16> to vector<256x8xbf16>
    %cst_18 = arith.constant 0.000000e+00 : bf16
    %45 = vector.broadcast %cst_18 : bf16 to vector<256x8xbf16>
    %46 = vector.shape_cast %20 : vector<256x1xi1> to vector<256x1xi1>
    %47 = vector.broadcast %46 : vector<256x1xi1> to vector<256x8xi1>
    %48 = arith.select %47, %44, %45 : vector<256x8xi1>, vector<256x8xbf16>
    %c0_19 = arith.constant 0 : index
    %c32 = arith.constant 32 : index
    %c0_20 = arith.constant 0 : index
    %49 = vector.load %arg1[%c0_19, %c32, %c0_20] : memref<1x290x8xbf16, #tpu.memory_space<vmem>>, vector<1x256x8xbf16>
    %50 = vector.shape_cast %49 : vector<1x256x8xbf16> to vector<256x8xbf16>
    %cst_21 = arith.constant 0.000000e+00 : bf16
    %51 = vector.broadcast %cst_21 : bf16 to vector<256x8xbf16>
    %52 = vector.shape_cast %18 : vector<256x1xi1> to vector<256x1xi1>
    %53 = vector.broadcast %52 : vector<256x1xi1> to vector<256x8xi1>
    %54 = arith.select %53, %50, %51 : vector<256x8xi1>, vector<256x8xbf16>
    %c0_22 = arith.constant 0 : index
    %c33 = arith.constant 33 : index
    %c0_23 = arith.constant 0 : index
    %55 = vector.load %arg1[%c0_22, %c33, %c0_23] : memref<1x290x8xbf16, #tpu.memory_space<vmem>>, vector<1x256x8xbf16>
    %56 = vector.shape_cast %55 : vector<1x256x8xbf16> to vector<256x8xbf16>
    %c0_24 = arith.constant 0 : index
    %c34 = arith.constant 34 : index
    %c0_25 = arith.constant 0 : index
    %57 = vector.load %arg1[%c0_24, %c34, %c0_25] : memref<1x290x8xbf16, #tpu.memory_space<vmem>>, vector<1x256x8xbf16>
    %58 = vector.shape_cast %57 : vector<1x256x8xbf16> to vector<256x8xbf16>
    %cst_26 = arith.constant 0.000000e+00 : bf16
    %59 = vector.broadcast %cst_26 : bf16 to vector<256x8xbf16>
    %60 = vector.shape_cast %20 : vector<256x1xi1> to vector<256x1xi1>
    %61 = vector.broadcast %60 : vector<256x1xi1> to vector<256x8xi1>
    %62 = arith.select %61, %58, %59 : vector<256x8xi1>, vector<256x8xbf16>
    %63 = tpu.concatenate %26, %28, %34, %40, %42, %48, %54, %56, %62 in 1 : vector<256x8xbf16>, vector<256x8xbf16>, vector<256x8xbf16>, vector<256x8xbf16>, vector<256x8xbf16>, vector<256x8xbf16>, vector<256x8xbf16>, vector<256x8xbf16>, vector<256x8xbf16> -> vector<256x72xbf16>
    %c0_27 = arith.constant 0 : index
    %c0_28 = arith.constant 0 : index
    %64 = vector.load %arg2[%c0_27, %c0_28] : memref<72x32xbf16, #tpu.memory_space<vmem>>, vector<72x32xbf16>
    %cst_29 = arith.constant dense<0.000000e+00> : vector<256x32xf32>
    %65 = tpu.matmul %63, %64, %cst_29 {dimension_numbers = #tpu.dot_dimension_numbers<[1], [0], [0], [1], [0, 0, 1, 1], [], []>} : vector<256x72xbf16>, vector<72x32xbf16>, vector<256x32xf32> -> vector<256x32xf32>
    %c0_30 = arith.constant 0 : index
    %c0_31 = arith.constant 0 : index
    %66 = vector.load %arg3[%c0_30, %c0_31] : memref<1x32xf32, #tpu.memory_space<vmem>>, vector<1x32xf32>
    %67 = vector.broadcast %66 : vector<1x32xf32> to vector<256x32xf32>
    %68 = arith.addf %65, %67 : vector<256x32xf32>
    %cst_32 = arith.constant 0.000000e+00 : f32
    %69 = vector.broadcast %cst_32 : f32 to vector<256x32xf32>
    %70 = arith.maximumf %68, %69 : vector<256x32xf32>
    %71 = vector.shape_cast %70 : vector<256x32xf32> to vector<1x256x32xf32>
    %c0_33 = arith.constant 0 : index
    %c0_34 = arith.constant 0 : index
    %c0_35 = arith.constant 0 : index
    %72 = vector.load %arg4[%c0_33, %c0_34, %c0_35] : memref<1x256x32xf32, #tpu.memory_space<vmem>>, vector<1x256x32xf32>
    tpu.vector_store %arg4[%c0_33, %c0_34, %c0_35], %71 {strides = array<i32>} : memref<1x256x32xf32, #tpu.memory_space<vmem>>, vector<1x256x32xf32>,
    %cst_36 = arith.constant 0.000000e+00 : bf16
    %73 = vector.broadcast %cst_36 : bf16 to vector<1x9x32xbf16>
    %c0_37 = arith.constant 0 : index
    %c0_38 = arith.constant 0 : index
    %c0_39 = arith.constant 0 : index
    %74 = vector.load %arg5[%c0_37, %c0_38, %c0_39] : memref<1x82x32xbf16, #tpu.memory_space<vmem>>, vector<1x9x32xbf16>
    tpu.vector_store %arg5[%c0_37, %c0_38, %c0_39], %73 {strides = array<i32>} : memref<1x82x32xbf16, #tpu.memory_space<vmem>>, vector<1x9x32xbf16>,
    %c0_40 = arith.constant 0 : index
    %c73 = arith.constant 73 : index
    %c0_41 = arith.constant 0 : index
    %75 = vector.load %arg5[%c0_40, %c73, %c0_41] : memref<1x82x32xbf16, #tpu.memory_space<vmem>>, vector<1x9x32xbf16>
    tpu.vector_store %arg5[%c0_40, %c73, %c0_41], %73 {strides = array<i32>} : memref<1x82x32xbf16, #tpu.memory_space<vmem>>, vector<1x9x32xbf16>,
    %76 = vector.shape_cast %70 : vector<256x32xf32> to vector<128x2x32xf32>
    %cst_42 = arith.constant dense<0xFF800000> : vector<128x32xf32>
    %77 = vector.multi_reduction <maximumf>, %76, %cst_42 [1] : vector<128x2x32xf32> to vector<128x32xf32>
    %78 = vector.shape_cast %77 : vector<128x32xf32> to vector<8x2x8x32xf32>
    %cst_43 = arith.constant dense<0xFF800000> : vector<8x8x32xf32>
    %79 = vector.multi_reduction <maximumf>, %78, %cst_43 [1] : vector<8x2x8x32xf32> to vector<8x8x32xf32>
    %80 = vector.shape_cast %79 : vector<8x8x32xf32> to vector<64x32xf32>
    %81 = arith.truncf %80 : vector<64x32xf32> to vector<64x32xbf16>
    %c0_44 = arith.constant 0 : index
    %c9 = arith.constant 9 : index
    %c0_45 = arith.constant 0 : index
    %82 = vector.load %arg5[%c0_44, %c9, %c0_45] : memref<1x82x32xbf16, #tpu.memory_space<vmem>>, vector<1x64x32xbf16>
    %83 = vector.shape_cast %82 : vector<1x64x32xbf16> to vector<64x32xbf16>
    %84 = vector.shape_cast %81 : vector<64x32xbf16> to vector<1x64x32xbf16>
    tpu.vector_store %arg5[%c0_44, %c9, %c0_45], %84 {strides = array<i32>} : memref<1x82x32xbf16, #tpu.memory_space<vmem>>, vector<1x64x32xbf16>,
    return
  }
  func.func @transform_0(%arg0: i32) -> (i32, i32, i32) {
    %c0_i32 = arith.constant 0 : i32
    %c0_i32_0 = arith.constant 0 : i32
    %c0_i32_1 = arith.constant 0 : i32
    return %arg0, %c0_i32, %c0_i32_0 : i32, i32, i32
  }
  func.func @transform_1(%arg0: i32) -> (i32, i32) {
    %c0_i32 = arith.constant 0 : i32
    %c0_i32_0 = arith.constant 0 : i32
    %c0_i32_1 = arith.constant 0 : i32
    return %c0_i32, %c0_i32_0 : i32, i32
  }
  func.func @transform_2(%arg0: i32) -> (i32, i32) {
    %c0_i32 = arith.constant 0 : i32
    %c0_i32_0 = arith.constant 0 : i32
    %c0_i32_1 = arith.constant 0 : i32
    return %c0_i32, %c0_i32_0 : i32, i32
  }
  func.func @transform_3(%arg0: i32) -> (i32, i32, i32) {
    %c0_i32 = arith.constant 0 : i32
    %c0_i32_0 = arith.constant 0 : i32
    %c0_i32_1 = arith.constant 0 : i32
    return %arg0, %c0_i32, %c0_i32_0 : i32, i32, i32
  }
  func.func @transform_4(%arg0: i32) -> (i32, i32, i32) {
    %c0_i32 = arith.constant 0 : i32
    %c0_i32_0 = arith.constant 0 : i32
    %c0_i32_1 = arith.constant 0 : i32
    return %arg0, %c0_i32, %c0_i32_0 : i32, i32, i32
  }
}

module attributes {stable_mosaic.version = 11 : i64} {
  func.func @_conv_block_kernel(%arg0: i32, %arg1: memref<1x82x32xbf16, #tpu.memory_space<vmem>>, %arg2: memref<288x64xbf16, #tpu.memory_space<vmem>>, %arg3: memref<1x64xf32, #tpu.memory_space<vmem>>, %arg4: memref<1x64x64xf32, #tpu.memory_space<vmem>>, %arg5: memref<1x26x64xbf16, #tpu.memory_space<vmem>>) attributes {dimension_semantics = [#tpu.dimension_semantics<parallel>], iteration_bounds = array<i64: 2>, scalar_prefetch = 0 : i64, scratch_operands = 0 : i64, tpu.core_type = #tpu.core_type<tc>, window_params = [{transform_indices = @transform_0, window_bounds = array<i64: 1, 82, 32>}, {pipeline_mode = #tpu.pipeline_mode<synchronous>, transform_indices = @transform_1, window_bounds = array<i64: 288, 64>}, {pipeline_mode = #tpu.pipeline_mode<synchronous>, transform_indices = @transform_2, window_bounds = array<i64: 1, 64>}, {transform_indices = @transform_3, window_bounds = array<i64: 1, 64, 64>}, {transform_indices = @transform_4, window_bounds = array<i64: 1, 26, 64>}]} {
    %0 = tpu.iota {dimensions = array<i32: 0>} : vector<64x1xi32>
    %c8_i32 = arith.constant 8 : i32
    %c0_i32 = arith.constant 0 : i32
    %1 = arith.cmpi eq, %c8_i32, %c0_i32 : i32
    %c1_i32 = arith.constant 1 : i32
    %2 = arith.select %1, %c1_i32, %c8_i32 : i32
    %3 = vector.broadcast %2 : i32 to vector<64x1xi32>
    %4 = arith.remsi %0, %3 : vector<64x1xi32>
    %c0_i32_0 = arith.constant 0 : i32
    %5 = vector.broadcast %c0_i32_0 : i32 to vector<64x1xi32>
    %6 = arith.cmpi ne, %4, %5 : vector<64x1xi32>
    %c0_i32_1 = arith.constant 0 : i32
    %7 = vector.broadcast %c0_i32_1 : i32 to vector<64x1xi32>
    %8 = arith.cmpi slt, %4, %7 : vector<64x1xi32>
    %c0_i32_2 = arith.constant 0 : i32
    %9 = arith.cmpi slt, %2, %c0_i32_2 : i32
    %10 = vector.broadcast %9 : i1 to vector<64x1xi1>
    %11 = vector.broadcast %10 : vector<64x1xi1> to vector<64x1xi1>
    %12 = arith.xori %8, %11 : vector<64x1xi1>
    %13 = arith.andi %12, %6 : vector<64x1xi1>
    %14 = vector.broadcast %2 : i32 to vector<64x1xi32>
    %15 = arith.addi %4, %14 : vector<64x1xi32>
    %16 = arith.select %13, %15, %4 : vector<64x1xi1>, vector<64x1xi32>
    %c1_i32_3 = arith.constant 1 : i32
    %17 = vector.broadcast %c1_i32_3 : i32 to vector<64x1xi32>
    %18 = arith.cmpi sge, %16, %17 : vector<64x1xi32>
    %c7_i32 = arith.constant 7 : i32
    %19 = vector.broadcast %c7_i32 : i32 to vector<64x1xi32>
    %20 = arith.cmpi slt, %16, %19 : vector<64x1xi32>
    %c0 = arith.constant 0 : index
    %c0_4 = arith.constant 0 : index
    %c0_5 = arith.constant 0 : index
    %21 = vector.load %arg1[%c0, %c0_4, %c0_5] : memref<1x82x32xbf16, #tpu.memory_space<vmem>>, vector<1x64x32xbf16>
    %22 = vector.shape_cast %21 : vector<1x64x32xbf16> to vector<64x32xbf16>
    %cst = arith.constant 0.000000e+00 : bf16
    %23 = vector.broadcast %cst : bf16 to vector<64x32xbf16>
    %24 = vector.shape_cast %18 : vector<64x1xi1> to vector<64x1xi1>
    %25 = vector.broadcast %24 : vector<64x1xi1> to vector<64x32xi1>
    %26 = arith.select %25, %22, %23 : vector<64x32xi1>, vector<64x32xbf16>
    %c0_6 = arith.constant 0 : index
    %c1 = arith.constant 1 : index
    %c0_7 = arith.constant 0 : index
    %27 = vector.load %arg1[%c0_6, %c1, %c0_7] : memref<1x82x32xbf16, #tpu.memory_space<vmem>>, vector<1x64x32xbf16>
    %28 = vector.shape_cast %27 : vector<1x64x32xbf16> to vector<64x32xbf16>
    %c0_8 = arith.constant 0 : index
    %c2 = arith.constant 2 : index
    %c0_9 = arith.constant 0 : index
    %29 = vector.load %arg1[%c0_8, %c2, %c0_9] : memref<1x82x32xbf16, #tpu.memory_space<vmem>>, vector<1x64x32xbf16>
    %30 = vector.shape_cast %29 : vector<1x64x32xbf16> to vector<64x32xbf16>
    %cst_10 = arith.constant 0.000000e+00 : bf16
    %31 = vector.broadcast %cst_10 : bf16 to vector<64x32xbf16>
    %32 = vector.shape_cast %20 : vector<64x1xi1> to vector<64x1xi1>
    %33 = vector.broadcast %32 : vector<64x1xi1> to vector<64x32xi1>
    %34 = arith.select %33, %30, %31 : vector<64x32xi1>, vector<64x32xbf16>
    %c0_11 = arith.constant 0 : index
    %c8 = arith.constant 8 : index
    %c0_12 = arith.constant 0 : index
    %35 = vector.load %arg1[%c0_11, %c8, %c0_12] : memref<1x82x32xbf16, #tpu.memory_space<vmem>>, vector<1x64x32xbf16>
    %36 = vector.shape_cast %35 : vector<1x64x32xbf16> to vector<64x32xbf16>
    %cst_13 = arith.constant 0.000000e+00 : bf16
    %37 = vector.broadcast %cst_13 : bf16 to vector<64x32xbf16>
    %38 = vector.shape_cast %18 : vector<64x1xi1> to vector<64x1xi1>
    %39 = vector.broadcast %38 : vector<64x1xi1> to vector<64x32xi1>
    %40 = arith.select %39, %36, %37 : vector<64x32xi1>, vector<64x32xbf16>
    %c0_14 = arith.constant 0 : index
    %c9 = arith.constant 9 : index
    %c0_15 = arith.constant 0 : index
    %41 = vector.load %arg1[%c0_14, %c9, %c0_15] : memref<1x82x32xbf16, #tpu.memory_space<vmem>>, vector<1x64x32xbf16>
    %42 = vector.shape_cast %41 : vector<1x64x32xbf16> to vector<64x32xbf16>
    %c0_16 = arith.constant 0 : index
    %c10 = arith.constant 10 : index
    %c0_17 = arith.constant 0 : index
    %43 = vector.load %arg1[%c0_16, %c10, %c0_17] : memref<1x82x32xbf16, #tpu.memory_space<vmem>>, vector<1x64x32xbf16>
    %44 = vector.shape_cast %43 : vector<1x64x32xbf16> to vector<64x32xbf16>
    %cst_18 = arith.constant 0.000000e+00 : bf16
    %45 = vector.broadcast %cst_18 : bf16 to vector<64x32xbf16>
    %46 = vector.shape_cast %20 : vector<64x1xi1> to vector<64x1xi1>
    %47 = vector.broadcast %46 : vector<64x1xi1> to vector<64x32xi1>
    %48 = arith.select %47, %44, %45 : vector<64x32xi1>, vector<64x32xbf16>
    %c0_19 = arith.constant 0 : index
    %c16 = arith.constant 16 : index
    %c0_20 = arith.constant 0 : index
    %49 = vector.load %arg1[%c0_19, %c16, %c0_20] : memref<1x82x32xbf16, #tpu.memory_space<vmem>>, vector<1x64x32xbf16>
    %50 = vector.shape_cast %49 : vector<1x64x32xbf16> to vector<64x32xbf16>
    %cst_21 = arith.constant 0.000000e+00 : bf16
    %51 = vector.broadcast %cst_21 : bf16 to vector<64x32xbf16>
    %52 = vector.shape_cast %18 : vector<64x1xi1> to vector<64x1xi1>
    %53 = vector.broadcast %52 : vector<64x1xi1> to vector<64x32xi1>
    %54 = arith.select %53, %50, %51 : vector<64x32xi1>, vector<64x32xbf16>
    %c0_22 = arith.constant 0 : index
    %c17 = arith.constant 17 : index
    %c0_23 = arith.constant 0 : index
    %55 = vector.load %arg1[%c0_22, %c17, %c0_23] : memref<1x82x32xbf16, #tpu.memory_space<vmem>>, vector<1x64x32xbf16>
    %56 = vector.shape_cast %55 : vector<1x64x32xbf16> to vector<64x32xbf16>
    %c0_24 = arith.constant 0 : index
    %c18 = arith.constant 18 : index
    %c0_25 = arith.constant 0 : index
    %57 = vector.load %arg1[%c0_24, %c18, %c0_25] : memref<1x82x32xbf16, #tpu.memory_space<vmem>>, vector<1x64x32xbf16>
    %58 = vector.shape_cast %57 : vector<1x64x32xbf16> to vector<64x32xbf16>
    %cst_26 = arith.constant 0.000000e+00 : bf16
    %59 = vector.broadcast %cst_26 : bf16 to vector<64x32xbf16>
    %60 = vector.shape_cast %20 : vector<64x1xi1> to vector<64x1xi1>
    %61 = vector.broadcast %60 : vector<64x1xi1> to vector<64x32xi1>
    %62 = arith.select %61, %58, %59 : vector<64x32xi1>, vector<64x32xbf16>
    %63 = tpu.concatenate %26, %28, %34, %40, %42, %48, %54, %56, %62 in 1 : vector<64x32xbf16>, vector<64x32xbf16>, vector<64x32xbf16>, vector<64x32xbf16>, vector<64x32xbf16>, vector<64x32xbf16>, vector<64x32xbf16>, vector<64x32xbf16>, vector<64x32xbf16> -> vector<64x288xbf16>
    %c0_27 = arith.constant 0 : index
    %c0_28 = arith.constant 0 : index
    %64 = vector.load %arg2[%c0_27, %c0_28] : memref<288x64xbf16, #tpu.memory_space<vmem>>, vector<288x64xbf16>
    %cst_29 = arith.constant dense<0.000000e+00> : vector<64x64xf32>
    %65 = tpu.matmul %63, %64, %cst_29 {dimension_numbers = #tpu.dot_dimension_numbers<[1], [0], [0], [1], [0, 0, 1, 1], [], []>} : vector<64x288xbf16>, vector<288x64xbf16>, vector<64x64xf32> -> vector<64x64xf32>
    %c0_30 = arith.constant 0 : index
    %c0_31 = arith.constant 0 : index
    %66 = vector.load %arg3[%c0_30, %c0_31] : memref<1x64xf32, #tpu.memory_space<vmem>>, vector<1x64xf32>
    %67 = vector.broadcast %66 : vector<1x64xf32> to vector<64x64xf32>
    %68 = arith.addf %65, %67 : vector<64x64xf32>
    %cst_32 = arith.constant 0.000000e+00 : f32
    %69 = vector.broadcast %cst_32 : f32 to vector<64x64xf32>
    %70 = arith.maximumf %68, %69 : vector<64x64xf32>
    %71 = vector.shape_cast %70 : vector<64x64xf32> to vector<1x64x64xf32>
    %c0_33 = arith.constant 0 : index
    %c0_34 = arith.constant 0 : index
    %c0_35 = arith.constant 0 : index
    %72 = vector.load %arg4[%c0_33, %c0_34, %c0_35] : memref<1x64x64xf32, #tpu.memory_space<vmem>>, vector<1x64x64xf32>
    tpu.vector_store %arg4[%c0_33, %c0_34, %c0_35], %71 {strides = array<i32>} : memref<1x64x64xf32, #tpu.memory_space<vmem>>, vector<1x64x64xf32>,
    %cst_36 = arith.constant 0.000000e+00 : bf16
    %73 = vector.broadcast %cst_36 : bf16 to vector<1x5x64xbf16>
    %c0_37 = arith.constant 0 : index
    %c0_38 = arith.constant 0 : index
    %c0_39 = arith.constant 0 : index
    %74 = vector.load %arg5[%c0_37, %c0_38, %c0_39] : memref<1x26x64xbf16, #tpu.memory_space<vmem>>, vector<1x5x64xbf16>
    tpu.vector_store %arg5[%c0_37, %c0_38, %c0_39], %73 {strides = array<i32>} : memref<1x26x64xbf16, #tpu.memory_space<vmem>>, vector<1x5x64xbf16>,
    %c0_40 = arith.constant 0 : index
    %c21 = arith.constant 21 : index
    %c0_41 = arith.constant 0 : index
    %75 = vector.load %arg5[%c0_40, %c21, %c0_41] : memref<1x26x64xbf16, #tpu.memory_space<vmem>>, vector<1x5x64xbf16>
    tpu.vector_store %arg5[%c0_40, %c21, %c0_41], %73 {strides = array<i32>} : memref<1x26x64xbf16, #tpu.memory_space<vmem>>, vector<1x5x64xbf16>,
    %76 = vector.shape_cast %70 : vector<64x64xf32> to vector<32x2x64xf32>
    %cst_42 = arith.constant dense<0xFF800000> : vector<32x64xf32>
    %77 = vector.multi_reduction <maximumf>, %76, %cst_42 [1] : vector<32x2x64xf32> to vector<32x64xf32>
    %78 = vector.shape_cast %77 : vector<32x64xf32> to vector<4x2x4x64xf32>
    %cst_43 = arith.constant dense<0xFF800000> : vector<4x4x64xf32>
    %79 = vector.multi_reduction <maximumf>, %78, %cst_43 [1] : vector<4x2x4x64xf32> to vector<4x4x64xf32>
    %80 = vector.shape_cast %79 : vector<4x4x64xf32> to vector<16x64xf32>
    %81 = arith.truncf %80 : vector<16x64xf32> to vector<16x64xbf16>
    %c0_44 = arith.constant 0 : index
    %c5 = arith.constant 5 : index
    %c0_45 = arith.constant 0 : index
    %82 = vector.load %arg5[%c0_44, %c5, %c0_45] : memref<1x26x64xbf16, #tpu.memory_space<vmem>>, vector<1x16x64xbf16>
    %83 = vector.shape_cast %82 : vector<1x16x64xbf16> to vector<16x64xbf16>
    %84 = vector.shape_cast %81 : vector<16x64xbf16> to vector<1x16x64xbf16>
    tpu.vector_store %arg5[%c0_44, %c5, %c0_45], %84 {strides = array<i32>} : memref<1x26x64xbf16, #tpu.memory_space<vmem>>, vector<1x16x64xbf16>,
    return
  }
  func.func @transform_0(%arg0: i32) -> (i32, i32, i32) {
    %c0_i32 = arith.constant 0 : i32
    %c0_i32_0 = arith.constant 0 : i32
    %c0_i32_1 = arith.constant 0 : i32
    return %arg0, %c0_i32, %c0_i32_0 : i32, i32, i32
  }
  func.func @transform_1(%arg0: i32) -> (i32, i32) {
    %c0_i32 = arith.constant 0 : i32
    %c0_i32_0 = arith.constant 0 : i32
    %c0_i32_1 = arith.constant 0 : i32
    return %c0_i32, %c0_i32_0 : i32, i32
  }
  func.func @transform_2(%arg0: i32) -> (i32, i32) {
    %c0_i32 = arith.constant 0 : i32
    %c0_i32_0 = arith.constant 0 : i32
    %c0_i32_1 = arith.constant 0 : i32
    return %c0_i32, %c0_i32_0 : i32, i32
  }
  func.func @transform_3(%arg0: i32) -> (i32, i32, i32) {
    %c0_i32 = arith.constant 0 : i32
    %c0_i32_0 = arith.constant 0 : i32
    %c0_i32_1 = arith.constant 0 : i32
    return %arg0, %c0_i32, %c0_i32_0 : i32, i32, i32
  }
  func.func @transform_4(%arg0: i32) -> (i32, i32, i32) {
    %c0_i32 = arith.constant 0 : i32
    %c0_i32_0 = arith.constant 0 : i32
    %c0_i32_1 = arith.constant 0 : i32
    return %arg0, %c0_i32, %c0_i32_0 : i32, i32, i32
  }
}

module attributes {stable_mosaic.version = 11 : i64} {
  func.func @_conv_block_kernel(%arg0: i32, %arg1: memref<1x26x64xbf16, #tpu.memory_space<vmem>>, %arg2: memref<576x128xbf16, #tpu.memory_space<vmem>>, %arg3: memref<1x128xf32, #tpu.memory_space<vmem>>, %arg4: memref<1x16x128xf32, #tpu.memory_space<vmem>>, %arg5: memref<1x10x128xbf16, #tpu.memory_space<vmem>>) attributes {dimension_semantics = [#tpu.dimension_semantics<parallel>], iteration_bounds = array<i64: 2>, scalar_prefetch = 0 : i64, scratch_operands = 0 : i64, tpu.core_type = #tpu.core_type<tc>, window_params = [{transform_indices = @transform_0, window_bounds = array<i64: 1, 26, 64>}, {pipeline_mode = #tpu.pipeline_mode<synchronous>, transform_indices = @transform_1, window_bounds = array<i64: 576, 128>}, {pipeline_mode = #tpu.pipeline_mode<synchronous>, transform_indices = @transform_2, window_bounds = array<i64: 1, 128>}, {transform_indices = @transform_3, window_bounds = array<i64: 1, 16, 128>}, {transform_indices = @transform_4, window_bounds = array<i64: 1, 10, 128>}]} {
    %0 = tpu.iota {dimensions = array<i32: 0>} : vector<16x1xi32>
    %c4_i32 = arith.constant 4 : i32
    %c0_i32 = arith.constant 0 : i32
    %1 = arith.cmpi eq, %c4_i32, %c0_i32 : i32
    %c1_i32 = arith.constant 1 : i32
    %2 = arith.select %1, %c1_i32, %c4_i32 : i32
    %3 = vector.broadcast %2 : i32 to vector<16x1xi32>
    %4 = arith.remsi %0, %3 : vector<16x1xi32>
    %c0_i32_0 = arith.constant 0 : i32
    %5 = vector.broadcast %c0_i32_0 : i32 to vector<16x1xi32>
    %6 = arith.cmpi ne, %4, %5 : vector<16x1xi32>
    %c0_i32_1 = arith.constant 0 : i32
    %7 = vector.broadcast %c0_i32_1 : i32 to vector<16x1xi32>
    %8 = arith.cmpi slt, %4, %7 : vector<16x1xi32>
    %c0_i32_2 = arith.constant 0 : i32
    %9 = arith.cmpi slt, %2, %c0_i32_2 : i32
    %10 = vector.broadcast %9 : i1 to vector<16x1xi1>
    %11 = vector.broadcast %10 : vector<16x1xi1> to vector<16x1xi1>
    %12 = arith.xori %8, %11 : vector<16x1xi1>
    %13 = arith.andi %12, %6 : vector<16x1xi1>
    %14 = vector.broadcast %2 : i32 to vector<16x1xi32>
    %15 = arith.addi %4, %14 : vector<16x1xi32>
    %16 = arith.select %13, %15, %4 : vector<16x1xi1>, vector<16x1xi32>
    %c1_i32_3 = arith.constant 1 : i32
    %17 = vector.broadcast %c1_i32_3 : i32 to vector<16x1xi32>
    %18 = arith.cmpi sge, %16, %17 : vector<16x1xi32>
    %c3_i32 = arith.constant 3 : i32
    %19 = vector.broadcast %c3_i32 : i32 to vector<16x1xi32>
    %20 = arith.cmpi slt, %16, %19 : vector<16x1xi32>
    %c0 = arith.constant 0 : index
    %c0_4 = arith.constant 0 : index
    %c0_5 = arith.constant 0 : index
    %21 = vector.load %arg1[%c0, %c0_4, %c0_5] : memref<1x26x64xbf16, #tpu.memory_space<vmem>>, vector<1x16x64xbf16>
    %22 = vector.shape_cast %21 : vector<1x16x64xbf16> to vector<16x64xbf16>
    %cst = arith.constant 0.000000e+00 : bf16
    %23 = vector.broadcast %cst : bf16 to vector<16x64xbf16>
    %24 = vector.shape_cast %18 : vector<16x1xi1> to vector<16x1xi1>
    %25 = vector.broadcast %24 : vector<16x1xi1> to vector<16x64xi1>
    %26 = arith.select %25, %22, %23 : vector<16x64xi1>, vector<16x64xbf16>
    %c0_6 = arith.constant 0 : index
    %c1 = arith.constant 1 : index
    %c0_7 = arith.constant 0 : index
    %27 = vector.load %arg1[%c0_6, %c1, %c0_7] : memref<1x26x64xbf16, #tpu.memory_space<vmem>>, vector<1x16x64xbf16>
    %28 = vector.shape_cast %27 : vector<1x16x64xbf16> to vector<16x64xbf16>
    %c0_8 = arith.constant 0 : index
    %c2 = arith.constant 2 : index
    %c0_9 = arith.constant 0 : index
    %29 = vector.load %arg1[%c0_8, %c2, %c0_9] : memref<1x26x64xbf16, #tpu.memory_space<vmem>>, vector<1x16x64xbf16>
    %30 = vector.shape_cast %29 : vector<1x16x64xbf16> to vector<16x64xbf16>
    %cst_10 = arith.constant 0.000000e+00 : bf16
    %31 = vector.broadcast %cst_10 : bf16 to vector<16x64xbf16>
    %32 = vector.shape_cast %20 : vector<16x1xi1> to vector<16x1xi1>
    %33 = vector.broadcast %32 : vector<16x1xi1> to vector<16x64xi1>
    %34 = arith.select %33, %30, %31 : vector<16x64xi1>, vector<16x64xbf16>
    %c0_11 = arith.constant 0 : index
    %c4 = arith.constant 4 : index
    %c0_12 = arith.constant 0 : index
    %35 = vector.load %arg1[%c0_11, %c4, %c0_12] : memref<1x26x64xbf16, #tpu.memory_space<vmem>>, vector<1x16x64xbf16>
    %36 = vector.shape_cast %35 : vector<1x16x64xbf16> to vector<16x64xbf16>
    %cst_13 = arith.constant 0.000000e+00 : bf16
    %37 = vector.broadcast %cst_13 : bf16 to vector<16x64xbf16>
    %38 = vector.shape_cast %18 : vector<16x1xi1> to vector<16x1xi1>
    %39 = vector.broadcast %38 : vector<16x1xi1> to vector<16x64xi1>
    %40 = arith.select %39, %36, %37 : vector<16x64xi1>, vector<16x64xbf16>
    %c0_14 = arith.constant 0 : index
    %c5 = arith.constant 5 : index
    %c0_15 = arith.constant 0 : index
    %41 = vector.load %arg1[%c0_14, %c5, %c0_15] : memref<1x26x64xbf16, #tpu.memory_space<vmem>>, vector<1x16x64xbf16>
    %42 = vector.shape_cast %41 : vector<1x16x64xbf16> to vector<16x64xbf16>
    %c0_16 = arith.constant 0 : index
    %c6 = arith.constant 6 : index
    %c0_17 = arith.constant 0 : index
    %43 = vector.load %arg1[%c0_16, %c6, %c0_17] : memref<1x26x64xbf16, #tpu.memory_space<vmem>>, vector<1x16x64xbf16>
    %44 = vector.shape_cast %43 : vector<1x16x64xbf16> to vector<16x64xbf16>
    %cst_18 = arith.constant 0.000000e+00 : bf16
    %45 = vector.broadcast %cst_18 : bf16 to vector<16x64xbf16>
    %46 = vector.shape_cast %20 : vector<16x1xi1> to vector<16x1xi1>
    %47 = vector.broadcast %46 : vector<16x1xi1> to vector<16x64xi1>
    %48 = arith.select %47, %44, %45 : vector<16x64xi1>, vector<16x64xbf16>
    %c0_19 = arith.constant 0 : index
    %c8 = arith.constant 8 : index
    %c0_20 = arith.constant 0 : index
    %49 = vector.load %arg1[%c0_19, %c8, %c0_20] : memref<1x26x64xbf16, #tpu.memory_space<vmem>>, vector<1x16x64xbf16>
    %50 = vector.shape_cast %49 : vector<1x16x64xbf16> to vector<16x64xbf16>
    %cst_21 = arith.constant 0.000000e+00 : bf16
    %51 = vector.broadcast %cst_21 : bf16 to vector<16x64xbf16>
    %52 = vector.shape_cast %18 : vector<16x1xi1> to vector<16x1xi1>
    %53 = vector.broadcast %52 : vector<16x1xi1> to vector<16x64xi1>
    %54 = arith.select %53, %50, %51 : vector<16x64xi1>, vector<16x64xbf16>
    %c0_22 = arith.constant 0 : index
    %c9 = arith.constant 9 : index
    %c0_23 = arith.constant 0 : index
    %55 = vector.load %arg1[%c0_22, %c9, %c0_23] : memref<1x26x64xbf16, #tpu.memory_space<vmem>>, vector<1x16x64xbf16>
    %56 = vector.shape_cast %55 : vector<1x16x64xbf16> to vector<16x64xbf16>
    %c0_24 = arith.constant 0 : index
    %c10 = arith.constant 10 : index
    %c0_25 = arith.constant 0 : index
    %57 = vector.load %arg1[%c0_24, %c10, %c0_25] : memref<1x26x64xbf16, #tpu.memory_space<vmem>>, vector<1x16x64xbf16>
    %58 = vector.shape_cast %57 : vector<1x16x64xbf16> to vector<16x64xbf16>
    %cst_26 = arith.constant 0.000000e+00 : bf16
    %59 = vector.broadcast %cst_26 : bf16 to vector<16x64xbf16>
    %60 = vector.shape_cast %20 : vector<16x1xi1> to vector<16x1xi1>
    %61 = vector.broadcast %60 : vector<16x1xi1> to vector<16x64xi1>
    %62 = arith.select %61, %58, %59 : vector<16x64xi1>, vector<16x64xbf16>
    %63 = tpu.concatenate %26, %28, %34, %40, %42, %48, %54, %56, %62 in 1 : vector<16x64xbf16>, vector<16x64xbf16>, vector<16x64xbf16>, vector<16x64xbf16>, vector<16x64xbf16>, vector<16x64xbf16>, vector<16x64xbf16>, vector<16x64xbf16>, vector<16x64xbf16> -> vector<16x576xbf16>
    %c0_27 = arith.constant 0 : index
    %c0_28 = arith.constant 0 : index
    %64 = vector.load %arg2[%c0_27, %c0_28] : memref<576x128xbf16, #tpu.memory_space<vmem>>, vector<576x128xbf16>
    %cst_29 = arith.constant dense<0.000000e+00> : vector<16x128xf32>
    %65 = tpu.matmul %63, %64, %cst_29 {dimension_numbers = #tpu.dot_dimension_numbers<[1], [0], [0], [1], [0, 0, 1, 1], [], []>} : vector<16x576xbf16>, vector<576x128xbf16>, vector<16x128xf32> -> vector<16x128xf32>
    %c0_30 = arith.constant 0 : index
    %c0_31 = arith.constant 0 : index
    %66 = vector.load %arg3[%c0_30, %c0_31] : memref<1x128xf32, #tpu.memory_space<vmem>>, vector<1x128xf32>
    %67 = vector.broadcast %66 : vector<1x128xf32> to vector<16x128xf32>
    %68 = arith.addf %65, %67 : vector<16x128xf32>
    %cst_32 = arith.constant 0.000000e+00 : f32
    %69 = vector.broadcast %cst_32 : f32 to vector<16x128xf32>
    %70 = arith.maximumf %68, %69 : vector<16x128xf32>
    %71 = vector.shape_cast %70 : vector<16x128xf32> to vector<1x16x128xf32>
    %c0_33 = arith.constant 0 : index
    %c0_34 = arith.constant 0 : index
    %c0_35 = arith.constant 0 : index
    %72 = vector.load %arg4[%c0_33, %c0_34, %c0_35] : memref<1x16x128xf32, #tpu.memory_space<vmem>>, vector<1x16x128xf32>
    tpu.vector_store %arg4[%c0_33, %c0_34, %c0_35], %71 {strides = array<i32>} : memref<1x16x128xf32, #tpu.memory_space<vmem>>, vector<1x16x128xf32>,
    %cst_36 = arith.constant 0.000000e+00 : bf16
    %73 = vector.broadcast %cst_36 : bf16 to vector<1x3x128xbf16>
    %c0_37 = arith.constant 0 : index
    %c0_38 = arith.constant 0 : index
    %c0_39 = arith.constant 0 : index
    %74 = vector.load %arg5[%c0_37, %c0_38, %c0_39] : memref<1x10x128xbf16, #tpu.memory_space<vmem>>, vector<1x3x128xbf16>
    tpu.vector_store %arg5[%c0_37, %c0_38, %c0_39], %73 {strides = array<i32>} : memref<1x10x128xbf16, #tpu.memory_space<vmem>>, vector<1x3x128xbf16>,
    %c0_40 = arith.constant 0 : index
    %c7 = arith.constant 7 : index
    %c0_41 = arith.constant 0 : index
    %75 = vector.load %arg5[%c0_40, %c7, %c0_41] : memref<1x10x128xbf16, #tpu.memory_space<vmem>>, vector<1x3x128xbf16>
    tpu.vector_store %arg5[%c0_40, %c7, %c0_41], %73 {strides = array<i32>} : memref<1x10x128xbf16, #tpu.memory_space<vmem>>, vector<1x3x128xbf16>,
    %76 = vector.shape_cast %70 : vector<16x128xf32> to vector<8x2x128xf32>
    %cst_42 = arith.constant dense<0xFF800000> : vector<8x128xf32>
    %77 = vector.multi_reduction <maximumf>, %76, %cst_42 [1] : vector<8x2x128xf32> to vector<8x128xf32>
    %78 = vector.shape_cast %77 : vector<8x128xf32> to vector<2x2x2x128xf32>
    %cst_43 = arith.constant dense<0xFF800000> : vector<2x2x128xf32>
    %79 = vector.multi_reduction <maximumf>, %78, %cst_43 [1] : vector<2x2x2x128xf32> to vector<2x2x128xf32>
    %80 = vector.shape_cast %79 : vector<2x2x128xf32> to vector<4x128xf32>
    %81 = arith.truncf %80 : vector<4x128xf32> to vector<4x128xbf16>
    %c0_44 = arith.constant 0 : index
    %c3 = arith.constant 3 : index
    %c0_45 = arith.constant 0 : index
    %82 = vector.load %arg5[%c0_44, %c3, %c0_45] : memref<1x10x128xbf16, #tpu.memory_space<vmem>>, vector<1x4x128xbf16>
    %83 = vector.shape_cast %82 : vector<1x4x128xbf16> to vector<4x128xbf16>
    %84 = vector.shape_cast %81 : vector<4x128xbf16> to vector<1x4x128xbf16>
    tpu.vector_store %arg5[%c0_44, %c3, %c0_45], %84 {strides = array<i32>} : memref<1x10x128xbf16, #tpu.memory_space<vmem>>, vector<1x4x128xbf16>,
    return
  }
  func.func @transform_0(%arg0: i32) -> (i32, i32, i32) {
    %c0_i32 = arith.constant 0 : i32
    %c0_i32_0 = arith.constant 0 : i32
    %c0_i32_1 = arith.constant 0 : i32
    return %arg0, %c0_i32, %c0_i32_0 : i32, i32, i32
  }
  func.func @transform_1(%arg0: i32) -> (i32, i32) {
    %c0_i32 = arith.constant 0 : i32
    %c0_i32_0 = arith.constant 0 : i32
    %c0_i32_1 = arith.constant 0 : i32
    return %c0_i32, %c0_i32_0 : i32, i32
  }
  func.func @transform_2(%arg0: i32) -> (i32, i32) {
    %c0_i32 = arith.constant 0 : i32
    %c0_i32_0 = arith.constant 0 : i32
    %c0_i32_1 = arith.constant 0 : i32
    return %c0_i32, %c0_i32_0 : i32, i32
  }
  func.func @transform_3(%arg0: i32) -> (i32, i32, i32) {
    %c0_i32 = arith.constant 0 : i32
    %c0_i32_0 = arith.constant 0 : i32
    %c0_i32_1 = arith.constant 0 : i32
    return %arg0, %c0_i32, %c0_i32_0 : i32, i32, i32
  }
  func.func @transform_4(%arg0: i32) -> (i32, i32, i32) {
    %c0_i32 = arith.constant 0 : i32
    %c0_i32_0 = arith.constant 0 : i32
    %c0_i32_1 = arith.constant 0 : i32
    return %arg0, %c0_i32, %c0_i32_0 : i32, i32, i32
  }
}

module attributes {stable_mosaic.version = 11 : i64} {
  func.func @_conv_block_kernel(%arg0: i32, %arg1: memref<1x10x128xbf16, #tpu.memory_space<vmem>>, %arg2: memref<1152x512xbf16, #tpu.memory_space<vmem>>, %arg3: memref<1x512xf32, #tpu.memory_space<vmem>>, %arg4: memref<1x4x512xf32, #tpu.memory_space<vmem>>, %arg5: memref<1x5x512xbf16, #tpu.memory_space<vmem>>) attributes {dimension_semantics = [#tpu.dimension_semantics<parallel>], iteration_bounds = array<i64: 2>, scalar_prefetch = 0 : i64, scratch_operands = 0 : i64, tpu.core_type = #tpu.core_type<tc>, window_params = [{transform_indices = @transform_0, window_bounds = array<i64: 1, 10, 128>}, {pipeline_mode = #tpu.pipeline_mode<synchronous>, transform_indices = @transform_1, window_bounds = array<i64: 1152, 512>}, {pipeline_mode = #tpu.pipeline_mode<synchronous>, transform_indices = @transform_2, window_bounds = array<i64: 1, 512>}, {transform_indices = @transform_3, window_bounds = array<i64: 1, 4, 512>}, {transform_indices = @transform_4, window_bounds = array<i64: 1, 5, 512>}]} {
    %0 = tpu.iota {dimensions = array<i32: 0>} : vector<4x1xi32>
    %c2_i32 = arith.constant 2 : i32
    %c0_i32 = arith.constant 0 : i32
    %1 = arith.cmpi eq, %c2_i32, %c0_i32 : i32
    %c1_i32 = arith.constant 1 : i32
    %2 = arith.select %1, %c1_i32, %c2_i32 : i32
    %3 = vector.broadcast %2 : i32 to vector<4x1xi32>
    %4 = arith.remsi %0, %3 : vector<4x1xi32>
    %c0_i32_0 = arith.constant 0 : i32
    %5 = vector.broadcast %c0_i32_0 : i32 to vector<4x1xi32>
    %6 = arith.cmpi ne, %4, %5 : vector<4x1xi32>
    %c0_i32_1 = arith.constant 0 : i32
    %7 = vector.broadcast %c0_i32_1 : i32 to vector<4x1xi32>
    %8 = arith.cmpi slt, %4, %7 : vector<4x1xi32>
    %c0_i32_2 = arith.constant 0 : i32
    %9 = arith.cmpi slt, %2, %c0_i32_2 : i32
    %10 = vector.broadcast %9 : i1 to vector<4x1xi1>
    %11 = vector.broadcast %10 : vector<4x1xi1> to vector<4x1xi1>
    %12 = arith.xori %8, %11 : vector<4x1xi1>
    %13 = arith.andi %12, %6 : vector<4x1xi1>
    %14 = vector.broadcast %2 : i32 to vector<4x1xi32>
    %15 = arith.addi %4, %14 : vector<4x1xi32>
    %16 = arith.select %13, %15, %4 : vector<4x1xi1>, vector<4x1xi32>
    %c1_i32_3 = arith.constant 1 : i32
    %17 = vector.broadcast %c1_i32_3 : i32 to vector<4x1xi32>
    %18 = arith.cmpi sge, %16, %17 : vector<4x1xi32>
    %c1_i32_4 = arith.constant 1 : i32
    %19 = vector.broadcast %c1_i32_4 : i32 to vector<4x1xi32>
    %20 = arith.cmpi slt, %16, %19 : vector<4x1xi32>
    %c0 = arith.constant 0 : index
    %c0_5 = arith.constant 0 : index
    %c0_6 = arith.constant 0 : index
    %21 = vector.load %arg1[%c0, %c0_5, %c0_6] : memref<1x10x128xbf16, #tpu.memory_space<vmem>>, vector<1x4x128xbf16>
    %22 = vector.shape_cast %21 : vector<1x4x128xbf16> to vector<4x128xbf16>
    %cst = arith.constant 0.000000e+00 : bf16
    %23 = vector.broadcast %cst : bf16 to vector<4x128xbf16>
    %24 = vector.shape_cast %18 : vector<4x1xi1> to vector<4x1xi1>
    %25 = vector.broadcast %24 : vector<4x1xi1> to vector<4x128xi1>
    %26 = arith.select %25, %22, %23 : vector<4x128xi1>, vector<4x128xbf16>
    %c0_7 = arith.constant 0 : index
    %c1 = arith.constant 1 : index
    %c0_8 = arith.constant 0 : index
    %27 = vector.load %arg1[%c0_7, %c1, %c0_8] : memref<1x10x128xbf16, #tpu.memory_space<vmem>>, vector<1x4x128xbf16>
    %28 = vector.shape_cast %27 : vector<1x4x128xbf16> to vector<4x128xbf16>
    %c0_9 = arith.constant 0 : index
    %c2 = arith.constant 2 : index
    %c0_10 = arith.constant 0 : index
    %29 = vector.load %arg1[%c0_9, %c2, %c0_10] : memref<1x10x128xbf16, #tpu.memory_space<vmem>>, vector<1x4x128xbf16>
    %30 = vector.shape_cast %29 : vector<1x4x128xbf16> to vector<4x128xbf16>
    %cst_11 = arith.constant 0.000000e+00 : bf16
    %31 = vector.broadcast %cst_11 : bf16 to vector<4x128xbf16>
    %32 = vector.shape_cast %20 : vector<4x1xi1> to vector<4x1xi1>
    %33 = vector.broadcast %32 : vector<4x1xi1> to vector<4x128xi1>
    %34 = arith.select %33, %30, %31 : vector<4x128xi1>, vector<4x128xbf16>
    %c0_12 = arith.constant 0 : index
    %c2_13 = arith.constant 2 : index
    %c0_14 = arith.constant 0 : index
    %35 = vector.load %arg1[%c0_12, %c2_13, %c0_14] : memref<1x10x128xbf16, #tpu.memory_space<vmem>>, vector<1x4x128xbf16>
    %36 = vector.shape_cast %35 : vector<1x4x128xbf16> to vector<4x128xbf16>
    %cst_15 = arith.constant 0.000000e+00 : bf16
    %37 = vector.broadcast %cst_15 : bf16 to vector<4x128xbf16>
    %38 = vector.shape_cast %18 : vector<4x1xi1> to vector<4x1xi1>
    %39 = vector.broadcast %38 : vector<4x1xi1> to vector<4x128xi1>
    %40 = arith.select %39, %36, %37 : vector<4x128xi1>, vector<4x128xbf16>
    %c0_16 = arith.constant 0 : index
    %c3 = arith.constant 3 : index
    %c0_17 = arith.constant 0 : index
    %41 = vector.load %arg1[%c0_16, %c3, %c0_17] : memref<1x10x128xbf16, #tpu.memory_space<vmem>>, vector<1x4x128xbf16>
    %42 = vector.shape_cast %41 : vector<1x4x128xbf16> to vector<4x128xbf16>
    %c0_18 = arith.constant 0 : index
    %c4 = arith.constant 4 : index
    %c0_19 = arith.constant 0 : index
    %43 = vector.load %arg1[%c0_18, %c4, %c0_19] : memref<1x10x128xbf16, #tpu.memory_space<vmem>>, vector<1x4x128xbf16>
    %44 = vector.shape_cast %43 : vector<1x4x128xbf16> to vector<4x128xbf16>
    %cst_20 = arith.constant 0.000000e+00 : bf16
    %45 = vector.broadcast %cst_20 : bf16 to vector<4x128xbf16>
    %46 = vector.shape_cast %20 : vector<4x1xi1> to vector<4x1xi1>
    %47 = vector.broadcast %46 : vector<4x1xi1> to vector<4x128xi1>
    %48 = arith.select %47, %44, %45 : vector<4x128xi1>, vector<4x128xbf16>
    %c0_21 = arith.constant 0 : index
    %c4_22 = arith.constant 4 : index
    %c0_23 = arith.constant 0 : index
    %49 = vector.load %arg1[%c0_21, %c4_22, %c0_23] : memref<1x10x128xbf16, #tpu.memory_space<vmem>>, vector<1x4x128xbf16>
    %50 = vector.shape_cast %49 : vector<1x4x128xbf16> to vector<4x128xbf16>
    %cst_24 = arith.constant 0.000000e+00 : bf16
    %51 = vector.broadcast %cst_24 : bf16 to vector<4x128xbf16>
    %52 = vector.shape_cast %18 : vector<4x1xi1> to vector<4x1xi1>
    %53 = vector.broadcast %52 : vector<4x1xi1> to vector<4x128xi1>
    %54 = arith.select %53, %50, %51 : vector<4x128xi1>, vector<4x128xbf16>
    %c0_25 = arith.constant 0 : index
    %c5 = arith.constant 5 : index
    %c0_26 = arith.constant 0 : index
    %55 = vector.load %arg1[%c0_25, %c5, %c0_26] : memref<1x10x128xbf16, #tpu.memory_space<vmem>>, vector<1x4x128xbf16>
    %56 = vector.shape_cast %55 : vector<1x4x128xbf16> to vector<4x128xbf16>
    %c0_27 = arith.constant 0 : index
    %c6 = arith.constant 6 : index
    %c0_28 = arith.constant 0 : index
    %57 = vector.load %arg1[%c0_27, %c6, %c0_28] : memref<1x10x128xbf16, #tpu.memory_space<vmem>>, vector<1x4x128xbf16>
    %58 = vector.shape_cast %57 : vector<1x4x128xbf16> to vector<4x128xbf16>
    %cst_29 = arith.constant 0.000000e+00 : bf16
    %59 = vector.broadcast %cst_29 : bf16 to vector<4x128xbf16>
    %60 = vector.shape_cast %20 : vector<4x1xi1> to vector<4x1xi1>
    %61 = vector.broadcast %60 : vector<4x1xi1> to vector<4x128xi1>
    %62 = arith.select %61, %58, %59 : vector<4x128xi1>, vector<4x128xbf16>
    %63 = tpu.concatenate %26, %28, %34, %40, %42, %48, %54, %56, %62 in 1 : vector<4x128xbf16>, vector<4x128xbf16>, vector<4x128xbf16>, vector<4x128xbf16>, vector<4x128xbf16>, vector<4x128xbf16>, vector<4x128xbf16>, vector<4x128xbf16>, vector<4x128xbf16> -> vector<4x1152xbf16>
    %c0_30 = arith.constant 0 : index
    %c0_31 = arith.constant 0 : index
    %64 = vector.load %arg2[%c0_30, %c0_31] : memref<1152x512xbf16, #tpu.memory_space<vmem>>, vector<1152x512xbf16>
    %cst_32 = arith.constant dense<0.000000e+00> : vector<4x512xf32>
    %65 = tpu.matmul %63, %64, %cst_32 {dimension_numbers = #tpu.dot_dimension_numbers<[1], [0], [0], [1], [0, 0, 1, 1], [], []>} : vector<4x1152xbf16>, vector<1152x512xbf16>, vector<4x512xf32> -> vector<4x512xf32>
    %c0_33 = arith.constant 0 : index
    %c0_34 = arith.constant 0 : index
    %66 = vector.load %arg3[%c0_33, %c0_34] : memref<1x512xf32, #tpu.memory_space<vmem>>, vector<1x512xf32>
    %67 = vector.broadcast %66 : vector<1x512xf32> to vector<4x512xf32>
    %68 = arith.addf %65, %67 : vector<4x512xf32>
    %cst_35 = arith.constant 0.000000e+00 : f32
    %69 = vector.broadcast %cst_35 : f32 to vector<4x512xf32>
    %70 = arith.maximumf %68, %69 : vector<4x512xf32>
    %71 = vector.shape_cast %70 : vector<4x512xf32> to vector<1x4x512xf32>
    %c0_36 = arith.constant 0 : index
    %c0_37 = arith.constant 0 : index
    %c0_38 = arith.constant 0 : index
    %72 = vector.load %arg4[%c0_36, %c0_37, %c0_38] : memref<1x4x512xf32, #tpu.memory_space<vmem>>, vector<1x4x512xf32>
    tpu.vector_store %arg4[%c0_36, %c0_37, %c0_38], %71 {strides = array<i32>} : memref<1x4x512xf32, #tpu.memory_space<vmem>>, vector<1x4x512xf32>,
    %cst_39 = arith.constant 0.000000e+00 : bf16
    %73 = vector.broadcast %cst_39 : bf16 to vector<1x2x512xbf16>
    %c0_40 = arith.constant 0 : index
    %c0_41 = arith.constant 0 : index
    %c0_42 = arith.constant 0 : index
    %74 = vector.load %arg5[%c0_40, %c0_41, %c0_42] : memref<1x5x512xbf16, #tpu.memory_space<vmem>>, vector<1x2x512xbf16>
    tpu.vector_store %arg5[%c0_40, %c0_41, %c0_42], %73 {strides = array<i32>} : memref<1x5x512xbf16, #tpu.memory_space<vmem>>, vector<1x2x512xbf16>,
    %c0_43 = arith.constant 0 : index
    %c3_44 = arith.constant 3 : index
    %c0_45 = arith.constant 0 : index
    %75 = vector.load %arg5[%c0_43, %c3_44, %c0_45] : memref<1x5x512xbf16, #tpu.memory_space<vmem>>, vector<1x2x512xbf16>
    tpu.vector_store %arg5[%c0_43, %c3_44, %c0_45], %73 {strides = array<i32>} : memref<1x5x512xbf16, #tpu.memory_space<vmem>>, vector<1x2x512xbf16>,
    %76 = vector.shape_cast %70 : vector<4x512xf32> to vector<2x2x512xf32>
    %cst_46 = arith.constant dense<0xFF800000> : vector<2x512xf32>
    %77 = vector.multi_reduction <maximumf>, %76, %cst_46 [1] : vector<2x2x512xf32> to vector<2x512xf32>
    %78 = vector.shape_cast %77 : vector<2x512xf32> to vector<1x2x1x512xf32>
    %cst_47 = arith.constant dense<0xFF800000> : vector<1x1x512xf32>
    %79 = vector.multi_reduction <maximumf>, %78, %cst_47 [1] : vector<1x2x1x512xf32> to vector<1x1x512xf32>
    %80 = vector.shape_cast %79 : vector<1x1x512xf32> to vector<1x512xf32>
    %81 = arith.truncf %80 : vector<1x512xf32> to vector<1x512xbf16>
    %c0_48 = arith.constant 0 : index
    %c2_49 = arith.constant 2 : index
    %c0_50 = arith.constant 0 : index
    %82 = vector.load %arg5[%c0_48, %c2_49, %c0_50] : memref<1x5x512xbf16, #tpu.memory_space<vmem>>, vector<1x1x512xbf16>
    %83 = vector.shape_cast %82 : vector<1x1x512xbf16> to vector<1x512xbf16>
    %84 = vector.shape_cast %81 : vector<1x512xbf16> to vector<1x1x512xbf16>
    tpu.vector_store %arg5[%c0_48, %c2_49, %c0_50], %84 {strides = array<i32>} : memref<1x5x512xbf16, #tpu.memory_space<vmem>>, vector<1x1x512xbf16>,
    return
  }
  func.func @transform_0(%arg0: i32) -> (i32, i32, i32) {
    %c0_i32 = arith.constant 0 : i32
    %c0_i32_0 = arith.constant 0 : i32
    %c0_i32_1 = arith.constant 0 : i32
    return %arg0, %c0_i32, %c0_i32_0 : i32, i32, i32
  }
  func.func @transform_1(%arg0: i32) -> (i32, i32) {
    %c0_i32 = arith.constant 0 : i32
    %c0_i32_0 = arith.constant 0 : i32
    %c0_i32_1 = arith.constant 0 : i32
    return %c0_i32, %c0_i32_0 : i32, i32
  }
  func.func @transform_2(%arg0: i32) -> (i32, i32) {
    %c0_i32 = arith.constant 0 : i32
    %c0_i32_0 = arith.constant 0 : i32
    %c0_i32_1 = arith.constant 0 : i32
    return %c0_i32, %c0_i32_0 : i32, i32
  }
  func.func @transform_3(%arg0: i32) -> (i32, i32, i32) {
    %c0_i32 = arith.constant 0 : i32
    %c0_i32_0 = arith.constant 0 : i32
    %c0_i32_1 = arith.constant 0 : i32
    return %arg0, %c0_i32, %c0_i32_0 : i32, i32, i32
  }
  func.func @transform_4(%arg0: i32) -> (i32, i32, i32) {
    %c0_i32 = arith.constant 0 : i32
    %c0_i32_0 = arith.constant 0 : i32
    %c0_i32_1 = arith.constant 0 : i32
    return %arg0, %c0_i32, %c0_i32_0 : i32, i32, i32
  }
}

module attributes {stable_mosaic.version = 11 : i64} {
  func.func @_classifier_kernel(%arg0: memref<2x512xf32, #tpu.memory_space<vmem>>, %arg1: memref<512x512xbf16, #tpu.memory_space<vmem>>, %arg2: memref<1x512xf32, #tpu.memory_space<vmem>>, %arg3: memref<512x512xbf16, #tpu.memory_space<vmem>>, %arg4: memref<1x512xf32, #tpu.memory_space<vmem>>, %arg5: memref<512x10xbf16, #tpu.memory_space<vmem>>, %arg6: memref<1x10xf32, #tpu.memory_space<vmem>>, %arg7: memref<2x10xf32, #tpu.memory_space<vmem>>) attributes {dimension_semantics = [], scalar_prefetch = 0 : i64, scratch_operands = 0 : i64, tpu.core_type = #tpu.core_type<tc>} {
    %c0 = arith.constant 0 : index
    %c0_0 = arith.constant 0 : index
    %0 = vector.load %arg0[%c0, %c0_0] : memref<2x512xf32, #tpu.memory_space<vmem>>, vector<2x512xf32>
    %1 = arith.truncf %0 : vector<2x512xf32> to vector<2x512xbf16>
    %c0_1 = arith.constant 0 : index
    %c0_2 = arith.constant 0 : index
    %2 = vector.load %arg1[%c0_1, %c0_2] : memref<512x512xbf16, #tpu.memory_space<vmem>>, vector<512x512xbf16>
    %cst = arith.constant dense<0.000000e+00> : vector<2x512xf32>
    %3 = tpu.matmul %1, %2, %cst {dimension_numbers = #tpu.dot_dimension_numbers<[1], [0], [0], [1], [0, 0, 1, 1], [], []>} : vector<2x512xbf16>, vector<512x512xbf16>, vector<2x512xf32> -> vector<2x512xf32>
    %c0_3 = arith.constant 0 : index
    %c0_4 = arith.constant 0 : index
    %4 = vector.load %arg2[%c0_3, %c0_4] : memref<1x512xf32, #tpu.memory_space<vmem>>, vector<1x512xf32>
    %5 = vector.broadcast %4 : vector<1x512xf32> to vector<2x512xf32>
    %6 = arith.addf %3, %5 : vector<2x512xf32>
    %cst_5 = arith.constant 0.000000e+00 : f32
    %7 = vector.broadcast %cst_5 : f32 to vector<2x512xf32>
    %8 = arith.maximumf %6, %7 : vector<2x512xf32>
    %9 = arith.truncf %8 : vector<2x512xf32> to vector<2x512xbf16>
    %c0_6 = arith.constant 0 : index
    %c0_7 = arith.constant 0 : index
    %10 = vector.load %arg3[%c0_6, %c0_7] : memref<512x512xbf16, #tpu.memory_space<vmem>>, vector<512x512xbf16>
    %cst_8 = arith.constant dense<0.000000e+00> : vector<2x512xf32>
    %11 = tpu.matmul %9, %10, %cst_8 {dimension_numbers = #tpu.dot_dimension_numbers<[1], [0], [0], [1], [0, 0, 1, 1], [], []>} : vector<2x512xbf16>, vector<512x512xbf16>, vector<2x512xf32> -> vector<2x512xf32>
    %c0_9 = arith.constant 0 : index
    %c0_10 = arith.constant 0 : index
    %12 = vector.load %arg4[%c0_9, %c0_10] : memref<1x512xf32, #tpu.memory_space<vmem>>, vector<1x512xf32>
    %13 = vector.broadcast %12 : vector<1x512xf32> to vector<2x512xf32>
    %14 = arith.addf %11, %13 : vector<2x512xf32>
    %cst_11 = arith.constant 0.000000e+00 : f32
    %15 = vector.broadcast %cst_11 : f32 to vector<2x512xf32>
    %16 = arith.maximumf %14, %15 : vector<2x512xf32>
    %17 = arith.truncf %16 : vector<2x512xf32> to vector<2x512xbf16>
    %c0_12 = arith.constant 0 : index
    %c0_13 = arith.constant 0 : index
    %18 = vector.load %arg5[%c0_12, %c0_13] : memref<512x10xbf16, #tpu.memory_space<vmem>>, vector<512x10xbf16>
    %cst_14 = arith.constant dense<0.000000e+00> : vector<2x10xf32>
    %19 = tpu.matmul %17, %18, %cst_14 {dimension_numbers = #tpu.dot_dimension_numbers<[1], [0], [0], [1], [0, 0, 1, 1], [], []>} : vector<2x512xbf16>, vector<512x10xbf16>, vector<2x10xf32> -> vector<2x10xf32>
    %c0_15 = arith.constant 0 : index
    %c0_16 = arith.constant 0 : index
    %20 = vector.load %arg6[%c0_15, %c0_16] : memref<1x10xf32, #tpu.memory_space<vmem>>, vector<1x10xf32>
    %21 = vector.broadcast %20 : vector<1x10xf32> to vector<2x10xf32>
    %22 = arith.addf %19, %21 : vector<2x10xf32>
    %c0_17 = arith.constant 0 : index
    %c0_18 = arith.constant 0 : index
    %23 = vector.load %arg7[%c0_17, %c0_18] : memref<2x10xf32, #tpu.memory_space<vmem>>, vector<2x10xf32>
    tpu.vector_store %arg7[%c0_17, %c0_18], %22 {strides = array<i32>} : memref<2x10xf32, #tpu.memory_space<vmem>>, vector<2x10xf32>,
    return
  }
}

</mosaic_0001>

<bundles_post_ra>
// kernel: vgg_forward.7
= control target key start
LH: loop header
LB: loop body
LE: loop exit
PB: predicated region body
PF: predicated region fallthrough
CT: control target
= control target key end

     0   :  { %10 = vsyncpa [#allocation3], 0  ;;  %s1892_s0 = inlined_call_operand.vmem [shape: bf16[2,26,64], index: 0, kind: input, shape index: {}]   ;;  %s1893_s1 = inlined_call_operand.hbm [shape: bf16[576,128], index: 1, kind: input, shape index: {}]   ;;  %s1894_s2 = inlined_call_operand.vmem [shape: f32[1,128], index: 2, kind: input, shape index: {}]   ;;  %s1895_s3 = inlined_call_operand.hbm [shape: f32[2,16,128], index: 3, kind: output, shape index: {0}]   ;;  %s1896_s4 = inlined_call_operand.vmem [shape: bf16[2,10,128], index: 4, kind: output, shape index: {1}]  }
   0x1   :  { %11 = vsyncpa [#allocation4], 0 }
   0x2   :  { %13 = vsyncpa [#allocation4 + $0x1], 0  ;;  %s1551_s15 = smov 0   ;;  %s1553_s16 = smov 0  }
   0x3   :  { %s1555_s17 = smov 0   ;;  %s1557_s18 = smov 0  }
   0x4 LB: > { %s1572_s19 = sadd.s32 4294967295, %s1513_s18   ;;  %s1176_s20 = sadd.s32 4294967294, %s1513_s18   ;;  %s1513_s18 = sphi %s1557_s18, %s1936_s18   ;;  %s1509_s17 = sphi %s1555_s17, %s1935_s17   ;;  %s1505_s16 = sphi %s1553_s16, %s1934_s16   ;;  %s1501_s15 = sphi %s1551_s15, %s1933_s15  }
   0x5   : > { %s1576_s21 = sadd.s32 1, %s1513_s18   ;;  %s94_s22 = sadd.s32 1, %s1509_s17 }
   0x6   : > { %s91_s23 = ssub.s32 %s1513_s18, %s1576_s21  ;;  %p104_p0 = scmp.ne.s32.totalorder %s1509_s17, %s1505_s16 }
   0x7   : > { %p92_p1 = scmp.eq.s32.totalorder %s91_s23, 0  ;;  %p105_p2 = scmp.eq.s32.totalorder %s1572_s19, 1 }
   0x8   : > { %p110_p3 = scmp.ne.s32.totalorder %s1505_s16, %s1501_s15  ;;  %p111_p4 = scmp.eq.s32.totalorder %s1176_s20, 1 }
   0x9   : > { %s1587_s24 = scalar_select %p92_p1, %s1509_s17, %s94_s22  }
   0xa   : > { %p1589_p5 = por %p105_p2, %p104_p0  ;;  %p1593_p6 = por %p111_p4, %p110_p3 }
   0xb   : > { %p1177_p7 = scmp.ge.s32.totalorder %s1513_s18, 1  ;;  %p144_p8 = scmp.lt.s32.totalorder %s1513_s18, 3 }
   0xc   : > { %s1900_s25 = scalar_select %p1589_p5, 1, 0 }
   0xd   : > { %s1901_s26 = scalar_select %p1593_p6, 1, 0 }
   0xe   : > { %p1897_p9 = scmp.eq.s32.totalorder %s1572_s19, 0  ;;  %p1600_p10 = pnand %p1177_p7, %p144_p8 }
   0xf   : > { %s1515_s28 = smov [#allocation2]   ;;  %s1419_s7 = scalar_lea.hbm %s1893_s1, 4608 }
  0x10   : > { %s1902_s27 = scalar_select %p1600_p10, 1, 0 }
  0x11   : > { %s156_s29 = sshll.u32 %s1515_s28, 4  ;;  %p1324_p11 = pneg %p1600_p10  ;;  %s157_s29 = int_to_ptr.vmem [resolvable:$true] %s156_s29 }
  0x12   : > { %p1420_p13 = scmp.ne.s32.totalorder %s1893_s1, %s1419_s7  ;;  %p1426_p3 = scmp.lt.u32.totalorder %s1419_s7, %s1893_s1 }
  0x13   : > { %p1608_p12 = pnand %p1897_p9, %p1324_p11 }
  0x15   : > { %p1421_p0 = pneg %p1608_p12 }
  0x17   : > { %p1422_p1 = pnand %p1421_p0, %p1420_p13 }
  0x19   : > { %p1423_p2 = pneg %p1422_p1 }
  0x1b   : > { %p1428_p4 = pnand %p1426_p3, %p1423_p2 }
  0x1d   : > { %1431 = shalt.err (!%p1428_p4)
}
  0x1e   : > { %s1432_s12 = scalar_lea.vmem %s157_s29, 4608  ;;  %p1440_p9 = scmp.lt.s32.totalorder %s157_s29, %s157_s29 }
  0x1f   : > { %p1433_p7 = scmp.ne.s32.totalorder %s157_s29, %s1432_s12  ;;  %p1441_p6 = scmp.lt.s32.totalorder %s1432_s12, %s1432_s12 }
  0x21   : > { %p1435_p8 = pnand %p1433_p7, %p1421_p0  ;;  %p1442_p5 = por %p1441_p6, %p1440_p9 }
  0x23   : > { %p1436_p11 = pneg %p1435_p8 }
  0x25   : > { %p1443_p10 = pnand %p1442_p5, %p1436_p11 }
  0x27   : > { %1446 = shalt.err (!%p1443_p10)
}
  0x28   : > { %s1516_s13 = smov 64   ;;  %s1517_s14 = smov 4  }
  0x29   : > { %1327 = dma.hbm_to_vmem [thread:$0]  (!%p1608_p12), %s1893_s1, 4608, %s157_s29, [#allocation3], %s1516_s13, %s1516_s13, %s1517_s14  }
  0x2a   : > { %p1904_p13 = scmp.ne.s32.totalorder %s1902_s27, 0 }
  0x2b   : > { %p1905_p1 = scmp.eq.s32.totalorder (!%p1904_p13), %s1572_s19, 0 }
  0x2c   : > { %183 = sbr.rel (%p1904_p13) target bundleno = 471 (0x1d7), region = 32 }
  0x33   : > { %1492 = dma.done.wait (%p1905_p1), [#allocation3], 4608   ;;  %p1906_p0 = pmov %p1905_p1 }
  0x34   : > { %p214_p5 = scmp.lt.s32.totalorder %s1572_s19, 1  ;;  %v227_v0 = vlaneseq  ;;  %vm296_vm0 = vcmask 1041408   ;;  %vm297_vm1 = vcmask 1045508   ;;  %vm904_vm2 = vsmask.f32 1280  ;;  %v1383_v41 = vld [vmem:[#allocation2 + $0x40] sm:$0xff]  }
  0x35   : > { %1494 = vsyncadd (%p1906_p0), [#allocation3], 4294962688  ;;  %vm909_vm3 = vcmask 1043459   ;;  %vm910_vm4 = vsmask.f32 7950  ;;  %v1518_v8 = vmov 0   ;;  %1257 = vmatprep.subr.bf16.mxu0 %v1383_v41 }
  0x36   : > { %s215_s23 = scalar_select %p214_p5, %s1572_s19, 1  ;;  %v1636_v1 = vshrl.u32 %v227_v0, 7  ;;  %vm1641_vm5 = vmor %vm296_vm0, %vm297_vm1  ;;  %vm347_vm15 = vsmask.f32 7424  ;;  %vm312_vm1 = vcmask 1042432   ;;  %v1384_v51 = vld [vmem:[#allocation2] sm:$0xff]  }
  0x37   : > { %vm1656_vm6 = vmand %vm296_vm0, %vm904_vm2  ;;  %vm382_vm2 = vcmask 1045504   ;;  %v1385_v56 = vld [vmem:[#allocation2 + $0xc0] sm:$0xff]   ;;  %1258 = vmatpush3.bf16.msra.mxu0 %v1384_v51  ;;  %s1519_s9 = smov 64   ;;  %v1407_v0 = vld [vmem:[#allocation2 + $0xa8] sm:$0xff]   ;;  %s204_s12 = sand.u32 1, %s1505_s16  }
  0x38   : > { %s1250_s27 = sshll.u32 %s215_s23, 4  ;;  %s1251_s28 = sshll.u32 %s215_s23, 3  ;;  %v229_v2 = vadd.s32 8, %v1636_v1  ;;  %v234_v3 = vand.u32 3, %v1636_v1  ;;  %vm1660_vm8 = vmand %vm909_vm3, %vm910_vm4  ;;  %vm313_vm4 = vcmask 1046532   ;;  %1279 = vmatprep.subr.bf16.mxu1 %v1385_v56  ;;  %v1387_v7 = vld [vmem:[#allocation2 + $0x80] sm:$0xff]  }
  0x39   : > { %s1648_s5 = scalar_lea.vmem %s1892_s0, %s1250_s27  ;;  %s1653_s8 = scalar_lea.vmem %s1896_s4, %s1251_s28  ;;  %1280 = vmatpush3.bf16.msra.mxu1 %v1387_v7  ;;  %v1400_v51 = vld [vmem:[#allocation2 + $0x20] sm:$0xff]   ;;  %v1410_v7 = vld [vmem:[#allocation2 + $0x78] sm:$0xff]  }
  0x3a   : > { %v241_v6 = vand.u32 3, %v229_v2  ;;  %vm254_vm7 = vcmp.ge.s32.totalorder %v234_v3, 1  ;;  %915 = vst [vmem:[%s1653_s8 + $0x4] sm:$0x1] %v1518_v8  ;;  %vm1665_vm9 = vcmp.lt.s32.totalorder %v234_v3, 3  ;;  %v1412_v11 = vld [vmem:[#allocation2 + $0x38] sm:$0xff]  }
  0x3b   : > { %v1670_v10 = vld [vmem:[%s1648_s5 + $0x4] sm:$0xf]  ;;  %vm1672_vm10 = vmpackc.low %vm254_vm7, %vm254_vm7  ;;  %v292_v12 = vld [vmem:[%s1648_s5] sm:$0xc]  ;;  %vm278_vm7 = vcmask 1040384   ;;  %s1182_s13 = sshll.u32 %s204_s12, 4 }
  0x3c   : > { %vm255_vm11 = vcmp.ge.s32.totalorder %v241_v6, 1  ;;  %v294_v13 = vsel %vm1672_vm10, 65537, %v1518_v8  ;;  %v1680_v14 = vcombine.low %v292_v12, %v1670_v10  ;;  %v906_v15 = vld [vmem:[%s1653_s8] sm:$0x3]  ;;  %vm274_vm12 = vmpackc.low %vm1665_vm9, %vm1665_vm9  ;;  %v912_v19 = vld [vmem:[%s1653_s8] sm:$0x8] }
  0x3d   : > { %vm1686_vm13 = vmpackc.low %vm255_vm11, %vm255_vm11  ;;  %v299_v17 = vrot.slane %v294_v13, 6  ;;  %v907_v18 = vsel %vm1656_vm6, 0, %v906_v15  ;;  %vm1693_vm14 = vcmp.lt.s32.totalorder %v241_v6, 3  ;;  %v913_v22 = vsel %vm1660_vm8, 0, %v912_v19  ;;  %v1706_v23 = vld [vmem:[%s1648_s5 + $0x8] sm:$0xf] }
  0x3e   : > { %v295_v21 = vsel %vm1686_vm13, 65537, %v1518_v8  ;;  %908 = vst [vmem:[%s1653_s8] sm:$0x3] %v907_v18  ;;  %vm275_vm3 = vmpackc.low %vm1693_vm14, %vm1693_vm14  ;;  %v1708_v24 = vsel %vm274_vm12, 65537, %v1518_v8  ;;  %v329_v29 = vld [vmem:[%s1648_s5 + $0xc] sm:$0x1]  ;;  %v1199_v32 = vcombine.low %v1670_v10, %v1706_v23  ;;  %vm420_vm12 = vcmask 1044480  }
  0x3f   : > { %v300_v25 = vrot.slane %v299_v17, 4  ;;  %v301_v26 = vrot.slane %v295_v21, 6  ;;  %vm1710_vm6 = vcmp.ne.s16.totalorder %v299_v17, 0  ;;  %914 = vst [vmem:[%s1653_s8] sm:$0x8] %v913_v22  ;;  %v1715_v28 = vsel %vm275_vm3, 65537, %v1518_v8  ;;  %vm1752_vm11 = vmor %vm312_vm1, %vm313_vm4  ;;  %v1386_v6 = vld [vmem:[#allocation2 + $0x48] sm:$0xff]  }
  0x40   : > { %v307_v30 = vsel %vm1710_vm6, %v292_v12, 0  ;;  %v283_v31 = vrot.slane %v1715_v28, 7  ;;  %v1200_v33 = vcombine.low %v329_v29, %v329_v29  ;;  %v1724_v34 = vld [vmem:[%s1648_s5] sm:$0xf]  ;;  %v1727_v35 = vld [vmem:[%s1648_s5 + $0x8] sm:$0x1]  ;;  %1259 = vmatprep.subr.bf16.mxu0 %v1386_v6 }
  0x41   : > { %v293_v36 = vld [vmem:[%s1648_s5 + $0x8] sm:$0x3]  ;;  %v302_v37 = vsel %vm1641_vm5, %v300_v25, %v301_v26  ;;  %v303_v38 = vrot.slane %v301_v26, 4  ;;  %v1188_v39 = vcombine.low %v1724_v34, %v1670_v10  ;;  %v1189_v40 = vcombine.low %v1727_v35, %v1727_v35  ;;  %v311_v60 = vld [vmem:[%s1648_s5] sm:$0x8]  ;;  %s206_s14 = scalar_lea.vmem [#allocation5], %s1182_s13 }
  0x42   : > { %vm305_vm8 = vcmp.ne.s16.totalorder %v302_v37, 0  ;;  %v1738_v42 = vrot.slane %v283_v31, 4  ;;  %v438_v43 = vshrl.u32 %v1199_v32, 16  ;;  %v440_v44 = vshll.u32 %v1199_v32, 16  ;;  %v1748_v63 = vld [vmem:[%s1648_s5 + $0x8] sm:$0x7] }
  0x43   : > { %vm306_vm9 = vcmp.ne.s16.totalorder %v303_v38, 0  ;;  %v308_v45 = vsel %vm305_vm8, %v1670_v10, 0  ;;  %v445_v46 = vshll.u32 %v1200_v33, 16  ;;  %v349_v47 = vshrl.u32 %v1188_v39, 16  ;;  %v1388_v17 = vld [vmem:[#allocation2 + $0x8] sm:$0xff]   ;;  %v1390_v26 = vld [vmem:[#allocation2 + $0x50] sm:$0xff]  }
  0x44   : > { %v309_v48 = vsel %vm306_vm9, %v293_v36, 0  ;;  %v1192_v49 = vcombine.low %v307_v30, %v308_v45  ;;  %vm288_vm5 = vcmp.ne.s16.totalorder %v1738_v42, 0  ;;  %v442_v50 = vrot.slane %v440_v44, 1  ;;  %1260 = vmatpush3.bf16.msra.mxu0 %v1388_v17  ;;  %v1389_v25 = vld [vmem:[#allocation2 + $0xc8] sm:$0xff]   ;;  %v1392_v36 = vld [vmem:[#allocation2 + $0x10] sm:$0xff]   ;;  %v1396_v45 = vld [vmem:[#allocation2 + $0x18] sm:$0xff]  }
  0x45   : > { %v1193_v52 = vcombine.low %v309_v48, %v309_v48  ;;  %v1744_v53 = vsel %vm288_vm5, %v329_v29, 0  ;;  %v447_v54 = vrot.slane %v445_v46, 1  ;;  %v351_v55 = vshll.u32 %v1188_v39, 16  ;;  %v1391_v30 = vld [vmem:[#allocation2 + $0x88] sm:$0xff]   ;;  %1281 = vmatprep.subr.bf16.mxu1 %v1389_v25  ;;  %1261 = vmatprep.subr.bf16.mxu0 %v1390_v26  ;;  %v1393_v38 = vld [vmem:[#allocation2 + $0xd0] sm:$0xff]   ;;  %v1394_v39 = vld [vmem:[#allocation2 + $0x58] sm:$0xff]  }
  0x46   : > { %v383_v57 = vrot.slane %v1192_v49, 2  ;;  %v443_v58 = vor.u32 %v442_v50, %v438_v43  ;;  %v356_v59 = vshll.u32 %v1189_v40, 16  ;;  %v315_v2 = vrot.slane %v1708_v24, 5  ;;  %1282 = vmatpush3.bf16.msra.mxu1 %v1391_v30  ;;  %v1395_v43 = vld [vmem:[#allocation2 + $0x90] sm:$0xff]   ;;  %v1397_v48 = vld [vmem:[#allocation2 + $0xd8] sm:$0xff]   ;;  %s1074_s20 = sshll.u32 %s206_s14, 4  ;;  %s1833_s20 = int_to_ptr.vmem [resolvable:$true] %s1074_s20 }
  0x47   : > { %v384_v61 = vrot.slane %v1193_v52, 2  ;;  %v353_v62 = vrot.slane %v351_v55, 1  ;;  %v317_v3 = vrot.slane %v1715_v28, 5  ;;  %vm279_vm14 = vcmask 1044484   ;;  %1283 = vmatprep.subr.bf16.mxu1 %v1393_v38  ;;  %v1403_v28 = vld [vmem:[#allocation2 + $0xa0] sm:$0xff]   ;;  %s1256_s22 = sshll.u32 %s1572_s19, 8 }
  0x48   : > { %v448_v4 = vsel %vm347_vm15, %v443_v58, %v447_v54  ;;  %v358_v5 = vrot.slane %v356_v59, 1  ;;  %v316_v12 = vrot.slane %v315_v2, 4  ;;  %vm1762_vm1 = vcmp.ne.s16.totalorder %v315_v2, 0  ;;  %vm1773_vm3 = vmor %vm278_vm7, %vm279_vm14  ;;  %1262 = vmatpush3.bf16.msra.mxu0 %v1392_v36  ;;  %v1401_v54 = vld [vmem:[#allocation2 + $0xe0] sm:$0xff]   ;;  %v1405_v58 = vld [vmem:[#allocation2 + $0xe8] sm:$0xff]   ;;  %s1838_s28 = scalar_lea.hbm %s1895_s3, %s1256_s22  ;;  %s1841_s19 = scalar_lea.sflag [#allocation4], %s204_s12 }
  0x49   : > { %v385_v8 = vsel %vm382_vm2, %v383_v57, %v384_v61  ;;  %449 = vrot.lane.b32.xlu1 %v448_v4, %s1519_s9  ;;  %v354_v9 = vor.u32 %v353_v62, %v349_v47  ;;  %v319_v13 = vrot.slane %v317_v3, 4  ;;  %v323_v20 = vsel %vm1762_vm1, %v311_v60, 0  ;;  %1263 = vmatprep.subr.bf16.mxu0 %v1394_v39  ;;  %v1404_v57 = vld [vmem:[#allocation2 + $0x28] sm:$0xff]   ;;  %v1406_v60 = vld [vmem:[#allocation2 + $0x70] sm:$0xff]   ;;  %s1447_s29 = scalar_lea.vmem %s1833_s20, 256  ;;  %p1931_p9 = scmp.ne.s32.totalorder %s1900_s25, 0 }
  0x4a   : > { %386 = vrot.lane.b32.xlu0 %v385_v8, %s1519_s9  ;;  %v318_v19 = vsel %vm1752_vm11, %v316_v12, %v317_v3  ;;  %v281_v40 = vrot.slane %v1708_v24, 7  ;;  %v291_v44 = vsel %vm288_vm5, %v1727_v35, 0  ;;  %v396_v47 = vshrl.u32 %v1680_v14, 16  ;;  %1284 = vmatpush3.bf16.msra.mxu1 %v1395_v43  ;;  %v1398_v24 = vld [vmem:[#allocation2 + $0x60] sm:$0xff]   ;;  %v1399_v35 = vld [vmem:[#allocation2 + $0x98] sm:$0xff]   ;;  %p1448_p6 = scmp.ne.s32.totalorder %s1833_s20, %s1447_s29  ;;  %s1523_s30 = smov [#allocation5]  }
  0x4b   : > { %v359_v18 = vsel %vm347_vm15, %v354_v9, %v358_v5  ;;  %vm322_vm2 = vcmp.ne.s16.totalorder %v319_v13, 0  ;;  %vm321_vm4 = vcmp.ne.s16.totalorder %v318_v19, 0  ;;  %v399_v49 = vshll.u32 %v1680_v14, 16  ;;  %1285 = vmatprep.subr.bf16.mxu1 %v1397_v48  ;;  %v1402_v14 = vld [vmem:[#allocation2 + $0x68] sm:$0xff]   ;;  %v1409_v5 = vld [vmem:[#allocation2 + $0xf0] sm:$0xff]   ;;  %v1413_v19 = vld [vmem:[#allocation2 + $0xf8] sm:$0xff]  }
  0x4c   : > { %v325_v22 = vsel %vm322_vm2, %v1748_v63, 0  ;;  %v324_v27 = vsel %vm321_vm4, %v1670_v10, 0  ;;  %v282_v46 = vrot.slane %v281_v40, 4  ;;  %1264 = vmatpush3.bf16.msra.mxu0 %v1396_v45  ;;  %v1191_v42 = vcombine.low %v291_v44, %v291_v44  ;;  %v1411_v9 = vld [vmem:[#allocation2 + $0xb0] sm:$0xff]   ;;  %v269_v13 = vld [vmem:[%s1648_s5] sm:$0xe]  ;;  %p1449_p10 = pnand %p1448_p6, %p1931_p9 }
  0x4d   : > { %v1197_v29 = vcombine.low %v325_v22, %v325_v22  ;;  %v1196_v32 = vcombine.low %v323_v20, %v324_v27  ;;  %1265 = vmatprep.subr.bf16.mxu0 %v1398_v24  ;;  %vm1794_vm6 = vcmp.ne.s16.totalorder %v281_v40, 0  ;;  %v266_v59 = vsel %vm1672_vm10, %v1724_v34, 0  ;;  %v1408_v34 = vld [vmem:[#allocation2 + $0x30] sm:$0xff]   ;;  %v330_v15 = vld [vmem:[%s1648_s5 + $0x4] sm:$0xe]  ;;  %v1414_v22 = vld [vmem:[#allocation2 + $0xb8] sm:$0xff]  }
  0x4e   : > { %360 = vrot.lane.b32.xlu0 %v359_v18, %s1519_s9  ;;  %v284_v50 = vsel %vm1773_vm3, %v282_v46, %v283_v31  ;;  %1286 = vmatpush3.bf16.msra.mxu1 %v1399_v35  ;;  %v372_v31 = vrot.slane %v1191_v42, 1  ;;  %v267_v61 = vsel %vm1686_vm13, %v1670_v10, 0  ;;  %v1195_v62 = vcombine.low %v1748_v63, %v1748_v63  ;;  %v1415_v43 = vld [vmem:[#allocation2 + $0x100] sm:$0xff]   ;;  %v1416_v46 = vld [vmem:[#allocation2 + $0x108] sm:$0xff]   ;;  %v1418_v24 = vld [vmem:[#allocation2 + $0x118] sm:$0xff]   ;;  %p1450_p12 = pneg %p1449_p10  ;;  %s1451_s5 = sshll.u32 %s1523_s30, 4  ;;  %s1452_s5 = int_to_ptr.vmem [resolvable:$false] %s1451_s5 }
  0x4f   : > { %v422_v33 = vrot.slane %v1197_v29, 3  ;;  %v421_v37 = vrot.slane %v1196_v32, 3  ;;  %vm287_vm15 = vcmp.ne.s16.totalorder %v284_v50, 0  ;;  %1287 = vmatprep.subr.bf16.mxu1 %v1401_v54  ;;  %vm370_vm7 = vcmask 1046528   ;;  %v1203_v42 = vld [vmem:[%s1894_s2] ss:$0 sm:$0xff]  ;;  %p1454_p2 = scmp.lt.s32.totalorder %s1833_s20, %s1452_s5 }
  0x50   : > { %v290_v52 = vsel %vm287_vm15, %v1670_v10, 0  ;;  %v332_v55 = vsel %vm287_vm15, %v1706_v23, 0  ;;  %1266 = vmatpush3.bf16.msra.mxu0 %v1400_v51  ;;  %v1187_v2 = vcombine.low %v266_v59, %v267_v61  ;;  %v327_v3 = vsel %vm1672_vm10, %v1670_v10, 0  ;;  %s1453_s6 = scalar_lea.vmem %s1452_s5, 512 }
  0x51   : > { %v423_v41 = vsel %vm420_vm12, %v421_v37, %v422_v33  ;;  %1267 = vmatprep.subr.bf16.mxu0 %v1402_v14  ;;  %v328_v4 = vsel %vm1686_vm13, %v1706_v23, 0  ;;  %v398_v63 = vrot.slane %v396_v47, 2  ;;  %v401_v8 = vrot.slane %v399_v49, 3  ;;  %v1417_v49 = vld [vmem:[#allocation2 + $0x110] sm:$0xff]   ;;  %p1455_p3 = scmp.lt.s32.totalorder %s1453_s6, %s1447_s29 }
  0x52   : > { %424 = vrot.lane.b32.xlu1 %v423_v41, %s1519_s9  ;;  %1288 = vmatpush3.bf16.msra.mxu1 %v1403_v28  ;;  %v1198_v6 = vcombine.low %v327_v3, %v328_v4  ;;  %v404_v12 = vshrl.u32 %v1195_v62, 16  ;;  %v1202_v10 = vcombine.low %v1744_v53, %v1744_v53  ;;  %v407_v16 = vshll.u32 %v1195_v62, 16 }
  0x53   : > { %1289 = vmatprep.subr.bf16.mxu1 %v1405_v58  ;;  %v289_v23 = vsel %vm1794_vm6, %v269_v13, 0  ;;  %v331_v17 = vsel %vm1794_vm6, %v330_v15, 0  ;;  %v1520_v25 = vmov 0.0   ;;  %v402_v53 = vor.u32 %v401_v8, %v398_v63  ;;  %p1456_p4 = por %p1455_p3, %p1454_p2 }
  0x54   : > { %1268 = vmatpush3.bf16.msra.mxu0 %v1404_v57  ;;  %v1190_v18 = vcombine.low %v289_v23, %v290_v52  ;;  %v406_v20 = vrot.slane %v404_v12, 2  ;;  %v1201_v21 = vcombine.low %v331_v17, %v332_v55  ;;  %v409_v26 = vrot.slane %v407_v16, 3 }
  0x55   : > { %1269 = vmatprep.subr.bf16.mxu0 %v1406_v60  ;;  %v460_v27 = vrot.slane %v1202_v10, 1  ;;  %vm394_vm10 = vsmask.f32 5376  ;;  %vm462_vm13 = vcmask 523264   ;;  %vm1521_vm8 = vmmov 0   ;;  %p1457_p7 = pnand %p1456_p4, %p1450_p12 }
  0x56   : > { %1290 = vmatpush3.bf16.msra.mxu1 %v1407_v0  ;;  %v371_v29 = vrot.slane %v1190_v18, 1  ;;  %v410_v30 = vor.u32 %v409_v26, %v406_v20  ;;  %v459_v33 = vrot.slane %v1201_v21, 1  ;;  %v1522_v62 = vmov 1983009808  }
  0x57   : > { %1291 = vmatprep.subr.bf16.mxu1 %v1409_v5  ;;  %v920_v0 = vunpack.c.l.s4 %v1522_v62 }
  0x58   : > { %1270 = vmatpush3.bf16.msra.mxu0 %v1408_v34  ;;  %v373_v32 = vsel %vm370_vm7, %v371_v29, %v372_v31  ;;  %v411_v36 = vsel %vm394_vm10, %v402_v53, %v410_v30  ;;  %v461_v37 = vsel %vm370_vm7, %v459_v33, %v460_v27 }
  0x59   : > { %1271 = vmatprep.subr.bf16.mxu0 %v1410_v7  ;;  %v921_v3 = vunpack.c.0.s8 %v920_v0 }
  0x5a   : > { %1292 = vmatpush3.bf16.msra.mxu1 %v1411_v9 }
  0x5b   : > { %1293 = vmatprep.subr.bf16.mxu1 %v1413_v19  ;;  %v924_v5 = vsub.s32 %v921_v3, %v1636_v1 }
  0x5c   : > { %1272 = vmatpush3.bf16.msra.mxu0 %v1412_v11 }
  0x5d   : > { %1306 = vmatprep.subr.bf16.mxu0 %v1520_v25 }
  0x5e   : > { %1294 = vmatpush3.bf16.msra.mxu1 %v1414_v22 }
  0xbb   : > { %v450_v38 = vpop.permute.xlu1 %449 }
  0xbc   : > { %v387_v39 = vpop.permute.xlu0 %386  ;;  %v477_v40 = vsel %vm462_vm13, %v1198_v6, %v450_v38 }
  0xbd   : > { %v469_v41 = vsel %vm462_vm13, %v373_v32, %v387_v39  ;;  %850 = vmatprep.mubr.bf16.mxu1 %v477_v40 }
  0xbe   : > { %809 = vmatprep.mubr.bf16.mxu0 %v469_v41 }
  0xc0   : > { %v361_v44 = vpop.permute.xlu0 %360 }
  0xc1   : > { %v465_v45 = vsel %vm462_vm13, %v1187_v2, %v361_v44 }
  0xc2   : > { %810 = vmatmul.mubr.bf16.vlgmr.msra.gmra.mrb[0].mxu0 %v465_v45 }
  0xc3   : > { %1307 = vmatpush3.bf16.msra.mxu0 %v1415_v43  ;;  %1314 = vmatprep.mubr.msk.bf16.mxu0 %vm1521_vm8, %v1520_v25 }
  0xc4   : > { %1308 = vmatprep.subr.bf16.mxu0 %v1520_v25  ;;  %v425_v47 = vpop.permute.xlu1 %424 }
  0xc5   : > { %v473_v48 = vsel %vm462_vm13, %v411_v36, %v425_v47 }
  0xc6   : > { %851 = vmatmul.mubr.bf16.vlgmr.msra.gmra.mrb[0].mxu1 %v473_v48 }
  0xc7   : > { %1309 = vmatpush3.bf16.msra.mxu0 %v1416_v46 }
  0xc8   : > { %1310 = vmatprep.subr.bf16.mxu0 %v1520_v25 }
  0xcb   : > { %1311 = vmatpush3.bf16.msra.mxu0 %v1417_v49 }
  0xcc   : > { %1312 = vmatprep.subr.bf16.mxu0 %v1520_v25 }
  0xcf   : > { %1313 = vmatpush3.bf16.msra.mxu0 %v1418_v24 }
  0xd2   : > { %1315 = vmatmul.mubr.msk.bf16.vlgmr.msra.gmra.mrb[4].mxu0 %vm462_vm13, %v461_v37 }
 0x195   : > { %v1273_v50 = vpop.f32.mrb[0].mxu0 }
 0x196   : > { %v1274_v35 = vpop.f32.mrb[1].mxu0 }
 0x197   : > { %v1275_v51 = vadd.f32 %v1274_v35, %v1273_v50  ;;  %v1276_v52 = vpop.f32.mrb[2].mxu0 }
 0x198   : > { %v1277_v54 = vpop.f32.mrb[3].mxu0 }
 0x199   : > { %v1278_v55 = vadd.f32 %v1277_v54, %v1276_v52  ;;  %v812_v14 = vadd.f32 %v1275_v51, %v1203_v42  ;;  %v1295_v56 = vpop.f32.mrb[0].mxu1 }
 0x19a   : > { %v1296_v28 = vpop.f32.mrb[1].mxu1 }
 0x19b   : > { %v815_v31 = vadd.f32 %v1278_v55, %v1203_v42  ;;  %v1297_v57 = vadd.f32 %v1296_v28, %v1295_v56  ;;  %v1298_v58 = vpop.f32.mrb[2].mxu1 }
 0x19c   : > { %v1299_v59 = vpop.f32.mrb[3].mxu1 }
 0x19d   : > { %v1300_v60 = vadd.f32 %v1299_v59, %v1298_v58  ;;  %v853_v61 = vadd.f32 %v1297_v57, %v812_v14 }
 0x19f   : > { %v856_v2 = vadd.f32 %v1300_v60, %v815_v31 }
 0x1a5   : > { %v893_v34 = vpop.f32.mrb[4].mxu0 }
 0x1a6   : > { %v894_v4 = vadd.f32 %v893_v34, %v853_v61  ;;  %v1316_v6 = vpop.f32.mrb[5].mxu0 }
 0x1a7   : > { %v896_v63 = vpop.f32.mrb[6].mxu0 }
 0x1a8   : > { %v900_v7 = vmax.f32 %v894_v4, 0.0  ;;  %v897_v8 = vadd.f32 %v896_v63, %v856_v2  ;;  %v1317_v9 = vpop.f32.mrb[7].mxu0 }
 0x1aa   : > { %902 = vst [vmem:[%s206_s14] sm:$0xff] %v900_v7  ;;  %v918_v12 = vcombine.high %v900_v7, %v900_v7  ;;  %v925_v10 = vrot.slane %v900_v7, %v924_v5  ;;  %v901_v11 = vmax.f32 %v897_v8, 0.0 }
 0x1ac   : > { %v932_v1 = vrot.slane %v918_v12, %v924_v5  ;;  %v933_v13 = vcombine.high %v925_v10, %v925_v10  ;;  %v961_v15 = vsel %vm296_vm0, %v925_v10, -inf  ;;  %903 = vst [vmem:[%s206_s14 + $0x8] sm:$0xff] %v901_v11  ;;  %v935_v16 = vcombine.high %v901_v11, %v901_v11 }
 0x1ad   : > { %v962_v23 = vrot.slane %v961_v15, 4  ;;  %v942_v17 = vrot.slane %v901_v11, %v924_v5 }
 0x1ae   : > { %1460 = shalt.err (!%p1457_p7)
}
 0x1af   : > { %s1461_s7 = scalar_lea.hbm %s1838_s28, 256  ;;  %s1465_s11 = scalar_lea.hbm %s1895_s3, 512 }
 0x1b0   : > { %p1462_p8 = scmp.ne.s32.totalorder %s1838_s28, %s1461_s7  ;;  %p1466_p1 = scmp.lt.u32.totalorder %s1838_s28, %s1895_s3 }
 0x1b1   : > { %p1467_p0 = scmp.lt.u32.totalorder %s1465_s11, %s1461_s7  ;;  %p1469_p6 = scmp.lt.u32.totalorder %s1461_s7, %s1838_s28 }
 0x1b2   : > { %p1463_p11 = pnand %p1462_p8, %p1931_p9 }
 0x1b3   : > { %p1468_p5 = por %p1467_p0, %p1466_p1 }
 0x1b4   : > { %p1464_p13 = pneg %p1463_p11 }
 0x1b5   : > { %p1470_p10 = por %p1469_p6, %p1468_p5 }
 0x1b7   : > { %p1471_p12 = pnand %p1470_p10, %p1464_p13 }
 0x1b9   : > { %1474 = shalt.err (!%p1471_p12)
}
 0x1ba   : > { %s1524_s14 = smov 128   ;;  %s1525_s22 = smov 8   ;;  %v934_v18 = vcombine.high %v932_v1, %v932_v1  ;;  %v968_v19 = vsel %vm296_vm0, %v933_v13, -inf  ;;  %v975_v20 = vsel %vm296_vm0, %v932_v1, -inf  ;;  %v949_v21 = vrot.slane %v935_v16, %v924_v5 }
 0x1bb   : > { %1322 = dma.vmem_to_hbm [thread:$0]  (%p1931_p9), %s1833_s20, 256, %s1838_s28, %s1841_s19, %s1524_s14, %s1524_s14, %s1525_s22   ;;  %v963_v22 = vmax.f32 %v961_v15, %v962_v23  ;;  %v969_v25 = vrot.slane %v968_v19, 4  ;;  %v976_v53 = vrot.slane %v975_v20, 4  ;;  %v950_v26 = vcombine.high %v942_v17, %v942_v17 }
 0x1bc   : > { %v982_v27 = vsel %vm296_vm0, %v934_v18, -inf  ;;  %v951_v29 = vcombine.high %v949_v21, %v949_v21  ;;  %v989_v30 = vsel %vm296_vm0, %v942_v17, -inf  ;;  %v1003_v32 = vsel %vm296_vm0, %v949_v21, -inf }
 0x1bd   : > { %v964_v33 = vrot.slane %v963_v22, 2  ;;  %v970_v36 = vmax.f32 %v968_v19, %v969_v25  ;;  %v977_v37 = vmax.f32 %v975_v20, %v976_v53  ;;  %v983_v38 = vrot.slane %v982_v27, 4 }
 0x1be   : > { %v990_v39 = vrot.slane %v989_v30, 4  ;;  %v996_v40 = vsel %vm296_vm0, %v950_v26, -inf  ;;  %v1004_v41 = vrot.slane %v1003_v32, 4  ;;  %v1010_v43 = vsel %vm296_vm0, %v951_v29, -inf  ;;  %v1052_v29 = vld [vmem:[%s1653_s8] sm:$0xe] }
 0x1bf   : > { %v965_v44 = vmax.f32 %v963_v22, %v964_v33  ;;  %v971_v45 = vrot.slane %v970_v36, 2  ;;  %v978_v46 = vrot.slane %v977_v37, 2  ;;  %v984_v47 = vmax.f32 %v982_v27, %v983_v38 }
 0x1c0   : > { %v991_v48 = vmax.f32 %v989_v30, %v990_v39  ;;  %v997_v49 = vrot.slane %v996_v40, 4  ;;  %v1005_v24 = vmax.f32 %v1003_v32, %v1004_v41  ;;  %v1011_v50 = vrot.slane %v1010_v43, 4 }
 0x1c1   : > { %v966_v35 = vrot.slane %v965_v44, 1  ;;  %v972_v42 = vmax.f32 %v970_v36, %v971_v45  ;;  %v979_v51 = vmax.f32 %v977_v37, %v978_v46  ;;  %v985_v52 = vrot.slane %v984_v47, 2 }
 0x1c2   : > { %v992_v54 = vrot.slane %v991_v48, 2  ;;  %v998_v55 = vmax.f32 %v996_v40, %v997_v49  ;;  %v1006_v14 = vrot.slane %v1005_v24, 2  ;;  %v1012_v56 = vmax.f32 %v1010_v43, %v1011_v50 }
 0x1c3   : > { %v973_v28 = vrot.slane %v972_v42, 1  ;;  %v980_v31 = vrot.slane %v979_v51, 1  ;;  %v986_v57 = vmax.f32 %v984_v47, %v985_v52  ;;  %v967_v62 = vmax.f32 %v965_v44, %v966_v35 }
 0x1c4   : > { %v993_v58 = vmax.f32 %v991_v48, %v992_v54  ;;  %v999_v59 = vrot.slane %v998_v55, 2  ;;  %v1007_v60 = vmax.f32 %v1005_v24, %v1006_v14  ;;  %v1013_v61 = vrot.slane %v1012_v56, 2 }
 0x1c5   : > { %v981_v0 = vmax.f32 %v979_v51, %v980_v31  ;;  %v987_v2 = vrot.slane %v986_v57, 1  ;;  %v974_v6 = vmax.f32 %v972_v42, %v973_v28  ;;  %vm1043_vm0 = vcmask 1045509  }
 0x1c6   : > { %v994_v3 = vrot.slane %v993_v58, 1  ;;  %v1000_v34 = vmax.f32 %v998_v55, %v999_v59  ;;  %v1008_v4 = vrot.slane %v1007_v60, 1  ;;  %v1014_v5 = vmax.f32 %v1012_v56, %v1013_v61 }
 0x1c7   : > { %v988_v63 = vmax.f32 %v986_v57, %v987_v2  ;;  %v1017_v7 = vmax.f32 %v967_v62, %v981_v0  ;;  %vm1045_vm9 = vcmask 1046534   ;;  %vm1049_vm5 = vcmask 1043457  }
 0x1c8   : > { %v995_v8 = vmax.f32 %v993_v58, %v994_v3  ;;  %v1001_v9 = vrot.slane %v1000_v34, 1  ;;  %v1009_v12 = vmax.f32 %v1007_v60, %v1008_v4  ;;  %v1015_v10 = vrot.slane %v1014_v5, 1 }
 0x1c9   : > { %v1018_v11 = vmax.f32 %v974_v6, %v988_v63  ;;  %v1252_v1 = vpack.c.bf16 %v1017_v7, %v1017_v7  ;;  %vm1050_vm11 = vsmask.f32 3334 }
 0x1ca   : > { %v1002_v13 = vmax.f32 %v1000_v34, %v1001_v9  ;;  %v1016_v15 = vmax.f32 %v1014_v5, %v1015_v10  ;;  %v1019_v16 = vmax.f32 %v995_v8, %v1009_v12  ;;  %vm1051_vm12 = vmand %vm1049_vm5, %vm1050_vm11 }
 0x1cb   : > { %v1253_v23 = vpack.c.bf16 %v1018_v11, %v1018_v11  ;;  %v1037_v19 = vunpack.c.l.b16 %v1252_v1 }
 0x1cc   : > { %v1020_v17 = vmax.f32 %v1002_v13, %v1016_v15  ;;  %v1254_v18 = vpack.c.bf16 %v1019_v16, %v1019_v16 }
 0x1cd   : > { %v1038_v20 = vunpack.c.l.b16 %v1253_v23 }
 0x1ce   : > { %v1255_v21 = vpack.c.bf16 %v1020_v17, %v1020_v17  ;;  %v1039_v22 = vunpack.c.l.b16 %v1254_v18 }
 0x1cf   : > { %v1042_v25 = vsel %vm279_vm14, %v1038_v20, %v1037_v19 }
 0x1d0   : > { %v1040_v53 = vunpack.c.l.b16 %v1255_v21  ;;  %v1044_v26 = vsel %vm1043_vm0, %v1039_v22, %v1042_v25 }
 0x1d2   : > { %v1046_v27 = vsel %vm1045_vm9, %v1040_v53, %v1044_v26 }
 0x1d3   : > { %v1047_v30 = vpack.c.b16 %v1046_v27, %v1046_v27 }
 0x1d5   : > { %v1053_v32 = vsel %vm1051_vm12, %v1047_v30, %v1052_v29 }
 0x1d6   : > { %1054 = vst [vmem:[%s1653_s8] sm:$0xe] %v1053_v32 }
 0x1d7 PF: > { %p1334_p9 = scmp.ge.s32.totalorder %s1513_s18, 2  ;;  %s1092_s25 = sand.u32 1, %s1501_s15  }
 0x1d8   : > { %p1932_p2 = scmp.ne.s32.totalorder %s1901_s26, 0  ;;  %s1093_s20 = scalar_lea.sflag [#allocation4], %s1092_s25 }
 0x1da   : > { %p1329_p3 = pnand %p1334_p9, %p1932_p2 }
 0x1dc   : > { %1496 = dma.done.wait (!%p1329_p3), %s1093_s20, 256  }
 0x1dd   : > { %1498 = vsyncadd (!%p1329_p3), %s1093_s20, 4294967040  ;;  %p16_p4 = scmp.ge.s32.totalorder %s1576_s21, 4   ;;  %s1933_s15 = smov %s1505_s16 }
 0x1de   : > { %s1934_s16 = smov %s1509_s17  ;;  %s1935_s17 = smov %s1587_s24 }
 0x1df   : > { %s1936_s18 = smov %s1576_s21  ;;  %18 = sbr.rel (!%p16_p4) target bundleno = 4 (0x4), region = 84 }
 0x1e6   :  { %1106 = vsyncpa [#allocation3], 1 }
 0x1e7   :  { %1108 = vsyncpa [#allocation3 + $0x1], 1 }
 0x1e8   :  { %1109 = vsyncpa [#allocation4], 1 }
 0x1e9   :  { %1111 = vsyncpa [#allocation4 + $0x1], 1 }

// kernel: vgg_forward.6
= control target key start
LH: loop header
LB: loop body
LE: loop exit
PB: predicated region body
PF: predicated region fallthrough
CT: control target
= control target key end

     0   :  { %10 = vsyncpa [#allocation3], 0  ;;  %s3321_s0 = inlined_call_operand.vmem [shape: bf16[2,82,32], index: 0, kind: input, shape index: {}]   ;;  %s3322_s1 = inlined_call_operand.hbm [shape: bf16[288,64], index: 1, kind: input, shape index: {}]   ;;  %s3323_s2 = inlined_call_operand.vmem [shape: f32[1,64], index: 2, kind: input, shape index: {}]   ;;  %s3324_s3 = inlined_call_operand.hbm [shape: f32[2,64,64], index: 3, kind: output, shape index: {0}]   ;;  %s3325_s4 = inlined_call_operand.vmem [shape: bf16[2,26,64], index: 4, kind: output, shape index: {1}]  }
   0x1   :  { %11 = vsyncpa [#allocation4], 0 }
   0x2   :  { %13 = vsyncpa [#allocation4 + $0x1], 0  ;;  %s2315_s15 = smov 0   ;;  %s2317_s16 = smov 0  }
   0x3   :  { %s2319_s17 = smov 0   ;;  %s2321_s18 = smov 0  }
   0x4 LB: > { %s2336_s19 = sadd.s32 4294967295, %s2277_s18   ;;  %s1909_s20 = sadd.s32 4294967294, %s2277_s18   ;;  %s2277_s18 = sphi %s2321_s18, %s3398_s18   ;;  %s2273_s17 = sphi %s2319_s17, %s3397_s17   ;;  %s2269_s16 = sphi %s2317_s16, %s3396_s16   ;;  %s2265_s15 = sphi %s2315_s15, %s3395_s15  }
   0x5   : > { %s2340_s21 = sadd.s32 1, %s2277_s18   ;;  %s94_s22 = sadd.s32 1, %s2273_s17 }
   0x6   : > { %s91_s23 = ssub.s32 %s2277_s18, %s2340_s21  ;;  %p104_p0 = scmp.ne.s32.totalorder %s2273_s17, %s2269_s16 }
   0x7   : > { %p92_p1 = scmp.eq.s32.totalorder %s91_s23, 0  ;;  %p105_p2 = scmp.eq.s32.totalorder %s2336_s19, 1 }
   0x8   : > { %p110_p3 = scmp.ne.s32.totalorder %s2269_s16, %s2265_s15  ;;  %p111_p4 = scmp.eq.s32.totalorder %s1909_s20, 1 }
   0x9   : > { %s2351_s24 = scalar_select %p92_p1, %s2273_s17, %s94_s22  }
   0xa   : > { %p2353_p5 = por %p105_p2, %p104_p0  ;;  %p2357_p6 = por %p111_p4, %p110_p3 }
   0xb   : > { %p1910_p7 = scmp.ge.s32.totalorder %s2277_s18, 1  ;;  %p144_p8 = scmp.lt.s32.totalorder %s2277_s18, 3 }
   0xc   : > { %s3334_s25 = scalar_select %p2353_p5, 1, 0 }
   0xd   : > { %s3335_s26 = scalar_select %p2357_p6, 1, 0 }
   0xe   : > { %p3326_p9 = scmp.eq.s32.totalorder %s2336_s19, 0  ;;  %p2364_p10 = pnand %p1910_p7, %p144_p8 }
   0xf   : > { %s2279_s28 = smov [#allocation2]   ;;  %s2183_s7 = scalar_lea.hbm %s3322_s1, 2304 }
  0x10   : > { %s3336_s27 = scalar_select %p2364_p10, 1, 0 }
  0x11   : > { %s156_s29 = sshll.u32 %s2279_s28, 4  ;;  %p2101_p11 = pneg %p2364_p10  ;;  %s157_s29 = int_to_ptr.vmem [resolvable:$true] %s156_s29 }
  0x12   : > { %p2184_p13 = scmp.ne.s32.totalorder %s3322_s1, %s2183_s7  ;;  %p2190_p3 = scmp.lt.u32.totalorder %s2183_s7, %s3322_s1 }
  0x13   : > { %p2372_p12 = pnand %p3326_p9, %p2101_p11 }
  0x15   : > { %p2185_p0 = pneg %p2372_p12 }
  0x17   : > { %p2186_p1 = pnand %p2185_p0, %p2184_p13 }
  0x19   : > { %p2187_p2 = pneg %p2186_p1 }
  0x1b   : > { %p2192_p4 = pnand %p2190_p3, %p2187_p2 }
  0x1d   : > { %2195 = shalt.err (!%p2192_p4)
}
  0x1e   : > { %s2196_s12 = scalar_lea.vmem %s157_s29, 2304  ;;  %p2204_p9 = scmp.lt.s32.totalorder %s157_s29, %s157_s29 }
  0x1f   : > { %p2197_p7 = scmp.ne.s32.totalorder %s157_s29, %s2196_s12  ;;  %p2205_p6 = scmp.lt.s32.totalorder %s2196_s12, %s2196_s12 }
  0x21   : > { %p2199_p8 = pnand %p2197_p7, %p2185_p0  ;;  %p2206_p5 = por %p2205_p6, %p2204_p9 }
  0x23   : > { %p2200_p11 = pneg %p2199_p8 }
  0x25   : > { %p2207_p10 = pnand %p2206_p5, %p2200_p11 }
  0x27   : > { %2210 = shalt.err (!%p2207_p10)
}
  0x28   : > { %s2280_s13 = smov 64   ;;  %s2281_s14 = smov 4  }
  0x29   : > { %2104 = dma.hbm_to_vmem [thread:$0]  (!%p2372_p12), %s3322_s1, 2304, %s157_s29, [#allocation3], %s2280_s13, %s2280_s13, %s2281_s14  }
  0x2a   : > { %p3338_p13 = scmp.ne.s32.totalorder %s3336_s27, 0 }
  0x2b   : > { %p3339_p1 = scmp.eq.s32.totalorder (!%p3338_p13), %s2336_s19, 0 }
  0x2c   : > { %183 = sbr.rel (%p3338_p13) target bundleno = 563 (0x233), region = 32 }
  0x33   : > { %2256 = dma.done.wait (%p3339_p1), [#allocation3], 2304   ;;  %p3340_p0 = pmov %p3339_p1 }
  0x34   : > { %p214_p5 = scmp.lt.s32.totalorder %s2336_s19, 1  ;;  %v227_v0 = vlaneseq  ;;  %vm1223_vm0 = vcmask 516096   ;;  %vm422_vm1 = vcmask 1040384   ;;  %vm3331_vm2 = vcmask 1044484   ;;  %v2162_v26 = vld [vmem:[#allocation2 + $0x40] sm:$0xff]   ;;  %s2283_s9 = smov 64  }
  0x35   : > { %2258 = vsyncadd (%p3340_p0), [#allocation3], 4294964992  ;;  %v2282_v11 = vmov 0   ;;  %2020 = vmatprep.subr.bf16.mxu0 %v2162_v26  ;;  %2078 = vmatprep.subr.bf16.mxu1 %v2162_v26  ;;  %v2163_v54 = vld [vmem:[#allocation2] sm:$0xff]   ;;  %v2164_v20 = vld [vmem:[#allocation2 + $0x48] sm:$0xff]   ;;  %s2284_s10 = smov 96  }
  0x36   : > { %s215_s23 = scalar_select %p214_p5, %s2336_s19, 1  ;;  %v2400_v1 = vshrl.u32 %v227_v0, 7  ;;  %vm2450_vm7 = vmor %vm422_vm1, %vm3331_vm2  ;;  %2021 = vmatpush3.bf16.msra.mxu0 %v2163_v54  ;;  %2086 = vmatpush3.bf16.msra.mxu1 %v2163_v54 }
  0x37   : > { %2022 = vmatprep.subr.bf16.mxu0 %v2164_v20  ;;  %2079 = vmatprep.subr.bf16.mxu1 %v2164_v20  ;;  %v2167_v20 = vld [vmem:[#allocation2 + $0x10] sm:$0xff]   ;;  %s2285_s11 = smov 32   ;;  %s204_s12 = sand.u32 1, %s2269_s16  }
  0x38   : > { %s2094_s28 = smul.u32 44, %s215_s23  ;;  %s2002_s30 = sshll.u32 %s215_s23, 4  ;;  %v2403_v2 = vadd.s32 40, %v2400_v1  ;;  %v234_v3 = vadd.s32 48, %v2400_v1  ;;  %v235_v4 = vadd.s32 56, %v2400_v1  ;;  %v229_v5 = vadd.s32 8, %v2400_v1 }
  0x39   : > { %s2410_s5 = scalar_lea.vmem %s3325_s4, %s2002_s30  ;;  %v240_v6 = vand.u32 7, %v2400_v1  ;;  %v2415_v7 = vadd.s32 16, %v2400_v1  ;;  %v2427_v12 = vadd.s32 24, %v2400_v1  ;;  %v232_v34 = vadd.s32 32, %v2400_v1  ;;  %s1915_s20 = sshll.u32 %s204_s12, 6 }
  0x3a   : > { %s2420_s8 = scalar_lea.vmem %s3321_s0, %s2094_s28  ;;  %v3329_v8 = vand.u32 7, %v2403_v2  ;;  %v282_v9 = vand.u32 7, %v234_v3  ;;  %v289_v10 = vand.u32 7, %v235_v4  ;;  %1224 = vst.msk [vmem:[%s2410_s5 + $0xc] sm:$0x1] %vm1223_vm0, %v2282_v11  ;;  %v247_v23 = vand.u32 7, %v229_v5 }
  0x3b   : > { %v2430_v13 = vld [vmem:[%s2420_s8 + $0x20] sm:$0xf]  ;;  %v2433_v14 = vld [vmem:[%s2420_s8 + $0x24] sm:$0xf]  ;;  %v2436_v15 = vld [vmem:[%s2420_s8 + $0x18] sm:$0xf] }
  0x3c   : > { %vm338_vm3 = vcmp.ge.s32.totalorder %v282_v9, 1  ;;  %vm339_vm4 = vcmp.ge.s32.totalorder %v289_v10, 1  ;;  %vm2440_vm5 = vcmp.lt.s32.totalorder %v3329_v8, 7  ;;  %vm2444_vm6 = vcmp.lt.s32.totalorder %v282_v9, 7  ;;  %v2455_v19 = vld [vmem:[%s2420_s8 + $0x1c] sm:$0xf] }
  0x3d   : > { %vm2457_vm8 = vcmp.lt.s32.totalorder %v289_v10, 7  ;;  %vm2461_vm9 = vmpackc.low %vm338_vm3, %vm338_vm3  ;;  %v2467_v22 = vcombine.low %v2430_v13, %v2433_v14  ;;  %vm2469_vm10 = vcmp.ge.s32.totalorder %v240_v6, 1  ;;  %v2474_v25 = vld [vmem:[%s2420_s8 + $0x8] sm:$0xf]  ;;  %vm2486_vm12 = vcmp.lt.s32.totalorder %v240_v6, 7  ;;  %s3054_s22 = scalar_lea.vmem [#allocation5], %s1915_s20 }
  0x3e   : > { %vm2476_vm11 = vmpackc.low %vm339_vm4, %vm339_vm4  ;;  %v493_v28 = vsel %vm2461_vm9, %v2430_v13, 0  ;;  %v2491_v31 = vld [vmem:[%s2420_s8 + $0xc] sm:$0xf]  ;;  %v473_v32 = vsel %vm2461_vm9, %v2455_v19, 0  ;;  %vm2505_vm14 = vcmp.ge.s32.totalorder %v247_v23, 1  ;;  %vm2509_vm15 = vcmp.lt.s32.totalorder %v247_v23, 7 }
  0x3f   : > { %vm411_vm13 = vmpackc.low %vm2440_vm5, %vm2440_vm5  ;;  %v494_v33 = vsel %vm2476_vm11, %v2433_v14, 0  ;;  %v2514_v37 = vld [vmem:[%s2420_s8] sm:$0xf]  ;;  %v2523_v40 = vld [vmem:[%s2420_s8 + $0x4] sm:$0xf]  ;;  %v2527_v41 = vcombine.low %v2474_v25, %v2491_v31  ;;  %v474_v42 = vsel %vm2476_vm11, %v2430_v13, 0 }
  0x40   : > { %vm412_vm0 = vmpackc.low %vm2444_vm6, %vm2444_vm6  ;;  %v2520_v38 = vsel %vm411_vm13, 65537, %v2282_v11  ;;  %v1950_v39 = vcombine.low %v493_v28, %v494_v33  ;;  %v2533_v43 = vld [vmem:[%s2420_s8 + $0x10] sm:$0xf]  ;;  %v2542_v46 = vcombine.low %v2514_v37, %v2523_v40  ;;  %v2544_v47 = vcombine.low %v473_v32, %v474_v42  ;;  %v2547_v48 = vld [vmem:[%s2420_s8 + $0x14] sm:$0xf]  ;;  %s2019_s23 = sshll.u32 %s2336_s19, 10 }
  0x41   : > { %vm413_vm1 = vmpackc.low %vm2457_vm8, %vm2457_vm8  ;;  %v420_v44 = vsel %vm412_vm0, 65537, %v2282_v11  ;;  %v3330_v45 = vrot.slane %v2520_v38, 7  ;;  %v558_v52 = vshll.u32 %v2527_v41, 16  ;;  %v2563_v53 = vcombine.low %v2533_v43, %v2547_v48  ;;  %v2607_v6 = vld [vmem:[%s2420_s8 + $0x20] sm:$0x1]  ;;  %v2174_v8 = vld [vmem:[#allocation2 + $0x70] sm:$0xff]   ;;  %s3213_s27 = scalar_lea.hbm %s3324_s3, %s2019_s23 }
  0x42   : > { %v2550_v49 = vsel %vm413_vm1, 65537, %v2282_v11  ;;  %v442_v50 = vrot.slane %v420_v44, 7  ;;  %774 = vrot.lane.b32.xlu0 %v1950_v39, %s2283_s9  ;;  %vm2556_vm3 = vmpackc.low %vm2469_vm10, %vm2469_vm10  ;;  %vm549_vm5 = vsmask.f32 7424  ;;  %v2621_v17 = vld [vmem:[%s2420_s8 + $0x28] sm:$0x1] }
  0x43   : > { %v441_v55 = vrot.slane %v3330_v45, 4  ;;  %v445_v56 = vrot.slane %v2550_v49, 7  ;;  %vm2571_vm4 = vmpackc.low %vm2505_vm14, %vm2505_vm14  ;;  %v487_v58 = vsel %vm2556_vm3, %v2474_v25, 0  ;;  %v467_v63 = vsel %vm2556_vm3, %v2523_v40, 0  ;;  %v2165_v28 = vld [vmem:[#allocation2 + $0x8] sm:$0xff]   ;;  %s1807_s28 = sshll.u32 %s3054_s22, 4  ;;  %s3215_s28 = int_to_ptr.vmem [resolvable:$true] %s1807_s28 }
  0x44   : > { %v444_v60 = vrot.slane %v442_v50, 4  ;;  %vm406_vm6 = vmpackc.low %vm2486_vm12, %vm2486_vm12  ;;  %v488_v61 = vsel %vm2571_vm4, %v2491_v31, 0  ;;  %v381_v62 = vsel %vm2571_vm4, %v2523_v40, 0  ;;  %v468_v5 = vsel %vm2571_vm4, %v2474_v25, 0  ;;  %2023 = vmatpush3.bf16.msra.mxu0 %v2165_v28  ;;  %2087 = vmatpush3.bf16.msra.mxu1 %v2165_v28  ;;  %s3230_s29 = scalar_lea.sflag [#allocation4], %s204_s12  ;;  %s2211_s6 = scalar_lea.vmem %s3215_s28, 1024 }
  0x45   : > { %v2595_v0 = vsel %vm2450_vm7, %v441_v55, %v442_v50  ;;  %vm407_vm8 = vmpackc.low %vm2509_vm15, %vm2509_vm15  ;;  %v2601_v3 = vsel %vm406_vm6, 65537, %v2282_v11  ;;  %v1947_v4 = vcombine.low %v487_v58, %v488_v61  ;;  %v1933_v26 = vcombine.low %v467_v63, %v468_v5  ;;  %p2212_p6 = scmp.ne.s32.totalorder %s3215_s28, %s2211_s6  ;;  %p3392_p9 = scmp.ne.s32.totalorder %s3334_s25, 0 }
  0x46   : > { %v2613_v9 = vsel %vm2450_vm7, %v444_v60, %v445_v56  ;;  %vm454_vm10 = vcmp.ne.s16.totalorder %v2595_v0, 0  ;;  %v2617_v10 = vsel %vm407_vm8, 65537, %v2282_v11  ;;  %v425_v16 = vrot.slane %v2601_v3, 7  ;;  %s2287_s7 = smov [#allocation5]  }
  0x47   : > { %vm455_vm12 = vcmp.ne.s16.totalorder %v2613_v9, 0  ;;  %v2627_v23 = vsel %vm454_vm10, %v2430_v13, 0  ;;  %v427_v24 = vrot.slane %v2617_v10, 7  ;;  %768 = vrot.lane.b32.xlu1 %v1947_v4, %s2283_s9  ;;  %v551_v33 = vshrl.u32 %v2542_v46, 16  ;;  %v389_v10 = vld [vmem:[%s2420_s8] sm:$0xe]  ;;  %p2213_p10 = pnand %p2212_p6, %p3392_p9 }
  0x48   : > { %v2634_v30 = vsel %vm455_vm12, %v2433_v14, 0  ;;  %v426_v32 = vrot.slane %v425_v16, 4  ;;  %v553_v35 = vshll.u32 %v2542_v46, 16  ;;  %v560_v42 = vrot.slane %v558_v52, 1  ;;  %v2166_v14 = vld [vmem:[#allocation2 + $0x50] sm:$0xff]  }
  0x49   : > { %v2642_v39 = vrot.slane %v427_v24, 4  ;;  %v562_v44 = vshrl.u32 %v2527_v41, 16  ;;  %v566_v54 = vshll.u32 %v2563_v53, 16  ;;  %v1926_v46 = vcombine.low %v2436_v15, %v2455_v19  ;;  %2024 = vmatprep.subr.bf16.mxu0 %v2166_v14  ;;  %2080 = vmatprep.subr.bf16.mxu1 %v2166_v14  ;;  %p2214_p12 = pneg %p2213_p10 }
  0x4a   : > { %v555_v50 = vrot.slane %v553_v35, 1  ;;  %v1927_v55 = vcombine.low %v2607_v6, %v2607_v6  ;;  %v1952_v41 = vcombine.low %v2621_v17, %v2621_v17  ;;  %v783_v52 = vshll.u32 %v2467_v22, 16  ;;  %2025 = vmatpush3.bf16.msra.mxu0 %v2167_v20  ;;  %2088 = vmatpush3.bf16.msra.mxu1 %v2167_v20 }
  0x4b   : > { %655 = vrot.lane.b32.xlu1 %v1933_v26, %s2284_s10  ;;  %v564_v58 = vor.u32 %v562_v44, %v560_v42  ;;  %v787_v60 = vshrl.u32 %v2467_v22, 16  ;;  %v2655_v63 = vrot.slane %v566_v54, 1  ;;  %v574_v4 = vshll.u32 %v1926_v46, 16  ;;  %v476_v54 = vld [vmem:[%s2420_s8 + $0x4] sm:$0xe] }
  0x4c   : > { %v556_v61 = vor.u32 %v555_v50, %v551_v33  ;;  %v578_v5 = vshrl.u32 %v1926_v46, 16  ;;  %v582_v28 = vshll.u32 %v1927_v55, 16  ;;  %v2658_v26 = vrot.slane %v783_v52, 1  ;;  %v2168_v55 = vld [vmem:[#allocation2 + $0x58] sm:$0xff]  }
  0x4d   : > { %v791_v35 = vshll.u32 %v1952_v41, 16  ;;  %v254_v44 = vand.u32 7, %v2415_v7  ;;  %v2664_v22 = vsel %vm549_vm5, %v564_v58, %v2655_v63  ;;  %v2666_v33 = vrot.slane %v574_v4, 1  ;;  %2026 = vmatprep.subr.bf16.mxu0 %v2168_v55  ;;  %2081 = vmatprep.subr.bf16.mxu1 %v2168_v55 }
  0x4e   : > { %v561_v36 = vsel %vm549_vm5, %v556_v61, %v560_v42  ;;  %v261_v50 = vand.u32 7, %v2427_v12  ;;  %v584_v14 = vrot.slane %v582_v28, 1  ;;  %v789_v42 = vor.u32 %v787_v60, %v2658_v26  ;;  %v2169_v60 = vld [vmem:[#allocation2 + $0x18] sm:$0xff]   ;;  %v2170_v61 = vld [vmem:[#allocation2 + $0x60] sm:$0xff]  }
  0x4f   : > { %586 = vrot.lane.b32.xlu0 %v561_v36, %s2285_s11  ;;  %661 = vrot.lane.b32.xlu1 %v2544_v47, %s2284_s10  ;;  %v793_v46 = vrot.slane %v791_v35, 1  ;;  %vm342_vm13 = vcmp.lt.s32.totalorder %v254_v44, 7  ;;  %v2677_v58 = vor.u32 %v578_v5, %v2666_v33  ;;  %v2683_v36 = vsel %vm2450_vm7, %v426_v32, %v427_v24  ;;  %v2171_v28 = vld [vmem:[#allocation2 + $0x20] sm:$0xff]  }
  0x50   : > { %vm343_vm14 = vcmp.lt.s32.totalorder %v261_v50, 7  ;;  %vm408_vm15 = vmpackc.low %vm342_vm13, %vm342_vm13  ;;  %vm2687_vm0 = vcmp.ne.s16.totalorder %v425_v16, 0  ;;  %vm449_vm6 = vcmp.ne.s16.totalorder %v2683_v36, 0  ;;  %vm617_vm8 = vcmask 1046528   ;;  %2027 = vmatpush3.bf16.msra.mxu0 %v2169_v60  ;;  %2089 = vmatpush3.bf16.msra.mxu1 %v2169_v60 }
  0x51   : > { %vm409_vm1 = vmpackc.low %vm343_vm14, %vm343_vm14  ;;  %v416_v41 = vsel %vm408_vm15, 65537, %v2282_v11  ;;  %v457_v52 = vsel %vm2687_vm0, %v389_v10, 0  ;;  %v585_v24 = vsel %vm549_vm5, %v2677_v58, %v584_v14  ;;  %v458_v32 = vsel %vm449_vm6, %v2523_v40, 0  ;;  %2028 = vmatprep.subr.bf16.mxu0 %v2170_v61  ;;  %2082 = vmatprep.subr.bf16.mxu1 %v2170_v61  ;;  %v2173_v61 = vld [vmem:[#allocation2 + $0x28] sm:$0xff]  }
  0x52   : > { %v2698_v3 = vsel %vm409_vm1, 65537, %v2282_v11  ;;  %v430_v16 = vrot.slane %v416_v41, 7  ;;  %v1928_v5 = vcombine.low %v457_v52, %v458_v32  ;;  %v477_v10 = vsel %vm2687_vm0, %v476_v54, 0 }
  0x53   : > { %795 = vrot.lane.b32.xlu0 %v2664_v22, %s2284_s10  ;;  %592 = vrot.lane.b32.xlu1 %v585_v24, %s2285_s11  ;;  %v433_v4 = vrot.slane %v2698_v3, 7  ;;  %v478_v20 = vsel %vm449_vm6, %v2474_v25, 0  ;;  %v794_v35 = vsel %vm549_vm5, %v789_v42, %v793_v46  ;;  %v2720_v41 = vrot.slane %v445_v56, 4  ;;  %v2172_v24 = vld [vmem:[#allocation2 + $0x68] sm:$0xff]  }
  0x54   : > { %v2716_v14 = vsel %vm2450_vm7, %v2642_v39, %v430_v16  ;;  %v432_v55 = vrot.slane %v430_v16, 4  ;;  %v1942_v54 = vcombine.low %v477_v10, %v478_v20  ;;  %v463_v52 = vsel %vm454_vm10, %v2436_v15, 0  ;;  %v2730_v39 = vld [vmem:[%s2420_s8 + $0x24] sm:$0x1]  ;;  %2029 = vmatpush3.bf16.msra.mxu0 %v2171_v28  ;;  %2090 = vmatpush3.bf16.msra.mxu1 %v2171_v28 }
  0x55   : > { %vm450_vm13 = vcmp.ne.s16.totalorder %v2716_v14, 0  ;;  %v464_v42 = vsel %vm455_vm12, %v2455_v19, 0  ;;  %v618_v46 = vrot.slane %v1928_v5, 1  ;;  %vm3332_vm15 = vcmp.ne.s16.totalorder %v2720_v41, 0  ;;  %2030 = vmatprep.subr.bf16.mxu0 %v2172_v24  ;;  %2083 = vmatprep.subr.bf16.mxu1 %v2172_v24  ;;  %v2175_v24 = vld [vmem:[#allocation2 + $0x30] sm:$0xff]  }
  0x56   : > { %v2736_v49 = vsel %vm2450_vm7, %v432_v55, %v433_v4  ;;  %v459_v56 = vsel %vm450_vm13, %v2474_v25, 0  ;;  %v479_v60 = vsel %vm450_vm13, %v2491_v31, 0  ;;  %v1931_v16 = vcombine.low %v463_v52, %v464_v42 }
  0x57   : > { %801 = vrot.lane.b32.xlu0 %v794_v35, %s2284_s10  ;;  %vm3333_vm14 = vcmp.ne.s16.totalorder %v2736_v49, 0  ;;  %v483_v32 = vsel %vm454_vm10, %v2455_v19, 0  ;;  %v465_v20 = vsel %vm3332_vm15, %v2607_v6, 0  ;;  %v484_v35 = vsel %vm455_vm12, %v2430_v13, 0 }
  0x58   : > { %v460_v5 = vsel %vm3333_vm14, %v2491_v31, 0  ;;  %v480_v10 = vsel %vm3333_vm14, %v2533_v43, 0  ;;  %v731_v52 = vrot.slane %v1942_v54, 1  ;;  %v1932_v42 = vcombine.low %v465_v20, %v465_v20  ;;  %2031 = vmatpush3.bf16.msra.mxu0 %v2173_v61  ;;  %2091 = vmatpush3.bf16.msra.mxu1 %v2173_v61 }
  0x59   : > { %v1929_v0 = vcombine.low %v459_v56, %v460_v5  ;;  %v1943_v55 = vcombine.low %v479_v60, %v480_v10  ;;  %v2762_v45 = vrot.slane %v1931_v16, 1  ;;  %v485_v29 = vsel %vm3332_vm15, %v2730_v39, 0  ;;  %2032 = vmatprep.subr.bf16.mxu0 %v2174_v8  ;;  %2084 = vmatprep.subr.bf16.mxu1 %v2174_v8  ;;  %v2178_v10 = vld [vmem:[#allocation2 + $0x78] sm:$0xff]  }
  0x5a   : > { %v1945_v6 = vcombine.low %v483_v32, %v484_v35  ;;  %v625_v28 = vrot.slane %v1932_v42, 1  ;;  %v1946_v56 = vcombine.low %v485_v29, %v485_v29  ;;  %v268_v60 = vand.u32 7, %v232_v34 }
  0x5b   : > { %v2768_v9 = vrot.slane %v1929_v0, 1  ;;  %v2770_v59 = vrot.slane %v1943_v55, 1  ;;  %vm334_vm10 = vcmp.ge.s32.totalorder %v254_v44, 1  ;;  %vm335_vm1 = vcmp.ge.s32.totalorder %v261_v50, 1  ;;  %v2179_v44 = vld [vmem:[#allocation2 + $0x38] sm:$0xff]  }
  0x5c   : > { %v2772_v54 = vrot.slane %v1945_v6, 1  ;;  %v738_v5 = vrot.slane %v1946_v56, 1  ;;  %vm344_vm12 = vcmp.lt.s32.totalorder %v268_v60, 7  ;;  %vm2784_vm2 = vmpackc.low %vm334_vm10, %vm334_vm10  ;;  %v626_v29 = vsel %vm617_vm8, %v2762_v45, %v625_v28  ;;  %2033 = vmatpush3.bf16.msra.mxu0 %v2175_v24  ;;  %2092 = vmatpush3.bf16.msra.mxu1 %v2175_v24 }
  0x5d   : > { %v620_v16 = vsel %vm617_vm8, %v618_v46, %v2768_v9  ;;  %v733_v32 = vsel %vm617_vm8, %v731_v52, %v2770_v59  ;;  %vm410_vm15 = vmpackc.low %vm344_vm12, %vm344_vm12  ;;  %v435_v8 = vrot.slane %v433_v4, 4  ;;  %v3371_v50 = vsel %vm2556_vm3, %v2514_v37, 0  ;;  %2034 = vmatprep.subr.bf16.mxu0 %v2178_v10  ;;  %2085 = vmatprep.subr.bf16.mxu1 %v2178_v10 }
  0x5e   : > { %627 = vrot.lane.b32.xlu1 %v620_v16, %s2283_s9  ;;  %740 = vrot.lane.b32.xlu0 %v733_v32, %s2285_s11  ;;  %v739_v34 = vsel %vm617_vm8, %v2772_v54, %v738_v5  ;;  %v418_v46 = vsel %vm410_vm15, 65537, %v2282_v11  ;;  %vm2795_vm14 = vmpackc.low %vm335_vm1, %vm335_vm1  ;;  %v2807_v61 = vcombine.low %v3371_v50, %v381_v62  ;;  %v570_v4 = vshrl.u32 %v2563_v53, 16  ;;  %v2810_v11 = vld [vmem:[#allocation2 + $0x80] sm:$0xff]  }
  0x5f   : > { %v436_v3 = vrot.slane %v418_v46, 7  ;;  %v1941_v57 = vcombine.low %v2730_v39, %v2730_v39  ;;  %v489_v37 = vsel %vm2784_vm2, %v2533_v43, 0  ;;  %v490_v62 = vsel %vm2795_vm14, %v2547_v48, 0 }
  0x60   : > { %v469_v20 = vsel %vm2784_vm2, %v2491_v31, 0  ;;  %v470_v39 = vsel %vm2795_vm14, %v2533_v43, 0  ;;  %vm2833_vm4 = vcmp.ge.s32.totalorder %v268_v60, 1  ;;  %v3374_v0 = vsel %vm2476_vm11, %v2455_v19, 0  ;;  %2035 = vmatpush3.bf16.msra.mxu0 %v2179_v44  ;;  %2093 = vmatpush3.bf16.msra.mxu1 %v2179_v44 }
  0x61   : > { %v2821_v51 = vsel %vm2450_vm7, %v435_v8, %v436_v3  ;;  %v438_v53 = vrot.slane %v436_v3, 4  ;;  %v3375_v55 = vsel %vm2461_vm9, %v2436_v15, 0  ;;  %v3376_v42 = vrot.slane %v2520_v38, 7  ;;  %2066 = vmatprep.subr.bf16.mxu1 %v2810_v11  ;;  %vm2880_vm11 = vmpackc.low %vm2833_vm4, %vm2833_vm4 }
  0x62   : > { %633 = vrot.lane.b32.xlu1 %v626_v29, %s2283_s9  ;;  %746 = vrot.lane.b32.xlu0 %v739_v34, %s2285_s11  ;;  %vm452_vm3 = vcmp.ne.s16.totalorder %v2821_v51, 0  ;;  %v2845_v52 = vcombine.low %v3375_v55, %v3374_v0  ;;  %v572_v21 = vor.u32 %v570_v4, %v2655_v63  ;;  %v3377_v56 = vand.u32 7, %v2403_v2 }
  0x63   : > { %v440_v6 = vsel %vm2450_vm7, %v438_v53, %v3376_v42  ;;  %v481_v28 = vsel %vm452_vm3, %v2547_v48, 0  ;;  %v461_v27 = vsel %vm452_vm3, %v2533_v43, 0  ;;  %v1948_v18 = vcombine.low %v489_v37, %v490_v62 }
  0x64   : > { %vm2860_vm9 = vcmp.ge.s32.totalorder %v3377_v56, 1  ;;  %vm453_vm7 = vcmp.ne.s16.totalorder %v440_v6, 0  ;;  %v1937_v38 = vcombine.low %v2523_v40, %v2474_v25  ;;  %v1938_v24 = vcombine.low %v2491_v31, %v2533_v43 }
  0x65   : > { %v482_v2 = vsel %vm453_vm7, %v2436_v15, 0  ;;  %v462_v63 = vsel %vm453_vm7, %v2547_v48, 0  ;;  %v1934_v16 = vcombine.low %v469_v20, %v470_v39  ;;  %v1940_v32 = vcombine.low %v2455_v19, %v2430_v13  ;;  %v496_v39 = vld [vmem:[%s2420_s8 + $0x8] sm:$0xe]  ;;  %s2215_s8 = sshll.u32 %s2287_s7, 4  ;;  %s2216_s8 = int_to_ptr.vmem [resolvable:$false] %s2215_s8 }
  0x66   : > { %588 = vrot.lane.b32.xlu1 %v2664_v22, %s2285_s11  ;;  %v1944_v5 = vcombine.low %v481_v28, %v482_v2  ;;  %v1930_v22 = vcombine.low %v461_v27, %v462_v63  ;;  %v673_v10 = vshrl.u32 %v1937_v38, 16  ;;  %v675_v29 = vshll.u32 %v1937_v38, 16  ;;  %p2218_p2 = scmp.lt.s32.totalorder %s3215_s28, %s2216_s8 }
  0x67   : > { %v680_v34 = vshll.u32 %v1938_v24, 16  ;;  %v696_v8 = vshll.u32 %v1940_v32, 16  ;;  %v700_v44 = vshrl.u32 %v1940_v32, 16  ;;  %v704_v46 = vshll.u32 %v1941_v57, 16 }
  0x68   : > { %v734_v50 = vrot.slane %v1944_v5, 1  ;;  %v621_v3 = vrot.slane %v1930_v22, 1  ;;  %v677_v4 = vrot.slane %v675_v29, 1  ;;  %v382_v13 = vsel %vm2784_vm2, %v2474_v25, 0 }
  0x69   : > { %v682_v37 = vrot.slane %v680_v34, 1  ;;  %v698_v53 = vrot.slane %v696_v8, 1  ;;  %v706_v62 = vrot.slane %v704_v46, 1  ;;  %v383_v20 = vsel %vm2795_vm14, %v2491_v31, 0 }
  0x6a   : > { %v735_v35 = vsel %vm617_vm8, %v2770_v59, %v734_v50  ;;  %v622_v57 = vsel %vm617_vm8, %v2768_v9, %v621_v3  ;;  %v577_v0 = vsel %vm549_vm5, %v572_v21, %v2666_v33  ;;  %v491_v25 = vsel %vm2880_vm11, %v2436_v15, 0 }
  0x6b   : > { %742 = vrot.lane.b32.xlu0 %v735_v35, %s2285_s11  ;;  %629 = vrot.lane.b32.xlu1 %v622_v57, %s2283_s9  ;;  %v678_v7 = vor.u32 %v677_v4, %v673_v10  ;;  %v702_v12 = vor.u32 %v700_v44, %v698_v53  ;;  %v2902_v55 = vcombine.low %v382_v13, %v383_v20  ;;  %v684_v42 = vshrl.u32 %v1938_v24, 16 }
  0x6c   : > { %v1939_v59 = vcombine.low %v2547_v48, %v2436_v15  ;;  %v497_v9 = vsel %vm2687_vm0, %v496_v39, 0  ;;  %v498_v33 = vsel %vm449_vm6, %v2491_v31, 0  ;;  %v499_v28 = vsel %vm450_vm13, %v2533_v43, 0  ;;  %vm2926_vm0 = vmpackc.low %vm2860_vm9, %vm2860_vm9 }
  0x6d   : > { %v2915_v27 = vsel %vm549_vm5, %v678_v7, %v682_v37  ;;  %v2918_v21 = vsel %vm549_vm5, %v702_v12, %v706_v62  ;;  %v686_v56 = vor.u32 %v684_v42, %v682_v37  ;;  %vm3382_vm2 = vcmp.ne.s16.totalorder %v2736_v49, 0 }
  0x6e   : > { %v500_v47 = vsel %vm3382_vm2, %v2547_v48, 0  ;;  %v688_v36 = vshll.u32 %v1939_v59, 16  ;;  %v1953_v14 = vcombine.low %v497_v9, %v498_v33  ;;  %v501_v24 = vsel %vm452_vm3, %v2436_v15, 0 }
  0x6f   : > { %v1954_v38 = vcombine.low %v499_v28, %v500_v47  ;;  %770 = vrot.lane.b32.xlu0 %v1948_v18, %s2283_s9  ;;  %657 = vrot.lane.b32.xlu1 %v1934_v16, %s2284_s10  ;;  %v502_v49 = vsel %vm453_vm7, %v2455_v19, 0  ;;  %v384_v60 = vsel %vm2880_vm11, %v2533_v43, 0  ;;  %v385_v2 = vsel %vm2926_vm0, %v2547_v48, 0  ;;  %v2182_v47 = vld [vmem:[#allocation2 + $0x88] sm:$0xff]  }
  0x70   : > { %v692_v63 = vshrl.u32 %v1939_v59, 16  ;;  %v690_v32 = vrot.slane %v688_v36, 1  ;;  %v826_v5 = vrot.slane %v1953_v14, 1  ;;  %v1955_v22 = vcombine.low %v501_v24, %v502_v49 }
  0x71   : > { %v827_v51 = vrot.slane %v1954_v38, 1  ;;  %v471_v18 = vsel %vm2880_vm11, %v2547_v48, 0  ;;  %v2946_v16 = vcombine.low %v384_v60, %v385_v2  ;;  %v3385_v6 = vcombine.low %v2627_v23, %v2634_v30 }
  0x72   : > { %vm3386_vm6 = vcmp.ne.s16.totalorder %v2720_v41, 0  ;;  %v2955_v29 = vsel %vm549_vm5, %v686_v56, %v690_v32  ;;  %v829_v8 = vrot.slane %v1955_v22, 1  ;;  %v694_v44 = vor.u32 %v692_v63, %v690_v32 }
  0x73   : > { %v831_v10 = vrot.slane %v3385_v6, 1  ;;  %v505_v43 = vsel %vm3386_vm6, %v2621_v17, 0  ;;  %v828_v34 = vsel %vm617_vm8, %v826_v5, %v827_v51  ;;  %797 = vrot.lane.b32.xlu0 %v577_v0, %s2284_s10  ;;  %590 = vrot.lane.b32.xlu1 %v577_v0, %s2285_s11  ;;  %v737_v48 = vsel %vm617_vm8, %v734_v50, %v2772_v54 }
  0x74   : > { %v492_v23 = vsel %vm2926_vm0, %v2455_v19, 0  ;;  %v472_v17 = vsel %vm2926_vm0, %v2436_v15, 0  ;;  %v1957_v30 = vcombine.low %v505_v43, %v505_v43  ;;  %v624_v41 = vsel %vm617_vm8, %v621_v3, %v2762_v45 }
  0x75   : > { %v830_v40 = vsel %vm617_vm8, %v827_v51, %v829_v8  ;;  %v2972_v46 = vsel %vm549_vm5, %v694_v44, %v698_v53  ;;  %v832_v4 = vsel %vm617_vm8, %v829_v8, %v831_v10  ;;  %v1949_v19 = vcombine.low %v491_v25, %v492_v23 }
  0x76   : > { %v833_v54 = vrot.slane %v1957_v30, 1  ;;  %v1935_v50 = vcombine.low %v471_v18, %v472_v17  ;;  %v786_v45 = vsel %vm549_vm5, %v2677_v58, %v2658_v26  ;;  %vm835_vm13 = vcmask 261120   ;;  %v1220_v17 = vld [vmem:[%s2410_s5 + $0x8] sm:$0xc] }
  0x77   : > { %744 = vrot.lane.b32.xlu0 %v737_v48, %s2285_s11  ;;  %631 = vrot.lane.b32.xlu1 %v624_v41, %s2283_s9  ;;  %vm857_vm14 = vcmask 785408   ;;  %vm1211_vm5 = vcmask 518144   ;;  %vm1212_vm15 = vsmask.f32 2304  ;;  %v1214_v48 = vld [vmem:[%s2410_s5] sm:$0x7] }
  0x78   : > { %v834_v15 = vsel %vm617_vm8, %v831_v10, %v833_v54  ;;  %vm848_vm8 = vcmask 523264   ;;  %vm3021_vm10 = vmand %vm1211_vm5, %vm1212_vm15  ;;  %vm1217_vm12 = vcmask 519170   ;;  %vm1218_vm1 = vsmask.f32 7946 }
  0x79   : > { %v1215_v23 = vsel %vm3021_vm10, 0, %v1214_v48  ;;  %vm3030_vm3 = vmand %vm1217_vm12, %vm1218_vm1  ;;  %vm1401_vm4 = vcmask 517120   ;;  %vm1754_vm9 = vcmask 1046534   ;;  %vm1756_vm7 = vcmask 1047559  }
  0x7a   : > { %1216 = vst [vmem:[%s2410_s5] sm:$0x7] %v1215_v23  ;;  %v1221_v41 = vsel %vm3030_vm3, 0, %v1220_v17  ;;  %vm1758_vm11 = vcmask 1041409   ;;  %vm1760_vm2 = vcmask 1042434   ;;  %vm1762_vm0 = vcmask 1043459  }
  0x7b   : > { %772 = vrot.lane.b32.xlu0 %v1949_v19, %s2283_s9  ;;  %659 = vrot.lane.b32.xlu1 %v1935_v50, %s2284_s10  ;;  %1222 = vst [vmem:[%s2410_s5 + $0x8] sm:$0xc] %v1221_v41  ;;  %vm3391_vm6 = vcmask 1044484   ;;  %s2217_s9 = scalar_lea.vmem %s2216_s8, 2048 }
  0x7c   : > { %p2219_p3 = scmp.lt.s32.totalorder %s2217_s9, %s2211_s6 }
  0x7e   : > { %p2220_p4 = por %p2219_p3, %p2218_p2 }
  0x7f   : > { %799 = vrot.lane.b32.xlu0 %v786_v45, %s2284_s10 }
  0x80   : > { %p2221_p7 = pnand %p2220_p4, %p2214_p12 }
  0xb4   : > { %v775_v13 = vpop.permute.xlu0 %774 }
  0xb9   : > { %v769_v3 = vpop.permute.xlu1 %768 }
  0xbd   : > { %v656_v37 = vpop.permute.xlu1 %655 }
  0xc1   : > { %v587_v53 = vpop.permute.xlu0 %586  ;;  %v662_v62 = vpop.permute.xlu1 %661 }
  0xc2   : > { %v838_v57 = vsel %vm835_vm13, %v2807_v61, %v587_v53 }
  0xc5   : > { %v796_v20 = vpop.permute.xlu0 %795  ;;  %v593_v39 = vpop.permute.xlu1 %592 }
  0xc6   : > { %v847_v42 = vsel %vm835_vm13, %v2845_v52, %v593_v39  ;;  %v3043_v39 = vld [vmem:[%s3323_s2] ss:$0 sm:$0xff] }
  0xc9   : > { %v802_v35 = vpop.permute.xlu0 %801 }
  0xd0   : > { %v628_v0 = vpop.permute.xlu1 %627  ;;  %v741_v25 = vpop.permute.xlu0 %740 }
  0xd1   : > { %v850_v26 = vsel %vm848_vm8, %v838_v57, %v628_v0  ;;  %v872_v58 = vsel %vm835_vm13, %v2915_v27, %v741_v25 }
  0xd2   : > { %v883_v7 = vsel %vm848_vm8, %v872_v58, %v769_v3  ;;  %v859_v61 = vsel %vm857_vm14, %v850_v26, %v656_v37  ;;  %v2286_v3 = vmov 1983009808  }
  0xd3   : > { %v891_v12 = vsel %vm857_vm14, %v883_v7, %v796_v20 }
  0xd4   : > { %v634_v59 = vpop.permute.xlu1 %633  ;;  %1097 = vmatprep.mubr.bf16.mxu0 %v891_v12  ;;  %v747_v9 = vpop.permute.xlu0 %746 }
  0xd5   : > { %v856_v33 = vsel %vm848_vm8, %v847_v42, %v634_v59  ;;  %v881_v28 = vsel %vm835_vm13, %v2918_v21, %v747_v9  ;;  %1098 = vmatmul.mubr.bf16.vlgmr.msra.gmra.mrb[0].mxu0 %v859_v61 }
  0xd6   : > { %v889_v27 = vsel %vm848_vm8, %v881_v28, %v775_v13  ;;  %v868_v31 = vsel %vm857_vm14, %v856_v33, %v662_v62  ;;  %v1235_v13 = vunpack.c.l.s4 %v2286_v3 }
  0xd7   : > { %v900_v56 = vsel %vm857_vm14, %v889_v27, %v802_v35 }
  0xd8   : > { %1121 = vmatprep.mubr.bf16.mxu1 %v900_v56  ;;  %v589_v52 = vpop.permute.xlu1 %588  ;;  %v1236_v35 = vunpack.c.0.s8 %v1235_v13 }
  0xd9   : > { %1122 = vmatmul.mubr.bf16.vlgmr.msra.gmra.mrb[0].mxu1 %v868_v31  ;;  %v841_v24 = vsel %vm835_vm13, %v2902_v55, %v589_v52 }
  0xda   : > { %2067 = vmatpush3.bf16.msra.mxu1 %v2810_v11  ;;  %2070 = vmatprep.mubr.msk.bf16.mxu1 %vm835_vm13, %v828_v34  ;;  %v3049_v26 = vsub.s32 %v1236_v35, %v2400_v1 }
  0xdb   : > { %2068 = vmatprep.subr.bf16.mxu1 %v2182_v47 }
  0xdd   : > { %v743_v36 = vpop.permute.xlu0 %742  ;;  %v630_v14 = vpop.permute.xlu1 %629 }
  0xde   : > { %2069 = vmatpush3.bf16.msra.mxu1 %v2182_v47  ;;  %v875_v49 = vsel %vm835_vm13, %v2955_v29, %v743_v36  ;;  %v852_v11 = vsel %vm848_vm8, %v841_v24, %v630_v14 }
  0xe1   : > { %2071 = vmatmul.mubr.msk.bf16.vlgmr.msra.gmra.mrb[4].mxu1 %vm835_vm13, %v830_v40  ;;  %v771_v21 = vpop.permute.xlu0 %770  ;;  %v658_v38 = vpop.permute.xlu1 %657 }
  0xe2   : > { %2074 = vmatprep.mubr.msk.bf16.mxu1 %vm835_vm13, %v832_v4  ;;  %v885_v60 = vsel %vm848_vm8, %v875_v49, %v771_v21  ;;  %v862_v63 = vsel %vm857_vm14, %v852_v11, %v658_v38 }
  0xe5   : > { %v798_v2 = vpop.permute.xlu0 %797  ;;  %v591_v32 = vpop.permute.xlu1 %590 }
  0xe6   : > { %v894_v5 = vsel %vm857_vm14, %v885_v60, %v798_v2  ;;  %v844_v6 = vsel %vm835_vm13, %v2946_v16, %v591_v32 }
  0xe7   : > { %1105 = vmatprep.mubr.bf16.mxu0 %v894_v5 }
  0xe8   : > { %1106 = vmatmul.mubr.bf16.gmra.mrb[4].mxu0 %v862_v63 }
  0xe9   : > { %2075 = vmatmul.mubr.msk.bf16.gmra.mrb[8].mxu1 %vm835_vm13, %v834_v15  ;;  %v745_v51 = vpop.permute.xlu0 %744  ;;  %v632_v55 = vpop.permute.xlu1 %631 }
  0xea   : > { %v878_v10 = vsel %vm835_vm13, %v2972_v46, %v745_v51  ;;  %v854_v43 = vsel %vm848_vm8, %v844_v6, %v632_v55 }
  0xed   : > { %v773_v22 = vpop.permute.xlu0 %772  ;;  %v660_v18 = vpop.permute.xlu1 %659 }
  0xee   : > { %v887_v29 = vsel %vm848_vm8, %v878_v10, %v773_v22  ;;  %v865_v8 = vsel %vm857_vm14, %v854_v43, %v660_v18 }
  0xf1   : > { %v800_v34 = vpop.permute.xlu0 %799 }
  0xf2   : > { %v897_v44 = vsel %vm857_vm14, %v887_v29, %v800_v34 }
  0xf3   : > { %1113 = vmatprep.mubr.bf16.mxu0 %v897_v44 }
  0xf4   : > { %1114 = vmatmul.mubr.bf16.gmra.mrb[8].mxu0 %v865_v8 }
 0x1a8   : > { %v2036_v40 = vpop.f32.mrb[0].mxu0 }
 0x1a9   : > { %v2037_v46 = vpop.f32.mrb[1].mxu0 }
 0x1aa   : > { %v2038_v4 = vadd.f32 %v2037_v46, %v2036_v40  ;;  %v2039_v54 = vpop.f32.mrb[2].mxu0 }
 0x1ab   : > { %v2040_v19 = vpop.f32.mrb[3].mxu0 }
 0x1ac   : > { %v2041_v50 = vadd.f32 %v2040_v19, %v2039_v54  ;;  %v2054_v15 = vpop.f32.mrb[0].mxu1  ;;  %v1100_v0 = vadd.f32 %v2038_v4, %v3043_v39 }
 0x1ad   : > { %v2055_v45 = vpop.f32.mrb[1].mxu1 }
 0x1ae   : > { %v2056_v37 = vadd.f32 %v2055_v45, %v2054_v15  ;;  %v2057_v53 = vpop.f32.mrb[2].mxu1  ;;  %v1103_v12 = vadd.f32 %v2041_v50, %v3043_v39 }
 0x1af   : > { %v2058_v62 = vpop.f32.mrb[3].mxu1 }
 0x1b0   : > { %v3037_v20 = vadd.f32 %v2058_v62, %v2057_v53  ;;  %v1124_v28 = vadd.f32 %v2056_v37, %v3043_v39 }
 0x1b4   : > { %v2072_v57 = vpop.f32.mrb[4].mxu1 }
 0x1b5   : > { %v1164_v25 = vpop.f32.mrb[5].mxu1 }
 0x1b6   : > { %v1165_v58 = vadd.f32 %v1164_v25, %v1100_v0  ;;  %v3051_v7 = vpop.f32.mrb[6].mxu1 }
 0x1b7   : > { %v1167_v42 = vpop.f32.mrb[7].mxu1 }
 0x1b8   : > { %v1195_v59 = vmax.f32 %v1165_v58, 0.0  ;;  %v1168_v9 = vadd.f32 %v1167_v42, %v1103_v12 }
 0x1ba   : > { %1203 = vst.msk [vmem:[%s3054_s22] sm:$0xff] %vm848_vm8, %v1195_v59  ;;  %v1233_v61 = vcombine.high %v1195_v59, %v1195_v59  ;;  %v1240_v33 = vrot.slane %v1195_v59, %v3049_v26  ;;  %v1196_v1 = vmax.f32 %v1168_v9, 0.0 }
 0x1bb   : > { %v2042_v14 = vpop.f32.mrb[4].mxu0 }
 0x1bc   : > { %v1247_v27 = vrot.slane %v1233_v61, %v3049_v26  ;;  %v1248_v56 = vcombine.high %v1240_v33, %v1240_v33  ;;  %v1402_v47 = vsel %vm1401_vm4, %v1240_v33, -inf  ;;  %1204 = vst.msk [vmem:[%s3054_s22 + $0x8] sm:$0xff] %vm848_vm8, %v1196_v1  ;;  %v1250_v31 = vcombine.high %v1196_v1, %v1196_v1  ;;  %v2076_v52 = vpop.f32.mrb[8].mxu1  ;;  %v2043_v2 = vpop.f32.mrb[5].mxu0 }
 0x1bd   : > { %v1403_v36 = vrot.slane %v1402_v47, 4  ;;  %v1257_v21 = vrot.slane %v1196_v1, %v3049_v26  ;;  %v3065_v38 = vadd.f32 %v2076_v52, %v1124_v28  ;;  %v3067_v24 = vpop.f32.mrb[9].mxu1  ;;  %v2044_v22 = vadd.f32 %v2043_v2, %v2042_v14  ;;  %v3076_v18 = vpop.f32.mrb[6].mxu0 }
 0x1be   : > { %v1249_v49 = vcombine.high %v1247_v27, %v1247_v27  ;;  %v1409_v11 = vsel %vm1401_vm4, %v1248_v56, -inf  ;;  %v1416_v60 = vsel %vm1401_vm4, %v1247_v27, -inf  ;;  %v3072_v63 = vrot.slane %v1250_v31, %v3049_v26  ;;  %v3074_v32 = vpop.f32.mrb[10].mxu1  ;;  %v3082_v34 = vpop.f32.mrb[7].mxu0 }
 0x1bf   : > { %v1404_v5 = vmax.f32 %v1402_v47, %v1403_v36  ;;  %v1410_v51 = vrot.slane %v1409_v11, 4  ;;  %v1417_v55 = vrot.slane %v1416_v60, 4  ;;  %v3078_v6 = vpop.f32.mrb[11].mxu1  ;;  %v1265_v43 = vcombine.high %v1257_v21, %v1257_v21 }
 0x1c0   : > { %v1423_v10 = vsel %vm1401_vm4, %v1249_v49, -inf  ;;  %v1430_v29 = vsel %vm1401_vm4, %v1257_v21, -inf  ;;  %v1108_v17 = vadd.f32 %v2044_v22, %v3043_v39  ;;  %v1444_v46 = vsel %vm1401_vm4, %v3072_v63, -inf }
 0x1c1   : > { %v1405_v8 = vrot.slane %v1404_v5, 2  ;;  %v1411_v44 = vmax.f32 %v1409_v11, %v1410_v51  ;;  %v1418_v48 = vmax.f32 %v1416_v60, %v1417_v55  ;;  %v1424_v23 = vrot.slane %v1423_v10, 4 }
 0x1c2   : > { %v1431_v41 = vrot.slane %v1430_v29, 4  ;;  %v1437_v40 = vsel %vm1401_vm4, %v1265_v43, -inf  ;;  %v1173_v15 = vadd.f32 %v2072_v57, %v1108_v17  ;;  %v1445_v13 = vrot.slane %v1444_v46, 4 }
 0x1c3   : > { %v1406_v4 = vmax.f32 %v1404_v5, %v1405_v8  ;;  %v1412_v54 = vrot.slane %v1411_v44, 2  ;;  %v1419_v19 = vrot.slane %v1418_v48, 2  ;;  %v1425_v50 = vmax.f32 %v1423_v10, %v1424_v23 }
 0x1c4   : > { %v1432_v45 = vmax.f32 %v1430_v29, %v1431_v41  ;;  %v1438_v3 = vrot.slane %v1437_v40, 4  ;;  %v1197_v0 = vmax.f32 %v1173_v15, 0.0  ;;  %v1266_v1 = vcombine.high %v3072_v63, %v3072_v63 }
 0x1c5   : > { %v1407_v37 = vrot.slane %v1406_v4, 1  ;;  %v1413_v53 = vmax.f32 %v1411_v44, %v1412_v54  ;;  %v1420_v62 = vmax.f32 %v1418_v48, %v1419_v19  ;;  %v1426_v35 = vrot.slane %v1425_v50, 2 }
 0x1c6   : > { %v1433_v25 = vrot.slane %v1432_v45, 2  ;;  %v1439_v58 = vmax.f32 %v1437_v40, %v1438_v3  ;;  %1205 = vst.msk [vmem:[%s3054_s22 + $0x10] sm:$0xff] %vm848_vm8, %v1197_v0  ;;  %v1267_v9 = vcombine.high %v1197_v0, %v1197_v0  ;;  %v1274_v61 = vrot.slane %v1197_v0, %v3049_v26 }
 0x1c7   : > { %v1414_v12 = vrot.slane %v1413_v53, 1  ;;  %v1421_v42 = vrot.slane %v1420_v62, 1  ;;  %v1427_v59 = vmax.f32 %v1425_v50, %v1426_v35  ;;  %v1408_v57 = vmax.f32 %v1406_v4, %v1407_v37  ;;  %v3093_v56 = vpop.f32.mrb[8].mxu0 }
 0x1c8   : > { %v1434_v33 = vmax.f32 %v1432_v45, %v1433_v25  ;;  %v1440_v28 = vrot.slane %v1439_v58, 2  ;;  %v1446_v27 = vmax.f32 %v1444_v46, %v1445_v13  ;;  %v1281_v47 = vrot.slane %v1267_v9, %v3049_v26  ;;  %v3097_v14 = vpop.f32.mrb[9].mxu0 }
 0x1c9   : > { %v1282_v31 = vcombine.high %v1274_v61, %v1274_v61  ;;  %v1458_v52 = vsel %vm1401_vm4, %v1274_v61, -inf  ;;  %v1415_v21 = vmax.f32 %v1413_v53, %v1414_v12  ;;  %v1422_v49 = vmax.f32 %v1420_v62, %v1421_v42  ;;  %v3099_v2 = vpop.f32.mrb[10].mxu0 }
 0x1ca   : > { %v1435_v36 = vrot.slane %v1434_v33, 1  ;;  %v1428_v11 = vrot.slane %v1427_v59, 1  ;;  %v1459_v60 = vrot.slane %v1458_v52, 4  ;;  %v1283_v5 = vcombine.high %v1281_v47, %v1281_v47  ;;  %v3103_v22 = vpop.f32.mrb[11].mxu0 }
 0x1cb   : > { %v1465_v63 = vsel %vm1401_vm4, %v1282_v31, -inf  ;;  %v1472_v51 = vsel %vm1401_vm4, %v1281_v47, -inf  ;;  %v1626_v10 = vsel %vm848_vm8, %v1408_v57, -inf  ;;  %v1441_v48 = vmax.f32 %v1439_v58, %v1440_v28 }
 0x1cc   : > { %v1436_v55 = vmax.f32 %v1434_v33, %v1435_v36  ;;  %v1460_v43 = vmax.f32 %v1458_v52, %v1459_v60  ;;  %v1466_v29 = vrot.slane %v1465_v63, 4  ;;  %v1473_v8 = vrot.slane %v1472_v51, 4 }
 0x1cd   : > { %v1479_v44 = vsel %vm1401_vm4, %v1283_v5, -inf  ;;  %v1447_v23 = vrot.slane %v1446_v27, 2  ;;  %v1451_v17 = vsel %vm1401_vm4, %v1266_v1, -inf  ;;  %v1442_v54 = vrot.slane %v1441_v48, 1 }
 0x1ce   : > { %v1461_v41 = vrot.slane %v1460_v43, 2  ;;  %v1467_v40 = vmax.f32 %v1465_v63, %v1466_v29  ;;  %v1474_v46 = vmax.f32 %v1472_v51, %v1473_v8  ;;  %v1480_v4 = vrot.slane %v1479_v44, 4 }
 0x1cf   : > { %v1448_v19 = vmax.f32 %v1446_v27, %v1447_v23  ;;  %v1452_v50 = vrot.slane %v1451_v17, 4  ;;  %v1627_v15 = vsel %vm848_vm8, %v1436_v55, -inf  ;;  %v1443_v53 = vmax.f32 %v1441_v48, %v1442_v54 }
 0x1d0   : > { %v1462_v45 = vmax.f32 %v1460_v43, %v1461_v41  ;;  %v1468_v3 = vrot.slane %v1467_v40, 2  ;;  %v1475_v13 = vrot.slane %v1474_v46, 2  ;;  %v1481_v37 = vmax.f32 %v1479_v44, %v1480_v4 }
 0x1d1   : > { %v1449_v62 = vrot.slane %v1448_v19, 1  ;;  %v1453_v35 = vmax.f32 %v1451_v17, %v1452_v50  ;;  %v1628_v0 = vmax.f32 %v1626_v10, %v1627_v15  ;;  %v1429_v25 = vmax.f32 %v1427_v59, %v1428_v11 }
 0x1d2   : > { %v1463_v58 = vrot.slane %v1462_v45, 1  ;;  %v1469_v12 = vmax.f32 %v1467_v40, %v1468_v3  ;;  %v1476_v42 = vmax.f32 %v1474_v46, %v1475_v13  ;;  %v1630_v33 = vsel %vm848_vm8, %v1443_v53, -inf }
 0x1d3   : > { %v1450_v9 = vmax.f32 %v1448_v19, %v1449_v62  ;;  %v1454_v61 = vrot.slane %v1453_v35, 2  ;;  %v1629_v57 = vsel %vm848_vm8, %v1415_v21, -inf  ;;  %v1482_v28 = vrot.slane %v1481_v37, 2 }
 0x1d4   : > { %v1470_v1 = vrot.slane %v1469_v12, 1  ;;  %v2003_v27 = vpack.c.bf16 %v1628_v0, %v1628_v0  ;;  %v1631_v31 = vmax.f32 %v1629_v57, %v1630_v33  ;;  %v1127_v59 = vadd.f32 %v3037_v20, %v3043_v39 }
 0x1d5   : > { %v1455_v47 = vmax.f32 %v1453_v35, %v1454_v61  ;;  %v1633_v52 = vsel %vm848_vm8, %v1450_v9, -inf  ;;  %v1632_v36 = vsel %vm848_vm8, %v1422_v49, -inf  ;;  %v1635_v11 = vsel %vm848_vm8, %v1429_v25, -inf }
 0x1d6   : > { %v1464_v60 = vmax.f32 %v1462_v45, %v1463_v58  ;;  %v1477_v5 = vrot.slane %v1476_v42, 1  ;;  %v1634_v51 = vmax.f32 %v1632_v36, %v1633_v52  ;;  %v2004_v21 = vpack.c.bf16 %v1631_v31, %v1631_v31  ;;  %v1780_v45 = vld [vmem:[%s2410_s5] sm:$0xc] }
 0x1d7   : > { %v1456_v63 = vrot.slane %v1455_v47, 1  ;;  %v2047_v55 = vadd.f32 %v3082_v34, %v3076_v18  ;;  %v3118_v10 = vmax.f32 %v1469_v12, %v1470_v1  ;;  %v3120_v43 = vmax.f32 %v1481_v37, %v1482_v28 }
 0x1d8   : > { %v1738_v29 = vunpack.c.l.b16 %v2003_v27  ;;  %v1201_v20 = vmax.f32 %v3065_v38, 0.0  ;;  %v2005_v49 = vpack.c.bf16 %v1634_v51, %v1634_v51  ;;  %v1739_v44 = vunpack.c.l.b16 %v2004_v21 }
 0x1d9   : > { %v1457_v8 = vmax.f32 %v1455_v47, %v1456_v63  ;;  %v1111_v48 = vadd.f32 %v2047_v55, %v3043_v39  ;;  %v3124_v23 = vmax.f32 %v1476_v42, %v1477_v5  ;;  %v1192_v34 = vadd.f32 %v3074_v32, %v1127_v59 }
 0x1da   : > { %1209 = vst.msk [vmem:[%s3054_s22 + $0x30] sm:$0xff] %vm848_vm8, %v1201_v20  ;;  %v1335_v17 = vcombine.high %v1201_v20, %v1201_v20  ;;  %v1342_v18 = vrot.slane %v1201_v20, %v3049_v26  ;;  %v1740_v40 = vunpack.c.l.b16 %v2005_v49  ;;  %v1755_v38 = vsel %vm1754_vm9, %v1739_v44, %v1738_v29 }
 0x1db   : > { %v1636_v41 = vsel %vm848_vm8, %v1457_v8, -inf  ;;  %v1176_v46 = vadd.f32 %v3051_v7, %v1111_v48  ;;  %v3139_v13 = vmax.f32 %v1192_v34, 0.0  ;;  %v1484_v37 = vrot.slane %v3120_v43, 1 }
 0x1dc   : > { %v3133_v4 = vmax.f32 %v1635_v11, %v1636_v41  ;;  %v1349_v54 = vrot.slane %v1335_v17, %v3049_v26  ;;  %v1350_v19 = vcombine.high %v1342_v18, %v1342_v18  ;;  %v1570_v50 = vsel %vm1401_vm4, %v1342_v18, -inf }
 0x1dd   : > { %v1757_v15 = vsel %vm1756_vm7, %v1740_v40, %v1755_v38  ;;  %v1198_v32 = vmax.f32 %v1176_v46, 0.0  ;;  %v1571_v3 = vrot.slane %v1570_v50, 4  ;;  %1210 = vst.msk [vmem:[%s3054_s22 + $0x38] sm:$0xff] %vm848_vm8, %v3139_v13  ;;  %v3150_v12 = vsel %vm848_vm8, %v1464_v60, -inf }
 0x1de   : > { %v1774_v53 = vpack.c.b16 %v1757_v15, %v1757_v15  ;;  %v1351_v7 = vcombine.high %v1349_v54, %v1349_v54  ;;  %v1577_v62 = vsel %vm1401_vm4, %v1350_v19, -inf  ;;  %v1584_v9 = vsel %vm1401_vm4, %v1349_v54, -inf }
 0x1df   : > { %1206 = vst.msk [vmem:[%s3054_s22 + $0x18] sm:$0xff] %vm848_vm8, %v1198_v32  ;;  %v1284_v35 = vcombine.high %v1198_v32, %v1198_v32  ;;  %v1291_v0 = vrot.slane %v1198_v32, %v3049_v26  ;;  %v1572_v25 = vmax.f32 %v1570_v50, %v1571_v3  ;;  %v1578_v58 = vrot.slane %v1577_v62, 4 }
 0x1e0   : > { %v1781_v42 = vsel %vm3030_vm3, %v1774_v53, %v1780_v45  ;;  %v1591_v61 = vsel %vm1401_vm4, %v1351_v7, -inf  ;;  %v1585_v31 = vrot.slane %v1584_v9, 4  ;;  %v1485_v17 = vmax.f32 %v3120_v43, %v1484_v37 }
 0x1e1   : > { %1782 = vst [vmem:[%s2410_s5] sm:$0xc] %v1781_v42  ;;  %v1298_v33 = vrot.slane %v1284_v35, %v3049_v26  ;;  %v1299_v57 = vcombine.high %v1291_v0, %v1291_v0  ;;  %v1486_v1 = vsel %vm1401_vm4, %v1291_v0, -inf  ;;  %v1573_v28 = vrot.slane %v1572_v25, 2 }
 0x1e2   : > { %v1487_v27 = vrot.slane %v1486_v1, 4  ;;  %v1579_v47 = vmax.f32 %v1577_v62, %v1578_v58  ;;  %v1592_v52 = vrot.slane %v1591_v61, 4  ;;  %v1586_v29 = vmax.f32 %v1584_v9, %v1585_v31 }
 0x1e3   : > { %v1300_v59 = vcombine.high %v1298_v33, %v1298_v33  ;;  %v1493_v36 = vsel %vm1401_vm4, %v1299_v57, -inf  ;;  %v1500_v30 = vsel %vm1401_vm4, %v1298_v33, -inf  ;;  %v1574_v11 = vmax.f32 %v1572_v25, %v1573_v28 }
 0x1e4   : > { %v1488_v60 = vmax.f32 %v1486_v1, %v1487_v27  ;;  %v1494_v5 = vrot.slane %v1493_v36, 4  ;;  %v1501_v63 = vrot.slane %v1500_v30, 4  ;;  %v1580_v51 = vrot.slane %v1579_v47, 2 }
 0x1e5   : > { %v1507_v21 = vsel %vm1401_vm4, %v1300_v59, -inf  ;;  %v1575_v55 = vrot.slane %v1574_v11, 1  ;;  %v1593_v20 = vmax.f32 %v1591_v61, %v1592_v52  ;;  %v1641_v18 = vsel %vm848_vm8, %v3118_v10, -inf }
 0x1e6   : > { %v1489_v8 = vrot.slane %v1488_v60, 2  ;;  %v1495_v49 = vmax.f32 %v1493_v36, %v1494_v5  ;;  %v1502_v44 = vmax.f32 %v1500_v30, %v1501_v63  ;;  %v1508_v48 = vrot.slane %v1507_v21, 4 }
 0x1e7   : > { %v1581_v34 = vmax.f32 %v1579_v47, %v1580_v51  ;;  %v1587_v41 = vrot.slane %v1586_v29, 2  ;;  %v1644_v19 = vsel %vm848_vm8, %v3124_v23, -inf  ;;  %v2006_v50 = vpack.c.bf16 %v3133_v4, %v3133_v4 }
 0x1e8   : > { %v1490_v40 = vmax.f32 %v1488_v60, %v1489_v8  ;;  %v1496_v38 = vrot.slane %v1495_v49, 2  ;;  %v1503_v46 = vrot.slane %v1502_v44, 2  ;;  %v1509_v54 = vmax.f32 %v1507_v21, %v1508_v48 }
 0x1e9   : > { %v1576_v15 = vmax.f32 %v1574_v11, %v1575_v55  ;;  %v1594_v45 = vrot.slane %v1593_v20, 2  ;;  %v1647_v10 = vsel %vm848_vm8, %v1485_v17, -inf  ;;  %v1582_v53 = vrot.slane %v1581_v34, 1 }
 0x1ea   : > { %v1491_v32 = vrot.slane %v1490_v40, 1  ;;  %v1497_v3 = vmax.f32 %v1495_v49, %v1496_v38  ;;  %v1504_v43 = vmax.f32 %v1502_v44, %v1503_v46  ;;  %v1510_v37 = vrot.slane %v1509_v54, 2 }
 0x1eb   : > { %v3170_v7 = vmax.f32 %v1586_v29, %v1587_v41  ;;  %v1352_v62 = vcombine.high %v3139_v13, %v3139_v13  ;;  %v1741_v4 = vunpack.c.l.b16 %v2006_v50  ;;  %v3174_v58 = vmax.f32 %v1593_v20, %v1594_v45 }
 0x1ec   : > { %v1492_v35 = vmax.f32 %v1490_v40, %v1491_v32  ;;  %v1498_v23 = vrot.slane %v1497_v3, 1  ;;  %v1505_v0 = vrot.slane %v1504_v43, 1  ;;  %v1511_v25 = vmax.f32 %v1509_v54, %v1510_v37 }
 0x1ed   : > { %v3177_v42 = vsel %vm848_vm8, %v1576_v15, -inf  ;;  %v1359_v9 = vrot.slane %v3139_v13, %v3049_v26  ;;  %v1583_v27 = vmax.f32 %v1581_v34, %v1582_v53  ;;  %v1589_v47 = vrot.slane %v3170_v7, 1 }
 0x1ee   : > { %v1499_v61 = vmax.f32 %v1497_v3, %v1498_v23  ;;  %v1506_v33 = vmax.f32 %v1504_v43, %v1505_v0  ;;  %v1512_v57 = vrot.slane %v1511_v25, 1  ;;  %v1639_v1 = vsel %vm848_vm8, %v1492_v35, -inf }
 0x1ef   : > { %v1640_v28 = vmax.f32 %v3150_v12, %v1639_v1  ;;  %v1366_v31 = vrot.slane %v1352_v62, %v3049_v26  ;;  %v1367_v30 = vcombine.high %v1359_v9, %v1359_v9  ;;  %v1598_v51 = vsel %vm1401_vm4, %v1359_v9, -inf }
 0x1f0   : > { %v1513_v52 = vmax.f32 %v1511_v25, %v1512_v57  ;;  %v1642_v59 = vsel %vm848_vm8, %v1499_v61, -inf  ;;  %v1645_v36 = vsel %vm848_vm8, %v1506_v33, -inf  ;;  %v1599_v49 = vrot.slane %v1598_v51, 4 }
 0x1f1   : > { %v1643_v13 = vmax.f32 %v1641_v18, %v1642_v59  ;;  %v1646_v11 = vmax.f32 %v1644_v19, %v1645_v36  ;;  %v2007_v60 = vpack.c.bf16 %v1640_v28, %v1640_v28  ;;  %v1368_v5 = vcombine.high %v1366_v31, %v1366_v31 }
 0x1f2   : > { %v1648_v63 = vsel %vm848_vm8, %v1513_v52, -inf  ;;  %v1605_v12 = vsel %vm1401_vm4, %v1367_v30, -inf  ;;  %v1612_v21 = vsel %vm1401_vm4, %v1366_v31, -inf  ;;  %v1600_v38 = vmax.f32 %v1598_v51, %v1599_v49 }
 0x1f3   : > { %v1649_v55 = vmax.f32 %v1647_v10, %v1648_v63  ;;  %v2008_v29 = vpack.c.bf16 %v1643_v13, %v1643_v13  ;;  %v2009_v20 = vpack.c.bf16 %v1646_v11, %v1646_v11  ;;  %v1742_v8 = vunpack.c.l.b16 %v2007_v60 }
 0x1f4   : > { %v1606_v44 = vrot.slane %v1605_v12, 4  ;;  %v1613_v48 = vrot.slane %v1612_v21, 4  ;;  %v1619_v17 = vsel %vm1401_vm4, %v1368_v5, -inf  ;;  %v2050_v45 = vadd.f32 %v3097_v14, %v3093_v56 }
 0x1f5   : > { %v2010_v18 = vpack.c.bf16 %v1649_v55, %v1649_v55  ;;  %v1743_v34 = vunpack.c.l.b16 %v2008_v29  ;;  %v1744_v41 = vunpack.c.l.b16 %v2009_v20  ;;  %v1759_v40 = vsel %vm1758_vm11, %v1742_v8, %v1741_v4 }
 0x1f6   : > { %v1607_v46 = vmax.f32 %v1605_v12, %v1606_v44  ;;  %v1614_v54 = vmax.f32 %v1612_v21, %v1613_v48  ;;  %v1620_v19 = vrot.slane %v1619_v17, 4  ;;  %v2053_v32 = vadd.f32 %v3103_v22, %v3099_v2 }
 0x1f7   : > { %v1745_v50 = vunpack.c.l.b16 %v2010_v18  ;;  %v1761_v15 = vsel %vm1760_vm2, %v1743_v34, %v1759_v40  ;;  %v1601_v3 = vrot.slane %v1600_v38, 2  ;;  %v1596_v53 = vrot.slane %v3174_v58, 1 }
 0x1f8   : > { %v1608_v43 = vrot.slane %v1607_v46, 2  ;;  %v1615_v37 = vrot.slane %v1614_v54, 2  ;;  %v1621_v10 = vmax.f32 %v1619_v17, %v1620_v19  ;;  %v1116_v62 = vadd.f32 %v2050_v45, %v3043_v39 }
 0x1f9   : > { %v1119_v35 = vadd.f32 %v2053_v32, %v3043_v39  ;;  %v1763_v23 = vsel %vm1762_vm0, %v1744_v41, %v1761_v15  ;;  %v1602_v0 = vmax.f32 %v1600_v38, %v1601_v3  ;;  %v1590_v2 = vmax.f32 %v3170_v7, %v1589_v47 }
 0x1fa   : > { %v1609_v25 = vmax.f32 %v1607_v46, %v1608_v43  ;;  %v1616_v56 = vmax.f32 %v1614_v54, %v1615_v37  ;;  %v1622_v14 = vrot.slane %v1621_v10, 2  ;;  %v1181_v22 = vadd.f32 %v3067_v24, %v1116_v62 }
 0x1fb   : > { %v1184_v4 = vadd.f32 %v3078_v6, %v1119_v35  ;;  %v3208_v9 = vsel %vm3391_vm6, %v1745_v50, %v1763_v23  ;;  %v1603_v61 = vrot.slane %v1602_v0, 1  ;;  %v1597_v24 = vmax.f32 %v3174_v58, %v1596_v53 }
 0x1fc   : > { %v1610_v39 = vrot.slane %v1609_v25, 1  ;;  %v1617_v33 = vrot.slane %v1616_v56, 1  ;;  %v1623_v57 = vmax.f32 %v1621_v10, %v1622_v14  ;;  %v1665_v6 = vsel %vm848_vm8, %v1583_v27, -inf }
 0x1fd   : > { %v1199_v7 = vmax.f32 %v1181_v22, 0.0  ;;  %v1200_v1 = vmax.f32 %v1184_v4, 0.0  ;;  %v1604_v28 = vmax.f32 %v1602_v0, %v1603_v61  ;;  %v1668_v59 = vsel %vm848_vm8, %v1590_v2, -inf }
 0x1fe   : > { %v1611_v47 = vmax.f32 %v1609_v25, %v1610_v39  ;;  %v1618_v31 = vmax.f32 %v1616_v56, %v1617_v33  ;;  %v1624_v52 = vrot.slane %v1623_v57, 1 }
 0x1ff   : > { %1207 = vst.msk [vmem:[%s3054_s22 + $0x20] sm:$0xff] %vm848_vm8, %v1199_v7  ;;  %v1301_v36 = vcombine.high %v1199_v7, %v1199_v7  ;;  %v1308_v30 = vrot.slane %v1199_v7, %v3049_v26  ;;  %1208 = vst.msk [vmem:[%s3054_s22 + $0x28] sm:$0xff] %vm848_vm8, %v1200_v1  ;;  %v1318_v58 = vcombine.high %v1200_v1, %v1200_v1  ;;  %v1663_v13 = vsel %vm848_vm8, %v1604_v28, -inf }
 0x200   : > { %v1625_v27 = vmax.f32 %v1623_v57, %v1624_v52  ;;  %v1666_v11 = vsel %vm848_vm8, %v1611_v47, -inf  ;;  %v1669_v60 = vsel %vm848_vm8, %v1618_v31, -inf }
 0x201   : > { %2224 = shalt.err (!%p2221_p7)
}
 0x202   : > { %s2225_s10 = scalar_lea.hbm %s3213_s27, 1024  ;;  %s2229_s13 = scalar_lea.hbm %s3324_s3, 2048 }
 0x203   : > { %p2226_p8 = scmp.ne.s32.totalorder %s3213_s27, %s2225_s10  ;;  %p2230_p1 = scmp.lt.u32.totalorder %s3213_s27, %s3324_s3 }
 0x204   : > { %p2231_p0 = scmp.lt.u32.totalorder %s2229_s13, %s2225_s10  ;;  %p2233_p6 = scmp.lt.u32.totalorder %s2225_s10, %s3213_s27 }
 0x205   : > { %p2227_p11 = pnand %p2226_p8, %p3392_p9 }
 0x206   : > { %p2232_p5 = por %p2231_p0, %p2230_p1 }
 0x207   : > { %p2228_p13 = pneg %p2227_p11 }
 0x208   : > { %p2234_p10 = por %p2233_p6, %p2232_p5 }
 0x20a   : > { %p2235_p12 = pnand %p2234_p10, %p2228_p13 }
 0x20c   : > { %2238 = shalt.err (!%p2235_p12)
}
 0x20d   : > { %s2288_s22 = smov 128   ;;  %s2289_s23 = smov 8   ;;  %v3255_v5 = vmax.f32 %v3177_v42, %v1663_v13  ;;  %v3257_v63 = vmax.f32 %v1665_v6, %v1666_v11  ;;  %v3259_v51 = vmax.f32 %v1668_v59, %v1669_v60  ;;  %v1315_v12 = vrot.slane %v1301_v36, %v3049_v26  ;;  %vm3393_vm14 = vmmov %vm3391_vm6 }
 0x20e   : > { %2099 = dma.vmem_to_hbm [thread:$0]  (%p3392_p9), %s3215_s28, 1024, %s3213_s27, %s3230_s29, %s2288_s22, %s2288_s22, %s2289_s23   ;;  %v1671_v21 = vsel %vm848_vm8, %v1597_v24, -inf  ;;  %v1672_v55 = vsel %vm848_vm8, %v1625_v27, -inf  ;;  %v1316_v29 = vcombine.high %v1308_v30, %v1308_v30  ;;  %v1514_v20 = vsel %vm1401_vm4, %v1308_v30, -inf }
 0x20f   : > { %v3265_v8 = vmax.f32 %v1671_v21, %v1672_v55  ;;  %v1325_v49 = vrot.slane %v1200_v1, %v3049_v26  ;;  %v1332_v42 = vrot.slane %v1318_v58, %v3049_v26  ;;  %v1317_v44 = vcombine.high %v1315_v12, %v1315_v12 }
 0x210   : > { %v1515_v48 = vrot.slane %v1514_v20, 4  ;;  %v1521_v17 = vsel %vm1401_vm4, %v1316_v29, -inf  ;;  %v1528_v18 = vsel %vm1401_vm4, %v1315_v12, -inf  ;;  %vm1766_vm13 = vcmask 1045509  }
 0x211   : > { %v1522_v41 = vrot.slane %v1521_v17, 4  ;;  %v1529_v40 = vrot.slane %v1528_v18, 4  ;;  %v1535_v38 = vsel %vm1401_vm4, %v1317_v44, -inf  ;;  %v1333_v54 = vcombine.high %v1325_v49, %v1325_v49 }
 0x212   : > { %v1516_v34 = vmax.f32 %v1514_v20, %v1515_v48  ;;  %v1536_v46 = vrot.slane %v1535_v38, 4  ;;  %v1334_v19 = vcombine.high %v1332_v42, %v1332_v42  ;;  %v1542_v32 = vsel %vm1401_vm4, %v1325_v49, -inf }
 0x213   : > { %v1523_v15 = vmax.f32 %v1521_v17, %v1522_v41  ;;  %v1530_v45 = vmax.f32 %v1528_v18, %v1529_v40  ;;  %v1543_v3 = vrot.slane %v1542_v32, 4  ;;  %v1549_v43 = vsel %vm1401_vm4, %v1333_v54, -inf }
 0x214   : > { %v1517_v50 = vrot.slane %v1516_v34, 2  ;;  %v1537_v26 = vmax.f32 %v1535_v38, %v1536_v46  ;;  %v1556_v37 = vsel %vm1401_vm4, %v1332_v42, -inf  ;;  %v1550_v35 = vrot.slane %v1549_v43, 4 }
 0x215   : > { %v1524_v53 = vrot.slane %v1523_v15, 2  ;;  %v1531_v62 = vrot.slane %v1530_v45, 2  ;;  %v1544_v0 = vmax.f32 %v1542_v32, %v1543_v3  ;;  %v1557_v25 = vrot.slane %v1556_v37, 4 }
 0x216   : > { %v1518_v10 = vmax.f32 %v1516_v34, %v1517_v50  ;;  %v1538_v23 = vrot.slane %v1537_v26, 2  ;;  %v1563_v56 = vsel %vm1401_vm4, %v1334_v19, -inf  ;;  %v1551_v4 = vmax.f32 %v1549_v43, %v1550_v35 }
 0x217   : > { %v1525_v2 = vmax.f32 %v1523_v15, %v1524_v53  ;;  %v1532_v22 = vmax.f32 %v1530_v45, %v1531_v62  ;;  %v1545_v39 = vrot.slane %v1544_v0, 2  ;;  %v1558_v33 = vmax.f32 %v1556_v37, %v1557_v25 }
 0x218   : > { %v1519_v14 = vrot.slane %v1518_v10, 1  ;;  %v1539_v61 = vmax.f32 %v1537_v26, %v1538_v23  ;;  %v1564_v57 = vrot.slane %v1563_v56, 4  ;;  %v1552_v6 = vrot.slane %v1551_v4, 2 }
 0x219   : > { %v1526_v24 = vrot.slane %v1525_v2, 1  ;;  %v1533_v7 = vrot.slane %v1532_v22, 1  ;;  %v1546_v1 = vmax.f32 %v1544_v0, %v1545_v39  ;;  %v1559_v28 = vrot.slane %v1558_v33, 2 }
 0x21a   : > { %v1565_v47 = vmax.f32 %v1563_v56, %v1564_v57  ;;  %v1520_v31 = vmax.f32 %v1518_v10, %v1519_v14  ;;  %v1553_v52 = vmax.f32 %v1551_v4, %v1552_v6  ;;  %v1540_v59 = vrot.slane %v1539_v61, 1 }
 0x21b   : > { %v1547_v36 = vrot.slane %v1546_v1, 1  ;;  %v1560_v30 = vmax.f32 %v1558_v33, %v1559_v28  ;;  %v1527_v27 = vmax.f32 %v1525_v2, %v1526_v24  ;;  %v1534_v11 = vmax.f32 %v1532_v22, %v1533_v7 }
 0x21c   : > { %v1566_v58 = vrot.slane %v1565_v47, 2  ;;  %v1554_v13 = vrot.slane %v1553_v52, 1  ;;  %v1650_v29 = vsel %vm848_vm8, %v1520_v31, -inf  ;;  %v1541_v20 = vmax.f32 %v1539_v61, %v1540_v59  ;;  %v1785_v61 = vld [vmem:[%s2410_s5 + $0x8] sm:$0x7] }
 0x21d   : > { %v1548_v60 = vmax.f32 %v1546_v1, %v1547_v36  ;;  %v1561_v12 = vrot.slane %v1560_v30, 1  ;;  %v1653_v17 = vsel %vm848_vm8, %v1527_v27, -inf  ;;  %v1656_v40 = vsel %vm848_vm8, %v1534_v11, -inf }
 0x21e   : > { %v1567_v21 = vmax.f32 %v1565_v47, %v1566_v58  ;;  %v1555_v55 = vmax.f32 %v1553_v52, %v1554_v13  ;;  %v1659_v19 = vsel %vm848_vm8, %v1541_v20, -inf  ;;  %v2015_v45 = vpack.c.bf16 %v3255_v5, %v3255_v5 }
 0x21f   : > { %v1562_v49 = vmax.f32 %v1560_v30, %v1561_v12  ;;  %v1651_v44 = vsel %vm848_vm8, %v1548_v60, -inf  ;;  %v2016_v43 = vpack.c.bf16 %v3257_v63, %v3257_v63  ;;  %v2017_v10 = vpack.c.bf16 %v3259_v51, %v3259_v51 }
 0x220   : > { %v1568_v42 = vrot.slane %v1567_v21, 1  ;;  %v1652_v48 = vmax.f32 %v1650_v29, %v1651_v44  ;;  %v1654_v18 = vsel %vm848_vm8, %v1555_v55, -inf  ;;  %v2018_v23 = vpack.c.bf16 %v3265_v8, %v3265_v8 }
 0x221   : > { %v1655_v41 = vmax.f32 %v1653_v17, %v1654_v18  ;;  %v1657_v38 = vsel %vm848_vm8, %v1562_v49, -inf  ;;  %v1750_v0 = vunpack.c.l.b16 %v2015_v45  ;;  %v1751_v56 = vunpack.c.l.b16 %v2016_v43 }
 0x222   : > { %v1569_v34 = vmax.f32 %v1567_v21, %v1568_v42  ;;  %v1658_v46 = vmax.f32 %v1656_v40, %v1657_v38  ;;  %v2011_v54 = vpack.c.bf16 %v1652_v48, %v1652_v48  ;;  %v1752_v51 = vunpack.c.l.b16 %v2017_v10 }
 0x223   : > { %v2012_v15 = vpack.c.bf16 %v1655_v41, %v1655_v41  ;;  %v1753_v22 = vunpack.c.l.b16 %v2018_v23 }
 0x224   : > { %v1660_v50 = vsel %vm848_vm8, %v1569_v34, -inf  ;;  %v2013_v26 = vpack.c.bf16 %v1658_v46, %v1658_v46  ;;  %v1746_v3 = vunpack.c.l.b16 %v2011_v54  ;;  %vm1783_vm8 = vcmask 519168  }
 0x225   : > { %v1661_v32 = vmax.f32 %v1659_v19, %v1660_v50  ;;  %v1747_v37 = vunpack.c.l.b16 %v2012_v15 }
 0x226   : > { %v1748_v62 = vunpack.c.l.b16 %v2013_v26  ;;  %v1767_v35 = vsel %vm1766_vm13, %v1746_v3, %v3208_v9 }
 0x227   : > { %v2014_v53 = vpack.c.bf16 %v1661_v32, %v1661_v32  ;;  %v1768_v5 = vsel %vm1754_vm9, %v1747_v37, %v1767_v35 }
 0x228   : > { %v1769_v63 = vsel %vm1756_vm7, %v1748_v62, %v1768_v5 }
 0x229   : > { %v1749_v25 = vunpack.c.l.b16 %v2014_v53  ;;  %v1775_v14 = vpack.c.b16 %v1769_v63, %v1769_v63 }
 0x22b   : > { %v1770_v2 = vsel %vm1758_vm11, %v1750_v0, %v1749_v25  ;;  %1784 = vst.msk [vmem:[%s2410_s5 + $0x4] sm:$0xf] %vm1783_vm8, %v1775_v14 }
 0x22c   : > { %v1771_v9 = vsel %vm1760_vm2, %v1751_v56, %v1770_v2 }
 0x22d   : > { %v1772_v4 = vsel %vm1762_vm0, %v1752_v51, %v1771_v9 }
 0x22e   : > { %v1773_v8 = vsel %vm3393_vm14, %v1753_v22, %v1772_v4 }
 0x22f   : > { %v1776_v39 = vpack.c.b16 %v1773_v8, %v1773_v8 }
 0x231   : > { %v1786_v33 = vsel %vm3021_vm10, %v1776_v39, %v1785_v61 }
 0x232   : > { %1787 = vst [vmem:[%s2410_s5 + $0x8] sm:$0x7] %v1786_v33 }
 0x233 PF: > { %p2111_p9 = scmp.ge.s32.totalorder %s2277_s18, 2  ;;  %s1825_s25 = sand.u32 1, %s2265_s15  }
 0x234   : > { %p3394_p2 = scmp.ne.s32.totalorder %s3335_s26, 0  ;;  %s1826_s28 = scalar_lea.sflag [#allocation4], %s1825_s25 }
 0x236   : > { %p2106_p3 = pnand %p2111_p9, %p3394_p2 }
 0x238   : > { %2260 = dma.done.wait (!%p2106_p3), %s1826_s28, 1024  }
 0x239   : > { %2262 = vsyncadd (!%p2106_p3), %s1826_s28, 4294966272  ;;  %p16_p4 = scmp.ge.s32.totalorder %s2340_s21, 4   ;;  %s3395_s15 = smov %s2269_s16 }
 0x23a   : > { %s3396_s16 = smov %s2273_s17  ;;  %s3397_s17 = smov %s2351_s24 }
 0x23b   : > { %s3398_s18 = smov %s2340_s21  ;;  %18 = sbr.rel (!%p16_p4) target bundleno = 4 (0x4), region = 84 }
 0x242   :  { %1839 = vsyncpa [#allocation3], 1 }
 0x243   :  { %1841 = vsyncpa [#allocation3 + $0x1], 1 }
 0x244   :  { %1842 = vsyncpa [#allocation4], 1 }
 0x245   :  { %1844 = vsyncpa [#allocation4 + $0x1], 1 }

// kernel: vgg_forward.8
= control target key start
LH: loop header
LB: loop body
LE: loop exit
PB: predicated region body
PF: predicated region fallthrough
CT: control target
= control target key end

     0   :  { %s3587_s15 = smov 0   ;;  %s4601_s0 = inlined_call_operand.vmem [shape: bf16[2,10,128], index: 0, kind: input, shape index: {}]   ;;  %s4602_s1 = inlined_call_operand.vmem [shape: bf16[1152,512], index: 1, kind: input, shape index: {}]   ;;  %s4603_s2 = inlined_call_operand.vmem [shape: f32[1,512], index: 2, kind: input, shape index: {}]   ;;  %s4604_s3 = inlined_call_operand.vmem [shape: f32[2,4,512], index: 3, kind: output, shape index: {0}]   ;;  %s4605_s4 = inlined_call_operand.vmem [shape: bf16[2,5,512], index: 4, kind: output, shape index: {1}]  }
   0x1 LB: > { %s2753_s16 = sadd.s32 4294967295, %s3558_s15   ;;  %p2757_p0 = scmp.ge.s32.totalorder %s3558_s15, 1  ;;  %s3558_s15 = sphi %s3587_s15, %s15_s15  }
   0x2   : > { %p165_p1 = scmp.lt.s32.totalorder %s3558_s15, 3 }
   0x4   : > { %p166_p2 = pnand %p2757_p0, %p165_p1 }
   0x5   : > { %v3117_v0 = vld [vmem:[%s4602_s1 + $0x4] ss:$16 sps:$4 sm:$0xff] (!%p166_p2)   ;;  %v3119_v1 = vld [vmem:[%s4602_s1 + $0xc] ss:$16 sps:$4 sm:$0xff] (!%p166_p2)   ;;  %v3121_v2 = vld [vmem:[%s4602_s1] ss:$16 sps:$4 sm:$0xff] (!%p166_p2)   ;;  %v214_v50 = vlaneseq (!%p166_p2) }
   0x6   : > { %169 = sbr.rel (%p166_p2) target bundleno = 544 (0x220), region = 32  ;;  %2078 = vmatprep.subr.bf16.mxu0 (!%p166_p2), %v3117_v0  ;;  %v3122_v3 = vld [vmem:[%s4602_s1 + $0x8] ss:$16 sps:$4 sm:$0xff] (!%p166_p2)   ;;  %2283 = vmatprep.subr.bf16.mxu1 (!%p166_p2), %v3119_v1  ;;  %v3123_v4 = vld [vmem:[%s4602_s1 + $0x24] ss:$16 sps:$4 sm:$0xff] (!%p166_p2)   ;;  %p196_p3 = scmp.lt.s32.totalorder (!%p166_p2), %s2753_s16, 1 }
   0x7   : > { %2079 = vmatpush1.bf16.msra.mxu0 (!%p166_p2), %v3121_v2  ;;  %2284 = vmatpush1.bf16.msra.mxu1 (!%p166_p2), %v3122_v3  ;;  %v3125_v5 = vld [vmem:[%s4602_s1 + $0x2c] ss:$16 sps:$4 sm:$0xff] (!%p166_p2)   ;;  %v3127_v6 = vld [vmem:[%s4602_s1 + $0x20] ss:$16 sps:$4 sm:$0xff] (!%p166_p2)   ;;  %v3128_v7 = vld [vmem:[%s4602_s1 + $0x28] ss:$16 sps:$4 sm:$0xff] (!%p166_p2)  }
   0x8   : > { %2080 = vmatprep.subr.bf16.mxu0 (!%p166_p2), %v3123_v4  ;;  %2285 = vmatprep.subr.bf16.mxu1 (!%p166_p2), %v3125_v5  ;;  %v3129_v8 = vld [vmem:[%s4602_s1 + $0x44] ss:$16 sps:$4 sm:$0xff] (!%p166_p2)   ;;  %v3131_v9 = vld [vmem:[%s4602_s1 + $0x4c] ss:$16 sps:$4 sm:$0xff] (!%p166_p2)   ;;  %v3133_v10 = vld [vmem:[%s4602_s1 + $0x40] ss:$16 sps:$4 sm:$0xff] (!%p166_p2)  }
   0x9   : > { %v3134_v11 = vld [vmem:[%s4602_s1 + $0x48] ss:$16 sps:$4 sm:$0xff] (!%p166_p2)   ;;  %v3135_v12 = vld [vmem:[%s4602_s1 + $0x64] ss:$16 sps:$4 sm:$0xff] (!%p166_p2)   ;;  %v3137_v13 = vld [vmem:[%s4602_s1 + $0x6c] ss:$16 sps:$4 sm:$0xff] (!%p166_p2)  }
   0xa   : > { %v3139_v14 = vld [vmem:[%s4602_s1 + $0x60] ss:$16 sps:$4 sm:$0xff] (!%p166_p2)   ;;  %v3140_v15 = vld [vmem:[%s4602_s1 + $0x68] ss:$16 sps:$4 sm:$0xff] (!%p166_p2)   ;;  %v3141_v16 = vld [vmem:[%s4602_s1 + $0x84] ss:$16 sps:$4 sm:$0xff] (!%p166_p2)  }
   0xb   : > { %2081 = vmatpush1.bf16.msra.mxu0 (!%p166_p2), %v3127_v6  ;;  %2286 = vmatpush1.bf16.msra.mxu1 (!%p166_p2), %v3128_v7  ;;  %v3143_v17 = vld [vmem:[%s4602_s1 + $0x8c] ss:$16 sps:$4 sm:$0xff] (!%p166_p2)   ;;  %v3145_v18 = vld [vmem:[%s4602_s1 + $0x80] ss:$16 sps:$4 sm:$0xff] (!%p166_p2)   ;;  %v3146_v19 = vld [vmem:[%s4602_s1 + $0x88] ss:$16 sps:$4 sm:$0xff] (!%p166_p2)  }
   0xc   : > { %2082 = vmatprep.subr.bf16.mxu0 (!%p166_p2), %v3129_v8  ;;  %2287 = vmatprep.subr.bf16.mxu1 (!%p166_p2), %v3131_v9  ;;  %v3147_v20 = vld [vmem:[%s4602_s1 + $0xa4] ss:$16 sps:$4 sm:$0xff] (!%p166_p2)   ;;  %v3149_v21 = vld [vmem:[%s4602_s1 + $0xac] ss:$16 sps:$4 sm:$0xff] (!%p166_p2)   ;;  %v3151_v22 = vld [vmem:[%s4602_s1 + $0xa0] ss:$16 sps:$4 sm:$0xff] (!%p166_p2)  }
   0xd   : > { %v3152_v23 = vld [vmem:[%s4602_s1 + $0xa8] ss:$16 sps:$4 sm:$0xff]   ;;  %v3153_v24 = vld [vmem:[%s4602_s1 + $0xc4] ss:$16 sps:$4 sm:$0xff]   ;;  %v3155_v25 = vld [vmem:[%s4602_s1 + $0xcc] ss:$16 sps:$4 sm:$0xff]  }
   0xe   : > { %v3157_v26 = vld [vmem:[%s4602_s1 + $0xc0] ss:$16 sps:$4 sm:$0xff]   ;;  %v3158_v27 = vld [vmem:[%s4602_s1 + $0xc8] ss:$16 sps:$4 sm:$0xff]   ;;  %v3159_v28 = vld [vmem:[%s4602_s1 + $0xe4] ss:$16 sps:$4 sm:$0xff]  }
   0xf   : > { %2083 = vmatpush1.bf16.msra.mxu0 %v3133_v10  ;;  %2288 = vmatpush1.bf16.msra.mxu1 %v3134_v11  ;;  %v3161_v29 = vld [vmem:[%s4602_s1 + $0xec] ss:$16 sps:$4 sm:$0xff]   ;;  %v3163_v30 = vld [vmem:[%s4602_s1 + $0xe0] ss:$16 sps:$4 sm:$0xff]   ;;  %v3164_v31 = vld [vmem:[%s4602_s1 + $0xe8] ss:$16 sps:$4 sm:$0xff]  }
  0x10   : > { %2084 = vmatprep.subr.bf16.mxu0 %v3135_v12  ;;  %2289 = vmatprep.subr.bf16.mxu1 %v3137_v13  ;;  %v3165_v32 = vld [vmem:[%s4602_s1 + $0x104] ss:$16 sps:$4 sm:$0xff]   ;;  %v3167_v33 = vld [vmem:[%s4602_s1 + $0x10c] ss:$16 sps:$4 sm:$0xff]   ;;  %v3169_v34 = vld [vmem:[%s4602_s1 + $0x100] ss:$16 sps:$4 sm:$0xff]  }
  0x11   : > { %v3170_v35 = vld [vmem:[%s4602_s1 + $0x108] ss:$16 sps:$4 sm:$0xff]   ;;  %v3171_v36 = vld [vmem:[%s4602_s1 + $0x124] ss:$16 sps:$4 sm:$0xff]   ;;  %v3173_v37 = vld [vmem:[%s4602_s1 + $0x12c] ss:$16 sps:$4 sm:$0xff]  }
  0x12   : > { %s4615_s16 = smov (!%p196_p3, %s2753_s16), 1  ;;  %v3175_v38 = vld [vmem:[%s4602_s1 + $0x120] ss:$16 sps:$4 sm:$0xff]   ;;  %v3176_v39 = vld [vmem:[%s4602_s1 + $0x128] ss:$16 sps:$4 sm:$0xff]   ;;  %v3767_v58 = vshrl.u32 %v214_v50, 7 }
  0x13   : > { %2085 = vmatpush1.bf16.msra.mxu0 %v3139_v14  ;;  %2290 = vmatpush1.bf16.msra.mxu1 %v3140_v15  ;;  %v3177_v40 = vld [vmem:[%s4602_s1 + $0x144] ss:$16 sps:$4 sm:$0xff]   ;;  %v3179_v41 = vld [vmem:[%s4602_s1 + $0x14c] ss:$16 sps:$4 sm:$0xff]   ;;  %s3066_s29 = sshll.u32 %s4615_s16, 3  ;;  %s3067_s8 = sshll.u32 %s4615_s16, 4 }
  0x14   : > { %2086 = vmatprep.subr.bf16.mxu0 %v3141_v16  ;;  %2291 = vmatprep.subr.bf16.mxu1 %v3143_v17  ;;  %v3181_v42 = vld [vmem:[%s4602_s1 + $0x140] ss:$16 sps:$4 sm:$0xff]   ;;  %v3182_v43 = vld [vmem:[%s4602_s1 + $0x148] ss:$16 sps:$4 sm:$0xff]   ;;  %v3183_v44 = vld [vmem:[%s4602_s1 + $0x164] ss:$16 sps:$4 sm:$0xff]   ;;  %s3740_s12 = scalar_lea.vmem %s4601_s0, %s3066_s29  ;;  %s4547_s10 = scalar_lea.vmem %s4605_s4, %s3067_s8 }
  0x15   : > { %v3185_v45 = vld [vmem:[%s4602_s1 + $0x16c] ss:$16 sps:$4 sm:$0xff]   ;;  %v3187_v46 = vld [vmem:[%s4602_s1 + $0x160] ss:$16 sps:$4 sm:$0xff]   ;;  %v3188_v48 = vld [vmem:[%s4602_s1 + $0x168] ss:$16 sps:$4 sm:$0xff]   ;;  %s205_s18 = scalar_lea.vmem %s4604_s3, %s3067_s8 }
  0x16   : > { %v3213_v47 = vld [vmem:[%s3740_s12] ss:$0 sps:$4 sm:$0x77]   ;;  %v3189_v49 = vld [vmem:[%s4602_s1 + $0x184] ss:$16 sps:$4 sm:$0xff]   ;;  %v220_v0 = vand.u32 1, %v3767_v58 }
  0x17   : > { %2087 = vmatpush1.bf16.msra.mxu0 %v3145_v18  ;;  %2292 = vmatpush1.bf16.msra.mxu1 %v3146_v19  ;;  %v3191_v51 = vld [vmem:[%s4602_s1 + $0x18c] ss:$16 sps:$4 sm:$0xff]   ;;  %v268_v52 = vshrl.u32 %v3213_v47, 16  ;;  %v270_v53 = vshll.u32 %v3213_v47, 16  ;;  %v3193_v54 = vld [vmem:[%s4602_s1 + $0x180] ss:$16 sps:$4 sm:$0xff]  }
  0x18   : > { %2088 = vmatprep.subr.bf16.mxu0 %v3147_v20  ;;  %2293 = vmatprep.subr.bf16.mxu1 %v3149_v21  ;;  %v3194_v55 = vld [vmem:[%s4602_s1 + $0x188] ss:$16 sps:$4 sm:$0xff]   ;;  %v3195_v57 = vld [vmem:[%s4602_s1 + $0x1a4] ss:$16 sps:$4 sm:$0xff]   ;;  %v3197_v59 = vld [vmem:[%s4602_s1 + $0x1ac] ss:$16 sps:$4 sm:$0xff]  }
  0x19   : > { %v272_v56 = vrot.slane %v270_v53, 1  ;;  %v3199_v61 = vld [vmem:[%s4602_s1 + $0x1a0] ss:$16 sps:$4 sm:$0xff]   ;;  %v3200_v62 = vld [vmem:[%s4602_s1 + $0x1a8] ss:$16 sps:$4 sm:$0xff]   ;;  %vm3796_vm0 = vcmp.ge.s32.totalorder %v220_v0, 1 }
  0x1a   : > { %v3201_v63 = vld [vmem:[%s4602_s1 + $0x1c4] ss:$16 sps:$4 sm:$0xff]   ;;  %v3203_v1 = vld [vmem:[%s4602_s1 + $0x1cc] ss:$16 sps:$4 sm:$0xff]   ;;  %v3205_v2 = vld [vmem:[%s4602_s1 + $0x1c0] ss:$16 sps:$4 sm:$0xff]  }
  0x1b   : > { %2089 = vmatpush1.bf16.msra.mxu0 %v3151_v22  ;;  %2294 = vmatpush1.bf16.msra.mxu1 %v3152_v23  ;;  %v273_v60 = vor.u32 %v272_v56, %v268_v52  ;;  %v3206_v3 = vld [vmem:[%s4602_s1 + $0x1c8] ss:$16 sps:$4 sm:$0xff]   ;;  %v3207_v4 = vld [vmem:[%s4602_s1 + $0x1e4] ss:$16 sps:$4 sm:$0xff]   ;;  %v3209_v6 = vld [vmem:[%s4602_s1 + $0x1ec] ss:$16 sps:$4 sm:$0xff]  }
  0x1c   : > { %2090 = vmatprep.subr.bf16.mxu0 %v3153_v24  ;;  %2295 = vmatprep.subr.bf16.mxu1 %v3155_v25  ;;  %v3211_v7 = vld [vmem:[%s4602_s1 + $0x1e0] ss:$16 sps:$4 sm:$0xff]   ;;  %v3212_v8 = vld [vmem:[%s4602_s1 + $0x1e8] ss:$16 sps:$4 sm:$0xff]   ;;  %v3216_v9 = vld [vmem:[%s4602_s1 + $0x204] ss:$16 sps:$4 sm:$0xff]  }
  0x1d   : > { %2110 = vmatprep.mubr.bf16.mxu0 %v273_v60  ;;  %2315 = vmatprep.mubr.bf16.mxu1 %v273_v60  ;;  %vm233_vm1 = vmpackc.low %vm3796_vm0, %vm3796_vm0  ;;  %v3219_v10 = vld [vmem:[%s4602_s1 + $0x20c] ss:$16 sps:$4 sm:$0xff]   ;;  %v230_v11 = vld [vmem:[%s3740_s12] sm:$0x3]  ;;  %vm3962_vm3 = vcmp.lt.s32.totalorder %v220_v0, 1  ;;  %vm2504_vm10 = vcmask 1042433  }
  0x1e   : > { %v3214_v12 = vld [vmem:[%s4602_s1 + $0x200] ss:$16 sps:$4 sm:$0xff]   ;;  %v3217_v13 = vld [vmem:[%s4602_s1 + $0x208] ss:$16 sps:$4 sm:$0xff]   ;;  %v234_v14 = vsel %vm233_vm1, %v230_v11, 0  ;;  %vm239_vm4 = vmpackc.low %vm3962_vm3, %vm3962_vm3  ;;  %vm2507_vm12 = vcmask 1046533  }
  0x1f   : > { %2091 = vmatpush1.bf16.msra.mxu0 %v3157_v26  ;;  %2296 = vmatpush1.bf16.msra.mxu1 %v3158_v27  ;;  %v3222_v15 = vld [vmem:[%s4602_s1 + $0x224] ss:$16 sps:$4 sm:$0xff]   ;;  %v3225_v16 = vld [vmem:[%s4602_s1 + $0x22c] ss:$16 sps:$4 sm:$0xff]   ;;  %v3220_v17 = vld [vmem:[%s4602_s1 + $0x220] ss:$16 sps:$4 sm:$0xff]  }
  0x20   : > { %2092 = vmatprep.subr.bf16.mxu0 %v3159_v28  ;;  %2297 = vmatprep.subr.bf16.mxu1 %v3161_v29  ;;  %v3223_v18 = vld [vmem:[%s4602_s1 + $0x228] ss:$16 sps:$4 sm:$0xff]   ;;  %v3228_v19 = vld [vmem:[%s4602_s1 + $0x244] ss:$16 sps:$4 sm:$0xff]   ;;  %v3231_v20 = vld [vmem:[%s4602_s1 + $0x24c] ss:$16 sps:$4 sm:$0xff]  }
  0x21   : > { %v3226_v21 = vld [vmem:[%s4602_s1 + $0x240] ss:$16 sps:$4 sm:$0xff]   ;;  %v3229_v22 = vld [vmem:[%s4602_s1 + $0x248] ss:$16 sps:$4 sm:$0xff]   ;;  %v3234_v23 = vld [vmem:[%s4602_s1 + $0x264] ss:$16 sps:$4 sm:$0xff]  }
  0x22   : > { %v3237_v24 = vld [vmem:[%s4602_s1 + $0x26c] ss:$16 sps:$4 sm:$0xff]   ;;  %v3232_v25 = vld [vmem:[%s4602_s1 + $0x260] ss:$16 sps:$4 sm:$0xff]   ;;  %v3235_v26 = vld [vmem:[%s4602_s1 + $0x268] ss:$16 sps:$4 sm:$0xff]  }
  0x23   : > { %2093 = vmatpush1.bf16.msra.mxu0 %v3163_v30  ;;  %2298 = vmatpush1.bf16.msra.mxu1 %v3164_v31  ;;  %v3240_v27 = vld [vmem:[%s4602_s1 + $0x284] ss:$16 sps:$4 sm:$0xff]   ;;  %v3243_v28 = vld [vmem:[%s4602_s1 + $0x28c] ss:$16 sps:$4 sm:$0xff]   ;;  %v3560_v29 = vmov 0  }
  0x24   : > { %2094 = vmatprep.subr.bf16.mxu0 %v3165_v32  ;;  %2299 = vmatprep.subr.bf16.mxu1 %v3167_v33  ;;  %v3878_v30 = vsel %vm233_vm1, 65537, %v3560_v29  ;;  %v3238_v31 = vld [vmem:[%s4602_s1 + $0x280] ss:$16 sps:$4 sm:$0xff]   ;;  %v3241_v32 = vld [vmem:[%s4602_s1 + $0x288] ss:$16 sps:$4 sm:$0xff]   ;;  %2502 = vst [vmem:[%s4547_s10] sm:$0x11] %v3560_v29 }
  0x25   : > { %v3246_v33 = vld [vmem:[%s4602_s1 + $0x2a4] ss:$16 sps:$4 sm:$0xff]   ;;  %v3256_v47 = vld [vmem:[%s4602_s1 + $0x2e0] ss:$16 sps:$4 sm:$0xff]   ;;  %v3265_v53 = vld [vmem:[%s4602_s1 + $0x308] ss:$16 sps:$4 sm:$0xff]  }
  0x26   : > { %v3262_v52 = vld [vmem:[%s4602_s1 + $0x300] ss:$16 sps:$4 sm:$0xff]   ;;  %v3279_v60 = vld [vmem:[%s4602_s1 + $0x34c] ss:$16 sps:$4 sm:$0xff]   ;;  %2503 = vst [vmem:[%s4547_s10 + $0x8] sm:$0x11] %v3560_v29 }
  0x27   : > { %2095 = vmatpush1.bf16.msra.mxu0 %v3169_v34  ;;  %2300 = vmatpush1.bf16.msra.mxu1 %v3170_v35  ;;  %v3249_v34 = vld [vmem:[%s4602_s1 + $0x2ac] ss:$16 sps:$4 sm:$0xff]   ;;  %v245_v35 = vrot.slane %v3878_v30, 7  ;;  %v3268_v56 = vld [vmem:[%s4602_s1 + $0x320] ss:$16 sps:$4 sm:$0xff]   ;;  %vm2575_vm1 = vcmask 1041408  }
  0x28   : > { %2096 = vmatprep.subr.bf16.mxu0 %v3171_v36  ;;  %2301 = vmatprep.subr.bf16.mxu1 %v3173_v37  ;;  %v3244_v36 = vld [vmem:[%s4602_s1 + $0x2a0] ss:$16 sps:$4 sm:$0xff]   ;;  %v3247_v37 = vld [vmem:[%s4602_s1 + $0x2a8] ss:$16 sps:$4 sm:$0xff]   ;;  %v3291_v5 = vld [vmem:[%s4602_s1 + $0x38c] ss:$16 sps:$4 sm:$0xff]  }
  0x29   : > { %vm246_vm2 = vcmp.ne.s16.totalorder %v245_v35, 0  ;;  %v3280_v0 = vld [vmem:[%s4602_s1 + $0x360] ss:$16 sps:$4 sm:$0xff]   ;;  %v3318_v35 = vld [vmem:[%s4602_s1 + $0x424] ss:$16 sps:$4 sm:$0xff]  }
  0x2a   : > { %vm2505_vm11 = vsmask.f32 2310  ;;  %vm2508_vm13 = vsmask.f32 6422  ;;  %vm2653_vm3 = vsmask.f32 1280 }
  0x2b   : > { %2097 = vmatpush1.bf16.msra.mxu0 %v3175_v38  ;;  %2302 = vmatpush1.bf16.msra.mxu1 %v3176_v39  ;;  %v3252_v38 = vld [vmem:[%s4602_s1 + $0x2c4] ss:$16 sps:$4 sm:$0xff]   ;;  %v3255_v39 = vld [vmem:[%s4602_s1 + $0x2cc] ss:$16 sps:$4 sm:$0xff]   ;;  %vm2506_vm14 = vmand %vm2504_vm10, %vm2505_vm11 }
  0x2c   : > { %2098 = vmatprep.subr.bf16.mxu0 %v3177_v40  ;;  %2303 = vmatprep.subr.bf16.mxu1 %v3179_v41  ;;  %v3250_v40 = vld [vmem:[%s4602_s1 + $0x2c0] ss:$16 sps:$4 sm:$0xff]   ;;  %v3253_v41 = vld [vmem:[%s4602_s1 + $0x2c8] ss:$16 sps:$4 sm:$0xff]   ;;  %vm2509_vm15 = vmand %vm2507_vm12, %vm2508_vm13 }
  0x2d   : > { %vm2510_vm0 = vmor %vm2509_vm15, %vm2506_vm14 }
  0x2f   : > { %2099 = vmatpush1.bf16.msra.mxu0 %v3181_v42  ;;  %2304 = vmatpush1.bf16.msra.mxu1 %v3182_v43  ;;  %v3912_v42 = vld [vmem:[%s3740_s12] sm:$0x6]  ;;  %v3258_v43 = vld [vmem:[%s4602_s1 + $0x2e4] ss:$16 sps:$4 sm:$0xff]  }
  0x30   : > { %2100 = vmatprep.subr.bf16.mxu0 %v3183_v44  ;;  %2305 = vmatprep.subr.bf16.mxu1 %v3185_v45  ;;  %v3261_v44 = vld [vmem:[%s4602_s1 + $0x2ec] ss:$16 sps:$4 sm:$0xff]   ;;  %v247_v45 = vsel %vm246_vm2, %v3912_v42, 0  ;;  %vm2652_vm2 = vcmask 1041409  }
  0x33   : > { %2101 = vmatpush1.bf16.msra.mxu0 %v3187_v46  ;;  %2306 = vmatpush1.bf16.msra.mxu1 %v3188_v48  ;;  %v2766_v46 = vcombine.low %v247_v45, %v247_v45  ;;  %v3259_v48 = vld [vmem:[%s4602_s1 + $0x2e8] ss:$16 sps:$4 sm:$0xff]   ;;  %v3333_v45 = vld [vmem:[%s4602_s1 + $0x46c] ss:$16 sps:$4 sm:$0xff]  }
  0x34   : > { %2102 = vmatprep.subr.bf16.mxu0 %v3189_v49  ;;  %2307 = vmatprep.subr.bf16.mxu1 %v3191_v51  ;;  %v3264_v49 = vld [vmem:[%s4602_s1 + $0x304] ss:$16 sps:$4 sm:$0xff]   ;;  %v3267_v51 = vld [vmem:[%s4602_s1 + $0x30c] ss:$16 sps:$4 sm:$0xff]  }
  0x35   : > { %v283_v50 = vrot.slane %v2766_v46, 1  ;;  %v3328_v46 = vld [vmem:[%s4602_s1 + $0x460] ss:$16 sps:$4 sm:$0xff]  }
  0x37   : > { %2103 = vmatpush1.bf16.msra.mxu0 %v3193_v54  ;;  %2308 = vmatpush1.bf16.msra.mxu1 %v3194_v55  ;;  %v3270_v54 = vld [vmem:[%s4602_s1 + $0x324] ss:$16 sps:$4 sm:$0xff]   ;;  %v3273_v55 = vld [vmem:[%s4602_s1 + $0x32c] ss:$16 sps:$4 sm:$0xff]  }
  0x38   : > { %2104 = vmatprep.subr.bf16.mxu0 %v3195_v57  ;;  %2309 = vmatprep.subr.bf16.mxu1 %v3197_v59  ;;  %v3271_v57 = vld [vmem:[%s4602_s1 + $0x328] ss:$16 sps:$4 sm:$0xff]   ;;  %v3276_v59 = vld [vmem:[%s4602_s1 + $0x344] ss:$16 sps:$4 sm:$0xff]  }
  0x3b   : > { %2105 = vmatpush1.bf16.msra.mxu0 %v3199_v61  ;;  %2310 = vmatpush1.bf16.msra.mxu1 %v3200_v62  ;;  %v3274_v61 = vld [vmem:[%s4602_s1 + $0x340] ss:$16 sps:$4 sm:$0xff]   ;;  %v3357_v62 = vld [vmem:[%s4602_s1 + $0x4ec] ss:$16 sps:$4 sm:$0xff]  }
  0x3c   : > { %2106 = vmatprep.subr.bf16.mxu0 %v3201_v63  ;;  %2311 = vmatprep.subr.bf16.mxu1 %v3203_v1  ;;  %v3277_v63 = vld [vmem:[%s4602_s1 + $0x348] ss:$16 sps:$4 sm:$0xff]   ;;  %v3282_v1 = vld [vmem:[%s4602_s1 + $0x364] ss:$16 sps:$4 sm:$0xff]  }
  0x3f   : > { %2107 = vmatpush1.bf16.msra.mxu0 %v3205_v2  ;;  %2312 = vmatpush1.bf16.msra.mxu1 %v3206_v3  ;;  %v3285_v2 = vld [vmem:[%s4602_s1 + $0x36c] ss:$16 sps:$4 sm:$0xff]   ;;  %v3283_v3 = vld [vmem:[%s4602_s1 + $0x368] ss:$16 sps:$4 sm:$0xff]  }
  0x40   : > { %2108 = vmatprep.subr.bf16.mxu0 %v3207_v4  ;;  %2313 = vmatprep.subr.bf16.mxu1 %v3209_v6  ;;  %v3288_v4 = vld [vmem:[%s4602_s1 + $0x384] ss:$16 sps:$4 sm:$0xff]   ;;  %v3991_v6 = vsel %vm239_vm4, 65537, %v3560_v29  ;;  %vm2655_vm4 = vcmask 1045509  }
  0x41   : > { %v241_v11 = vrot.slane %v3991_v6, 7 }
  0x43   : > { %2109 = vmatpush1.bf16.msra.mxu0 %v3211_v7  ;;  %2314 = vmatpush1.bf16.msra.mxu1 %v3212_v8  ;;  %v3286_v7 = vld [vmem:[%s4602_s1 + $0x380] ss:$16 sps:$4 sm:$0xff]   ;;  %v3289_v8 = vld [vmem:[%s4602_s1 + $0x388] ss:$16 sps:$4 sm:$0xff]   ;;  %vm242_vm5 = vcmp.ne.s16.totalorder %v241_v11, 0 }
  0x44   : > { %2119 = vmatprep.subr.bf16.mxu0 %v3216_v9  ;;  %2324 = vmatprep.subr.bf16.mxu1 %v3219_v10  ;;  %v3294_v9 = vld [vmem:[%s4602_s1 + $0x3a4] ss:$16 sps:$4 sm:$0xff]   ;;  %v3297_v10 = vld [vmem:[%s4602_s1 + $0x3ac] ss:$16 sps:$4 sm:$0xff]  }
  0x45   : > { %v3372_v11 = vld [vmem:[%s4602_s1 + $0x544] ss:$16 sps:$4 sm:$0xff]  }
  0x46   : > { %2111 = vmatmul.mubr.bf16.vlgmr.msra.gmra.mrb[0].mxu0 %v234_v14  ;;  %2316 = vmatmul.mubr.bf16.vlgmr.msra.gmra.mrb[0].mxu1 %v234_v14  ;;  %v3295_v14 = vld [vmem:[%s4602_s1 + $0x3a8] ss:$16 sps:$4 sm:$0xff]  }
  0x47   : > { %2120 = vmatpush1.bf16.msra.mxu0 %v3214_v12  ;;  %2325 = vmatpush1.bf16.msra.mxu1 %v3217_v13  ;;  %v3292_v12 = vld [vmem:[%s4602_s1 + $0x3a0] ss:$16 sps:$4 sm:$0xff]   ;;  %v250_v13 = vrot.slane %v3991_v6, 6 }
  0x48   : > { %2121 = vmatprep.subr.bf16.mxu0 %v3222_v15  ;;  %2326 = vmatprep.subr.bf16.mxu1 %v3225_v16  ;;  %v3300_v15 = vld [vmem:[%s4602_s1 + $0x3c4] ss:$16 sps:$4 sm:$0xff]   ;;  %v3303_v16 = vld [vmem:[%s4602_s1 + $0x3cc] ss:$16 sps:$4 sm:$0xff]  }
  0x49   : > { %2151 = vmatprep.mubr.bf16.mxu0 %v283_v50  ;;  %2356 = vmatprep.mubr.bf16.mxu1 %v283_v50  ;;  %vm251_vm6 = vcmp.ne.s16.totalorder %v250_v13, 0  ;;  %v3334_v50 = vld [vmem:[%s4602_s1 + $0x480] ss:$16 sps:$4 sm:$0xff]  }
  0x4a   : > { %v3370_v13 = vld [vmem:[%s4602_s1 + $0x540] ss:$16 sps:$4 sm:$0xff]  }
  0x4b   : > { %2122 = vmatpush1.bf16.msra.mxu0 %v3220_v17  ;;  %2327 = vmatpush1.bf16.msra.mxu1 %v3223_v18  ;;  %v4020_v17 = vld [vmem:[%s3740_s12] sm:$0xc] }
  0x4c   : > { %2123 = vmatprep.subr.bf16.mxu0 %v3228_v19  ;;  %2328 = vmatprep.subr.bf16.mxu1 %v3231_v20  ;;  %v3298_v18 = vld [vmem:[%s4602_s1 + $0x3c0] ss:$16 sps:$4 sm:$0xff]   ;;  %v3301_v19 = vld [vmem:[%s4602_s1 + $0x3c8] ss:$16 sps:$4 sm:$0xff]   ;;  %v3306_v20 = vld [vmem:[%s4602_s1 + $0x3e4] ss:$16 sps:$4 sm:$0xff]  }
  0x4f   : > { %2124 = vmatpush1.bf16.msra.mxu0 %v3226_v21  ;;  %2329 = vmatpush1.bf16.msra.mxu1 %v3229_v22  ;;  %v243_v21 = vsel %vm242_vm5, %v3912_v42, 0  ;;  %v3309_v22 = vld [vmem:[%s4602_s1 + $0x3ec] ss:$16 sps:$4 sm:$0xff]   ;;  %v3322_v42 = vld [vmem:[%s4602_s1 + $0x440] ss:$16 sps:$4 sm:$0xff]  }
  0x50   : > { %2125 = vmatprep.subr.bf16.mxu0 %v3234_v23  ;;  %2330 = vmatprep.subr.bf16.mxu1 %v3237_v24  ;;  %v3304_v23 = vld [vmem:[%s4602_s1 + $0x3e0] ss:$16 sps:$4 sm:$0xff]   ;;  %v2765_v24 = vcombine.low %v243_v21, %v243_v21  ;;  %v3384_v21 = vld [vmem:[%s4602_s1 + $0x584] ss:$16 sps:$4 sm:$0xff]   ;;  %vm2656_vm5 = vsmask.f32 5376 }
  0x53   : > { %2126 = vmatpush1.bf16.msra.mxu0 %v3232_v25  ;;  %2331 = vmatpush1.bf16.msra.mxu1 %v3235_v26  ;;  %v252_v25 = vsel %vm251_vm6, %v4020_v17, 0  ;;  %v3307_v26 = vld [vmem:[%s4602_s1 + $0x3e8] ss:$16 sps:$4 sm:$0xff]   ;;  %vm4580_vm6 = vmand %vm2652_vm2, %vm2653_vm3 }
  0x54   : > { %2127 = vmatprep.subr.bf16.mxu0 %v3240_v27  ;;  %2332 = vmatprep.subr.bf16.mxu1 %v3243_v28  ;;  %v3312_v27 = vld [vmem:[%s4602_s1 + $0x404] ss:$16 sps:$4 sm:$0xff]   ;;  %v3315_v28 = vld [vmem:[%s4602_s1 + $0x40c] ss:$16 sps:$4 sm:$0xff]  }
  0x57   : > { %2128 = vmatpush1.bf16.msra.mxu0 %v3238_v31  ;;  %2333 = vmatpush1.bf16.msra.mxu1 %v3241_v32  ;;  %v2768_v31 = vcombine.low %v252_v25, %v252_v25  ;;  %v3310_v32 = vld [vmem:[%s4602_s1 + $0x400] ss:$16 sps:$4 sm:$0xff]   ;;  %v3385_v25 = vld [vmem:[%s4602_s1 + $0x588] ss:$16 sps:$4 sm:$0xff]  }
  0x58   : > { %2129 = vmatprep.subr.bf16.mxu0 %v3246_v33  ;;  %2334 = vmatprep.subr.bf16.mxu1 %v3249_v34  ;;  %v278_v33 = vrot.slane %v2765_v24, 1  ;;  %v3313_v34 = vld [vmem:[%s4602_s1 + $0x408] ss:$16 sps:$4 sm:$0xff]   ;;  %v256_v24 = vld [vmem:[%s3740_s12 + $0x4] sm:$0x1] }
  0x5b   : > { %2130 = vmatpush1.bf16.msra.mxu0 %v3244_v36  ;;  %2335 = vmatpush1.bf16.msra.mxu1 %v3247_v37  ;;  %v3321_v36 = vld [vmem:[%s4602_s1 + $0x42c] ss:$16 sps:$4 sm:$0xff]   ;;  %v300_v37 = vrot.slane %v2768_v31, 2  ;;  %v3388_v31 = vld [vmem:[%s4602_s1 + $0x5a0] ss:$16 sps:$4 sm:$0xff]  }
  0x5c   : > { %2131 = vmatprep.subr.bf16.mxu0 %v3252_v38  ;;  %2336 = vmatprep.subr.bf16.mxu1 %v3255_v39  ;;  %v3316_v38 = vld [vmem:[%s4602_s1 + $0x420] ss:$16 sps:$4 sm:$0xff]   ;;  %v3319_v39 = vld [vmem:[%s4602_s1 + $0x428] ss:$16 sps:$4 sm:$0xff]  }
  0x5f   : > { %2132 = vmatpush1.bf16.msra.mxu0 %v3250_v40  ;;  %2337 = vmatpush1.bf16.msra.mxu1 %v3253_v41  ;;  %v3324_v40 = vld [vmem:[%s4602_s1 + $0x444] ss:$16 sps:$4 sm:$0xff]   ;;  %v3327_v41 = vld [vmem:[%s4602_s1 + $0x44c] ss:$16 sps:$4 sm:$0xff]  }
  0x60   : > { %2133 = vmatprep.subr.bf16.mxu0 %v3258_v43  ;;  %2338 = vmatprep.subr.bf16.mxu1 %v3261_v44  ;;  %v3325_v43 = vld [vmem:[%s4602_s1 + $0x448] ss:$16 sps:$4 sm:$0xff]   ;;  %v3330_v44 = vld [vmem:[%s4602_s1 + $0x464] ss:$16 sps:$4 sm:$0xff]  }
  0x63   : > { %2134 = vmatpush1.bf16.msra.mxu0 %v3256_v47  ;;  %2339 = vmatpush1.bf16.msra.mxu1 %v3259_v48  ;;  %v3331_v47 = vld [vmem:[%s4602_s1 + $0x468] ss:$16 sps:$4 sm:$0xff]   ;;  %v3336_v48 = vld [vmem:[%s4602_s1 + $0x484] ss:$16 sps:$4 sm:$0xff]  }
  0x64   : > { %2135 = vmatprep.subr.bf16.mxu0 %v3264_v49  ;;  %2340 = vmatprep.subr.bf16.mxu1 %v3267_v51  ;;  %v3339_v49 = vld [vmem:[%s4602_s1 + $0x48c] ss:$16 sps:$4 sm:$0xff]   ;;  %v3337_v51 = vld [vmem:[%s4602_s1 + $0x488] ss:$16 sps:$4 sm:$0xff]  }
  0x67   : > { %2136 = vmatpush1.bf16.msra.mxu0 %v3262_v52  ;;  %2341 = vmatpush1.bf16.msra.mxu1 %v3265_v53  ;;  %v3342_v52 = vld [vmem:[%s4602_s1 + $0x4a4] ss:$16 sps:$4 sm:$0xff]   ;;  %v3345_v53 = vld [vmem:[%s4602_s1 + $0x4ac] ss:$16 sps:$4 sm:$0xff]  }
  0x68   : > { %2137 = vmatprep.subr.bf16.mxu0 %v3270_v54  ;;  %2342 = vmatprep.subr.bf16.mxu1 %v3273_v55  ;;  %v3340_v54 = vld [vmem:[%s4602_s1 + $0x4a0] ss:$16 sps:$4 sm:$0xff]   ;;  %v3343_v55 = vld [vmem:[%s4602_s1 + $0x4a8] ss:$16 sps:$4 sm:$0xff]  }
  0x6b   : > { %2138 = vmatpush1.bf16.msra.mxu0 %v3268_v56  ;;  %2343 = vmatpush1.bf16.msra.mxu1 %v3271_v57  ;;  %v3348_v56 = vld [vmem:[%s4602_s1 + $0x4c4] ss:$16 sps:$4 sm:$0xff]   ;;  %v3351_v57 = vld [vmem:[%s4602_s1 + $0x4cc] ss:$16 sps:$4 sm:$0xff]  }
  0x6c   : > { %2139 = vmatprep.subr.bf16.mxu0 %v3276_v59  ;;  %2344 = vmatprep.subr.bf16.mxu1 %v3279_v60  ;;  %v3346_v59 = vld [vmem:[%s4602_s1 + $0x4c0] ss:$16 sps:$4 sm:$0xff]   ;;  %v3349_v60 = vld [vmem:[%s4602_s1 + $0x4c8] ss:$16 sps:$4 sm:$0xff]  }
  0x6f   : > { %2140 = vmatpush1.bf16.msra.mxu0 %v3274_v61  ;;  %2345 = vmatpush1.bf16.msra.mxu1 %v3277_v63  ;;  %v3354_v61 = vld [vmem:[%s4602_s1 + $0x4e4] ss:$16 sps:$4 sm:$0xff]   ;;  %v3352_v63 = vld [vmem:[%s4602_s1 + $0x4e0] ss:$16 sps:$4 sm:$0xff]  }
  0x70   : > { %2141 = vmatprep.subr.bf16.mxu0 %v3282_v1  ;;  %2346 = vmatprep.subr.bf16.mxu1 %v3285_v2  ;;  %v3355_v1 = vld [vmem:[%s4602_s1 + $0x4e8] ss:$16 sps:$4 sm:$0xff]   ;;  %v3360_v2 = vld [vmem:[%s4602_s1 + $0x504] ss:$16 sps:$4 sm:$0xff]  }
  0x73   : > { %2142 = vmatpush1.bf16.msra.mxu0 %v3280_v0  ;;  %2347 = vmatpush1.bf16.msra.mxu1 %v3283_v3  ;;  %v3363_v0 = vld [vmem:[%s4602_s1 + $0x50c] ss:$16 sps:$4 sm:$0xff]   ;;  %v3358_v3 = vld [vmem:[%s4602_s1 + $0x500] ss:$16 sps:$4 sm:$0xff]  }
  0x74   : > { %2143 = vmatprep.subr.bf16.mxu0 %v3288_v4  ;;  %2348 = vmatprep.subr.bf16.mxu1 %v3291_v5  ;;  %v3361_v4 = vld [vmem:[%s4602_s1 + $0x508] ss:$16 sps:$4 sm:$0xff]   ;;  %v3366_v5 = vld [vmem:[%s4602_s1 + $0x524] ss:$16 sps:$4 sm:$0xff]  }
  0x77   : > { %2144 = vmatpush1.bf16.msra.mxu0 %v3286_v7  ;;  %2349 = vmatpush1.bf16.msra.mxu1 %v3289_v8  ;;  %v3369_v7 = vld [vmem:[%s4602_s1 + $0x52c] ss:$16 sps:$4 sm:$0xff]   ;;  %v3364_v8 = vld [vmem:[%s4602_s1 + $0x520] ss:$16 sps:$4 sm:$0xff]  }
  0x78   : > { %2145 = vmatprep.subr.bf16.mxu0 %v3294_v9  ;;  %2350 = vmatprep.subr.bf16.mxu1 %v3297_v10  ;;  %v3367_v9 = vld [vmem:[%s4602_s1 + $0x528] ss:$16 sps:$4 sm:$0xff]   ;;  %v258_v10 = vrot.slane %v3991_v6, 5  ;;  %v3424_v6 = vld [vmem:[%s4602_s1 + $0x64c] ss:$16 sps:$4 sm:$0xff]  }
  0x7a   : > { %vm260_vm8 = vcmp.ne.s16.totalorder %v258_v10, 0 }
  0x7b   : > { %2146 = vmatpush1.bf16.msra.mxu0 %v3292_v12  ;;  %2351 = vmatpush1.bf16.msra.mxu1 %v3295_v14  ;;  %v3375_v12 = vld [vmem:[%s4602_s1 + $0x54c] ss:$16 sps:$4 sm:$0xff]   ;;  %v3373_v14 = vld [vmem:[%s4602_s1 + $0x548] ss:$16 sps:$4 sm:$0xff]  }
  0x7c   : > { %2147 = vmatprep.subr.bf16.mxu0 %v3300_v15  ;;  %2352 = vmatprep.subr.bf16.mxu1 %v3303_v16  ;;  %v3378_v15 = vld [vmem:[%s4602_s1 + $0x564] ss:$16 sps:$4 sm:$0xff]   ;;  %v3381_v16 = vld [vmem:[%s4602_s1 + $0x56c] ss:$16 sps:$4 sm:$0xff]  }
  0x7f   : > { %2148 = vmatpush1.bf16.msra.mxu0 %v3298_v18  ;;  %2353 = vmatpush1.bf16.msra.mxu1 %v3301_v19  ;;  %v259_v18 = vrot.slane %v258_v10, 4  ;;  %v3376_v19 = vld [vmem:[%s4602_s1 + $0x560] ss:$16 sps:$4 sm:$0xff]   ;;  %v3436_v10 = vld [vmem:[%s4602_s1 + $0x68c] ss:$16 sps:$4 sm:$0xff]  }
  0x80   : > { %2149 = vmatprep.subr.bf16.mxu0 %v3306_v20  ;;  %2354 = vmatprep.subr.bf16.mxu1 %v3309_v22  ;;  %v3379_v20 = vld [vmem:[%s4602_s1 + $0x568] ss:$16 sps:$4 sm:$0xff]   ;;  %v3387_v22 = vld [vmem:[%s4602_s1 + $0x58c] ss:$16 sps:$4 sm:$0xff]  }
  0x81   : > { %vm261_vm7 = vcmp.ne.s16.totalorder %v259_v18, 0  ;;  %v3445_v18 = vld [vmem:[%s4602_s1 + $0x6c4] ss:$16 sps:$4 sm:$0xff]  }
  0x83   : > { %2150 = vmatpush1.bf16.msra.mxu0 %v3304_v23  ;;  %2355 = vmatpush1.bf16.msra.mxu1 %v3307_v26  ;;  %v3382_v23 = vld [vmem:[%s4602_s1 + $0x580] ss:$16 sps:$4 sm:$0xff]   ;;  %v3390_v26 = vld [vmem:[%s4602_s1 + $0x5a4] ss:$16 sps:$4 sm:$0xff]  }
  0x84   : > { %2160 = vmatprep.subr.bf16.mxu0 %v3312_v27  ;;  %2365 = vmatprep.subr.bf16.mxu1 %v3315_v28  ;;  %v4205_v27 = vsel %vm261_vm7, %v256_v24, 0  ;;  %v3393_v28 = vld [vmem:[%s4602_s1 + $0x5ac] ss:$16 sps:$4 sm:$0xff]   ;;  %vm4586_vm7 = vmand %vm2655_vm4, %vm2656_vm5 }
  0x86   : > { %2152 = vmatmul.mubr.bf16.vlgmr.msra.gmra.mrb[0].mxu0 %v278_v33  ;;  %2357 = vmatmul.mubr.bf16.vlgmr.msra.gmra.mrb[0].mxu1 %v278_v33  ;;  %v3391_v33 = vld [vmem:[%s4602_s1 + $0x5a8] ss:$16 sps:$4 sm:$0xff]  }
  0x87   : > { %2161 = vmatpush1.bf16.msra.mxu0 %v3310_v32  ;;  %2366 = vmatpush1.bf16.msra.mxu1 %v3313_v34  ;;  %v3412_v32 = vld [vmem:[%s3740_s12] ss:$0 sps:$4 sm:$0xee]   ;;  %v3396_v34 = vld [vmem:[%s4602_s1 + $0x5c4] ss:$16 sps:$4 sm:$0xff]  }
  0x88   : > { %2162 = vmatprep.subr.bf16.mxu0 %v3318_v35  ;;  %2367 = vmatprep.subr.bf16.mxu1 %v3321_v36  ;;  %v3399_v35 = vld [vmem:[%s4602_s1 + $0x5cc] ss:$16 sps:$4 sm:$0xff]   ;;  %v2770_v36 = vcombine.low %v4020_v17, %v256_v24  ;;  %v3449_v24 = vld [vmem:[%s4602_s1 + $0x6e0] ss:$16 sps:$4 sm:$0xff]  }
  0x89   : > { %2192 = vmatprep.mubr.bf16.mxu0 %v300_v37  ;;  %2397 = vmatprep.mubr.bf16.mxu1 %v300_v37  ;;  %v3394_v37 = vld [vmem:[%s4602_s1 + $0x5c0] ss:$16 sps:$4 sm:$0xff]  }
  0x8b   : > { %2163 = vmatpush1.bf16.msra.mxu0 %v3316_v38  ;;  %2368 = vmatpush1.bf16.msra.mxu1 %v3319_v39  ;;  %v289_v38 = vshrl.u32 %v3412_v32, 16  ;;  %v292_v39 = vshll.u32 %v3412_v32, 16  ;;  %v3463_v32 = vld [vmem:[%s4602_s1 + $0x724] ss:$16 sps:$4 sm:$0xff]  }
  0x8c   : > { %2164 = vmatprep.subr.bf16.mxu0 %v3324_v40  ;;  %2369 = vmatprep.subr.bf16.mxu1 %v3327_v41  ;;  %v3397_v40 = vld [vmem:[%s4602_s1 + $0x5c8] ss:$16 sps:$4 sm:$0xff]   ;;  %v3402_v41 = vld [vmem:[%s4602_s1 + $0x5e4] ss:$16 sps:$4 sm:$0xff]  }
  0x8f   : > { %2165 = vmatpush1.bf16.msra.mxu0 %v3322_v42  ;;  %2370 = vmatpush1.bf16.msra.mxu1 %v3325_v43  ;;  %v3405_v42 = vld [vmem:[%s4602_s1 + $0x5ec] ss:$16 sps:$4 sm:$0xff]   ;;  %v313_v43 = vshrl.u32 %v2770_v36, 16 }
  0x90   : > { %2166 = vmatprep.subr.bf16.mxu0 %v3330_v44  ;;  %2371 = vmatprep.subr.bf16.mxu1 %v3333_v45  ;;  %v316_v44 = vshll.u32 %v2770_v36, 16  ;;  %v3400_v45 = vld [vmem:[%s4602_s1 + $0x5e0] ss:$16 sps:$4 sm:$0xff]   ;;  %v3469_v36 = vld [vmem:[%s4602_s1 + $0x744] ss:$16 sps:$4 sm:$0xff]  }
  0x93   : > { %2167 = vmatpush1.bf16.msra.mxu0 %v3328_v46  ;;  %2372 = vmatpush1.bf16.msra.mxu1 %v3331_v47  ;;  %v291_v46 = vrot.slane %v289_v38, 1  ;;  %v294_v47 = vrot.slane %v292_v39, 2  ;;  %v3467_v38 = vld [vmem:[%s4602_s1 + $0x740] ss:$16 sps:$4 sm:$0xff]   ;;  %v3470_v39 = vld [vmem:[%s4602_s1 + $0x748] ss:$16 sps:$4 sm:$0xff]  }
  0x94   : > { %2168 = vmatprep.subr.bf16.mxu0 %v3336_v48  ;;  %2373 = vmatprep.subr.bf16.mxu1 %v3339_v49  ;;  %v3403_v48 = vld [vmem:[%s4602_s1 + $0x5e8] ss:$16 sps:$4 sm:$0xff]   ;;  %v3408_v49 = vld [vmem:[%s4602_s1 + $0x604] ss:$16 sps:$4 sm:$0xff]  }
  0x97   : > { %2169 = vmatpush1.bf16.msra.mxu0 %v3334_v50  ;;  %2374 = vmatpush1.bf16.msra.mxu1 %v3337_v51  ;;  %v3411_v50 = vld [vmem:[%s4602_s1 + $0x60c] ss:$16 sps:$4 sm:$0xff]   ;;  %v315_v51 = vrot.slane %v313_v43, 2  ;;  %v3476_v43 = vld [vmem:[%s4602_s1 + $0x768] ss:$16 sps:$4 sm:$0xff]  }
  0x98   : > { %2170 = vmatprep.subr.bf16.mxu0 %v3342_v52  ;;  %2375 = vmatprep.subr.bf16.mxu1 %v3345_v53  ;;  %v318_v52 = vrot.slane %v316_v44, 3  ;;  %v3406_v53 = vld [vmem:[%s4602_s1 + $0x600] ss:$16 sps:$4 sm:$0xff]   ;;  %v3481_v44 = vld [vmem:[%s4602_s1 + $0x784] ss:$16 sps:$4 sm:$0xff]  }
  0x9b   : > { %2171 = vmatpush1.bf16.msra.mxu0 %v3340_v54  ;;  %2376 = vmatpush1.bf16.msra.mxu1 %v3343_v55  ;;  %v295_v54 = vor.u32 %v294_v47, %v291_v46  ;;  %v3409_v55 = vld [vmem:[%s4602_s1 + $0x608] ss:$16 sps:$4 sm:$0xff]   ;;  %v3479_v46 = vld [vmem:[%s4602_s1 + $0x780] ss:$16 sps:$4 sm:$0xff]  }
  0x9c   : > { %2172 = vmatprep.subr.bf16.mxu0 %v3348_v56  ;;  %2377 = vmatprep.subr.bf16.mxu1 %v3351_v57  ;;  %v3415_v56 = vld [vmem:[%s4602_s1 + $0x624] ss:$16 sps:$4 sm:$0xff]   ;;  %v3418_v57 = vld [vmem:[%s4602_s1 + $0x62c] ss:$16 sps:$4 sm:$0xff]   ;;  %v3482_v47 = vld [vmem:[%s4602_s1 + $0x788] ss:$16 sps:$4 sm:$0xff]  }
  0x9f   : > { %2173 = vmatpush1.bf16.msra.mxu0 %v3346_v59  ;;  %2378 = vmatpush1.bf16.msra.mxu1 %v3349_v60  ;;  %v319_v59 = vor.u32 %v318_v52, %v315_v51  ;;  %v3413_v60 = vld [vmem:[%s4602_s1 + $0x620] ss:$16 sps:$4 sm:$0xff]   ;;  %v3493_v52 = vld [vmem:[%s4602_s1 + $0x7c4] ss:$16 sps:$4 sm:$0xff]  }
  0xa0   : > { %2174 = vmatprep.subr.bf16.mxu0 %v3354_v61  ;;  %2379 = vmatprep.subr.bf16.mxu1 %v3357_v62  ;;  %v3416_v61 = vld [vmem:[%s4602_s1 + $0x628] ss:$16 sps:$4 sm:$0xff]   ;;  %v3421_v62 = vld [vmem:[%s4602_s1 + $0x644] ss:$16 sps:$4 sm:$0xff]   ;;  %v3485_v51 = vld [vmem:[%s4602_s1 + $0x7a0] ss:$16 sps:$4 sm:$0xff]  }
  0xa3   : > { %2175 = vmatpush1.bf16.msra.mxu0 %v3352_v63  ;;  %2380 = vmatpush1.bf16.msra.mxu1 %v3355_v1  ;;  %v257_v63 = vld [vmem:[%s3740_s12] sm:$0x8] }
  0xa4   : > { %2176 = vmatprep.subr.bf16.mxu0 %v3360_v2  ;;  %2381 = vmatprep.subr.bf16.mxu1 %v3363_v0  ;;  %v262_v1 = vsel %vm260_vm8, %v257_v63, 0  ;;  %v3419_v0 = vld [vmem:[%s4602_s1 + $0x640] ss:$16 sps:$4 sm:$0xff]   ;;  %vm2658_vm8 = vmor %vm4586_vm7, %vm4580_vm6 }
  0xa5   : > { %v4276_v2 = vcombine.low %v262_v1, %v4205_v27  ;;  %v3460_v27 = vld [vmem:[%s4602_s1 + $0x70c] ss:$16 sps:$4 sm:$0xff]   ;;  %v3504_v1 = vld [vmem:[%s4602_s1 + $0x800] ss:$16 sps:$4 sm:$0xff]  }
  0xa7   : > { %2177 = vmatpush1.bf16.msra.mxu0 %v3358_v3  ;;  %2382 = vmatpush1.bf16.msra.mxu1 %v3361_v4  ;;  %v3422_v3 = vld [vmem:[%s4602_s1 + $0x648] ss:$16 sps:$4 sm:$0xff]   ;;  %v3427_v4 = vld [vmem:[%s4602_s1 + $0x664] ss:$16 sps:$4 sm:$0xff]  }
  0xa8   : > { %2178 = vmatprep.subr.bf16.mxu0 %v3366_v5  ;;  %2383 = vmatprep.subr.bf16.mxu1 %v3369_v7  ;;  %v3430_v5 = vld [vmem:[%s4602_s1 + $0x66c] ss:$16 sps:$4 sm:$0xff]   ;;  %v3425_v7 = vld [vmem:[%s4602_s1 + $0x660] ss:$16 sps:$4 sm:$0xff]  }
  0xab   : > { %2179 = vmatpush1.bf16.msra.mxu0 %v3364_v8  ;;  %2384 = vmatpush1.bf16.msra.mxu1 %v3367_v9  ;;  %v3428_v8 = vld [vmem:[%s4602_s1 + $0x668] ss:$16 sps:$4 sm:$0xff]   ;;  %v3433_v9 = vld [vmem:[%s4602_s1 + $0x684] ss:$16 sps:$4 sm:$0xff]  }
  0xac   : > { %2180 = vmatprep.subr.bf16.mxu0 %v3372_v11  ;;  %2385 = vmatprep.subr.bf16.mxu1 %v3375_v12  ;;  %v3431_v11 = vld [vmem:[%s4602_s1 + $0x680] ss:$16 sps:$4 sm:$0xff]   ;;  %v3434_v12 = vld [vmem:[%s4602_s1 + $0x688] ss:$16 sps:$4 sm:$0xff]  }
  0xaf   : > { %2181 = vmatpush1.bf16.msra.mxu0 %v3370_v13  ;;  %2386 = vmatpush1.bf16.msra.mxu1 %v3373_v14  ;;  %v3439_v13 = vld [vmem:[%s4602_s1 + $0x6a4] ss:$16 sps:$4 sm:$0xff]   ;;  %v3442_v14 = vld [vmem:[%s4602_s1 + $0x6ac] ss:$16 sps:$4 sm:$0xff]  }
  0xb0   : > { %2182 = vmatprep.subr.bf16.mxu0 %v3378_v15  ;;  %2387 = vmatprep.subr.bf16.mxu1 %v3381_v16  ;;  %v3437_v15 = vld [vmem:[%s4602_s1 + $0x6a0] ss:$16 sps:$4 sm:$0xff]   ;;  %v3440_v16 = vld [vmem:[%s4602_s1 + $0x6a8] ss:$16 sps:$4 sm:$0xff]  }
  0xb3   : > { %2183 = vmatpush1.bf16.msra.mxu0 %v3376_v19  ;;  %2388 = vmatpush1.bf16.msra.mxu1 %v3379_v20  ;;  %v3448_v19 = vld [vmem:[%s4602_s1 + $0x6cc] ss:$16 sps:$4 sm:$0xff]   ;;  %v3443_v20 = vld [vmem:[%s4602_s1 + $0x6c0] ss:$16 sps:$4 sm:$0xff]  }
  0xb4   : > { %2184 = vmatprep.subr.bf16.mxu0 %v3384_v21  ;;  %2389 = vmatprep.subr.bf16.mxu1 %v3387_v22  ;;  %v3446_v21 = vld [vmem:[%s4602_s1 + $0x6c8] ss:$16 sps:$4 sm:$0xff]   ;;  %v3451_v22 = vld [vmem:[%s4602_s1 + $0x6e4] ss:$16 sps:$4 sm:$0xff]  }
  0xb7   : > { %2185 = vmatpush1.bf16.msra.mxu0 %v3382_v23  ;;  %2390 = vmatpush1.bf16.msra.mxu1 %v3385_v25  ;;  %v3454_v23 = vld [vmem:[%s4602_s1 + $0x6ec] ss:$16 sps:$4 sm:$0xff]   ;;  %v3452_v25 = vld [vmem:[%s4602_s1 + $0x6e8] ss:$16 sps:$4 sm:$0xff]  }
  0xb8   : > { %2186 = vmatprep.subr.bf16.mxu0 %v3390_v26  ;;  %2391 = vmatprep.subr.bf16.mxu1 %v3393_v28  ;;  %v3457_v26 = vld [vmem:[%s4602_s1 + $0x704] ss:$16 sps:$4 sm:$0xff]   ;;  %v3455_v28 = vld [vmem:[%s4602_s1 + $0x700] ss:$16 sps:$4 sm:$0xff]  }
  0xbb   : > { %2187 = vmatpush1.bf16.msra.mxu0 %v3388_v31  ;;  %2392 = vmatpush1.bf16.msra.mxu1 %v3391_v33  ;;  %v3458_v31 = vld [vmem:[%s4602_s1 + $0x708] ss:$16 sps:$4 sm:$0xff]   ;;  %v3466_v33 = vld [vmem:[%s4602_s1 + $0x72c] ss:$16 sps:$4 sm:$0xff]  }
  0xbc   : > { %2188 = vmatprep.subr.bf16.mxu0 %v3396_v34  ;;  %2393 = vmatprep.subr.bf16.mxu1 %v3399_v35  ;;  %v3461_v34 = vld [vmem:[%s4602_s1 + $0x720] ss:$16 sps:$4 sm:$0xff]   ;;  %v3464_v35 = vld [vmem:[%s4602_s1 + $0x728] ss:$16 sps:$4 sm:$0xff]  }
  0xbf   : > { %2189 = vmatpush1.bf16.msra.mxu0 %v3394_v37  ;;  %2394 = vmatpush1.bf16.msra.mxu1 %v3397_v40  ;;  %v3472_v37 = vld [vmem:[%s4602_s1 + $0x74c] ss:$16 sps:$4 sm:$0xff]   ;;  %v3475_v40 = vld [vmem:[%s4602_s1 + $0x764] ss:$16 sps:$4 sm:$0xff]  }
  0xc0   : > { %2190 = vmatprep.subr.bf16.mxu0 %v3402_v41  ;;  %2395 = vmatprep.subr.bf16.mxu1 %v3405_v42  ;;  %v3478_v41 = vld [vmem:[%s4602_s1 + $0x76c] ss:$16 sps:$4 sm:$0xff]   ;;  %v3473_v42 = vld [vmem:[%s4602_s1 + $0x760] ss:$16 sps:$4 sm:$0xff]  }
  0xc3   : > { %2191 = vmatpush1.bf16.msra.mxu0 %v3400_v45  ;;  %2396 = vmatpush1.bf16.msra.mxu1 %v3403_v48  ;;  %v3484_v45 = vld [vmem:[%s4602_s1 + $0x78c] ss:$16 sps:$4 sm:$0xff]   ;;  %v253_v48 = vrot.slane %v3878_v30, 6  ;;  %v3488_v30 = vld [vmem:[%s4602_s1 + $0x7a8] ss:$16 sps:$4 sm:$0xff]  }
  0xc4   : > { %2201 = vmatprep.subr.bf16.mxu0 %v3408_v49  ;;  %2406 = vmatprep.subr.bf16.mxu1 %v3411_v50  ;;  %v3487_v49 = vld [vmem:[%s4602_s1 + $0x7a4] ss:$16 sps:$4 sm:$0xff]   ;;  %v3490_v50 = vld [vmem:[%s4602_s1 + $0x7ac] ss:$16 sps:$4 sm:$0xff]  }
  0xc5   : > { %vm254_vm9 = vcmp.ne.s16.totalorder %v253_v48, 0 }
  0xc6   : > { %2193 = vmatmul.mubr.bf16.vlgmr.msra.gmra.mrb[0].mxu0 %v295_v54  ;;  %2398 = vmatmul.mubr.bf16.vlgmr.msra.gmra.mrb[0].mxu1 %v295_v54  ;;  %v255_v54 = vsel %vm254_vm9, %v4020_v17, 0  ;;  %v3502_v17 = vld [vmem:[%s4602_s1 + $0x7ec] ss:$16 sps:$4 sm:$0xff]  }
  0xc7   : > { %2202 = vmatpush1.bf16.msra.mxu0 %v3406_v53  ;;  %2407 = vmatpush1.bf16.msra.mxu1 %v3409_v55  ;;  %v3496_v53 = vld [vmem:[%s4602_s1 + $0x7cc] ss:$16 sps:$4 sm:$0xff]   ;;  %v3491_v55 = vld [vmem:[%s4602_s1 + $0x7c0] ss:$16 sps:$4 sm:$0xff]  }
  0xc8   : > { %2203 = vmatprep.subr.bf16.mxu0 %v3415_v56  ;;  %2408 = vmatprep.subr.bf16.mxu1 %v3418_v57  ;;  %v3494_v56 = vld [vmem:[%s4602_s1 + $0x7c8] ss:$16 sps:$4 sm:$0xff]   ;;  %v3499_v57 = vld [vmem:[%s4602_s1 + $0x7e4] ss:$16 sps:$4 sm:$0xff]  }
  0xc9   : > { %2233 = vmatprep.mubr.bf16.mxu0 %v319_v59  ;;  %2438 = vmatprep.mubr.bf16.mxu1 %v319_v59  ;;  %v2769_v59 = vcombine.low %v255_v54, %v255_v54 }
  0xcb   : > { %2204 = vmatpush1.bf16.msra.mxu0 %v3413_v60  ;;  %2409 = vmatpush1.bf16.msra.mxu1 %v3416_v61  ;;  %v3497_v60 = vld [vmem:[%s4602_s1 + $0x7e0] ss:$16 sps:$4 sm:$0xff]   ;;  %v3500_v61 = vld [vmem:[%s4602_s1 + $0x7e8] ss:$16 sps:$4 sm:$0xff]   ;;  %v305_v63 = vrot.slane %v2769_v59, 2 }
  0xcc   : > { %2205 = vmatprep.subr.bf16.mxu0 %v3421_v62  ;;  %2410 = vmatprep.subr.bf16.mxu1 %v3424_v6  ;;  %v3506_v62 = vld [vmem:[%s4602_s1 + $0x804] ss:$16 sps:$4 sm:$0xff]   ;;  %v3509_v6 = vld [vmem:[%s4602_s1 + $0x80c] ss:$16 sps:$4 sm:$0xff]  }
  0xcf   : > { %2206 = vmatpush1.bf16.msra.mxu0 %v3419_v0  ;;  %2411 = vmatpush1.bf16.msra.mxu1 %v3422_v3  ;;  %v3507_v0 = vld [vmem:[%s4602_s1 + $0x808] ss:$16 sps:$4 sm:$0xff]   ;;  %v3512_v3 = vld [vmem:[%s4602_s1 + $0x824] ss:$16 sps:$4 sm:$0xff]  }
  0xd0   : > { %2207 = vmatprep.subr.bf16.mxu0 %v3427_v4  ;;  %2412 = vmatprep.subr.bf16.mxu1 %v3430_v5  ;;  %v3515_v4 = vld [vmem:[%s4602_s1 + $0x82c] ss:$16 sps:$4 sm:$0xff]   ;;  %v3510_v5 = vld [vmem:[%s4602_s1 + $0x820] ss:$16 sps:$4 sm:$0xff]  }
  0xd3   : > { %2208 = vmatpush1.bf16.msra.mxu0 %v3425_v7  ;;  %2413 = vmatpush1.bf16.msra.mxu1 %v3428_v8  ;;  %v3513_v7 = vld [vmem:[%s4602_s1 + $0x828] ss:$16 sps:$4 sm:$0xff]   ;;  %v3518_v8 = vld [vmem:[%s4602_s1 + $0x844] ss:$16 sps:$4 sm:$0xff]  }
  0xd4   : > { %2209 = vmatprep.subr.bf16.mxu0 %v3433_v9  ;;  %2414 = vmatprep.subr.bf16.mxu1 %v3436_v10  ;;  %v3521_v9 = vld [vmem:[%s4602_s1 + $0x84c] ss:$16 sps:$4 sm:$0xff]   ;;  %v3516_v10 = vld [vmem:[%s4602_s1 + $0x840] ss:$16 sps:$4 sm:$0xff]  }
  0xd7   : > { %2210 = vmatpush1.bf16.msra.mxu0 %v3431_v11  ;;  %2415 = vmatpush1.bf16.msra.mxu1 %v3434_v12  ;;  %v3519_v11 = vld [vmem:[%s4602_s1 + $0x848] ss:$16 sps:$4 sm:$0xff]   ;;  %v3524_v12 = vld [vmem:[%s4602_s1 + $0x864] ss:$16 sps:$4 sm:$0xff]  }
  0xd8   : > { %2211 = vmatprep.subr.bf16.mxu0 %v3439_v13  ;;  %2416 = vmatprep.subr.bf16.mxu1 %v3442_v14  ;;  %v3527_v13 = vld [vmem:[%s4602_s1 + $0x86c] ss:$16 sps:$4 sm:$0xff]   ;;  %v3522_v14 = vld [vmem:[%s4602_s1 + $0x860] ss:$16 sps:$4 sm:$0xff]  }
  0xdb   : > { %2212 = vmatpush1.bf16.msra.mxu0 %v3437_v15  ;;  %2417 = vmatpush1.bf16.msra.mxu1 %v3440_v16  ;;  %v3525_v15 = vld [vmem:[%s4602_s1 + $0x868] ss:$16 sps:$4 sm:$0xff]   ;;  %v3530_v16 = vld [vmem:[%s4602_s1 + $0x884] ss:$16 sps:$4 sm:$0xff]  }
  0xdc   : > { %2213 = vmatprep.subr.bf16.mxu0 %v3445_v18  ;;  %2418 = vmatprep.subr.bf16.mxu1 %v3448_v19  ;;  %v3533_v18 = vld [vmem:[%s4602_s1 + $0x88c] ss:$16 sps:$4 sm:$0xff]   ;;  %v3528_v19 = vld [vmem:[%s4602_s1 + $0x880] ss:$16 sps:$4 sm:$0xff]  }
  0xdf   : > { %2214 = vmatpush1.bf16.msra.mxu0 %v3443_v20  ;;  %2419 = vmatpush1.bf16.msra.mxu1 %v3446_v21  ;;  %v3531_v20 = vld [vmem:[%s4602_s1 + $0x888] ss:$16 sps:$4 sm:$0xff]   ;;  %v3536_v21 = vld [vmem:[%s4602_s1 + $0x8a4] ss:$16 sps:$4 sm:$0xff]  }
  0xe0   : > { %2215 = vmatprep.subr.bf16.mxu0 %v3451_v22  ;;  %2420 = vmatprep.subr.bf16.mxu1 %v3454_v23  ;;  %v3539_v22 = vld [vmem:[%s4602_s1 + $0x8ac] ss:$16 sps:$4 sm:$0xff]   ;;  %v3534_v23 = vld [vmem:[%s4602_s1 + $0x8a0] ss:$16 sps:$4 sm:$0xff]  }
  0xe3   : > { %2216 = vmatpush1.bf16.msra.mxu0 %v3449_v24  ;;  %2421 = vmatpush1.bf16.msra.mxu1 %v3452_v25  ;;  %v3537_v24 = vld [vmem:[%s4602_s1 + $0x8a8] ss:$16 sps:$4 sm:$0xff]   ;;  %v3542_v25 = vld [vmem:[%s4602_s1 + $0x8c4] ss:$16 sps:$4 sm:$0xff]  }
  0xe4   : > { %2217 = vmatprep.subr.bf16.mxu0 %v3457_v26  ;;  %2422 = vmatprep.subr.bf16.mxu1 %v3460_v27  ;;  %v3545_v26 = vld [vmem:[%s4602_s1 + $0x8cc] ss:$16 sps:$4 sm:$0xff]   ;;  %v3540_v27 = vld [vmem:[%s4602_s1 + $0x8c0] ss:$16 sps:$4 sm:$0xff]  }
  0xe7   : > { %2218 = vmatpush1.bf16.msra.mxu0 %v3455_v28  ;;  %2423 = vmatpush1.bf16.msra.mxu1 %v3458_v31  ;;  %v3543_v28 = vld [vmem:[%s4602_s1 + $0x8c8] ss:$16 sps:$4 sm:$0xff]   ;;  %v3548_v31 = vld [vmem:[%s4602_s1 + $0x8e4] ss:$16 sps:$4 sm:$0xff]  }
  0xe8   : > { %2219 = vmatprep.subr.bf16.mxu0 %v3463_v32  ;;  %2424 = vmatprep.subr.bf16.mxu1 %v3466_v33  ;;  %v3551_v32 = vld [vmem:[%s4602_s1 + $0x8ec] ss:$16 sps:$4 sm:$0xff]   ;;  %v3546_v33 = vld [vmem:[%s4602_s1 + $0x8e0] ss:$16 sps:$4 sm:$0xff]  }
  0xeb   : > { %2220 = vmatpush1.bf16.msra.mxu0 %v3461_v34  ;;  %2425 = vmatpush1.bf16.msra.mxu1 %v3464_v35  ;;  %v3549_v34 = vld [vmem:[%s4602_s1 + $0x8e8] ss:$16 sps:$4 sm:$0xff]   ;;  %v326_v35 = vrot.slane %v4276_v2, 3  ;;  %v2511_v2 = vld [vmem:[%s4547_s10] sm:$0x66] }
  0xec   : > { %2221 = vmatprep.subr.bf16.mxu0 %v3469_v36  ;;  %2426 = vmatprep.subr.bf16.mxu1 %v3472_v37  ;;  %v2514_v36 = vld [vmem:[%s4547_s10 + $0x8] sm:$0x66]  ;;  %v2512_v37 = vsel %vm2510_vm0, 0, %v2511_v2 }
  0xed   : > { %2513 = vst [vmem:[%s4547_s10] sm:$0x66] %v2512_v37 }
  0xef   : > { %2222 = vmatpush1.bf16.msra.mxu0 %v3467_v38  ;;  %2427 = vmatpush1.bf16.msra.mxu1 %v3470_v39  ;;  %v2515_v38 = vsel %vm2510_vm0, 0, %v2514_v36  ;;  %v620_v39 = vsub.s32 0, %v3767_v58 }
  0xf0   : > { %2223 = vmatprep.subr.bf16.mxu0 %v3475_v40  ;;  %2428 = vmatprep.subr.bf16.mxu1 %v3478_v41  ;;  %2516 = vst [vmem:[%s4547_s10 + $0x8] sm:$0x66] %v2515_v38  ;;  %v628_v40 = vsub.s32 2, %v3767_v58  ;;  %v624_v41 = vsub.s32 1, %v3767_v58 }
  0xf3   : > { %2224 = vmatpush1.bf16.msra.mxu0 %v3473_v42  ;;  %2429 = vmatpush1.bf16.msra.mxu1 %v3476_v43  ;;  %v632_v42 = vsub.s32 3, %v3767_v58  ;;  %v3561_v43 = vmov 1983009808  }
  0xf4   : > { %2225 = vmatprep.subr.bf16.mxu0 %v3481_v44  ;;  %2430 = vmatprep.subr.bf16.mxu1 %v3484_v45  ;;  %v2518_v44 = vunpack.c.l.s4 %v3561_v43 }
  0xf7   : > { %2226 = vmatpush1.bf16.msra.mxu0 %v3479_v46  ;;  %2431 = vmatpush1.bf16.msra.mxu1 %v3482_v47 }
  0xf8   : > { %2227 = vmatprep.subr.bf16.mxu0 %v3487_v49  ;;  %2432 = vmatprep.subr.bf16.mxu1 %v3490_v50 }
  0xfb   : > { %2228 = vmatpush1.bf16.msra.mxu0 %v3485_v51  ;;  %2433 = vmatpush1.bf16.msra.mxu1 %v3488_v30  ;;  %v2519_v51 = vunpack.c.0.s8 %v2518_v44 }
  0xfc   : > { %2229 = vmatprep.subr.bf16.mxu0 %v3493_v52  ;;  %2434 = vmatprep.subr.bf16.mxu1 %v3496_v53 }
  0xff   : > { %2230 = vmatpush1.bf16.msra.mxu0 %v3491_v55  ;;  %2435 = vmatpush1.bf16.msra.mxu1 %v3494_v56 }
 0x100   : > { %2231 = vmatprep.subr.bf16.mxu0 %v3499_v57  ;;  %2436 = vmatprep.subr.bf16.mxu1 %v3502_v17 }
 0x103   : > { %2232 = vmatpush1.bf16.msra.mxu0 %v3497_v60  ;;  %2437 = vmatpush1.bf16.msra.mxu1 %v3500_v61 }
 0x104   : > { %2242 = vmatprep.subr.bf16.mxu0 %v3506_v62  ;;  %2447 = vmatprep.subr.bf16.mxu1 %v3509_v6 }
 0x106   : > { %2234 = vmatmul.mubr.bf16.vlgmr.msra.gmra.mrb[0].mxu0 %v305_v63  ;;  %2439 = vmatmul.mubr.bf16.vlgmr.msra.gmra.mrb[0].mxu1 %v305_v63  ;;  %v2522_v63 = vsub.s32 %v2519_v51, %v3767_v58 }
 0x107   : > { %2243 = vmatpush1.bf16.msra.mxu0 %v3504_v1  ;;  %2448 = vmatpush1.bf16.msra.mxu1 %v3507_v0 }
 0x108   : > { %2244 = vmatprep.subr.bf16.mxu0 %v3512_v3  ;;  %2449 = vmatprep.subr.bf16.mxu1 %v3515_v4 }
 0x109   : > { %2274 = vmatprep.mubr.bf16.mxu0 %v3560_v29  ;;  %2479 = vmatprep.mubr.bf16.mxu1 %v3560_v29  ;;  %v616_v29 = vld [vmem:[%s4603_s2] sm:$0xf] }
 0x10a   : > { %v621_v45 = vrot.slane %v616_v29, %v620_v39  ;;  %v629_v46 = vrot.slane %v616_v29, %v628_v40  ;;  %v625_v47 = vrot.slane %v616_v29, %v624_v41  ;;  %v633_v48 = vrot.slane %v616_v29, %v632_v42 }
 0x10b   : > { %2245 = vmatpush1.bf16.msra.mxu0 %v3510_v5  ;;  %2450 = vmatpush1.bf16.msra.mxu1 %v3513_v7 }
 0x10c   : > { %2246 = vmatprep.subr.bf16.mxu0 %v3518_v8  ;;  %2451 = vmatprep.subr.bf16.mxu1 %v3521_v9 }
 0x10f   : > { %2247 = vmatpush1.bf16.msra.mxu0 %v3516_v10  ;;  %2452 = vmatpush1.bf16.msra.mxu1 %v3519_v11 }
 0x110   : > { %2248 = vmatprep.subr.bf16.mxu0 %v3524_v12  ;;  %2453 = vmatprep.subr.bf16.mxu1 %v3527_v13 }
 0x113   : > { %2249 = vmatpush1.bf16.msra.mxu0 %v3522_v14  ;;  %2454 = vmatpush1.bf16.msra.mxu1 %v3525_v15 }
 0x114   : > { %2250 = vmatprep.subr.bf16.mxu0 %v3530_v16  ;;  %2455 = vmatprep.subr.bf16.mxu1 %v3533_v18 }
 0x117   : > { %2251 = vmatpush1.bf16.msra.mxu0 %v3528_v19  ;;  %2456 = vmatpush1.bf16.msra.mxu1 %v3531_v20 }
 0x118   : > { %2252 = vmatprep.subr.bf16.mxu0 %v3536_v21  ;;  %2457 = vmatprep.subr.bf16.mxu1 %v3539_v22 }
 0x11b   : > { %2253 = vmatpush1.bf16.msra.mxu0 %v3534_v23  ;;  %2458 = vmatpush1.bf16.msra.mxu1 %v3537_v24 }
 0x11c   : > { %2254 = vmatprep.subr.bf16.mxu0 %v3542_v25  ;;  %2459 = vmatprep.subr.bf16.mxu1 %v3545_v26 }
 0x11f   : > { %2255 = vmatpush1.bf16.msra.mxu0 %v3540_v27  ;;  %2460 = vmatpush1.bf16.msra.mxu1 %v3543_v28 }
 0x120   : > { %2256 = vmatprep.subr.bf16.mxu0 %v3548_v31  ;;  %2461 = vmatprep.subr.bf16.mxu1 %v3551_v32 }
 0x123   : > { %2257 = vmatpush1.bf16.msra.mxu0 %v3546_v33  ;;  %2462 = vmatpush1.bf16.msra.mxu1 %v3549_v34 }
 0x126   : > { %2275 = vmatmul.mubr.bf16.vlgmr.msra.gmra.mrb[0].mxu0 %v326_v35  ;;  %2480 = vmatmul.mubr.bf16.vlgmr.msra.gmra.mrb[0].mxu1 %v326_v35 }
 0x1f9   : > { %v2276_v49 = vpop.f32.mrb[0].mxu0  ;;  %v2481_v50 = vpop.f32.mrb[0].mxu1 }
 0x1fa   : > { %v3071_v30 = vadd.f32 %v2276_v49, %v621_v45  ;;  %v3073_v52 = vadd.f32 %v2481_v50, %v629_v46  ;;  %v2278_v53 = vpop.f32.mrb[1].mxu0  ;;  %v2483_v54 = vpop.f32.mrb[1].mxu1 }
 0x1fb   : > { %v3072_v55 = vadd.f32 %v2278_v53, %v625_v47  ;;  %v3074_v56 = vadd.f32 %v2483_v54, %v633_v48  ;;  %v2280_v57 = vpop.f32.mrb[2].mxu0  ;;  %v2485_v17 = vpop.f32.mrb[2].mxu1 }
 0x1fc   : > { %v2488_v59 = vmax.f32 %v3071_v30, 0.0  ;;  %v2490_v60 = vmax.f32 %v3073_v52, 0.0  ;;  %v2281_v61 = vpop.f32.mrb[3].mxu0  ;;  %v2486_v62 = vpop.f32.mrb[3].mxu1 }
 0x1fd   : > { %v2489_v6 = vmax.f32 %v3072_v55, 0.0  ;;  %v2491_v1 = vmax.f32 %v3074_v56, 0.0 }
 0x1ff   : > { %v2496_v0 = vcombine.low %v2488_v59, %v2489_v6  ;;  %v2497_v3 = vcombine.low %v2490_v60, %v2491_v1 }
 0x201   : > { %2500 = vst [vmem:[%s205_s18] sm:$0xff] %v2496_v0  ;;  %v2523_v4 = vrot.slane %v2496_v0, %v2522_v63  ;;  %2501 = vst [vmem:[%s205_s18 + $0x8] sm:$0xff] %v2497_v3  ;;  %v2530_v5 = vrot.slane %v2497_v3, %v2522_v63 }
 0x203   : > { %v2531_v7 = vcombine.low %v2523_v4, %v2530_v5  ;;  %v2532_v8 = vcombine.high %v2523_v4, %v2530_v5  ;;  %v3060_v9 = vcombine.low %v2530_v5, %v2530_v5  ;;  %v3061_v10 = vcombine.high %v2530_v5, %v2530_v5 }
 0x205   : > { %v2540_v11 = vrot.slane %v2531_v7, %v2522_v63  ;;  %v2547_v12 = vrot.slane %v3060_v9, %v2522_v63  ;;  %v2557_v58 = vrot.slane %v2532_v8, %v2522_v63  ;;  %v2564_v13 = vrot.slane %v3061_v10, %v2522_v63 }
 0x207   : > { %v2548_v14 = vcombine.high %v2540_v11, %v2540_v11  ;;  %v2549_v15 = vcombine.high %v2547_v12, %v2547_v12  ;;  %v2565_v16 = vcombine.high %v2557_v58, %v2557_v58  ;;  %v2566_v18 = vcombine.high %v2564_v13, %v2564_v13 }
 0x208   : > { %v2576_v19 = vsel %vm2575_vm1, %v2540_v11, -inf  ;;  %v2590_v20 = vsel %vm2575_vm1, %v2547_v12, -inf  ;;  %v2604_v21 = vsel %vm2575_vm1, %v2557_v58, -inf  ;;  %v2618_v22 = vsel %vm2575_vm1, %v2564_v13, -inf }
 0x209   : > { %v2577_v23 = vrot.slane %v2576_v19, 4  ;;  %v2583_v24 = vsel %vm2575_vm1, %v2548_v14, -inf  ;;  %v2591_v25 = vrot.slane %v2590_v20, 4  ;;  %v2597_v26 = vsel %vm2575_vm1, %v2549_v15, -inf  ;;  %v2659_v14 = vld [vmem:[%s4547_s10] sm:$0x22] }
 0x20a   : > { %v2584_v27 = vrot.slane %v2583_v24, 4  ;;  %v2598_v28 = vrot.slane %v2597_v26, 4  ;;  %v2605_v31 = vrot.slane %v2604_v21, 4  ;;  %v2611_v32 = vsel %vm2575_vm1, %v2565_v16, -inf }
 0x20b   : > { %v2578_v33 = vmax.f32 %v2576_v19, %v2577_v23  ;;  %v2592_v34 = vmax.f32 %v2590_v20, %v2591_v25  ;;  %v2612_v35 = vrot.slane %v2611_v32, 4  ;;  %v2619_v2 = vrot.slane %v2618_v22, 4  ;;  %v2662_v20 = vld [vmem:[%s4547_s10 + $0x8] sm:$0x22] }
 0x20c   : > { %v2585_v36 = vmax.f32 %v2583_v24, %v2584_v27  ;;  %v2599_v37 = vmax.f32 %v2597_v26, %v2598_v28  ;;  %v2606_v38 = vmax.f32 %v2604_v21, %v2605_v31  ;;  %v2625_v39 = vsel %vm2575_vm1, %v2566_v18, -inf }
 0x20d   : > { %v2579_v40 = vrot.slane %v2578_v33, 2  ;;  %v2593_v29 = vrot.slane %v2592_v34, 2  ;;  %v2613_v41 = vmax.f32 %v2611_v32, %v2612_v35  ;;  %v2620_v42 = vmax.f32 %v2618_v22, %v2619_v2 }
 0x20e   : > { %v2586_v43 = vrot.slane %v2585_v36, 2  ;;  %v2600_v44 = vrot.slane %v2599_v37, 2  ;;  %v2607_v45 = vrot.slane %v2606_v38, 2  ;;  %v2626_v46 = vrot.slane %v2625_v39, 4 }
 0x20f   : > { %v2580_v47 = vmax.f32 %v2578_v33, %v2579_v40  ;;  %v2594_v48 = vmax.f32 %v2592_v34, %v2593_v29  ;;  %v2614_v49 = vrot.slane %v2613_v41, 2  ;;  %v2621_v50 = vrot.slane %v2620_v42, 2 }
 0x210   : > { %v2587_v51 = vmax.f32 %v2585_v36, %v2586_v43  ;;  %v2601_v30 = vmax.f32 %v2599_v37, %v2600_v44  ;;  %v2608_v52 = vmax.f32 %v2606_v38, %v2607_v45  ;;  %v2627_v53 = vmax.f32 %v2625_v39, %v2626_v46 }
 0x211   : > { %v2581_v54 = vrot.slane %v2580_v47, 1  ;;  %v2595_v55 = vrot.slane %v2594_v48, 1  ;;  %v2615_v56 = vmax.f32 %v2613_v41, %v2614_v49  ;;  %v2622_v57 = vmax.f32 %v2620_v42, %v2621_v50 }
 0x212   : > { %v2588_v17 = vrot.slane %v2587_v51, 1  ;;  %v2602_v59 = vrot.slane %v2601_v30, 1  ;;  %v2609_v60 = vrot.slane %v2608_v52, 1  ;;  %v2628_v61 = vrot.slane %v2627_v53, 2 }
 0x213   : > { %v2582_v62 = vmax.f32 %v2580_v47, %v2581_v54  ;;  %v2616_v6 = vrot.slane %v2615_v56, 1  ;;  %v2623_v63 = vrot.slane %v2622_v57, 1  ;;  %v2596_v5 = vmax.f32 %v2594_v48, %v2595_v55 }
 0x214   : > { %v2589_v1 = vmax.f32 %v2587_v51, %v2588_v17  ;;  %v2610_v0 = vmax.f32 %v2608_v52, %v2609_v60  ;;  %v2629_v3 = vmax.f32 %v2627_v53, %v2628_v61  ;;  %v2603_v9 = vmax.f32 %v2601_v30, %v2602_v59 }
 0x215   : > { %v2617_v7 = vmax.f32 %v2615_v56, %v2616_v6  ;;  %v2624_v10 = vmax.f32 %v2622_v57, %v2623_v63 }
 0x216   : > { %v2630_v11 = vrot.slane %v2629_v3, 1  ;;  %v2632_v12 = vmax.f32 %v2582_v62, %v2610_v0 }
 0x217   : > { %v2633_v58 = vmax.f32 %v2589_v1, %v2617_v7  ;;  %v2634_v16 = vmax.f32 %v2596_v5, %v2624_v10 }
 0x218   : > { %v2631_v13 = vmax.f32 %v2629_v3, %v2630_v11 }
 0x219   : > { %v3069_v15 = vpack.c.bf16 %v2633_v58, %v2632_v12 }
 0x21a   : > { %v2635_v18 = vmax.f32 %v2603_v9, %v2631_v13 }
 0x21b   : > { %v2660_v19 = vsel %vm2658_vm8, %v3069_v15, %v2659_v14 }
 0x21c   : > { %v3070_v21 = vpack.c.bf16 %v2635_v18, %v2634_v16  ;;  %2661 = vst [vmem:[%s4547_s10] sm:$0x22] %v2660_v19 }
 0x21e   : > { %v2663_v22 = vsel %vm2658_vm8, %v3070_v21, %v2662_v20 }
 0x21f   : > { %2664 = vst [vmem:[%s4547_s10 + $0x8] sm:$0x22] %v2663_v22 }
 0x220 PF: > { %s15_s15 = sadd.s32 1, %s3558_s15  }
 0x221   : > { %p12_p4 = scmp.ge.s32.totalorder %s15_s15, 4  }
 0x223   :  { %14 = sbr.rel (!%p12_p4) target bundleno = 1 (0x1), region = 74 }

// kernel: vgg_forward.5
= control target key start
LH: loop header
LB: loop body
LE: loop exit
PB: predicated region body
PF: predicated region fallthrough
CT: control target
= control target key end

     0   :  { %10 = vsyncpa [#allocation3], 0  ;;  %s9033_s0 = inlined_call_operand.vmem [shape: bf16[2,290,8], index: 0, kind: input, shape index: {}]   ;;  %s9034_s1 = inlined_call_operand.hbm [shape: bf16[72,32], index: 1, kind: input, shape index: {}]   ;;  %s9035_s2 = inlined_call_operand.vmem [shape: f32[1,32], index: 2, kind: input, shape index: {}]   ;;  %s9036_s3 = inlined_call_operand.hbm [shape: f32[2,256,32], index: 3, kind: output, shape index: {0}]   ;;  %s9037_s4 = inlined_call_operand.vmem [shape: bf16[2,82,32], index: 4, kind: output, shape index: {1}]  }
   0x1   :  { %11 = vsyncpa [#allocation4], 0 }
   0x2   :  { %13 = vsyncpa [#allocation4 + $0x1], 0  ;;  %s5938_s15 = smov 0   ;;  %s5940_s16 = smov 0  }
   0x3   :  { %s5942_s17 = smov 0   ;;  %s5944_s18 = smov 0  }
   0x4 LB: > { %s5959_s19 = sadd.s32 4294967295, %s5895_s18   ;;  %s5331_s20 = sadd.s32 4294967294, %s5895_s18   ;;  %s5895_s18 = sphi %s5944_s18, %s9670_s18   ;;  %s5891_s17 = sphi %s5942_s17, %s9669_s17   ;;  %s5887_s16 = sphi %s5940_s16, %s9668_s16   ;;  %s5883_s15 = sphi %s5938_s15, %s9667_s15  }
   0x5   : > { %s5963_s21 = sadd.s32 1, %s5895_s18   ;;  %s94_s22 = sadd.s32 1, %s5891_s17 }
   0x6   : > { %s91_s23 = ssub.s32 %s5895_s18, %s5963_s21  ;;  %p104_p0 = scmp.ne.s32.totalorder %s5891_s17, %s5887_s16 }
   0x7   : > { %p92_p1 = scmp.eq.s32.totalorder %s91_s23, 0  ;;  %p105_p2 = scmp.eq.s32.totalorder %s5959_s19, 1 }
   0x8   : > { %p110_p3 = scmp.ne.s32.totalorder %s5887_s16, %s5883_s15  ;;  %p111_p4 = scmp.eq.s32.totalorder %s5331_s20, 1 }
   0x9   : > { %s5974_s24 = scalar_select %p92_p1, %s5891_s17, %s94_s22  }
   0xa   : > { %p5976_p5 = por %p105_p2, %p104_p0  ;;  %p5980_p6 = por %p111_p4, %p110_p3 }
   0xb   : > { %p5332_p7 = scmp.ge.s32.totalorder %s5895_s18, 1  ;;  %p144_p8 = scmp.lt.s32.totalorder %s5895_s18, 3 }
   0xc   : > { %s9121_s25 = scalar_select %p5976_p5, 1, 0 }
   0xd   : > { %s9122_s26 = scalar_select %p5980_p6, 1, 0 }
   0xe   : > { %p9038_p9 = scmp.eq.s32.totalorder %s5959_s19, 0  ;;  %p5987_p10 = pnand %p5332_p7, %p144_p8 }
   0xf   : > { %s5897_s28 = smov [#allocation2]   ;;  %s5801_s7 = scalar_lea.hbm %s9034_s1, 576 }
  0x10   : > { %s9123_s27 = scalar_select %p5987_p10, 1, 0 }
  0x11   : > { %s156_s29 = sshll.u32 %s5897_s28, 4  ;;  %p5701_p11 = pneg %p5987_p10  ;;  %s157_s29 = int_to_ptr.vmem [resolvable:$true] %s156_s29 }
  0x12   : > { %p5802_p13 = scmp.ne.s32.totalorder %s9034_s1, %s5801_s7  ;;  %p5808_p3 = scmp.lt.u32.totalorder %s5801_s7, %s9034_s1 }
  0x13   : > { %p5995_p12 = pnand %p9038_p9, %p5701_p11 }
  0x15   : > { %p5803_p0 = pneg %p5995_p12 }
  0x17   : > { %p5804_p1 = pnand %p5803_p0, %p5802_p13 }
  0x19   : > { %p5805_p2 = pneg %p5804_p1 }
  0x1b   : > { %p5810_p4 = pnand %p5808_p3, %p5805_p2 }
  0x1d   : > { %5813 = shalt.err (!%p5810_p4)
}
  0x1e   : > { %s5814_s12 = scalar_lea.vmem %s157_s29, 576  ;;  %p5822_p9 = scmp.lt.s32.totalorder %s157_s29, %s157_s29 }
  0x1f   : > { %p5815_p7 = scmp.ne.s32.totalorder %s157_s29, %s5814_s12  ;;  %p5823_p6 = scmp.lt.s32.totalorder %s5814_s12, %s5814_s12 }
  0x21   : > { %p5817_p8 = pnand %p5815_p7, %p5803_p0  ;;  %p5824_p5 = por %p5823_p6, %p5822_p9 }
  0x23   : > { %p5818_p11 = pneg %p5817_p8 }
  0x25   : > { %p5825_p10 = pnand %p5824_p5, %p5818_p11 }
  0x27   : > { %5828 = shalt.err (!%p5825_p10)
}
  0x28   : > { %s5898_s13 = smov 64   ;;  %s5899_s14 = smov 4  }
  0x29   : > { %5704 = dma.hbm_to_vmem [thread:$0]  (!%p5995_p12), %s9034_s1, 576, %s157_s29, [#allocation3], %s5898_s13, %s5898_s13, %s5899_s14  }
  0x2a   : > { %p9125_p13 = scmp.ne.s32.totalorder %s9123_s27, 0 }
  0x2c   : > { %183 = sbr.rel (%p9125_p13) target bundleno = 858 (0x35a), region = 32 }
  0x33   : > { %p9126_p1 = scmp.eq.s32.totalorder %s5959_s19, 0 }
  0x35   : > { %5874 = dma.done.wait (%p9126_p1), [#allocation3], 576   ;;  %p9127_p0 = pmov %p9126_p1 }
  0x36   : > { %p214_p5 = scmp.lt.s32.totalorder %s5959_s19, 1  ;;  %v227_v0 = vlaneseq  ;;  %vm5900_vm0 = vmmov 1   ;;  %v9055_v3 = vmov 0   ;;  %vm998_vm4 = vcmask 1040384   ;;  %s5902_s5 = smov 48  }
  0x37   : > { %5876 = vsyncadd (%p9127_p0), [#allocation3], 4294966720  ;;  %vm9041_vm5 = vcmask 1044484   ;;  %vm9050_vm8 = vsmask.f32 7424  ;;  %s5903_s6 = smov 24  }
  0x38   : > { %vm6022_vm1 = vmpackc.low %vm5900_vm0, %vm5900_vm0  ;;  %s6027_s23 = scalar_select %p214_p5, %s5959_s19, 1  ;;  %v6029_v2 = vshrl.u32 %v227_v0, 7 }
  0x39   : > { %v966_v4 = vsel %vm6022_vm1, 65537, %v9055_v3  ;;  %vm6171_vm0 = vmor %vm998_vm4, %vm9041_vm5  ;;  %s5904_s7 = smov 8   ;;  %s5905_s8 = smov 32  }
  0x3a   : > { %v6034_v5 = vrot.slane %v966_v4, 7  ;;  %s5693_s27 = smul.u32 148, %s6027_s23  ;;  %v232_v6 = vadd.s32 32, %v6029_v2  ;;  %v264_v7 = vand.u32 15, %v6029_v2  ;;  %v230_v8 = vadd.s32 16, %v6029_v2  ;;  %s5906_s9 = smov 16  }
  0x3b   : > { %v229_v9 = vadd.s32 8, %v6029_v2  ;;  %v6042_v10 = vadd.s32 24, %v6029_v2  ;;  %v6048_v12 = vadd.s32 40, %v6029_v2  ;;  %s5907_s10 = smov 40   ;;  %s5908_s11 = smov 56  }
  0x3c   : > { %v6045_v11 = vrot.slane %v6034_v5, 4  ;;  %s6053_s30 = scalar_lea.vmem %s9033_s0, %s5693_s27  ;;  %v292_v13 = vand.u32 15, %v232_v6  ;;  %vm644_vm2 = vcmp.ge.s32.totalorder %v264_v7, 1  ;;  %v278_v14 = vand.u32 15, %v230_v8  ;;  %s5909_s12 = smov 64  }
  0x3d   : > { %v271_v15 = vand.u32 15, %v229_v9  ;;  %v6056_v16 = vld [vmem:[%s6053_s30 + $0x10] sm:$0xf]  ;;  %v6059_v17 = vld [vmem:[%s6053_s30 + $0x14] sm:$0xf]  ;;  %vm6061_vm3 = vmpackc.low %vm644_vm2, %vm644_vm2  ;;  %v285_v19 = vand.u32 15, %v6042_v10 }
  0x3e   : > { %v299_v20 = vand.u32 15, %v6048_v12  ;;  %vm648_vm6 = vcmp.ge.s32.totalorder %v292_v13, 1  ;;  %v841_v21 = vsel %vm6022_vm1, %v6059_v17, 0  ;;  %v1233_v22 = vsel %vm6061_vm3, %v6056_v16, 0  ;;  %v6074_v23 = vld [vmem:[%s6053_s30] sm:$0xf] }
  0x3f   : > { %vm646_vm7 = vcmp.ge.s32.totalorder %v278_v14, 1  ;;  %vm6076_vm9 = vmpackc.low %vm648_vm6, %vm648_vm6  ;;  %v5425_v25 = vcombine.low %v1233_v22, %v841_v21  ;;  %v6081_v26 = vld [vmem:[%s6053_s30 + $0x4] sm:$0xf]  ;;  %v6087_v28 = vld [vmem:[%s6053_s30 + $0x8] sm:$0xf]  ;;  %v5358_v29 = vcombine.low %v6056_v16, %v6059_v17  ;;  %vm6091_vm10 = vcmp.lt.s32.totalorder %v271_v15, 15 }
  0x40   : > { %vm1096_vm11 = vcmp.ne.s16.totalorder %v6034_v5, 0  ;;  %v840_v31 = vsel %vm6076_vm9, %v6056_v16, 0  ;;  %v5356_v32 = vcombine.low %v6074_v23, %v6081_v26  ;;  %v6102_v33 = vld [vmem:[%s6053_s30 + $0xc] sm:$0xf]  ;;  %vm6104_vm12 = vmpackc.low %vm646_vm7, %vm646_vm7  ;;  %v1164_v35 = vsel %vm6061_vm3, %v6087_v28, 0  ;;  %s5694_s13 = smul.u32 44, %s6027_s23 }
  0x41   : > { %v6112_v36 = vld [vmem:[%s6053_s30 + $0x18] sm:$0xf]  ;;  %2170 = vrot.lane.b32.xlu1 %v5425_v25, %s5902_s5  ;;  %v6115_v37 = vcombine.low %v840_v31, %v841_v21  ;;  %v839_v38 = vsel %vm6022_vm1, %v6102_v33, 0  ;;  %v838_v39 = vsel %vm6104_vm12, %v6087_v28, 0  ;;  %v1166_v40 = vsel %vm6104_vm12, %v6056_v16, 0  ;;  %vm935_vm13 = vmpackc.low %vm6091_vm10, %vm6091_vm10  ;;  %s204_s23 = sand.u32 1, %s5887_s16  }
  0x42   : > { %v6127_v41 = vld [vmem:[%s6053_s30 + $0x1c] sm:$0xf]  ;;  %v5390_v42 = vcombine.low %v1164_v35, %v839_v38  ;;  %v6129_v43 = vcombine.low %v838_v39, %v839_v38  ;;  %v5391_v44 = vcombine.low %v1166_v40, %v841_v21  ;;  %v5357_v45 = vcombine.low %v6087_v28, %v6102_v33  ;;  %v6134_v46 = vld [vmem:[%s6053_s30 + $0x40] sm:$0xf]  ;;  %v6137_v47 = vld [vmem:[%s6053_s30 + $0x44] sm:$0xf]  ;;  %s7993_s22 = scalar_lea.vmem %s9037_s4, %s5694_s13 }
  0x43   : > { %9138 = vst [vmem:[#allocation8_spill] sm:$0xff] %v6115_v37  ;;  %v6140_v48 = vld [vmem:[%s6053_s30 + $0x48] sm:$0xf]  ;;  %v1465_v49 = vshrl.u32 %v5356_v32, 16  ;;  %v1467_v50 = vshll.u32 %v5356_v32, 16  ;;  %v6144_v51 = vcombine.low %v6112_v36, %v6127_v41  ;;  %v1480_v52 = vshll.u32 %v5358_v29, 16 }
  0x44   : > { %v6147_v53 = vld [vmem:[%s6053_s30 + $0x4c] sm:$0xf]  ;;  %1857 = vrot.lane.b32.xlu0 %v5390_v42, %s5903_s6  ;;  %v1472_v54 = vshll.u32 %v5357_v45, 16  ;;  %v1484_v55 = vshrl.u32 %v5358_v29, 16  ;;  %v1476_v56 = vshrl.u32 %v5357_v45, 16  ;;  %v5364_v57 = vcombine.low %v6134_v46, %v6137_v47  ;;  %s5337_s29 = sshll.u32 %s204_s23, 8 }
  0x45   : > { %1859 = vrot.lane.b32.xlu1 %v5391_v44, %s5903_s6  ;;  %v1469_v58 = vrot.slane %v1467_v50, 1  ;;  %v1482_v59 = vrot.slane %v1480_v52, 1  ;;  %v1488_v60 = vshll.u32 %v6144_v51, 16  ;;  %v6156_v61 = vcombine.low %v6140_v48, %v6147_v53  ;;  %v869_v9 = vld [vmem:[%s6053_s30] sm:$0xe]  ;;  %s8957_s14 = scalar_lea.sflag [#allocation4], %s204_s23 }
  0x46   : > { %v1474_v62 = vrot.slane %v1472_v54, 1  ;;  %v1528_v63 = vshll.u32 %v5364_v57, 16  ;;  %v1532_v0 = vshrl.u32 %v5364_v57, 16  ;;  %vm679_vm14 = vcmp.lt.s32.totalorder %v285_v19, 15  ;;  %v1197_v19 = vld [vmem:[%s6053_s30 + $0x8] sm:$0xe] }
  0x47   : > { %v1470_v4 = vor.u32 %v1469_v58, %v1465_v49  ;;  %v1486_v6 = vor.u32 %v1484_v55, %v1482_v59  ;;  %v6161_v7 = vrot.slane %v1488_v60, 1  ;;  %v1536_v8 = vshll.u32 %v6156_v61, 16  ;;  %vm937_vm15 = vmpackc.low %vm679_vm14, %vm679_vm14  ;;  %p9657_p9 = scmp.ne.s32.totalorder %s9121_s25, 0  ;;  %s5911_s27 = smov [#allocation5]  }
  0x48   : > { %v1478_v10 = vor.u32 %v1476_v56, %v1474_v62  ;;  %v6165_v13 = vrot.slane %v1528_v63, 1  ;;  %v967_v14 = vsel %vm935_vm13, 65537, %v9055_v3  ;;  %v969_v15 = vsel %vm937_vm15, 65537, %v9055_v3  ;;  %s5833_s28 = sshll.u32 %s5911_s27, 4  ;;  %s5834_s28 = int_to_ptr.vmem [resolvable:$false] %s5833_s28 }
  0x49   : > { %v1475_v22 = vsel %vm9050_vm8, %v1470_v4, %v1474_v62  ;;  %v6179_v25 = vsel %vm9050_vm8, %v1486_v6, %v6161_v7  ;;  %v6181_v29 = vrot.slane %v1536_v8, 1  ;;  %v1003_v30 = vrot.slane %v967_v14, 7  ;;  %v6252_v4 = vld [vmem:[%s6053_s30 + $0x50] sm:$0xf] }
  0x4a   : > { %9139 = vst [vmem:[#allocation9_spill] sm:$0xff] %v6165_v13  ;;  %vm9065_vm2 = vcmask 1046528   ;;  %1596 = vrot.lane.b32.xlu0 %v1475_v22, %s5904_s7  ;;  %1912 = vrot.lane.b32.xlu1 %v6179_v25, %s5905_s8  ;;  %v1483_v31 = vsel %vm9050_vm8, %v1478_v10, %v1482_v59  ;;  %v1534_v32 = vor.u32 %v1532_v0, %v6165_v13  ;;  %v1009_v35 = vrot.slane %v969_v15, 7  ;;  %v6261_v10 = vld [vmem:[%s6053_s30 + $0x54] sm:$0xf] }
  0x4b   : > { %v1129_v38 = vsel %vm1096_vm11, %v869_v9, 0  ;;  %v6193_v39 = vsel %vm6171_vm0, %v6045_v11, %v1003_v30  ;;  %v1005_v40 = vrot.slane %v1003_v30, 4  ;;  %v1198_v42 = vsel %vm1096_vm11, %v1197_v19, 0 }
  0x4c   : > { %vm6199_vm4 = vcmp.lt.s32.totalorder %v299_v20, 15  ;;  %v6205_v45 = vsel %vm9050_vm8, %v1534_v32, %v6181_v29  ;;  %v6210_v49 = vsel %vm6171_vm0, %v6045_v11, %v1009_v35  ;;  %vm1097_vm6 = vcmp.ne.s16.totalorder %v6193_v39, 0 }
  0x4d   : > { %9144 = vst [vmem:[#allocation10_spill] sm:$0xff] %v6205_v45  ;;  %vm939_vm7 = vmpackc.low %vm6199_vm4, %vm6199_vm4  ;;  %v1011_v12 = vrot.slane %v1009_v35, 4  ;;  %v1007_v20 = vsel %vm6171_vm0, %v1005_v40, %v6034_v5  ;;  %vm9042_vm10 = vcmp.ne.s16.totalorder %v6210_v49, 0  ;;  %v1130_v50 = vsel %vm1097_vm6, %v6081_v26, 0 }
  0x4e   : > { %v1199_v52 = vsel %vm1097_vm6, %v6102_v33, 0  ;;  %1598 = vrot.lane.b32.xlu0 %v1483_v31, %s5904_s7  ;;  %1612 = vrot.lane.b32.xlu1 %v6205_v45, %s5904_s7  ;;  %vm6229_vm13 = vcmp.ne.s16.totalorder %v1007_v20, 0  ;;  %v1132_v55 = vsel %vm9042_vm10, %v6102_v33, 0  ;;  %v5373_v26 = vcombine.low %v1129_v38, %v1130_v50 }
  0x4f   : > { %v1201_v56 = vsel %vm9042_vm10, %v6059_v17, 0  ;;  %v1131_v57 = vsel %vm6229_vm13, %v6087_v28, 0  ;;  %v1200_v58 = vsel %vm6229_vm13, %v6056_v16, 0  ;;  %v5408_v59 = vcombine.low %v1198_v42, %v1199_v52 }
  0x50   : > { %v6246_v60 = vsel %vm939_vm7, 65537, %v9055_v3  ;;  %v5374_v62 = vcombine.low %v1131_v57, %v1132_v55  ;;  %v1712_v33 = vrot.slane %v5373_v26, 1  ;;  %v5409_v63 = vcombine.low %v1200_v58, %v1201_v56 }
  0x51   : > { %v1013_v0 = vsel %vm6171_vm0, %v1011_v12, %v6034_v5  ;;  %v2025_v6 = vrot.slane %v5408_v59, 1  ;;  %v1015_v28 = vrot.slane %v6246_v60, 7  ;;  %v243_v9 = vadd.s32 120, %v6029_v2 }
  0x52   : > { %vm6255_vm14 = vcmp.ne.s16.totalorder %v1013_v0, 0  ;;  %1910 = vrot.lane.b32.xlu0 %v1483_v31, %s5905_s8  ;;  %v1713_v14 = vrot.slane %v5374_v62, 1  ;;  %v2026_v15 = vrot.slane %v5409_v63, 1  ;;  %v245_v32 = vadd.s32 136, %v6029_v2 }
  0x53   : > { %v1133_v19 = vsel %vm6255_vm14, %v6056_v16, 0  ;;  %v1202_v22 = vsel %vm6255_vm14, %v6112_v36, 0  ;;  %v6275_v30 = vsel %vm6171_vm0, %v6045_v11, %v1015_v28  ;;  %v247_v31 = vadd.s32 152, %v6029_v2 }
  0x54   : > { %v369_v35 = vand.u32 15, %v243_v9  ;;  %v1714_v38 = vsel %vm9065_vm2, %v1712_v33, %v1713_v14  ;;  %v2027_v16 = vsel %vm9065_vm2, %v2025_v6, %v2026_v15  ;;  %vm9043_vm15 = vcmp.ne.s16.totalorder %v6275_v30, 0  ;;  %v5773_v33 = vld [vmem:[#allocation2] sm:$0xff]  }
  0x55   : > { %v6284_v40 = vcombine.low %v6252_v4, %v6261_v10  ;;  %1745 = vrot.lane.b32.xlu1 %v1714_v38, %s5906_s9  ;;  %v1134_v42 = vsel %vm9043_vm15, %v6059_v17, 0  ;;  %v1203_v44 = vsel %vm9043_vm15, %v6127_v41, 0  ;;  %v383_v12 = vand.u32 15, %v245_v32  ;;  %5639 = vmatprep.subr.bf16.mxu0 %v5773_v33 }
  0x56   : > { %v397_v20 = vand.u32 15, %v247_v31  ;;  %2058 = vrot.lane.b32.xlu0 %v2027_v16, %s5907_s10  ;;  %v6294_v50 = vcombine.low %v1133_v19, %v1134_v42  ;;  %v6296_v52 = vcombine.low %v1202_v22, %v1203_v44  ;;  %vm691_vm4 = vcmp.lt.s32.totalorder %v369_v35, 15  ;;  %5681 = vmatprep.subr.bf16.mxu1 %v5773_v33  ;;  %v5775_v42 = vld [vmem:[#allocation2 + $0x8] sm:$0xff]  }
  0x57   : > { %v1540_v55 = vshrl.u32 %v6156_v61, 16  ;;  %vm693_vm7 = vcmp.lt.s32.totalorder %v383_v12, 15  ;;  %vm949_vm10 = vmpackc.low %vm691_vm4, %vm691_vm4  ;;  %v1544_v56 = vshll.u32 %v6284_v40, 16  ;;  %v6307_v57 = vsel %vm6022_vm1, %v6127_v41, 0  ;;  %5640 = vmatpush3.bf16.msra.mxu0 %v5773_v33  ;;  %5686 = vmatpush3.bf16.msra.mxu1 %v5773_v33 }
  0x58   : > { %vm6299_vm5 = vcmp.lt.s32.totalorder %v397_v20, 15  ;;  %9151 = vst [vmem:[#allocation11_spill] sm:$0xff] %v6307_v57  ;;  %v9052_v58 = vrot.slane %v6294_v50, 1  ;;  %v9048_v59 = vrot.slane %v6296_v52, 1  ;;  %vm951_vm15 = vmpackc.low %vm693_vm7, %vm693_vm7  ;;  %v6312_v61 = vsel %vm949_vm10, 65537, %v9055_v3  ;;  %5641 = vmatprep.subr.bf16.mxu0 %v5775_v42  ;;  %5682 = vmatprep.subr.bf16.mxu1 %v5775_v42 }
  0x59   : > { %9152 = vst [vmem:[#allocation12_spill] sm:$0xff] %v6312_v61  ;;  %v1542_v62 = vor.u32 %v1540_v55, %v6181_v29  ;;  %vm953_vm4 = vmpackc.low %vm6299_vm5, %vm6299_vm5  ;;  %v983_v63 = vsel %vm951_vm15, 65537, %v9055_v3  ;;  %v9047_v0 = vrot.slane %v6312_v61, 7  ;;  %v6320_v6 = vrot.slane %v1544_v56, 1 }
  0x5a   : > { %v1235_v9 = vsel %vm6104_vm12, %v6112_v36, 0  ;;  %v1716_v19 = vsel %vm9065_vm2, %v1713_v14, %v9052_v58  ;;  %v2029_v29 = vsel %vm9065_vm2, %v2026_v15, %v9048_v59  ;;  %v985_v22 = vsel %vm953_vm4, 65537, %v9055_v3 }
  0x5b   : > { %v1051_v32 = vrot.slane %v983_v63, 7  ;;  %1747 = vrot.lane.b32.xlu1 %v1716_v19, %s5906_s9  ;;  %2060 = vrot.lane.b32.xlu0 %v2029_v29, %s5907_s10  ;;  %v1047_v34 = vrot.slane %v9047_v0, 4  ;;  %v1057_v31 = vrot.slane %v985_v22, 7  ;;  %v6338_v14 = vsel %vm9050_vm8, %v1542_v62, %v6320_v6 }
  0x5c   : > { %9153 = vst [vmem:[#allocation13_spill] sm:$0xff] %v6338_v14  ;;  %v5426_v38 = vcombine.low %v1235_v9, %v6307_v57  ;;  %v244_v16 = vadd.s32 128, %v6029_v2  ;;  %v249_v20 = vadd.s32 168, %v6029_v2  ;;  %5642 = vmatpush3.bf16.msra.mxu0 %v5775_v42  ;;  %5687 = vmatpush3.bf16.msra.mxu1 %v5775_v42  ;;  %v242_v58 = vadd.s32 112, %v6029_v2 }
  0x5d   : > { %v6343_v15 = vsel %vm6171_vm0, %v6045_v11, %v1051_v32  ;;  %v1053_v35 = vrot.slane %v1051_v32, 4  ;;  %v1049_v44 = vsel %vm6171_vm0, %v1047_v34, %v6034_v5  ;;  %v6353_v12 = vsel %vm6171_vm0, %v6045_v11, %v1057_v31  ;;  %v1266_v32 = vld [vmem:[%s6053_s30 + $0x10] sm:$0xe] }
  0x5e   : > { %vm9045_vm5 = vcmp.ne.s16.totalorder %v6343_v15, 0  ;;  %vm6360_vm12 = vcmp.ne.s16.totalorder %v1049_v44, 0  ;;  %vm9044_vm10 = vcmp.ne.s16.totalorder %v6353_v12, 0  ;;  %v376_v9 = vand.u32 15, %v244_v16 }
  0x5f   : > { %v1055_v55 = vsel %vm6171_vm0, %v1053_v35, %v6034_v5  ;;  %v1146_v56 = vsel %vm9045_vm5, %v6137_v47, 0  ;;  %v1145_v33 = vsel %vm6360_vm12, %v6134_v46, 0  ;;  %v1148_v63 = vsel %vm9044_vm10, %v6147_v53, 0  ;;  %1614 = vrot.lane.b32.xlu0 %v6338_v14, %s5904_s7  ;;  %v5776_v46 = vld [vmem:[#allocation2 + $0x10] sm:$0xff]  }
  0x60   : > { %vm6368_vm15 = vcmp.ne.s16.totalorder %v1055_v55, 0  ;;  %v6383_v19 = vcombine.low %v1145_v33, %v1146_v56  ;;  %v411_v29 = vand.u32 15, %v249_v20  ;;  %v1059_v22 = vrot.slane %v1057_v31, 4  ;;  %v6397_v20 = vld [vmem:[%s6053_s30 + $0x20] sm:$0xf]  ;;  %5643 = vmatprep.subr.bf16.mxu0 %v5776_v46  ;;  %5683 = vmatprep.subr.bf16.mxu1 %v5776_v46 }
  0x61   : > { %v1147_v47 = vsel %vm6368_vm15, %v6140_v48, 0  ;;  %vm660_vm7 = vcmp.ge.s32.totalorder %v376_v9, 1  ;;  %v9159_v16 = vmov 0  ;;  %v6400_v31 = vld [vmem:[%s6053_s30 + $0x24] sm:$0xf]  ;;  %v1267_v55 = vsel %vm1096_vm11, %v1266_v32, 0  ;;  %5644 = vmatpush3.bf16.msra.mxu0 %v5776_v46  ;;  %5688 = vmatpush3.bf16.msra.mxu1 %v5776_v46 }
  0x62   : > { %9158 = vst [vmem:[#allocation14_spill] sm:$0xff] %v6383_v19  ;;  %v6386_v34 = vcombine.low %v1147_v47, %v1148_v63  ;;  %v9046_v35 = vrot.slane %v6383_v19, 1  ;;  %vm6389_vm4 = vmpackc.low %vm660_vm7, %vm660_vm7  ;;  %vm697_vm10 = vcmp.lt.s32.totalorder %v411_v29, 15  ;;  %v1061_v44 = vsel %vm6171_vm0, %v1059_v22, %v6034_v5  ;;  %v5777_v47 = vld [vmem:[#allocation2 + $0x18] sm:$0xff]  }
  0x63   : > { %v9160_v16 = vsel %vm6389_vm4, 4294967295, %v9159_v16  ;;  %2172 = vrot.lane.b32.xlu0 %v5426_v38, %s5902_s5  ;;  %vm955_vm5 = vmpackc.low %vm697_vm10, %vm697_vm10  ;;  %v1268_v56 = vsel %vm1097_vm6, %v6059_v17, 0  ;;  %vm6412_vm7 = vcmp.ne.s16.totalorder %v1061_v44, 0  ;;  %v1269_v9 = vsel %vm6229_vm13, %v6112_v36, 0  ;;  %5645 = vmatprep.subr.bf16.mxu0 %v5777_v47  ;;  %v7123_v19 = vld [vmem:[%s6053_s30 + $0x74] sm:$0xf] }
  0x64   : > { %9161 = vst [vmem:[#allocation15_spill] sm:$0xff] %v9160_v16  ;;  %v1729_v42 = vrot.slane %v6386_v34, 1  ;;  %v6410_v33 = vsel %vm955_vm5, 65537, %v9055_v3  ;;  %vm9164_vm10 = vcmp.ne.s16.totalorder %v6210_v49, 0  ;;  %v6428_v29 = vcombine.low %v6397_v20, %v6400_v31  ;;  %5684 = vmatprep.subr.bf16.mxu1 %v5777_v47 }
  0x65   : > { %v1270_v38 = vsel %vm9164_vm10, %v6127_v41, 0  ;;  %v9049_v39 = vrot.slane %v6410_v33, 7  ;;  %v6434_v49 = vsel %vm6022_vm1, %v6147_v53, 0  ;;  %v1180_v54 = vsel %vm6389_vm4, %v6140_v48, 0  ;;  %5646 = vmatpush3.bf16.msra.mxu0 %v5777_v47  ;;  %5689 = vmatpush3.bf16.msra.mxu1 %v5777_v47 }
  0x66   : > { %v1730_v17 = vsel %vm9065_vm2, %v9046_v35, %v1729_v42  ;;  %9165 = vst [vmem:[#allocation16_spill] sm:$0xff] %v6434_v49  ;;  %v246_v22 = vadd.s32 144, %v6029_v2  ;;  %v1149_v46 = vsel %vm6412_vm7, %v6252_v4, 0  ;;  %v5443_v34 = vcombine.low %v1267_v55, %v1268_v56 }
  0x67   : > { %1761 = vrot.lane.b32.xlu1 %v1730_v17, %s5906_s9  ;;  %v6445_v32 = vsel %vm6171_vm0, %v6045_v11, %v9049_v39  ;;  %v6450_v44 = vcombine.low %v1269_v9, %v1270_v38  ;;  %v1492_v17 = vshrl.u32 %v6144_v51, 16  ;;  %v1496_v35 = vshll.u32 %v6428_v29, 16 }
  0x68   : > { %vm9057_vm11 = vcmp.ne.s16.totalorder %v6445_v32, 0  ;;  %v390_v0 = vand.u32 15, %v246_v22  ;;  %v5398_v27 = vcombine.low %v1180_v54, %v6434_v49  ;;  %v1271_v55 = vsel %vm6255_vm14, %v6397_v20, 0 }
  0x69   : > { %v1150_v59 = vsel %vm9057_vm11, %v6261_v10, 0  ;;  %vm9166_vm6 = vcmp.ne.s16.totalorder %v6275_v30, 0  ;;  %v235_v9 = vadd.s32 56, %v6029_v2  ;;  %v1017_v38 = vrot.slane %v1015_v28, 4 }
  0x6a   : > { %v1272_v56 = vsel %vm9166_vm6, %v6400_v31, 0  ;;  %v6467_v51 = vcombine.low %v1149_v46, %v1150_v59  ;;  %vm662_vm13 = vcmp.ge.s32.totalorder %v390_v0, 1  ;;  %v2338_v47 = vrot.slane %v5443_v34, 1 }
  0x6b   : > { %2223 = vrot.lane.b32.xlu1 %v6179_v25, %s5908_s11  ;;  %v2339_v8 = vrot.slane %v6450_v44, 1  ;;  %v1494_v30 = vor.u32 %v1492_v17, %v6161_v7  ;;  %v6475_v22 = vrot.slane %v1496_v35, 1  ;;  %vm6477_vm14 = vmpackc.low %vm662_vm13, %vm662_vm13  ;;  %v9167_v39 = vmov 0 }
  0x6c   : > { %v9051_v54 = vrot.slane %v6467_v51, 1  ;;  %v9168_v39 = vsel %vm6477_vm14, 4294967295, %v9167_v39  ;;  %v313_v59 = vand.u32 15, %v235_v9  ;;  %v6481_v0 = vcombine.low %v1271_v55, %v1272_v56  ;;  %v6512_v56 = vld [vmem:[%s6053_s30 + $0x58] sm:$0xf] }
  0x6d   : > { %9169 = vst [vmem:[#allocation17_spill] sm:$0xff] %v9168_v39  ;;  %v1019_v60 = vsel %vm6171_vm0, %v1017_v38, %v6034_v5  ;;  %v2340_v28 = vsel %vm9065_vm2, %v2338_v47, %v2339_v8  ;;  %v6495_v35 = vsel %vm6022_vm1, %v6261_v10, 0  ;;  %v1182_v46 = vsel %vm6477_vm14, %v6252_v4, 0  ;;  %v6515_v9 = vld [vmem:[%s6053_s30 + $0x5c] sm:$0xf] }
  0x6e   : > { %v1732_v7 = vsel %vm9065_vm2, %v1729_v42, %v9051_v54  ;;  %vm683_vm5 = vcmp.lt.s32.totalorder %v313_v59, 15  ;;  %9170 = vst [vmem:[#allocation18_spill] sm:$0xff] %v6495_v35  ;;  %vm6505_vm6 = vcmp.ne.s16.totalorder %v1019_v60, 0  ;;  %v237_v44 = vadd.s32 72, %v6029_v2 }
  0x6f   : > { %1873 = vrot.lane.b32.xlu1 %v5398_v27, %s5903_s6  ;;  %1763 = vrot.lane.b32.xlu0 %v1732_v7, %s5906_s9  ;;  %vm941_vm10 = vmpackc.low %vm683_vm5, %vm683_vm5  ;;  %v6502_v27 = vsel %vm9050_vm8, %v1494_v30, %v6475_v22  ;;  %v9053_v17 = vrot.slane %v6481_v0, 1  ;;  %v5399_v38 = vcombine.low %v1182_v46, %v6495_v35  ;;  %v1214_v47 = vsel %vm6360_vm12, %v6140_v48, 0 }
  0x70   : > { %v973_v42 = vsel %vm941_vm10, 65537, %v9055_v3  ;;  %vm9173_vm13 = vcmp.ne.s16.totalorder %v6343_v15, 0  ;;  %v327_v59 = vand.u32 15, %v237_v44  ;;  %v1135_v7 = vsel %vm6505_vm6, %v6112_v36, 0 }
  0x71   : > { %v1021_v55 = vrot.slane %v973_v42, 7  ;;  %v1215_v30 = vsel %vm9173_vm13, %v6147_v53, 0  ;;  %v1216_v48 = vsel %vm6368_vm15, %v6252_v4, 0  ;;  %vm9174_vm10 = vcmp.ne.s16.totalorder %v6353_v12, 0 }
  0x72   : > { %v1217_v53 = vsel %vm9174_vm10, %v6261_v10, 0  ;;  %v6544_v46 = vcombine.low %v6512_v56, %v6515_v9  ;;  %vm685_vm13 = vcmp.lt.s32.totalorder %v327_v59, 15  ;;  %v6565_v59 = vcombine.low %v1214_v47, %v1215_v30 }
  0x73   : > { %2371 = vrot.lane.b32.xlu1 %v2340_v28, %s5909_s12  ;;  %2225 = vrot.lane.b32.xlu0 %v6502_v27, %s5908_s11  ;;  %v6530_v60 = vsel %vm6171_vm0, %v6045_v11, %v1021_v55  ;;  %v1023_v28 = vrot.slane %v1021_v55, 4  ;;  %vm943_vm8 = vmpackc.low %vm685_vm13, %vm685_vm13  ;;  %v234_v47 = vadd.s32 48, %v6029_v2  ;;  %vm9179_vm13 = vsmask.f32 7424 }
  0x74   : > { %vm9062_vm5 = vcmp.ne.s16.totalorder %v6530_v60, 0  ;;  %v6554_v54 = vsel %vm943_vm8, 65537, %v9055_v3  ;;  %9177 = vst [vmem:[#allocation19_spill] sm:$0xff] %v6565_v59  ;;  %v1218_v3 = vsel %vm6412_vm7, %v6512_v56, 0  ;;  %v6679_v37 = vsel %vm6022_vm1, %v6515_v9, 0 }
  0x75   : > { %v1136_v42 = vsel %vm9062_vm5, %v6127_v41, 0  ;;  %v1025_v44 = vsel %vm6171_vm0, %v1023_v28, %v6034_v5  ;;  %v2342_v41 = vsel %vm9065_vm2, %v2339_v8, %v9053_v17  ;;  %v5417_v28 = vcombine.low %v1216_v48, %v1217_v53  ;;  %9185 = vst [vmem:[#allocation22_spill] sm:$0xff] %v6679_v37 }
  0x76   : > { %v5376_v55 = vcombine.low %v1135_v7, %v1136_v42  ;;  %vm6556_vm10 = vcmp.ne.s16.totalorder %v1025_v44, 0  ;;  %v1548_v42 = vshrl.u32 %v6284_v40, 16  ;;  %v1552_v44 = vshll.u32 %v6544_v46, 16 }
  0x77   : > { %1875 = vrot.lane.b32.xlu1 %v5399_v38, %s5903_s6  ;;  %1600 = vrot.lane.b32.xlu0 %v6179_v25, %s5904_s7  ;;  %v9054_v38 = vrot.slane %v6554_v54, 7  ;;  %v1137_v8 = vsel %vm6556_vm10, %v6397_v20, 0  ;;  %v9178_v40 = vrot.slane %v6294_v50, 1  ;;  %v9058_v48 = vrot.slane %v6565_v59, 1 }
  0x78   : > { %v1717_v7 = vrot.slane %v5376_v55, 1  ;;  %v2042_v53 = vrot.slane %v5417_v28, 1  ;;  %v1550_v17 = vor.u32 %v1548_v42, %v6320_v6  ;;  %v1219_v50 = vsel %vm9057_vm11, %v6515_v9, 0 }
  0x79   : > { %v6575_v25 = vsel %vm6171_vm0, %v6045_v11, %v9054_v38  ;;  %v6593_v38 = vrot.slane %v1552_v44, 1  ;;  %v1168_v28 = vsel %vm6076_vm9, %v6112_v36, 0  ;;  %v1249_v36 = vsel %vm6389_vm4, %v6252_v4, 0 }
  0x7a   : > { %vm1105_vm8 = vcmp.ne.s16.totalorder %v6575_v25, 0  ;;  %v1718_v30 = vsel %vm9065_vm2, %v9178_v40, %v1717_v7  ;;  %v306_v40 = vand.u32 15, %v234_v47  ;;  %v2043_v6 = vsel %vm9065_vm2, %v9058_v48, %v2042_v53 }
  0x7b   : > { %2373 = vrot.lane.b32.xlu1 %v2342_v41, %s5909_s12  ;;  %1926 = vrot.lane.b32.xlu0 %v6338_v14, %s5905_s8  ;;  %v1138_v55 = vsel %vm1105_vm8, %v6400_v31, 0  ;;  %v6614_v42 = vsel %vm9179_vm13, %v1550_v17, %v6593_v38  ;;  %v5392_v47 = vcombine.low %v1168_v28, %v6307_v57  ;;  %v1205_v28 = vsel %vm9062_vm5, %v6400_v31, 0  ;;  %v6669_v14 = vld [vmem:[%s6053_s30 + $0x60] sm:$0xf] }
  0x7c   : > { %v6595_v41 = vcombine.low %v1137_v8, %v1138_v55  ;;  %v6617_v8 = vcombine.low %v1218_v3, %v1219_v50  ;;  %vm650_vm11 = vcmp.ge.s32.totalorder %v306_v40, 1  ;;  %v9180_v3 = vmov 0  ;;  %v6635_v55 = vld [vmem:[%s6053_s30 + $0x28] sm:$0xf]  ;;  %v6638_v50 = vld [vmem:[%s6053_s30 + $0x2c] sm:$0xf] }
  0x7d   : > { %vm6630_vm13 = vmpackc.low %vm650_vm11, %vm650_vm11  ;;  %v251_v40 = vadd.s32 184, %v6029_v2  ;;  %v1500_v59 = vshrl.u32 %v6428_v29, 16  ;;  %v1285_v29 = vsel %vm6368_vm15, %v6512_v56, 0  ;;  %v9190_v26 = vrot.slane %v6410_v33, 7 }
  0x7e   : > { %v9059_v44 = vrot.slane %v6595_v41, 1  ;;  %v9181_v3 = vsel %vm6630_vm13, 4294967295, %v9180_v3  ;;  %v1206_v33 = vsel %vm6556_vm10, %v6635_v55, 0  ;;  %vm9194_vm15 = vcmask 1046528  }
  0x7f   : > { %1749 = vrot.lane.b32.xlu1 %v1718_v30, %s5906_s9  ;;  %1602 = vrot.lane.b32.xlu0 %v6502_v27, %s5904_s7  ;;  %9182 = vst [vmem:[#allocation20_spill] sm:$0xff] %v9181_v3  ;;  %v425_v48 = vand.u32 15, %v251_v40  ;;  %v253_v30 = vadd.s32 200, %v6029_v2  ;;  %v1502_v49 = vor.u32 %v1500_v59, %v6475_v22  ;;  %v239_v63 = vadd.s32 88, %v6029_v2 }
  0x80   : > { %v1720_v17 = vsel %vm9065_vm2, %v1717_v7, %v9059_v44  ;;  %v1204_v7 = vsel %vm6505_vm6, %v6397_v20, 0  ;;  %v6653_v44 = vsel %vm6022_vm1, %v6400_v31, 0  ;;  %v6672_v31 = vld [vmem:[%s6053_s30 + $0x64] sm:$0xf] }
  0x81   : > { %9183 = vst [vmem:[#allocation21_spill] sm:$0xff] %v6653_v44  ;;  %vm699_vm11 = vcmp.lt.s32.totalorder %v425_v48, 15  ;;  %v6939_v25 = vsel %vm6022_vm1, %v6672_v31, 0 }
  0x82   : > { %vm957_vm5 = vmpackc.low %vm699_vm11, %vm699_vm11  ;;  %vm9186_vm11 = vcmp.ne.s16.totalorder %v6343_v15, 0  ;;  %9224 = vst [vmem:[#allocation27_spill] sm:$0xff] %v6939_v25 }
  0x83   : > { %2074 = vrot.lane.b32.xlu1 %v2043_v6, %s5907_s10  ;;  %1928 = vrot.lane.b32.xlu0 %v6614_v42, %s5905_s8  ;;  %v5433_v6 = vcombine.low %v1249_v36, %v6495_v35  ;;  %v6660_v36 = vcombine.low %v6635_v55, %v6638_v50  ;;  %v9184_v35 = vrot.slane %v6617_v8, 1 }
  0x85   : > { %v2045_v40 = vsel %vm9065_vm2, %v2042_v53, %v9184_v35  ;;  %v439_v35 = vand.u32 15, %v253_v30  ;;  %v1504_v48 = vshll.u32 %v6660_v36, 16  ;;  %v1283_v53 = vsel %vm6360_vm12, %v6252_v4, 0 }
  0x86   : > { %vm9188_vm2 = vcmp.ne.s16.totalorder %v6353_v12, 0  ;;  %v6702_v4 = vcombine.low %v6669_v14, %v6672_v31 }
  0x87   : > { %1861 = vrot.lane.b32.xlu1 %v5392_v47, %s5903_s6  ;;  %1751 = vrot.lane.b32.xlu0 %v1720_v17, %s5906_s9  ;;  %v1170_v47 = vsel %vm6630_vm13, %v6397_v20, 0  ;;  %v6666_v17 = vcombine.low %v1204_v7, %v1205_v28  ;;  %v9187_v7 = vmov 0   ;;  %v1286_v30 = vsel %vm9188_vm2, %v6515_v9, 0 }
  0x88   : > { %v5393_v57 = vcombine.low %v1170_v47, %v6653_v44  ;;  %v989_v28 = vsel %vm957_vm5, 65537, %v9187_v7  ;;  %v1251_v47 = vsel %vm6477_vm14, %v6512_v56, 0  ;;  %vm6711_vm12 = vcmp.lt.s32.totalorder %v439_v35, 15 }
  0x89   : > { %v1069_v62 = vrot.slane %v989_v28, 7  ;;  %v5434_v12 = vcombine.low %v1251_v47, %v6679_v37  ;;  %v5452_v39 = vcombine.low %v1285_v29, %v1286_v30  ;;  %v1207_v35 = vsel %vm1105_vm8, %v6638_v50, 0  ;;  %vm959_vm2 = vmpackc.low %vm6711_vm12, %vm6711_vm12 }
  0x8a   : > { %vm9195_vm5 = vcmp.ne.s16.totalorder %v6445_v32, 0 }
  0x8b   : > { %2186 = vrot.lane.b32.xlu1 %v5433_v6, %s5902_s5  ;;  %2076 = vrot.lane.b32.xlu0 %v2045_v40, %s5907_s10  ;;  %v1284_v6 = vsel %vm9186_vm11, %v6261_v10, 0  ;;  %v2030_v10 = vrot.slane %v6666_v17, 1  ;;  %v1065_v40 = vrot.slane %v9190_v26, 4  ;;  %v6718_v17 = vrot.slane %v1504_v48, 1 }
  0x8c   : > { %v6707_v15 = vcombine.low %v1283_v53, %v1284_v6  ;;  %v1560_v53 = vshll.u32 %v6702_v4, 16  ;;  %v6743_v48 = vsel %vm6171_vm0, %v6045_v11, %v1069_v62  ;;  %v2355_v45 = vrot.slane %v5452_v39, 1 }
  0x8d   : > { %v1067_v59 = vsel %vm6171_vm0, %v1065_v40, %v6034_v5  ;;  %v6746_v6 = vcombine.low %v1206_v33, %v1207_v35  ;;  %v1288_v28 = vsel %vm9195_vm5, %v6672_v31, 0  ;;  %vm9196_vm11 = vsmask.f32 7424  ;;  %vm9200_vm5 = vmmov %vm9194_vm15 }
  0x8e   : > { %9189 = vst [vmem:[#allocation23_spill] sm:$0xff] %v6707_v15  ;;  %v6756_v47 = vsel %vm9196_vm11, %v1502_v49, %v6718_v17  ;;  %v6759_v30 = vrot.slane %v1560_v53, 1  ;;  %v6762_v39 = vsel %vm959_vm2, 65537, %v9187_v7  ;;  %vm6764_vm12 = vcmp.ne.s16.totalorder %v1067_v59, 0  ;;  %vm9199_vm2 = vmmov %vm9196_vm11 }
  0x8f   : > { %1914 = vrot.lane.b32.xlu1 %v6502_v27, %s5905_s8  ;;  %1863 = vrot.lane.b32.xlu0 %v5393_v57, %s5903_s6  ;;  %v1556_v27 = vshrl.u32 %v6544_v46, 16  ;;  %v9193_v57 = vrot.slane %v6296_v52, 1  ;;  %v9072_v46 = vrot.slane %v6707_v15, 1  ;;  %v1287_v52 = vsel %vm6412_vm7, %v6669_v14, 0 }
  0x90   : > { %vm9071_vm7 = vcmp.ne.s16.totalorder %v6743_v48, 0  ;;  %v6771_v32 = vcombine.low %v1287_v52, %v1288_v28  ;;  %v1071_v40 = vrot.slane %v1069_v62, 4  ;;  %v1151_v53 = vsel %vm6764_vm12, %v6512_v56, 0 }
  0x91   : > { %v2031_v22 = vsel %vm9194_vm15, %v9193_v57, %v2030_v10  ;;  %v1558_v29 = vor.u32 %v1556_v27, %v6593_v38  ;;  %v2356_v49 = vsel %vm9194_vm15, %v9072_v46, %v2355_v45  ;;  %v9074_v38 = vrot.slane %v6746_v6, 1 }
  0x92   : > { %v1152_v33 = vsel %vm9071_vm7, %v6515_v9, 0  ;;  %v248_v35 = vadd.s32 160, %v6029_v2  ;;  %v341_v57 = vand.u32 15, %v239_v63  ;;  %v9073_v62 = vrot.slane %v6771_v32, 1 }
  0x93   : > { %2239 = vrot.lane.b32.xlu1 %v6614_v42, %s5908_s11  ;;  %2188 = vrot.lane.b32.xlu0 %v5434_v12, %s5902_s5  ;;  %v9076_v12 = vrot.slane %v6762_v39, 7  ;;  %v6782_v27 = vsel %vm9199_vm2, %v1558_v29, %v6759_v30  ;;  %v5384_v59 = vcombine.low %v1151_v53, %v1152_v33  ;;  %v1073_v9 = vsel %vm6171_vm0, %v1071_v40, %v6034_v5  ;;  %v6829_v53 = vld [vmem:[%s6053_s30 + $0x30] sm:$0xf] }
  0x94   : > { %v1237_v28 = vsel %vm6076_vm9, %v6397_v20, 0  ;;  %v404_v29 = vand.u32 15, %v248_v35  ;;  %vm6811_vm11 = vcmp.lt.s32.totalorder %v341_v57, 15  ;;  %vm6816_vm15 = vcmp.ne.s16.totalorder %v1073_v9, 0  ;;  %vm9205_vm9 = vmmov %vm9200_vm5  ;;  %v6841_v35 = vld [vmem:[%s6053_s30 + $0x34] sm:$0xf] }
  0x95   : > { %v6806_v52 = vsel %vm6171_vm0, %v6045_v11, %v9076_v12  ;;  %v2358_v24 = vsel %vm9205_vm9, %v2355_v45, %v9073_v62  ;;  %v5427_v20 = vcombine.low %v1237_v28, %v6653_v44  ;;  %v1733_v40 = vrot.slane %v5384_v59, 1 }
  0x96   : > { %vm9081_vm2 = vcmp.ne.s16.totalorder %v6806_v52, 0  ;;  %vm664_vm7 = vcmp.ge.s32.totalorder %v404_v29, 1  ;;  %v1153_v33 = vsel %vm6816_vm15, %v6669_v14, 0  ;;  %v250_v45 = vadd.s32 176, %v6029_v2 }
  0x97   : > { %2062 = vrot.lane.b32.xlu1 %v2031_v22, %s5907_s10  ;;  %1916 = vrot.lane.b32.xlu0 %v6756_v47, %s5905_s8  ;;  %v2033_v22 = vsel %vm9200_vm5, %v2030_v10, %v9074_v38  ;;  %vm945_vm5 = vmpackc.low %vm6811_vm11, %vm6811_vm11  ;;  %v1273_v9 = vsel %vm6505_vm6, %v6635_v55, 0  ;;  %v6859_v10 = vsel %vm6022_vm1, %v6638_v50, 0  ;;  %v1220_v12 = vsel %vm6764_vm12, %v6669_v14, 0 }
  0x98   : > { %vm9207_vm11 = vmmov %vm9205_vm9  ;;  %vm9208_vm9 = vcmp.ne.s16.totalorder %v6530_v60, 0  ;;  %v977_v29 = vsel %vm945_vm5, 65537, %v9187_v7  ;;  %9209 = vst [vmem:[#allocation24_spill] sm:$0xff] %v6859_v10  ;;  %v6872_v60 = vcombine.low %v6829_v53, %v6841_v35 }
  0x99   : > { %v1274_v28 = vsel %vm9208_vm9, %v6638_v50, 0  ;;  %v1033_v62 = vrot.slane %v977_v29, 7  ;;  %vm9216_vm9 = vcmask 1046528  }
  0x9b   : > { %2387 = vrot.lane.b32.xlu1 %v2356_v49, %s5909_s12  ;;  %2241 = vrot.lane.b32.xlu0 %v6782_v27, %s5908_s11  ;;  %v241_v49 = vadd.s32 104, %v6029_v2 }
  0x9d   : > { %v355_v57 = vand.u32 15, %v241_v49  ;;  %v9210_v49 = vmov 0 }
  0x9f   : > { %2064 = vrot.lane.b32.xlu1 %v2033_v22, %s5907_s10  ;;  %1616 = vrot.lane.b32.xlu0 %v6614_v42, %s5904_s7  ;;  %v1154_v42 = vsel %vm9081_vm2, %v6672_v31, 0  ;;  %v9206_v22 = vrot.slane %v6467_v51, 1  ;;  %v1239_v51 = vsel %vm6630_vm13, %v6635_v55, 0  ;;  %vm6879_vm6 = vcmp.lt.s32.totalorder %v355_v57, 15 }
  0xa0   : > { %v6868_v34 = vcombine.low %v1153_v33, %v1154_v42  ;;  %v5428_v33 = vcombine.low %v1239_v51, %v6859_v10  ;;  %vm947_vm5 = vmpackc.low %vm6879_vm6, %vm6879_vm6 }
  0xa1   : > { %v1734_v59 = vsel %vm9207_vm11, %v9206_v22, %v1733_v40  ;;  %vm6864_vm11 = vmpackc.low %vm664_vm7, %vm664_vm7  ;;  %v9213_v22 = vrot.slane %v6554_v54, 7  ;;  %v1512_v54 = vshll.u32 %v6872_v60, 16 }
  0xa2   : > { %v9211_v49 = vsel %vm6864_vm11, 4294967295, %v9210_v49  ;;  %v1184_v42 = vsel %vm6864_vm11, %v6512_v56, 0 }
  0xa3   : > { %2389 = vrot.lane.b32.xlu1 %v2358_v24, %s5909_s12  ;;  %2174 = vrot.lane.b32.xlu0 %v5427_v20, %s5902_s5  ;;  %9212 = vst [vmem:[#allocation25_spill] sm:$0xff] %v9211_v49  ;;  %v418_v24 = vand.u32 15, %v250_v45  ;;  %v6875_v20 = vcombine.low %v1273_v9, %v1274_v28  ;;  %v1029_v46 = vrot.slane %v9213_v22, 4  ;;  %v1508_v45 = vshrl.u32 %v6660_v36, 16  ;;  %v5778_v22 = vld [vmem:[#allocation2 + $0x20] ss:$0 sps:$4 sm:$0xff]  }
  0xa4   : > { %v5400_v57 = vcombine.low %v1184_v42, %v6679_v37  ;;  %v6905_v36 = vsel %vm6171_vm0, %v6045_v11, %v1033_v62  ;;  %v1275_v28 = vsel %vm6556_vm10, %v6829_v53, 0  ;;  %v6915_v51 = vrot.slane %v1512_v54, 1 }
  0xa5   : > { %vm666_vm7 = vcmp.ge.s32.totalorder %v418_v24, 1  ;;  %v2343_v9 = vrot.slane %v6875_v20, 1  ;;  %v1031_v56 = vsel %vm6171_vm0, %v1029_v46, %v6034_v5  ;;  %v1510_v38 = vor.u32 %v1508_v45, %v6718_v17 }
  0xa6   : > { %vm6917_vm6 = vmpackc.low %vm666_vm7, %vm666_vm7  ;;  %v9217_v46 = vmov 0  ;;  %v1276_v24 = vsel %vm1105_vm8, %v6841_v35, 0  ;;  %v6925_v17 = vsel %vm947_vm5, 65537, %v9187_v7  ;;  %vm6927_vm10 = vcmp.ne.s16.totalorder %v1031_v56, 0 }
  0xa7   : > { %1765 = vrot.lane.b32.xlu1 %v1734_v59, %s5906_s9  ;;  %1618 = vrot.lane.b32.xlu0 %v6782_v27, %s5904_s7  ;;  %v9075_v59 = vrot.slane %v6868_v34, 1  ;;  %v9218_v46 = vsel %vm6917_vm6, 4294967295, %v9217_v46  ;;  %vm9223_vm7 = vcmask 1046528   ;;  %v6945_v42 = vcombine.low %v1275_v28, %v1276_v24 }
  0xa8   : > { %9219 = vst [vmem:[#allocation26_spill] sm:$0xff] %v9218_v46  ;;  %v1035_v45 = vrot.slane %v1033_v62, 4  ;;  %v9077_v54 = vrot.slane %v6925_v17, 7  ;;  %vm9226_vm8 = vsmask.f32 7424  ;;  %v236_v62 = vadd.s32 64, %v6029_v2 }
  0xa9   : > { %v1736_v29 = vsel %vm9216_vm9, %v1733_v40, %v9075_v59  ;;  %vm9078_vm9 = vcmp.ne.s16.totalorder %v6905_v36, 0  ;;  %v9222_v40 = vrot.slane %v6481_v0, 1  ;;  %9225 = vst [vmem:[#allocation28_spill] sm:$0xff] %v6945_v42  ;;  %v6950_v0 = vsel %vm9226_vm8, %v1510_v38, %v6915_v51 }
  0xaa   : > { %v1140_v56 = vsel %vm9078_vm9, %v6638_v50, 0  ;;  %vm2759_vm5 = vcmask 1043456   ;;  %v1037_v50 = vsel %vm6171_vm0, %v1035_v45, %v6034_v5 }
  0xab   : > { %2227 = vrot.lane.b32.xlu1 %v6756_v47, %s5908_s11  ;;  %2176 = vrot.lane.b32.xlu0 %v5428_v33, %s5902_s5  ;;  %v2344_v20 = vsel %vm9223_vm7, %v9222_v40, %v2343_v9  ;;  %v1186_v33 = vsel %vm6917_vm6, %v6669_v14, 0  ;;  %v6962_v40 = vld [vmem:[%s6053_s30 + $0x6c] sm:$0xf]  ;;  %v2761_v28 = vsel %vm2759_vm5, %v5778_v22, 0  ;;  %vm9227_vm7 = vcmp.ne.s16.totalorder %v6743_v48, 0 }
  0xac   : > { %v5401_v38 = vcombine.low %v1186_v33, %v6939_v25  ;;  %5691 = vmatprep.subr.msk.bf16.mxu0 %vm2759_vm5, %v5778_v22  ;;  %5692 = vmatprep.subr.msk.bf16.mxu1 %vm2759_vm5, %v5778_v22  ;;  %vm6995_vm8 = vcmp.ne.s16.totalorder %v1037_v50, 0 }
  0xad   : > { %5648 = vmatpush3.bf16.msra.mxu0 %v2761_v28  ;;  %5690 = vmatpush3.bf16.msra.mxu1 %v2761_v28  ;;  %v1564_v28 = vshrl.u32 %v6702_v4, 16  ;;  %v1141_v50 = vsel %vm6995_vm8, %v6829_v53, 0  ;;  %v9232_v4 = vrot.slane %v6595_v41, 1 }
  0xaf   : > { %1877 = vrot.lane.b32.xlu1 %v5400_v57, %s5903_s6  ;;  %1767 = vrot.lane.b32.xlu0 %v1736_v29, %s5906_s9  ;;  %v1139_v57 = vsel %vm6927_vm10, %v6635_v55, 0  ;;  %v6959_v29 = vld [vmem:[%s6053_s30 + $0x68] sm:$0xf] }
  0xb0   : > { %v5378_v59 = vcombine.low %v1139_v57, %v1140_v56  ;;  %v1221_v57 = vsel %vm9227_vm7, %v6672_v31, 0  ;;  %v6990_v45 = vcombine.low %v6959_v29, %v6962_v40  ;;  %v320_v56 = vand.u32 15, %v236_v62 }
  0xb1   : > { %v9230_v31 = vrot.slane %v6945_v42, 1  ;;  %vm9231_vm7 = vcmask 1046528   ;;  %v5419_v62 = vcombine.low %v1220_v12, %v1221_v57  ;;  %v1566_v57 = vor.u32 %v1564_v28, %v6759_v30 }
  0xb2   : > { %v1721_v22 = vrot.slane %v5378_v59, 1  ;;  %vm652_vm5 = vcmp.ge.s32.totalorder %v320_v56, 1  ;;  %v238_v59 = vadd.s32 80, %v6029_v2  ;;  %v255_v30 = vadd.s32 216, %v6029_v2 }
  0xb3   : > { %2375 = vrot.lane.b32.xlu1 %v2344_v20, %s5909_s12  ;;  %2229 = vrot.lane.b32.xlu0 %v6950_v0, %s5908_s11  ;;  %v6978_v20 = vsel %vm6171_vm0, %v6045_v11, %v9077_v54  ;;  %v6980_v33 = vpop.permute.xlu1 %2170  ;;  %v2346_v44 = vsel %vm9231_vm7, %v2343_v9, %v9230_v31  ;;  %v2046_v9 = vrot.slane %v5419_v62, 1  ;;  %vm7025_vm2 = vmpackc.low %vm652_vm5, %vm652_vm5  ;;  %v9233_v31 = vmov 0 }
  0xb4   : > { %vm9083_vm9 = vcmp.ne.s16.totalorder %v6978_v20, 0  ;;  %v1722_v12 = vsel %vm9231_vm7, %v9232_v4, %v1721_v22  ;;  %v9234_v31 = vsel %vm7025_vm2, 4294967295, %v9233_v31  ;;  %vm9237_vm7 = vcmp.ne.s16.totalorder %v6806_v52, 0 }
  0xb5   : > { %v1142_v37 = vsel %vm9083_vm9, %v6841_v35, 0  ;;  %9235 = vst [vmem:[#allocation29_spill] sm:$0xff] %v9234_v31  ;;  %v1223_v41 = vsel %vm9237_vm7, %v6962_v40, 0  ;;  %v334_v62 = vand.u32 15, %v238_v59  ;;  %v9238_v28 = vrot.slane %v6617_v8, 1 }
  0xb6   : > { %v6993_v54 = vpop.permute.xlu0 %1857  ;;  %v7031_v15 = vcombine.low %v1141_v50, %v1142_v37  ;;  %vm9239_vm5 = vcmask 1046528   ;;  %vm9240_vm9 = vsmask.f32 7424  ;;  %v453_v8 = vand.u32 15, %v255_v30  ;;  %v7074_v30 = vld [vmem:[%s6053_s30 + $0x38] sm:$0xf] }
  0xb7   : > { %1879 = vrot.lane.b32.xlu1 %v5401_v38, %s5903_s6  ;;  %1604 = vrot.lane.b32.xlu0 %v6756_v47, %s5904_s7  ;;  %v1568_v38 = vshll.u32 %v6990_v45, 16  ;;  %v7014_v47 = vpop.permute.xlu1 %1859  ;;  %v2047_v37 = vsel %vm9239_vm5, %v9238_v28, %v2046_v9  ;;  %vm654_vm7 = vcmp.ge.s32.totalorder %v334_v62, 1  ;;  %v9243_v62 = vmov 0 }
  0xb8   : > { %9236 = vst [vmem:[#allocation30_spill] sm:$0xff] %v7031_v15  ;;  %v9086_v59 = vrot.slane %v7031_v15, 1  ;;  %vm7083_vm13 = vcmp.lt.s32.totalorder %v453_v8, 15  ;;  %v1255_v26 = vsel %vm6917_vm6, %v6959_v29, 0  ;;  %vm9102_vm6 = vcmask 130048  }
  0xb9   : > { %v7023_v56 = vrot.slane %v1568_v38, 1  ;;  %v1172_v38 = vsel %vm7025_vm2, %v6635_v55, 0  ;;  %v1253_v55 = vsel %vm6864_vm11, %v6669_v14, 0 }
  0xba   : > { %v5394_v28 = vcombine.low %v1172_v38, %v6859_v10 }
  0xbb   : > { %2377 = vrot.lane.b32.xlu1 %v2346_v44, %s5909_s12  ;;  %1930 = vrot.lane.b32.xlu0 %v6782_v27, %s5905_s8  ;;  %v1222_v27 = vsel %vm6816_vm15, %v6959_v29, 0  ;;  %v7051_v50 = vsel %vm9240_vm9, %v1566_v57, %v7023_v56  ;;  %vm9242_vm9 = vmmov %vm9239_vm5 }
  0xbc   : > { %v7029_v44 = vpop.permute.xlu0 %1596  ;;  %v7053_v4 = vpop.permute.xlu1 %1912  ;;  %v7058_v3 = vcombine.low %v1222_v27, %v1223_v41  ;;  %v1724_v57 = vsel %vm9242_vm9, %v1721_v22, %v9086_v59  ;;  %vm7079_vm5 = vmpackc.low %vm654_vm7, %vm654_vm7  ;;  %v5435_v22 = vcombine.low %v1253_v55, %v6939_v25  ;;  %v257_v59 = vadd.s32 232, %v6029_v2 }
  0xbd   : > { %v9244_v62 = vsel %vm7079_vm5, 4294967295, %v9243_v62  ;;  %v1208_v27 = vsel %vm6927_vm10, %v6829_v53, 0  ;;  %vm9249_vm7 = vcmp.ne.s16.totalorder %v6905_v36, 0  ;;  %v1174_v25 = vsel %vm7079_vm5, %v6829_v53, 0 }
  0xbe   : > { %9241 = vst [vmem:[#allocation31_spill] sm:$0xff] %v7058_v3  ;;  %9245 = vst [vmem:[#allocation32_spill] sm:$0xff] %v9244_v62  ;;  %v1209_v8 = vsel %vm9249_vm7, %v6841_v35, 0  ;;  %v467_v14 = vand.u32 15, %v257_v59  ;;  %v5785_v59 = vld [vmem:[%s6053_s30 + $0x4] sm:$0xf] }
  0xbf   : > { %1753 = vrot.lane.b32.xlu1 %v1722_v12, %s5906_s9  ;;  %1606 = vrot.lane.b32.xlu0 %v6950_v0, %s5904_s7  ;;  %vm961_vm7 = vmpackc.low %vm7083_vm13, %vm7083_vm13  ;;  %vm9253_vm13 = vcmp.ne.s16.totalorder %v6743_v48, 0  ;;  %v837_v48 = vsel %vm6022_vm1, %v5785_v59, 0 }
  0xc0   : > { %v7056_v12 = vpop.permute.xlu0 %1598  ;;  %v7089_v38 = vpop.permute.xlu1 %1612  ;;  %v1290_v15 = vsel %vm9253_vm13, %v6962_v40, 0 }
  0xc1   : > { %9248 = vst [vmem:[#allocation33_spill] sm:$0xff] %v7089_v38  ;;  %v7120_v38 = vld [vmem:[%s6053_s30 + $0x70] sm:$0xf] }
  0xc3   : > { %2078 = vrot.lane.b32.xlu1 %v2047_v37, %s5907_s10  ;;  %1932 = vrot.lane.b32.xlu0 %v7051_v50, %s5905_s8  ;;  %v7077_v37 = vld [vmem:[%s6053_s30 + $0x3c] sm:$0xf] }
  0xc4   : > { %v7071_v41 = vpop.permute.xlu0 %1910  ;;  %v7101_v10 = vcombine.low %v7074_v30, %v7077_v37 }
  0xc6   : > { %9250 = vst [vmem:[#allocation34_spill] sm:$0xff] %v7101_v10  ;;  %v1520_v16 = vshll.u32 %v7101_v10, 16 }
  0xc7   : > { %1865 = vrot.lane.b32.xlu1 %v5394_v28, %s5903_s6  ;;  %1755 = vrot.lane.b32.xlu0 %v1724_v57, %s5906_s9  ;;  %v9251_v28 = vrot.slane %v7058_v3, 1  ;;  %v7109_v57 = vsel %vm6022_vm1, %v6841_v35, 0  ;;  %v1516_v35 = vshrl.u32 %v6872_v60, 16  ;;  %v7142_v60 = vsel %vm6022_vm1, %v6962_v40, 0 }
  0xc8   : > { %9252 = vst [vmem:[#allocation35_spill] sm:$0xff] %v7109_v57  ;;  %v7117_v49 = vpop.permute.xlu0 %2058  ;;  %v5395_v3 = vcombine.low %v1174_v25, %v7109_v57  ;;  %9254 = vst [vmem:[#allocation36_spill] sm:$0xff] %v7142_v60  ;;  %v7149_v25 = vcombine.low %v7120_v38, %v7123_v19  ;;  %v5436_v61 = vcombine.low %v1255_v26, %v7142_v60  ;;  %v1291_v26 = vsel %vm6816_vm15, %v7120_v38, 0 }
  0xc9   : > { %v2049_v55 = vsel %vm9242_vm9, %v2046_v9, %v9251_v28  ;;  %v7126_v9 = vcombine.low %v1208_v27, %v1209_v8  ;;  %v1289_v28 = vsel %vm6764_vm12, %v6959_v29, 0  ;;  %v993_v27 = vsel %vm961_vm7, 65537, %v9187_v7 }
  0xca   : > { %v7156_v8 = vcombine.low %v1289_v28, %v1290_v15  ;;  %v1081_v42 = vrot.slane %v993_v27, 7  ;;  %vm7160_vm12 = vcmp.lt.s32.totalorder %v467_v14, 15  ;;  %v7170_v15 = vrot.slane %v1520_v16, 1 }
  0xcb   : > { %2190 = vrot.lane.b32.xlu1 %v5435_v22, %s5902_s5  ;;  %2080 = vrot.lane.b32.xlu0 %v2049_v55, %s5907_s10  ;;  %v1746_v22 = vpop.permute.xlu1 %1745  ;;  %v9255_v55 = vrot.slane %v6762_v39, 7  ;;  %v2034_v10 = vrot.slane %v7126_v9, 1  ;;  %v1572_v39 = vshrl.u32 %v6990_v45, 16  ;;  %v1576_v28 = vshll.u32 %v7149_v25, 16  ;;  %vm963_vm13 = vmpackc.low %vm7160_vm12, %vm7160_vm12 }
  0xcc   : > { %v1210_v14 = vsel %vm6995_vm8, %v7074_v30, 0  ;;  %vm9258_vm9 = vcmp.ne.s16.totalorder %v6978_v20, 0  ;;  %vm9103_vm7 = vcmask 64512   ;;  %v9259_v9 = vsel %vm6061_vm3, %v6074_v23, 0 }
  0xcd   : > { %v1077_v13 = vrot.slane %v9255_v55, 4  ;;  %v7167_v59 = vpop.permute.xlu0 %2060  ;;  %v2359_v45 = vrot.slane %v7156_v8, 1  ;;  %v7196_v18 = vsel %vm6171_vm0, %v6045_v11, %v1081_v42  ;;  %v9260_v23 = vrot.slane %v6746_v6, 1 }
  0xce   : > { %vm9261_vm3 = vcmask 1046528   ;;  %vm9262_vm12 = vcmp.ne.s16.totalorder %v6806_v52, 0  ;;  %v7215_v8 = vrot.slane %v1576_v28, 1  ;;  %v7218_v6 = vsel %vm963_vm13, 65537, %v9187_v7 }
  0xcf   : > { %1918 = vrot.lane.b32.xlu1 %v6950_v0, %s5905_s8  ;;  %1867 = vrot.lane.b32.xlu0 %v5395_v3, %s5903_s6  ;;  %v1518_v0 = vor.u32 %v1516_v35, %v6915_v51  ;;  %v1211_v3 = vsel %vm9258_vm9, %v7077_v37, 0  ;;  %v5340_v51 = vcombine.low %v9259_v9, %v837_v48  ;;  %v1748_v16 = vpop.permute.xlu1 %1747  ;;  %v1079_v35 = vsel %vm6171_vm0, %v1077_v13, %v6034_v5 }
  0xd0   : > { %v2035_v46 = vsel %vm9261_vm3, %v9260_v23, %v2034_v10  ;;  %v7202_v27 = vcombine.low %v1210_v14, %v1211_v3  ;;  %v1292_v13 = vsel %vm9262_vm12, %v7123_v19, 0  ;;  %vm9263_vm9 = vsmask.f32 7424 }
  0xd1   : > { %v7212_v48 = vsel %vm9263_vm9, %v1518_v0, %v7170_v15  ;;  %v7220_v55 = vpop.permute.xlu0 %1614  ;;  %vm7222_vm3 = vcmp.ne.s16.totalorder %v1079_v35, 0  ;;  %vm9100_vm15 = vcmp.ne.s16.totalorder %v7196_v18, 0  ;;  %v2406_v52 = vsel %vm9103_vm7, %v5340_v51, %v7029_v44 }
  0xd2   : > { %vm9101_vm12 = vcmask 195584   ;;  %vm9267_vm9 = vcmask 1046528   ;;  %v2454_v28 = vsel %vm9102_vm6, %v2406_v52, %v1746_v22  ;;  %v9110_v14 = vrot.slane %v7202_v27, 1 }
  0xd3   : > { %2243 = vrot.lane.b32.xlu1 %v7051_v50, %s5908_s11  ;;  %2192 = vrot.lane.b32.xlu0 %v5436_v61, %s5902_s5  ;;  %v1574_v61 = vor.u32 %v1572_v39, %v7023_v56  ;;  %v9266_v56 = vrot.slane %v6771_v32, 1  ;;  %v7233_v39 = vcombine.low %v1291_v26, %v1292_v13  ;;  %v1083_v3 = vrot.slane %v1081_v42, 4 }
  0xd4   : > { %v9111_v9 = vrot.slane %v7218_v6, 7  ;;  %vm9268_vm13 = vsmask.f32 7424  ;;  %v1155_v32 = vsel %vm7222_vm3, %v6959_v29, 0  ;;  %v1156_v22 = vsel %vm9100_vm15, %v6962_v40, 0 }
  0xd5   : > { %v2360_v0 = vsel %vm9267_vm9, %v9266_v56, %v2359_v45  ;;  %v7244_v51 = vsel %vm9268_vm13, %v1574_v61, %v7215_v8  ;;  %v252_v35 = vadd.s32 192, %v6029_v2  ;;  %v2487_v42 = vsel %vm9101_vm12, %v2454_v28, %v6993_v54  ;;  %v7262_v26 = vpop.permute.xlu0 %2172 }
  0xd6   : > { %vm9104_vm9 = vcmask 261120   ;;  %v9109_v23 = vrot.slane %v7233_v39, 1  ;;  %vm9269_vm13 = vcmask 1046528   ;;  %v7264_v40 = vcombine.low %v1155_v32, %v1156_v22 }
  0xd7   : > { %2066 = vrot.lane.b32.xlu1 %v2035_v46, %s5907_s10  ;;  %1920 = vrot.lane.b32.xlu0 %v7212_v48, %s5905_s8  ;;  %v2037_v46 = vsel %vm9269_vm13, %v2034_v10, %v9110_v14  ;;  %v1085_v54 = vsel %vm6171_vm0, %v1083_v3, %v6034_v5  ;;  %v7274_v13 = vsel %vm6171_vm0, %v6045_v11, %v9111_v9  ;;  %v1241_v10 = vsel %vm7025_vm2, %v6829_v53, 0 }
  0xd8   : > { %vm9105_vm13 = vcmask 326656   ;;  %v2520_v52 = vsel %vm9104_vm9, %v2487_v42, %v7071_v41  ;;  %v432_v56 = vand.u32 15, %v252_v35  ;;  %vm7282_vm15 = vcmp.ne.s16.totalorder %v1085_v54, 0 }
  0xd9   : > { %v7240_v44 = vpop.permute.xlu1 %1761  ;;  %vm9272_vm7 = vcmask 1046528   ;;  %v5429_v28 = vcombine.low %v1241_v10, %v7109_v57  ;;  %v1737_v41 = vrot.slane %v7264_v40, 1  ;;  %vm9273_vm9 = vcmask 64512  }
  0xda   : > { %v2362_v53 = vsel %vm9272_vm7, %v2359_v45, %v9109_v23  ;;  %v2409_v3 = vsel %vm9273_vm9, %v6129_v43, %v7056_v12  ;;  %v2553_v32 = vsel %vm9105_vm13, %v2520_v52, %v7117_v49  ;;  %vm9274_vm6 = vcmask 130048  }
  0xdb   : > { %2391 = vrot.lane.b32.xlu1 %v2360_v0, %s5909_s12  ;;  %2245 = vrot.lane.b32.xlu0 %v7244_v51, %s5908_s11  ;;  %v2456_v35 = vsel %vm9274_vm6, %v2409_v3, %v1748_v16  ;;  %vm7305_vm7 = vcmp.ge.s32.totalorder %v432_v56, 1  ;;  %v1157_v43 = vsel %vm7282_vm15, %v7120_v38, 0  ;;  %vm9277_vm9 = vcmp.ne.s16.totalorder %v7274_v13, 0  ;;  %v868_v0 = vld [vmem:[%s6053_s30 + $0x80] sm:$0x1] }
  0xdc   : > { %v1158_v49 = vsel %vm9277_vm9, %v7123_v19, 0  ;;  %v7319_v12 = vsel %vm6022_vm1, %v7077_v37, 0  ;;  %v1243_v16 = vsel %vm7079_vm5, %v7074_v30, 0  ;;  %vm9278_vm6 = vcmask 392192  }
  0xdd   : > { %v2224_v61 = vpop.permute.xlu1 %2223  ;;  %v9279_v40 = vrot.slane %v6868_v34, 1  ;;  %vm9280_vm9 = vcmask 1046528   ;;  %v1277_v10 = vsel %vm6927_vm10, %v7074_v30, 0  ;;  %vm9281_vm12 = vcmp.ne.s16.totalorder %v6905_v36, 0 }
  0xde   : > { %v1278_v52 = vsel %vm9281_vm12, %v7077_v37, 0  ;;  %vm9282_vm13 = vcmask 195584   ;;  %vm9283_vm5 = vcmask 457728   ;;  %vm9286_vm10 = vcmask 523264  }
  0xdf   : > { %2068 = vrot.lane.b32.xlu1 %v2037_v46, %s5907_s10  ;;  %1620 = vrot.lane.b32.xlu0 %v7051_v50, %s5904_s7  ;;  %v254_v50 = vadd.s32 208, %v6029_v2  ;;  %v2586_v46 = vsel %vm9278_vm6, %v2553_v32, %v6980_v33  ;;  %v1738_v54 = vsel %vm9280_vm9, %v9279_v40, %v1737_v41  ;;  %v2489_v56 = vsel %vm9282_vm13, %v2456_v35, %v7014_v47  ;;  %vm7342_vm6 = vmpackc.low %vm7305_vm7, %vm7305_vm7 }
  0xe0   : > { %vm9287_vm12 = vcmask 588800   ;;  %v5430_v47 = vcombine.low %v1243_v16, %v7319_v12  ;;  %vm9291_vm7 = vcmask 326656   ;;  %vm9294_vm9 = vcmask 392192  }
  0xe1   : > { %v7299_v22 = vpop.permute.xlu1 %1873  ;;  %v7303_v42 = vpop.permute.xlu0 %1763  ;;  %v446_v32 = vand.u32 15, %v254_v50  ;;  %v5448_v50 = vcombine.low %v1277_v10, %v1278_v52  ;;  %v9292_v52 = vld [vmem:[#allocation12_spill] sm:$0xff]  ;;  %vm9301_vm2 = vcmask 523264   ;;  %v9346_v63 = vrot.slane %v7218_v6, 7 }
  0xe3   : > { %2393 = vrot.lane.b32.xlu1 %v2362_v53, %s5909_s12  ;;  %2178 = vrot.lane.b32.xlu0 %v5429_v28, %s5902_s5  ;;  %v2619_v53 = vsel %vm9283_vm5, %v2586_v46, %v2224_v61  ;;  %v7346_v28 = vcombine.low %v1157_v43, %v1158_v49  ;;  %v9288_v61 = vrot.slane %v6925_v17, 7  ;;  %vm9289_vm5 = vcmask 261120   ;;  %v9290_v49 = vld [vmem:[#allocation34_spill] sm:$0xff] }
  0xe4   : > { %v2522_v45 = vsel %vm9289_vm5, %v2489_v56, %v7053_v4  ;;  %v1188_v43 = vsel %vm7342_vm6, %v6959_v29, 0  ;;  %v1524_v46 = vshrl.u32 %v9290_v49, 16  ;;  %v362_v17 = vand.u32 15, %v242_v58 }
  0xe5   : > { %v2372_v33 = vpop.permute.xlu1 %2371  ;;  %v2226_v3 = vpop.permute.xlu0 %2225  ;;  %v1041_v35 = vrot.slane %v9288_v61, 4  ;;  %v9108_v16 = vrot.slane %v7346_v28, 1  ;;  %vm670_vm13 = vcmp.ge.s32.totalorder %v446_v32, 1  ;;  %v2555_v4 = vsel %vm9291_vm7, %v2522_v45, %v7167_v59 }
  0xe6   : > { %v2652_v36 = vsel %vm9286_vm10, %v2619_v53, %v2372_v33  ;;  %v5402_v29 = vcombine.low %v1188_v43, %v7142_v60  ;;  %v9293_v56 = vrot.slane %v9292_v52, 7  ;;  %v2588_v33 = vsel %vm9294_vm9, %v2555_v4, %v7262_v26  ;;  %vm7397_vm5 = vmpackc.low %vm670_vm13, %vm670_vm13 }
  0xe7   : > { %1769 = vrot.lane.b32.xlu1 %v1738_v54, %s5906_s9  ;;  %5649 = vmatprep.mubr.msk.bf16.mxu0 %vm9287_vm12, %v2652_v36  ;;  %v1043_v10 = vsel %vm6171_vm0, %v1041_v35, %v6034_v5  ;;  %v2347_v59 = vrot.slane %v5448_v50, 1  ;;  %v1526_v58 = vor.u32 %v1524_v46, %v7170_v15  ;;  %v7388_v36 = vld [vmem:[%s6053_s30 + $0x40] sm:$0xf]  ;;  %vm9295_vm10 = vcmask 457728  }
  0xe8   : > { %1622 = vrot.lane.b32.xlu0 %v7244_v51, %s5904_s7  ;;  %v7381_v53 = vsel %vm6171_vm0, %v6045_v11, %v9293_v56  ;;  %v1279_v32 = vsel %vm6995_vm8, %v7388_v36, 0  ;;  %v2621_v61 = vsel %vm9295_vm10, %v2588_v33, %v2226_v3  ;;  %vm9296_vm12 = vcmask 1046528  }
  0xe9   : > { %v7363_v40 = vpop.permute.xlu1 %1875  ;;  %v7366_v54 = vpop.permute.xlu0 %1600  ;;  %v1740_v45 = vsel %vm9296_vm12, %v1737_v41, %v9108_v16  ;;  %v9297_v26 = vmov 0  ;;  %vm9300_vm7 = vcmp.ne.s16.totalorder %v6978_v20, 0  ;;  %vm658_vm9 = vcmp.ge.s32.totalorder %v362_v17, 1  ;;  %v9305_v20 = vld [vmem:[#allocation28_spill] sm:$0xff] }
  0xea   : > { %v9298_v26 = vsel %vm7397_vm5, 4294967295, %v9297_v26  ;;  %vm7410_vm8 = vcmp.ne.s16.totalorder %v1043_v10, 0  ;;  %vm1111_vm13 = vcmp.ne.s16.totalorder %v7381_v53, 0  ;;  %vm9304_vm10 = vcmask 588800   ;;  %v9311_v10 = vld [vmem:[#allocation9_spill] sm:$0xff] }
  0xeb   : > { %2231 = vrot.lane.b32.xlu1 %v7212_v48, %s5908_s11  ;;  %9299 = vst [vmem:[#allocation34_spill] sm:$0xff] %v9298_v26  ;;  %v9306_v41 = vrot.slane %v9305_v20, 1  ;;  %v7424_v49 = vsel %vm6022_vm1, %v7123_v19, 0  ;;  %v1190_v46 = vsel %vm7397_vm5, %v7120_v38, 0  ;;  %v1143_v56 = vsel %vm7410_vm8, %v7074_v30, 0 }
  0xec   : > { %2180 = vrot.lane.b32.xlu0 %v5430_v47, %s5902_s5  ;;  %v7402_v47 = vld [vmem:[%s6053_s30 + $0x44] sm:$0xf]  ;;  %9307 = vst [vmem:[#allocation12_spill] sm:$0xff] %v7424_v49  ;;  %v1144_v33 = vsel %vm1111_vm13, %v7077_v37, 0 }
  0xed   : > { %v2374_v35 = vpop.permute.xlu1 %2373  ;;  %v1280_v15 = vsel %vm9300_vm7, %v7402_v47, 0  ;;  %v7408_v43 = vpop.permute.xlu0 %1926  ;;  %v2348_v50 = vsel %vm9296_vm12, %v9306_v41, %v2347_v59  ;;  %vm9312_vm7 = vsmask.f32 7424  ;;  %v5380_v20 = vcombine.low %v1143_v56, %v1144_v33 }
  0xee   : > { %v2654_v24 = vsel %vm9301_vm2, %v2621_v61, %v2374_v35  ;;  %v7429_v17 = vcombine.low %v1279_v32, %v1280_v15  ;;  %vm7431_vm2 = vmpackc.low %vm658_vm9, %vm658_vm9  ;;  %v7439_v52 = vsel %vm9312_vm7, %v1526_v58, %v9311_v10  ;;  %v7453_v35 = vld [vmem:[%s6053_s30 + $0x78] sm:$0xf]  ;;  %v240_v58 = vadd.s32 96, %v6029_v2 }
  0xef   : > { %1881 = vrot.lane.b32.xlu1 %v5402_v29, %s5903_s6  ;;  %5650 = vmatmul.mubr.msk.bf16.vlgmr.msra.gmra.mrb[0].mxu0 %vm9304_vm10, %v2654_v24  ;;  %v850_v32 = vsel %vm7431_vm2, %v7074_v30, 0  ;;  %v5403_v24 = vcombine.low %v1190_v46, %v7424_v49  ;;  %v1224_v10 = vsel %vm7222_vm3, %v7120_v38, 0  ;;  %vm9314_vm9 = vcmp.ne.s16.totalorder %v7196_v18, 0  ;;  %vm9315_vm10 = vmmov %vm9296_vm12 }
  0xf0   : > { %1771 = vrot.lane.b32.xlu0 %v1740_v45, %s5906_s9  ;;  %9308 = vst [vmem:[#allocation28_spill] sm:$0xff] %v7429_v17  ;;  %v7456_v45 = vld [vmem:[%s6053_s30 + $0x7c] sm:$0xf]  ;;  %v7460_v15 = vcombine.low %v850_v32, %v7319_v12  ;;  %v9112_v37 = vrot.slane %v7429_v17, 1  ;;  %v1225_v32 = vsel %vm9314_vm9, %v7123_v19, 0  ;;  %v348_v16 = vand.u32 15, %v240_v58  ;;  %vm9318_vm7 = vmmov %vm9315_vm10 }
  0xf1   : > { %v7435_v29 = vpop.permute.xlu1 %1749  ;;  %v7450_v61 = vpop.permute.xlu0 %1602  ;;  %v1725_v33 = vrot.slane %v5380_v20, 1  ;;  %v5421_v23 = vcombine.low %v1224_v10, %v1225_v32  ;;  %v1580_v19 = vshrl.u32 %v7149_v25, 16 }
  0xf2   : > { %9313 = vst [vmem:[#allocation9_spill] sm:$0xff] %v7460_v15  ;;  %v2350_v56 = vsel %vm9315_vm10, %v2347_v59, %v9112_v37  ;;  %vm656_vm12 = vcmp.ge.s32.totalorder %v348_v16, 1  ;;  %v1226_v16 = vsel %vm7282_vm15, %v7453_v35, 0  ;;  %vm9321_vm10 = vcmp.ne.s16.totalorder %v7274_v13, 0 }
  0xf3   : > { %2379 = vrot.lane.b32.xlu1 %v2348_v50, %s5909_s12  ;;  %v7477_v50 = vcombine.low %v7453_v35, %v7456_v45  ;;  %v1582_v10 = vor.u32 %v1580_v19, %v7215_v8  ;;  %vm7502_vm9 = vmpackc.low %vm656_vm12, %vm656_vm12  ;;  %v7522_v19 = vsel %vm6022_vm1, %v7402_v47, 0 }
  0xf4   : > { %2233 = vrot.lane.b32.xlu0 %v7439_v52, %s5908_s11  ;;  %vm9325_vm12 = vmmov %vm9318_vm7  ;;  %v1176_v57 = vsel %vm7502_vm9, %v7074_v30, 0  ;;  %v1257_v30 = vsel %vm7342_vm6, %v7120_v38, 0 }
  0xf5   : > { %v7467_v41 = vpop.permute.xlu1 %2074  ;;  %v7479_v46 = vpop.permute.xlu0 %1928  ;;  %v1584_v9 = vshll.u32 %v7477_v50, 16  ;;  %v5437_v38 = vcombine.low %v1257_v30, %v7424_v49  ;;  %v1212_v30 = vsel %vm7410_vm8, %v7388_v36, 0  ;;  %v1293_v49 = vsel %vm7222_vm3, %v7453_v35, 0 }
  0xf6   : > { %vm9347_vm3 = vcmask 130048  }
  0xf7   : > { %1883 = vrot.lane.b32.xlu1 %v5403_v24, %s5903_s6  ;;  %v2050_v24 = vrot.slane %v5421_v23, 1  ;;  %v7500_v32 = vrot.slane %v1584_v9, 1  ;;  %v259_v23 = vadd.s32 248, %v6029_v2  ;;  %v852_v9 = vsel %vm6389_vm4, %v7388_v36, 0 }
  0xf8   : > { %1608 = vrot.lane.b32.xlu0 %v7212_v48, %s5904_s7  ;;  %v9316_v48 = vld [vmem:[#allocation30_spill] sm:$0xff]  ;;  %vm9326_vm4 = vsmask.f32 7424 }
  0xf9   : > { %v7487_v14 = vpop.permute.xlu1 %1861  ;;  %v7491_v15 = vpop.permute.xlu0 %1751  ;;  %v9317_v58 = vrot.slane %v9316_v48, 1  ;;  %v9323_v48 = vld [vmem:[#allocation31_spill] sm:$0xff]  ;;  %v481_v31 = vand.u32 15, %v259_v23 }
  0xfb   : > { %2381 = vrot.lane.b32.xlu1 %v2350_v56, %s5909_s12  ;;  %v1726_v59 = vsel %vm9318_vm7, %v9317_v58, %v1725_v33  ;;  %v9324_v58 = vrot.slane %v9323_v48, 1  ;;  %v5348_v48 = vcombine.low %v852_v9, %v7522_v19 }
  0xfc   : > { %1934 = vrot.lane.b32.xlu0 %v7244_v51, %s5905_s8  ;;  %v1227_v51 = vsel %vm9321_vm10, %v7456_v45, 0  ;;  %vm7554_vm10 = vcmp.lt.s32.totalorder %v481_v31, 15 }
  0xfd   : > { %v2187_v20 = vpop.permute.xlu1 %2186  ;;  %v7512_v56 = vpop.permute.xlu0 %2076  ;;  %v2051_v37 = vsel %vm9325_vm12, %v9324_v58, %v2050_v24  ;;  %v7532_v8 = vcombine.low %v1226_v16, %v1227_v51  ;;  %v5396_v58 = vcombine.low %v1176_v57, %v7319_v12  ;;  %v9328_v51 = vld [vmem:[#allocation14_spill] sm:$0xff]  ;;  %v9332_v57 = vld [vmem:[#allocation33_spill] sm:$0xff]  ;;  %vm9333_vm12 = vcmask 64512  }
  0xfe   : > { %v9329_v17 = vrot.slane %v9328_v51, 1  ;;  %v2430_v12 = vsel %vm9333_vm12, %v5348_v48, %v9332_v57  ;;  %v7565_v51 = vld [vmem:[%s6053_s30 + $0x48] sm:$0xf]  ;;  %vm9336_vm12 = vcmask 195584   ;;  %v7595_v57 = vld [vmem:[%s6053_s30 + $0x80] sm:$0xf] }
  0xff   : > { %1757 = vrot.lane.b32.xlu1 %v1726_v59, %s5906_s9  ;;  %v7538_v59 = vsel %vm9326_vm4, %v1582_v10, %v7500_v32  ;;  %v9118_v10 = vrot.slane %v7532_v8, 1  ;;  %vm9334_vm4 = vcmask 130048   ;;  %v854_v31 = vsel %vm6477_vm14, %v7565_v51, 0  ;;  %vm965_vm14 = vmpackc.low %vm7554_vm10, %vm7554_vm10 }
 0x100   : > { %1610 = vrot.lane.b32.xlu0 %v7439_v52, %s5904_s7  ;;  %v1728_v23 = vsel %vm9318_vm7, %v1725_v33, %v9329_v17  ;;  %vm9340_vm10 = vcmask 392192  }
 0x101   : > { %v7534_v60 = vpop.permute.xlu1 %1914  ;;  %v7540_v62 = vpop.permute.xlu0 %1863  ;;  %v2053_v33 = vsel %vm9318_vm7, %v2050_v24, %v9118_v10  ;;  %vm9339_vm7 = vcmask 326656  }
 0x102   : > { %9327 = vst [vmem:[#allocation30_spill] sm:$0xff] %v7540_v62 }
 0x103   : > { %2082 = vrot.lane.b32.xlu1 %v2051_v37, %s5907_s10  ;;  %v2470_v37 = vsel %vm9334_vm4, %v2430_v12, %v7240_v44  ;;  %v1178_v44 = vsel %vm7431_vm2, %v7388_v36, 0  ;;  %vm9337_vm4 = vcmask 261120   ;;  %v7598_v12 = vld [vmem:[%s6053_s30 + $0x84] sm:$0xf] }
 0x104   : > { %1936 = vrot.lane.b32.xlu0 %v7538_v59, %s5905_s8  ;;  %v2503_v48 = vsel %vm9336_vm12, %v2470_v37, %v7299_v22  ;;  %v9338_v37 = vld [vmem:[#allocation16_spill] sm:$0xff]  ;;  %vm9341_vm12 = vcmask 457728  }
 0x105   : > { %v2240_v16 = vpop.permute.xlu1 %2239  ;;  %v2189_v62 = vpop.permute.xlu0 %2188  ;;  %v2536_v22 = vsel %vm9337_vm4, %v2503_v48, %v7408_v43  ;;  %v5349_v17 = vcombine.low %v854_v31, %v9338_v37  ;;  %v1259_v43 = vsel %vm7397_vm5, %v7453_v35, 0  ;;  %v5397_v31 = vcombine.low %v1178_v44, %v7522_v19 }
 0x106   : > { %v2569_v10 = vsel %vm9339_vm7, %v2536_v22, %v7467_v41  ;;  %v997_v41 = vsel %vm965_vm14, 65537, %v9187_v7  ;;  %vm9342_vm4 = vcmp.ne.s16.totalorder %v7196_v18, 0  ;;  %vm9343_vm7 = vcmask 523264  }
 0x107   : > { %1869 = vrot.lane.b32.xlu1 %v5396_v58, %s5903_s6  ;;  %v2602_v9 = vsel %vm9340_vm10, %v2569_v10, %v2187_v20  ;;  %v1294_v26 = vsel %vm9342_vm4, %v7456_v45, 0  ;;  %v7625_v20 = vcombine.low %v7595_v57, %v7598_v12  ;;  %vm9344_vm14 = vcmask 64512  }
 0x108   : > { %1759 = vrot.lane.b32.xlu0 %v1728_v23, %s5906_s9  ;;  %v1213_v23 = vsel %vm1111_vm13, %v7402_v47, 0  ;;  %v7607_v47 = vsel %vm6022_vm1, %v7456_v45, 0  ;;  %v2433_v44 = vsel %vm9344_vm14, %v5349_v17, %v7220_v55  ;;  %vm9345_vm10 = vcmask 588800  }
 0x109   : > { %v7576_v58 = vpop.permute.xlu1 %2062  ;;  %v7592_v24 = vpop.permute.xlu0 %1916  ;;  %v5415_v48 = vcombine.low %v1212_v30, %v1213_v23  ;;  %v1093_v18 = vrot.slane %v997_v41, 7  ;;  %v2472_v30 = vsel %vm9347_vm3, %v2433_v44, %v7303_v42  ;;  %v5438_v23 = vcombine.low %v1259_v43, %v7607_v47 }
 0x10a   : > { %v1898_v6 = vshll.u32 %v7625_v20, 16  ;;  %vm9349_vm4 = vcmask 261120   ;;  %vm9351_vm14 = vcmask 392192   ;;  %v1295_v43 = vsel %vm7282_vm15, %v7595_v57, 0 }
 0x10b   : > { %2194 = vrot.lane.b32.xlu1 %v5437_v38, %s5902_s5  ;;  %v2635_v38 = vsel %vm9341_vm12, %v2602_v9, %v2240_v16  ;;  %v1089_v16 = vrot.slane %v9346_v63, 4  ;;  %v2038_v9 = vrot.slane %v5415_v48, 1  ;;  %vm9348_vm12 = vcmask 195584  }
 0x10c   : > { %2084 = vrot.lane.b32.xlu0 %v2053_v33, %s5907_s10  ;;  %v2505_v55 = vsel %vm9348_vm12, %v2472_v30, %v7363_v40  ;;  %vm9354_vm3 = vcmask 457728   ;;  %vm9356_vm12 = vcmask 523264  }
 0x10d   : > { %v2388_v22 = vpop.permute.xlu1 %2387  ;;  %v2242_v33 = vpop.permute.xlu0 %2241  ;;  %v2538_v41 = vsel %vm9349_vm4, %v2505_v55, %v7479_v46  ;;  %v1091_v40 = vsel %vm6171_vm0, %v1089_v16, %v6034_v5  ;;  %v256_v55 = vadd.s32 224, %v6029_v2 }
 0x10e   : > { %v2668_v10 = vsel %vm9343_vm7, %v2635_v38, %v2388_v22  ;;  %v5456_v38 = vcombine.low %v1293_v49, %v1294_v26  ;;  %vm9350_vm7 = vcmask 326656   ;;  %v7659_v26 = vsel %vm6171_vm0, %v6045_v11, %v1093_v18 }
 0x10f   : > { %1922 = vrot.lane.b32.xlu1 %v7439_v52, %s5905_s8  ;;  %5665 = vmatprep.mubr.msk.bf16.mxu1 %vm9345_vm10, %v2668_v10  ;;  %v1588_v52 = vshrl.u32 %v7477_v50, 16  ;;  %v2571_v42 = vsel %vm9350_vm7, %v2538_v41, %v7512_v56  ;;  %v9352_v50 = vrot.slane %v7202_v27, 1  ;;  %vm9353_vm10 = vcmask 1046528  }
 0x110   : > { %1871 = vrot.lane.b32.xlu0 %v5397_v31, %s5903_s6  ;;  %v2604_v49 = vsel %vm9351_vm14, %v2571_v42, %v2189_v62  ;;  %v2363_v56 = vrot.slane %v5456_v38, 1  ;;  %v7671_v11 = vrot.slane %v1898_v6, 1  ;;  %vm9355_vm0 = vcmp.ne.s16.totalorder %v7274_v13, 0  ;;  %vm9362_vm14 = vmmov %vm9353_vm10  ;;  %v9364_v6 = vld [vmem:[#allocation19_spill] sm:$0xff] }
 0x111   : > { %v7641_v17 = vpop.permute.xlu1 %2064  ;;  %v7647_v22 = vpop.permute.xlu0 %1616  ;;  %v2039_v46 = vsel %vm9353_vm10, %v9352_v50, %v2038_v9  ;;  %v2637_v5 = vsel %vm9354_vm3, %v2604_v49, %v2242_v33  ;;  %v1590_v21 = vor.u32 %v1588_v52, %v7500_v32  ;;  %v1296_v62 = vsel %vm9355_vm0, %v7598_v12, 0  ;;  %v9360_v32 = vld [vmem:[#allocation10_spill] sm:$0xff]  ;;  %vm9366_vm3 = vmmov %vm9362_vm14 }
 0x112   : > { %vm7677_vm4 = vcmp.ne.s16.totalorder %v1091_v40, 0  ;;  %vm1127_vm15 = vcmp.ne.s16.totalorder %v7659_v26, 0  ;;  %vm9359_vm7 = vcmask 588800   ;;  %v9361_v13 = vrot.slane %v7233_v39, 1 }
 0x113   : > { %2247 = vrot.lane.b32.xlu1 %v7538_v59, %s5908_s11  ;;  %v7690_v44 = vcombine.low %v1295_v43, %v1296_v62  ;;  %vm9363_vm10 = vsmask.f32 7424  ;;  %v1159_v30 = vsel %vm7677_vm4, %v7453_v35, 0  ;;  %v5372_v39 = vcombine.low %v868_v0, %v868_v0  ;;  %v5789_v62 = vld [vmem:[%s6053_s30 + $0x18] sm:$0xf] }
 0x114   : > { %2196 = vrot.lane.b32.xlu0 %v5438_v23, %s5902_s5  ;;  %v2364_v33 = vsel %vm9362_vm14, %v9361_v13, %v2363_v56  ;;  %v7696_v16 = vsel %vm9363_vm10, %v1590_v21, %v7671_v11  ;;  %v1160_v23 = vsel %vm1127_vm15, %v7456_v45, 0  ;;  %v7708_v52 = vrot.slane %v1093_v18, 4  ;;  %vm9372_vm10 = vmmov %vm9366_vm3 }
 0x115   : > { %v2390_v31 = vpop.permute.xlu1 %2389  ;;  %v2175_v48 = vpop.permute.xlu0 %2174  ;;  %v9365_v41 = vrot.slane %v9364_v6, 1  ;;  %v2365_v40 = vrot.slane %v7690_v44, 1  ;;  %v7716_v45 = vcombine.low %v1159_v30, %v1160_v23  ;;  %v1245_v50 = vsel %vm7502_vm9, %v7388_v36, 0 }
 0x116   : > { %v2670_v27 = vsel %vm9356_vm12, %v2637_v5, %v2390_v31  ;;  %v460_v18 = vand.u32 15, %v256_v55  ;;  %v9367_v5 = vld [vmem:[#allocation8_spill] sm:$0xff]  ;;  %vm9368_vm0 = vcmask 64512   ;;  %vm9371_vm14 = vcmask 130048  }
 0x117   : > { %2070 = vrot.lane.b32.xlu1 %v2039_v46, %s5907_s10  ;;  %5666 = vmatmul.mubr.msk.bf16.vlgmr.msra.gmra.mrb[0].mxu1 %vm9359_vm7, %v2670_v27  ;;  %v2041_v42 = vsel %vm9366_vm3, %v2038_v9, %v9365_v41  ;;  %v1592_v46 = vshll.u32 %v5372_v39, 16  ;;  %v2412_v31 = vsel %vm9368_vm0, %v9367_v5, %v7366_v54  ;;  %v9369_v27 = vld [vmem:[#allocation20_spill] sm:$0xff]  ;;  %vm1128_vm7 = vcmp.ne.s16.totalorder %v7708_v52, 0  ;;  %v9411_v52 = vld [vmem:[#allocation18_spill] sm:$0xff] }
 0x118   : > { %1924 = vrot.lane.b32.xlu0 %v9360_v32, %s5905_s8  ;;  %vm9370_vm12 = vnez %v9369_v27  ;;  %v2458_v13 = vsel %vm9371_vm14, %v2412_v31, %v7435_v29  ;;  %v2366_v36 = vsel %vm9372_vm10, %v2363_v56, %v2365_v40  ;;  %v5431_v54 = vcombine.low %v1245_v50, %v7522_v19  ;;  %v9375_v56 = vld [vmem:[#allocation11_spill] sm:$0xff]  ;;  %v1196_v27 = vld [vmem:[%s6053_s30 + $0x88] sm:$0x1] }
 0x119   : > { %v7692_v63 = vpop.permute.xlu1 %1765  ;;  %v7704_v38 = vpop.permute.xlu0 %1618  ;;  %v842_v9 = vsel %vm9370_vm12, %v5789_v62, 0  ;;  %vm9373_vm3 = vcmask 195584   ;;  %v1594_v39 = vrot.slane %v1592_v46, 1  ;;  %vm9374_vm0 = vcmask 261120  }
 0x11a   : > { %v2491_v30 = vsel %vm9373_vm3, %v2458_v13, %v7487_v14  ;;  %vm672_vm12 = vcmp.ge.s32.totalorder %v460_v18, 1  ;;  %v5343_v19 = vcombine.low %v842_v9, %v9375_v56  ;;  %vm9376_vm14 = vcmask 326656   ;;  %v5790_v18 = vld [vmem:[%s6053_s30 + $0x4c] sm:$0xf] }
 0x11b   : > { %2395 = vrot.lane.b32.xlu1 %v2364_v33, %s5909_s12  ;;  %v1741_v33 = vrot.slane %v7716_v45, 1  ;;  %v2524_v29 = vsel %vm9374_vm0, %v2491_v30, %v7534_v60  ;;  %v258_v14 = vadd.s32 240, %v6029_v2  ;;  %vm9377_vm10 = vcmask 392192   ;;  %v9388_v9 = vld [vmem:[#allocation30_spill] sm:$0xff] }
 0x11c   : > { %2249 = vrot.lane.b32.xlu0 %v7696_v16, %s5908_s11  ;;  %v2557_v6 = vsel %vm9376_vm14, %v2524_v29, %v7576_v58  ;;  %v9378_v60 = vrot.slane %v7346_v28, 1  ;;  %vm9379_vm3 = vcmask 1046528   ;;  %v1281_v58 = vsel %vm7410_vm8, %v7565_v51, 0 }
 0x11d   : > { %v2228_v49 = vpop.permute.xlu1 %2227  ;;  %v2177_v43 = vpop.permute.xlu0 %2176  ;;  %v2590_v41 = vsel %vm9377_vm10, %v2557_v6, %v2175_v48  ;;  %vm9380_vm0 = vcmask 457728   ;;  %vm9381_vm14 = vsmask.f32 7424  ;;  %vm7766_vm10 = vmpackc.low %vm672_vm12, %vm672_vm12  ;;  %v1282_v4 = vsel %vm1111_vm13, %v5790_v18, 0 }
 0x11e   : > { %v2623_v45 = vsel %vm9380_vm0, %v2590_v41, %v2228_v49  ;;  %v1595_v46 = vsel %vm9381_vm14, %v1590_v21, %v1594_v39  ;;  %vm9385_vm8 = vcmask 64512   ;;  %vm9387_vm12 = vcmask 130048   ;;  %v9399_v41 = vld [vmem:[#allocation28_spill] sm:$0xff] }
 0x11f   : > { %2072 = vrot.lane.b32.xlu1 %v2041_v42, %s5907_s10  ;;  %v1742_v42 = vsel %vm9379_vm3, %v9378_v60, %v1741_v33  ;;  %v2415_v3 = vsel %vm9385_vm8, %v5343_v19, %v7450_v61  ;;  %vm9386_vm3 = vcmask 588800   ;;  %v1192_v53 = vsel %vm7766_vm10, %v7453_v35, 0 }
 0x120   : > { %1624 = vrot.lane.b32.xlu0 %v7538_v59, %s5904_s7  ;;  %v1161_v59 = vsel %vm1128_vm7, %v868_v0, 0  ;;  %v1247_v0 = vsel %vm7431_vm2, %v7565_v51, 0  ;;  %vm9384_vm2 = vcmask 523264   ;;  %v474_v51 = vand.u32 15, %v258_v14 }
 0x121   : > { %v7740_v23 = vpop.permute.xlu1 %1877  ;;  %v7744_v55 = vpop.permute.xlu0 %1767  ;;  %v5389_v28 = vcombine.low %v1161_v59, %v1161_v59  ;;  %v2460_v21 = vsel %vm9387_vm12, %v2415_v3, %v7491_v15  ;;  %v5432_v49 = vcombine.low %v1247_v0, %v9338_v37  ;;  %v5450_v62 = vcombine.low %v1281_v58, %v1282_v4  ;;  %v1231_v0 = vld [vmem:[%s6053_s30 + $0x88] sm:$0xf] }
 0x122   : > { %vm9389_vm13 = vcmask 195584   ;;  %vm9390_vm0 = vcmask 261120   ;;  %vm9391_vm14 = vcmask 326656   ;;  %v5404_v30 = vcombine.low %v1192_v53, %v7607_v47 }
 0x123   : > { %2397 = vrot.lane.b32.xlu1 %v2366_v36, %s5909_s12  ;;  %v2493_v61 = vsel %vm9389_vm13, %v2460_v21, %v9388_v9  ;;  %v1743_v36 = vrot.slane %v5389_v28, 1  ;;  %v5407_v39 = vcombine.low %v1196_v27, %v1196_v27  ;;  %vm9392_vm8 = vcmask 392192   ;;  %v1232_v28 = vld [vmem:[%s6053_s30 + $0x8c] sm:$0xf] }
 0x124   : > { %2182 = vrot.lane.b32.xlu0 %v5431_v54, %s5902_s5  ;;  %v2526_v54 = vsel %vm9390_vm0, %v2493_v61, %v7592_v24  ;;  %v2351_v59 = vrot.slane %v5450_v62, 1  ;;  %vm9394_vm12 = vcmask 1046528   ;;  %vm9395_vm13 = vcmask 523264  }
 0x125   : > { %v2376_v50 = vpop.permute.xlu1 %2375  ;;  %v2230_v31 = vpop.permute.xlu0 %2229  ;;  %v2559_v37 = vsel %vm9391_vm14, %v2526_v54, %v7641_v17  ;;  %v1744_v19 = vsel %vm9394_vm12, %v1741_v33, %v1743_v36  ;;  %vm9398_vm14 = vcmask 588800   ;;  %v1906_v14 = vshll.u32 %v5407_v39, 16 }
 0x126   : > { %v2656_v5 = vsel %vm9384_vm2, %v2623_v45, %v2376_v50  ;;  %vm674_vm2 = vcmp.ge.s32.totalorder %v474_v51, 1  ;;  %v2592_v29 = vsel %vm9392_vm8, %v2559_v37, %v2177_v43  ;;  %v1902_v43 = vshrl.u32 %v7625_v20, 16  ;;  %vm9401_vm8 = vmmov %vm9394_vm12  ;;  %v9404_v37 = vld [vmem:[#allocation23_spill] sm:$0xff] }
 0x127   : > { %1773 = vrot.lane.b32.xlu1 %v1742_v42, %s5906_s9  ;;  %5653 = vmatprep.mubr.msk.bf16.mxu0 %vm9386_vm3, %v2656_v5  ;;  %vm9393_vm3 = vcmask 457728   ;;  %vm7806_vm0 = vmpackc.low %vm674_vm2, %vm674_vm2  ;;  %v9400_v33 = vrot.slane %v9399_v41, 1  ;;  %v1195_v42 = vsel %vm6022_vm1, %v7598_v12, 0  ;;  %v1228_v20 = vsel %vm7677_vm4, %v7595_v57, 0 }
 0x128   : > { %1626 = vrot.lane.b32.xlu0 %v1595_v46, %s5904_s7  ;;  %v2625_v24 = vsel %vm9393_vm3, %v2592_v29, %v2230_v31  ;;  %v1194_v45 = vsel %vm7806_vm0, %v7595_v57, 0  ;;  %v1229_v50 = vsel %vm1127_vm15, %v7598_v12, 0  ;;  %v1230_v46 = vsel %vm1128_vm7, %v1196_v27, 0  ;;  %v9402_v31 = vld [vmem:[#allocation13_spill] sm:$0xff]  ;;  %v1265_v12 = vld [vmem:[%s6053_s30 + $0x90] sm:$0x1]  ;;  %vm9406_vm3 = vmmov %vm9401_vm8 }
 0x129   : > { %v7788_v13 = vpop.permute.xlu1 %1879  ;;  %v7792_v15 = vpop.permute.xlu0 %1604  ;;  %v2352_v60 = vsel %vm9401_vm8, %v9400_v33, %v2351_v59  ;;  %v1904_v4 = vor.u32 %v1902_v43, %v7671_v11  ;;  %v1908_v5 = vrot.slane %v1906_v14, 1  ;;  %v5405_v3 = vcombine.low %v1194_v45, %v1195_v42  ;;  %vm9407_vm12 = vmmov %vm9406_vm3 }
 0x12a   : > { %v5423_v51 = vcombine.low %v1228_v20, %v1229_v50  ;;  %v5424_v21 = vcombine.low %v1230_v46, %v1230_v46  ;;  %vm9403_vm2 = vsmask.f32 7424  ;;  %v5442_v61 = vcombine.low %v1265_v12, %v1265_v12  ;;  %v5791_v20 = vld [vmem:[%s6053_s30 + $0x50] sm:$0xf] }
 0x12b   : > { %2235 = vrot.lane.b32.xlu1 %v9360_v32, %s5908_s11  ;;  %v1909_v27 = vsel %vm9403_vm2, %v1904_v4, %v1908_v5  ;;  %v9408_v41 = vrot.slane %v7532_v8, 1  ;;  %v1297_v1 = vsel %vm7677_vm4, %v1231_v0, 0  ;;  %v856_v46 = vsel %vm6864_vm11, %v5791_v20, 0 }
 0x12c   : > { %2184 = vrot.lane.b32.xlu0 %v5432_v49, %s5902_s5  ;;  %v5441_v49 = vcombine.low %v1231_v0, %v1232_v28  ;;  %v2054_v11 = vrot.slane %v5423_v51, 1  ;;  %v2056_v9 = vrot.slane %v5424_v21, 1  ;;  %v2219_v43 = vshll.u32 %v5442_v61, 16 }
 0x12d   : > { %v2378_v56 = vpop.permute.xlu1 %2377  ;;  %v7804_v6 = vpop.permute.xlu0 %1930  ;;  %v5350_v51 = vcombine.low %v856_v46, %v9411_v52  ;;  %vm9414_vm4 = vcmask 64512   ;;  %vm9419_vm8 = vcmask 195584  }
 0x12e   : > { %v2658_v17 = vsel %vm9395_vm13, %v2625_v24, %v2378_v56  ;;  %v2211_v36 = vshll.u32 %v5441_v49, 16  ;;  %v1264_v24 = vsel %vm6022_vm1, %v1232_v28, 0  ;;  %v1261_v56 = vsel %vm7766_vm10, %v7595_v57, 0  ;;  %vm9409_vm13 = vmmov %vm9406_vm3 }
 0x12f   : > { %1885 = vrot.lane.b32.xlu1 %v5404_v30, %s5903_s6  ;;  %5654 = vmatmul.mubr.msk.bf16.gmra.mrb[4].mxu0 %vm9398_vm14, %v2658_v17  ;;  %v9405_v30 = vrot.slane %v9404_v37, 1  ;;  %v2215_v17 = vshrl.u32 %v5441_v49, 16  ;;  %v2055_v33 = vsel %vm9409_vm13, %v9408_v41, %v2054_v11  ;;  %v1299_v57 = vsel %vm1128_vm7, %v1265_v12, 0  ;;  %vm9412_vm1 = vmmov %vm9403_vm2  ;;  %v9416_v37 = vld [vmem:[#allocation26_spill] sm:$0xff] }
 0x130   : > { %1775 = vrot.lane.b32.xlu0 %v1744_v19, %s5906_s9  ;;  %v2057_v19 = vsel %vm9407_vm12, %v2054_v11, %v2056_v9  ;;  %v5439_v8 = vcombine.low %v1261_v56, %v1195_v42  ;;  %v2221_v10 = vrot.slane %v2219_v43, 1  ;;  %v5459_v26 = vcombine.low %v1299_v57, %v1299_v57  ;;  %vm9413_vm11 = vmmov %vm9412_vm1  ;;  %v9422_v56 = vld [vmem:[#allocation22_spill] sm:$0xff] }
 0x131   : > { %v7821_v58 = vpop.permute.xlu1 %1753  ;;  %v7835_v18 = vpop.permute.xlu0 %1606  ;;  %v2354_v39 = vsel %vm9406_vm3, %v2351_v59, %v9405_v30  ;;  %v2213_v59 = vrot.slane %v2211_v36, 1  ;;  %v2436_v9 = vsel %vm9414_vm4, %v5350_v51, %v7647_v22  ;;  %v5792_v36 = vld [vmem:[%s6053_s30 + $0x58] sm:$0xf]  ;;  %vm9417_vm7 = vnez %v9416_v37  ;;  %vm9418_vm14 = vmmov %vm9406_vm3  ;;  %v5794_v51 = vld [vmem:[%s6053_s30 + $0x28] sm:$0xf] }
 0x132   : > { %v2369_v42 = vrot.slane %v5459_v26, 1  ;;  %v858_v30 = vsel %vm9417_vm7, %v5792_v36, 0  ;;  %vm9420_vm2 = vmmov %vm9406_vm3  ;;  %vm9421_vm3 = vcmask 261120   ;;  %vm9423_vm12 = vcmask 326656  }
 0x133   : > { %2383 = vrot.lane.b32.xlu1 %v2352_v60, %s5909_s12  ;;  %v1298_v60 = vsel %vm1127_vm15, %v1232_v28, 0  ;;  %vm9415_vm15 = vcmask 130048   ;;  %vm9424_vm13 = vcmask 392192   ;;  %vm9428_vm7 = vcmask 130048  }
 0x134   : > { %2237 = vrot.lane.b32.xlu0 %v9402_v31, %s5908_s11  ;;  %v2217_v31 = vor.u32 %v2215_v17, %v2213_v59  ;;  %v2474_v61 = vsel %vm9415_vm15, %v2436_v9, %v7692_v63  ;;  %vm9427_vm15 = vcmask 588800   ;;  %v9442_v9 = vld [vmem:[#allocation24_spill] sm:$0xff] }
 0x135   : > { %v7841_v53 = vpop.permute.xlu1 %2078  ;;  %v7844_v62 = vpop.permute.xlu0 %1932 }
 0x136   : > { %v2222_v21 = vsel %vm9412_vm1, %v2217_v31, %v2221_v10  ;;  %vm9425_vm1 = vcmask 457728   ;;  %v9438_v31 = vld [vmem:[#allocation21_spill] sm:$0xff] }
 0x137   : > { %1938 = vrot.lane.b32.xlu1 %v7696_v16, %s5905_s8  ;;  %v1263_v16 = vsel %vm7806_vm0, %v1231_v0, 0  ;;  %v5458_v0 = vcombine.low %v1297_v1, %v1298_v60 }
 0x138   : > { %1887 = vrot.lane.b32.xlu0 %v5405_v3, %s5903_s6  ;;  %v5440_v5 = vcombine.low %v1263_v16, %v1264_v24 }
 0x139   : > { %v7850_v54 = vpop.permute.xlu1 %1865  ;;  %v7855_v29 = vpop.permute.xlu0 %1755  ;;  %v2367_v49 = vrot.slane %v5458_v0, 1 }
 0x13b   : > { %1940 = vrot.lane.b32.xlu1 %v1909_v27, %s5905_s8  ;;  %v2214_v27 = vsel %vm9413_vm11, %v1904_v4, %v2213_v59  ;;  %v2507_v4 = vsel %vm9419_vm8, %v2474_v61, %v7740_v23  ;;  %v2368_v22 = vsel %vm9420_vm2, %v2365_v40, %v2367_v49  ;;  %vm9426_vm11 = vcmask 523264   ;;  %vm9431_vm2 = vmmov %vm9423_vm12 }
 0x13c   : > { %2385 = vrot.lane.b32.xlu0 %v2354_v39, %s5909_s12  ;;  %v2370_v39 = vsel %vm9418_vm14, %v2367_v49, %v2369_v42  ;;  %v2540_v24 = vsel %vm9421_vm3, %v2507_v4, %v7804_v6  ;;  %vm9429_vm14 = vmmov %vm9419_vm8 }
 0x13d   : > { %v2191_v14 = vpop.permute.xlu1 %2190  ;;  %v2081_v45 = vpop.permute.xlu0 %2080  ;;  %v2573_v59 = vsel %vm9423_vm12, %v2540_v24, %v7841_v53  ;;  %vm9430_vm8 = vmmov %vm9421_vm3 }
 0x13e   : > { %v2606_v17 = vsel %vm9424_vm13, %v2573_v59, %v2191_v14  ;;  %vm9432_vm3 = vmmov %vm9424_vm13 }
 0x13f   : > { %2088 = vrot.lane.b32.xlu1 %v2057_v19, %s5907_s10  ;;  %v5351_v19 = vcombine.low %v858_v30, %v9422_v56  ;;  %vm9433_vm12 = vmmov %vm9425_vm1 }
 0x140   : > { %2086 = vrot.lane.b32.xlu0 %v2055_v33, %s5907_s10  ;;  %vm9434_vm13 = vmmov %vm9426_vm11  ;;  %s5617_s10 = sshll.u32 %s5959_s19, 12 }
 0x141   : > { %v1919_v28 = vpop.permute.xlu1 %1918  ;;  %v7881_v3 = vpop.permute.xlu0 %1867  ;;  %v2439_v6 = vsel %vm9414_vm4, %v5351_v19, %v7704_v38  ;;  %s8928_s13 = scalar_lea.hbm %s9036_s3, %s5617_s10 }
 0x142   : > { %v2476_v53 = vsel %vm9428_vm7, %v2439_v6, %v7744_v55  ;;  %v5793_v55 = vld [vmem:[%s6053_s30 + $0x20] sm:$0xf] }
 0x143   : > { %2200 = vrot.lane.b32.xlu1 %v5440_v5, %s5902_s5  ;;  %v2509_v14 = vsel %vm9429_vm14, %v2476_v53, %v7788_v13  ;;  %v9436_v13 = vld [vmem:[#allocation29_spill] sm:$0xff] }
 0x144   : > { %2198 = vrot.lane.b32.xlu0 %v5439_v8, %s5902_s5  ;;  %v2542_v33 = vsel %vm9430_vm8, %v2509_v14, %v7844_v62  ;;  %v5795_v14 = vld [vmem:[%s6053_s30 + $0x60] sm:$0xf] }
 0x145   : > { %v2244_v12 = vpop.permute.xlu1 %2243  ;;  %v2193_v11 = vpop.permute.xlu0 %2192  ;;  %v2575_v60 = vsel %vm9431_vm2, %v2542_v33, %v2081_v45 }
 0x146   : > { %v2639_v23 = vsel %vm9425_vm1, %v2606_v17, %v2244_v12  ;;  %v2608_v57 = vsel %vm9432_vm3, %v2575_v60, %v2193_v11  ;;  %vm9435_vm1 = vmmov %vm9427_vm15 }
 0x147   : > { %2253 = vrot.lane.b32.xlu1 %v2222_v21, %s5908_s11  ;;  %v9440_v21 = vld [vmem:[#allocation32_spill] sm:$0xff] }
 0x148   : > { %2251 = vrot.lane.b32.xlu0 %v2214_v27, %s5908_s11 }
 0x149   : > { %v2067_v16 = vpop.permute.xlu1 %2066  ;;  %v1921_v63 = vpop.permute.xlu0 %1920 }
 0x14b   : > { %2401 = vrot.lane.b32.xlu1 %v2370_v39, %s5909_s12 }
 0x14c   : > { %2399 = vrot.lane.b32.xlu0 %v2368_v22, %s5909_s12 }
 0x14d   : > { %v2392_v44 = vpop.permute.xlu1 %2391  ;;  %v2246_v43 = vpop.permute.xlu0 %2245 }
 0x14e   : > { %v2672_v40 = vsel %vm9426_vm11, %v2639_v23, %v2392_v44  ;;  %v2641_v38 = vsel %vm9433_vm12, %v2608_v57, %v2246_v43  ;;  %vm9437_vm11 = vnez %v9436_v13  ;;  %v9453_v57 = vld [vmem:[#allocation27_spill] sm:$0xff]  ;;  %v5796_v13 = vld [vmem:[%s6053_s30 + $0x68] sm:$0xf] }
 0x14f   : > { %5669 = vmatprep.mubr.msk.bf16.mxu1 %vm9427_vm15, %v2672_v40  ;;  %v844_v5 = vsel %vm9437_vm11, %v5793_v55, 0  ;;  %vm9439_vm15 = vmmov %vm9428_vm7  ;;  %vm9441_vm7 = vnez %v9440_v21  ;;  %vm9444_vm11 = vcmask 588800  }
 0x150   : > { %v5344_v45 = vcombine.low %v844_v5, %v9438_v31  ;;  %v846_v49 = vsel %vm9441_vm7, %v5794_v51, 0  ;;  %vm9447_vm7 = vmmov %vm9430_vm8  ;;  %v862_v31 = vsel %vm7397_vm5, %v5796_v13, 0 }
 0x151   : > { %v2069_v41 = vpop.permute.xlu1 %2068  ;;  %v1621_v1 = vpop.permute.xlu0 %1620  ;;  %v5345_v61 = vcombine.low %v846_v49, %v9442_v9 }
 0x152   : > { %v2418_v26 = vsel %vm9414_vm4, %v5344_v45, %v7792_v15 }
 0x153   : > { %v2462_v52 = vsel %vm9439_vm15, %v2418_v26, %v7821_v58  ;;  %v9459_v26 = vld [vmem:[#allocation36_spill] sm:$0xff] }
 0x154   : > { %v2495_v42 = vsel %vm9429_vm14, %v2462_v52, %v7850_v54  ;;  %v5353_v52 = vcombine.low %v862_v31, %v9459_v26 }
 0x155   : > { %v2394_v20 = vpop.permute.xlu1 %2393  ;;  %v2179_v46 = vpop.permute.xlu0 %2178  ;;  %v2528_v27 = vsel %vm9430_vm8, %v2495_v42, %v1919_v28  ;;  %vm9449_vm8 = vmmov %vm9432_vm3 }
 0x156   : > { %v2674_v50 = vsel %vm9434_vm13, %v2641_v38, %v2394_v20  ;;  %v2561_v36 = vsel %vm9431_vm2, %v2528_v27, %v2067_v16 }
 0x157   : > { %5670 = vmatmul.mubr.msk.bf16.gmra.mrb[4].mxu1 %vm9435_vm1, %v2674_v50  ;;  %v2594_v15 = vsel %vm9432_vm3, %v2561_v36, %v2179_v46  ;;  %vm9443_vm1 = vmmov %vm9414_vm4 }
 0x158   : > { %v2421_v4 = vsel %vm9443_vm1, %v5345_v61, %v7835_v18  ;;  %vm9445_vm4 = vmmov %vm9439_vm15 }
 0x159   : > { %v1770_v8 = vpop.permute.xlu1 %1769  ;;  %v2464_v54 = vsel %vm9445_vm4, %v2421_v4, %v7855_v29  ;;  %vm9446_vm15 = vmmov %vm9429_vm14  ;;  %v5797_v4 = vld [vmem:[%s6053_s30 + $0x30] sm:$0xf] }
 0x15a   : > { %v7930_v62 = vpop.permute.xlu0 %1622  ;;  %v2497_v28 = vsel %vm9446_vm15, %v2464_v54, %v7881_v3  ;;  %vm9448_vm14 = vmmov %vm9431_vm2  ;;  %v848_v54 = vsel %vm7502_vm9, %v5797_v4, 0 }
 0x15b   : > { %v2530_v22 = vsel %vm9447_vm7, %v2497_v28, %v1921_v63  ;;  %vm9450_vm2 = vmmov %vm9433_vm12 }
 0x15c   : > { %v2563_v56 = vsel %vm9448_vm14, %v2530_v22, %v2069_v41  ;;  %vm9451_vm3 = vmmov %vm9434_vm13  ;;  %v860_v41 = vsel %vm7342_vm6, %v5795_v14, 0  ;;  %v9474_v22 = vld [vmem:[#allocation35_spill] sm:$0xff] }
 0x15d   : > { %v2232_v10 = vpop.permute.xlu1 %2231  ;;  %v5352_v38 = vcombine.low %v860_v41, %v9453_v57  ;;  %vm9460_vm6 = vmmov %vm9448_vm14 }
 0x15e   : > { %v2181_v0 = vpop.permute.xlu0 %2180  ;;  %v2627_v37 = vsel %vm9433_vm12, %v2594_v15, %v2232_v10  ;;  %vm9452_vm12 = vmmov %vm9444_vm11 }
 0x15f   : > { %v2596_v19 = vsel %vm9449_vm8, %v2563_v56, %v2181_v0  ;;  %vm9463_vm14 = vmmov %vm9451_vm3  ;;  %v5346_v56 = vcombine.low %v848_v54, %v9474_v22  ;;  %v8058_v22 = vld [vmem:[%s9035_s2] ss:$0 sm:$0xff] }
 0x161   : > { %v1882_v12 = vpop.permute.xlu1 %1881 }
 0x162   : > { %v1772_v11 = vpop.permute.xlu0 %1771 }
 0x165   : > { %v2380_v58 = vpop.permute.xlu1 %2379 }
 0x166   : > { %v2660_v30 = vsel %vm9434_vm13, %v2627_v37, %v2380_v58  ;;  %v2234_v39 = vpop.permute.xlu0 %2233  ;;  %vm9454_vm13 = vmmov %vm9443_vm1 }
 0x167   : > { %5657 = vmatprep.mubr.msk.bf16.mxu0 %vm9444_vm11, %v2660_v30  ;;  %v2629_v18 = vsel %vm9450_vm2, %v2596_v19, %v2234_v39  ;;  %v2442_v46 = vsel %vm9454_vm13, %v5352_v38, %v1621_v1  ;;  %vm9455_vm1 = vmmov %vm9445_vm4 }
 0x168   : > { %v2478_v55 = vsel %vm9455_vm1, %v2442_v46, %v1770_v8  ;;  %vm9457_vm11 = vmmov %vm9446_vm15 }
 0x169   : > { %v1884_v16 = vpop.permute.xlu1 %1883  ;;  %v2511_v45 = vsel %vm9457_vm11, %v2478_v55, %v1882_v12  ;;  %vm9458_vm4 = vmmov %vm9447_vm7 }
 0x16a   : > { %v7956_v24 = vpop.permute.xlu0 %1608  ;;  %vm9461_vm15 = vmmov %vm9449_vm8 }
 0x16b   : > { %vm9462_vm7 = vmmov %vm9450_vm2 }
 0x16c   : > { %vm9464_vm5 = vmmov %vm9454_vm13  ;;  %vm2988_vm13 = vcmask 257024  }
 0x16d   : > { %v2382_v59 = vpop.permute.xlu1 %2381  ;;  %v2445_v12 = vsel %vm9464_vm5, %v5353_v52, %v7930_v62  ;;  %vm9465_vm8 = vmmov %vm9452_vm12  ;;  %2989 = vst.msk [vmem:[%s7993_s22] sm:$0xf] %vm2988_vm13, %v9187_v7  ;;  %v9494_v52 = vld [vmem:[#allocation12_spill] sm:$0xff] }
 0x16e   : > { %v2662_v17 = vsel %vm9451_vm3, %v2629_v18, %v2382_v59  ;;  %v1935_v23 = vpop.permute.xlu0 %1934  ;;  %vm9466_vm2 = vmmov %vm9455_vm1 }
 0x16f   : > { %5658 = vmatmul.mubr.msk.bf16.gmra.mrb[8].mxu0 %vm9452_vm12, %v2662_v17  ;;  %v2544_v34 = vsel %vm9458_vm4, %v2511_v45, %v1935_v23  ;;  %v2480_v27 = vsel %vm9466_vm2, %v2445_v12, %v1772_v11  ;;  %vm9467_vm3 = vmmov %vm9457_vm11 }
 0x170   : > { %v2513_v9 = vsel %vm9467_vm3, %v2480_v27, %v1884_v16  ;;  %vm9468_vm12 = vmmov %vm9458_vm4 }
 0x171   : > { %v1758_v29 = vpop.permute.xlu1 %1757  ;;  %vm9469_vm1 = vmmov %vm9460_vm6 }
 0x172   : > { %v7963_v3 = vpop.permute.xlu0 %1610  ;;  %vm9470_vm11 = vmmov %vm9461_vm15 }
 0x173   : > { %vm9471_vm4 = vmmov %vm9462_vm7 }
 0x174   : > { %vm9480_vm9 = vmmov %vm9470_vm11 }
 0x175   : > { %v2083_v63 = vpop.permute.xlu1 %2082 }
 0x176   : > { %v1937_v44 = vpop.permute.xlu0 %1936  ;;  %v2577_v51 = vsel %vm9460_vm6, %v2544_v34, %v2083_v63  ;;  %vm9472_vm6 = vmmov %vm9463_vm14 }
 0x177   : > { %v2546_v36 = vsel %vm9468_vm12, %v2513_v9, %v1937_v44  ;;  %v5910_v9 = vmov 1983009808  }
 0x179   : > { %v1870_v40 = vpop.permute.xlu1 %1869 }
 0x17a   : > { %v7965_v43 = vpop.permute.xlu0 %1759 }
 0x17d   : > { %v2195_v6 = vpop.permute.xlu1 %2194 }
 0x17e   : > { %v2085_v53 = vpop.permute.xlu0 %2084  ;;  %v2610_v21 = vsel %vm9461_vm15, %v2577_v51, %v2195_v6  ;;  %vm9473_vm15 = vmmov %vm9465_vm8 }
 0x17f   : > { %v2579_v62 = vsel %vm9469_vm1, %v2546_v36, %v2085_v53 }
 0x181   : > { %v1923_v33 = vpop.permute.xlu1 %1922 }
 0x182   : > { %v1872_v60 = vpop.permute.xlu0 %1871 }
 0x185   : > { %v2248_v20 = vpop.permute.xlu1 %2247 }
 0x186   : > { %v2197_v50 = vpop.permute.xlu0 %2196  ;;  %v2643_v1 = vsel %vm9462_vm7, %v2610_v21, %v2248_v20  ;;  %vm9475_vm7 = vmmov %vm9464_vm5 }
 0x187   : > { %v2612_v11 = vsel %vm9470_vm11, %v2579_v62, %v2197_v50  ;;  %v2424_v59 = vsel %vm9475_vm7, %v5346_v56, %v7956_v24  ;;  %vm9477_vm5 = vmmov %vm9467_vm3  ;;  %v9484_v24 = vld [vmem:[#allocation9_spill] sm:$0xff] }
 0x188   : > { %vm9481_vm3 = vmmov %vm9471_vm4 }
 0x189   : > { %v2071_v10 = vpop.permute.xlu1 %2070  ;;  %vm9485_vm11 = vmmov %vm9475_vm7 }
 0x18a   : > { %v1925_v0 = vpop.permute.xlu0 %1924 }
 0x18d   : > { %v2396_v49 = vpop.permute.xlu1 %2395 }
 0x18e   : > { %v2676_v8 = vsel %vm9463_vm14, %v2643_v1, %v2396_v49  ;;  %v2250_v42 = vpop.permute.xlu0 %2249  ;;  %vm9476_vm14 = vmmov %vm9466_vm2 }
 0x18f   : > { %5673 = vmatprep.mubr.msk.bf16.mxu1 %vm9465_vm8, %v2676_v8  ;;  %v2645_v37 = vsel %vm9471_vm4, %v2612_v11, %v2250_v42  ;;  %v2466_v17 = vsel %vm9476_vm14, %v2424_v59, %v1758_v29  ;;  %vm9478_vm8 = vmmov %vm9468_vm12  ;;  %v2427_v29 = vsel %vm9485_vm11, %v9484_v24, %v7963_v3  ;;  %v866_v3 = vsel %vm7806_vm0, %v7453_v35, 0 }
 0x190   : > { %v2499_v23 = vsel %vm9477_vm5, %v2466_v17, %v1870_v40  ;;  %vm9479_vm2 = vmmov %vm9469_vm1  ;;  %v5355_v26 = vcombine.low %v866_v3, %v7607_v47 }
 0x191   : > { %v2073_v61 = vpop.permute.xlu1 %2072  ;;  %v2532_v44 = vsel %vm9478_vm8, %v2499_v23, %v1923_v33  ;;  %vm9482_vm12 = vmmov %vm9472_vm6 }
 0x192   : > { %v1625_v15 = vpop.permute.xlu0 %1624  ;;  %v2565_v25 = vsel %vm9479_vm2, %v2532_v44, %v2071_v10  ;;  %vm9483_vm1 = vmmov %vm9473_vm15 }
 0x193   : > { %vm9486_vm4 = vmmov %vm9476_vm14 }
 0x194   : > { %v2468_v40 = vsel %vm9486_vm4, %v2427_v29, %v7965_v43  ;;  %vm9489_vm7 = vmmov %vm9479_vm2  ;;  %v5798_v43 = vld [vmem:[%s6053_s30 + $0x70] sm:$0xf]  ;;  %s8070_s30 = scalar_lea.vmem [#allocation5], %s5337_s29  ;;  %s5835_s29 = scalar_lea.vmem %s5834_s28, 8192 }
 0x195   : > { %v2398_v58 = vpop.permute.xlu1 %2397  ;;  %vm9490_vm14 = vmmov %vm9480_vm9  ;;  %s5229_s11 = sshll.u32 %s8070_s30, 4  ;;  %s8934_s11 = int_to_ptr.vmem [resolvable:$true] %s5229_s11 }
 0x196   : > { %v2678_v30 = vsel %vm9472_vm6, %v2645_v37, %v2398_v58  ;;  %v2183_v39 = vpop.permute.xlu0 %2182  ;;  %vm9487_vm6 = vmmov %vm9477_vm5  ;;  %s5829_s20 = scalar_lea.vmem %s8934_s11, 4096  ;;  %p5836_p2 = scmp.lt.s32.totalorder %s8934_s11, %s5834_s28 }
 0x197   : > { %5674 = vmatmul.mubr.msk.bf16.gmra.mrb[8].mxu1 %vm9473_vm15, %v2678_v30  ;;  %v2598_v53 = vsel %vm9480_vm9, %v2565_v25, %v2183_v39  ;;  %v2501_v20 = vsel %vm9487_vm6, %v2468_v40, %v1872_v60  ;;  %vm9488_vm15 = vmmov %vm9478_vm8  ;;  %v864_v60 = vsel %vm7766_vm10, %v5798_v43, 0  ;;  %p5830_p6 = scmp.ne.s32.totalorder %s8934_s11, %s5829_s20  ;;  %p5837_p3 = scmp.lt.s32.totalorder %s5835_s29, %s5829_s20 }
 0x198   : > { %v2534_v46 = vsel %vm9488_vm15, %v2501_v20, %v1925_v0  ;;  %vm9491_vm5 = vmmov %vm9481_vm3  ;;  %v5354_v51 = vcombine.low %v864_v60, %v9494_v52 }
 0x199   : > { %v1774_v28 = vpop.permute.xlu1 %1773  ;;  %v2567_v55 = vsel %vm9489_vm7, %v2534_v46, %v2073_v61  ;;  %vm9492_vm8 = vmmov %vm9482_vm12  ;;  %v3038_v61 = vunpack.c.l.s4 %v5910_v9  ;;  %p5831_p10 = pnand %p5830_p6, %p9657_p9  ;;  %p5838_p4 = por %p5837_p3, %p5836_p2 }
 0x19a   : > { %v1627_v16 = vpop.permute.xlu0 %1626  ;;  %vm9493_vm2 = vmmov %vm9483_vm1 }
 0x19b   : > { %vm9495_vm9 = vmmov %vm9485_vm11  ;;  %p5832_p12 = pneg %p5831_p10 }
 0x19c   : > { %v2451_v49 = vsel %vm9495_vm9, %v5355_v26, %v1627_v16  ;;  %vm9498_vm0 = vmmov %vm9486_vm4 }
 0x19d   : > { %v2236_v19 = vpop.permute.xlu1 %2235  ;;  %vm9501_vm11 = vmmov %vm9488_vm15  ;;  %p5839_p7 = pnand %p5838_p4, %p5832_p12 }
 0x19e   : > { %v2185_v18 = vpop.permute.xlu0 %2184  ;;  %v2631_v14 = vsel %vm9481_vm3, %v2598_v53, %v2236_v19  ;;  %vm9496_vm3 = vmmov %vm9495_vm9 }
 0x19f   : > { %v2600_v13 = vsel %vm9490_vm14, %v2567_v55, %v2185_v18  ;;  %v2448_v8 = vsel %vm9496_vm3, %v5354_v51, %v1625_v15  ;;  %vm9510_vm3 = vcmask 588800  }
 0x1a0   : > { %v2482_v32 = vsel %vm9498_vm0, %v2448_v8, %v1774_v28  ;;  %v3039_v28 = vunpack.c.0.s8 %v3038_v61  ;;  %vm3708_vm0 = vcmask 254976  }
 0x1a1   : > { %v1886_v63 = vpop.permute.xlu1 %1885 }
 0x1a2   : > { %v1776_v6 = vpop.permute.xlu0 %1775  ;;  %v8065_v18 = vsub.s32 %v3039_v28, %v6029_v2 }
 0x1a5   : > { %v2384_v41 = vpop.permute.xlu1 %2383 }
 0x1a6   : > { %v2664_v57 = vsel %vm9482_vm12, %v2631_v14, %v2384_v41  ;;  %v2238_v38 = vpop.permute.xlu0 %2237  ;;  %vm9497_vm12 = vmmov %vm9486_vm4 }
 0x1a7   : > { %5661 = vmatprep.mubr.msk.bf16.mxu0 %vm9483_vm1, %v2664_v57  ;;  %v2633_v31 = vsel %vm9491_vm5, %v2600_v13, %v2238_v38  ;;  %v2484_v35 = vsel %vm9497_vm12, %v2451_v49, %v1776_v6  ;;  %vm9499_vm1 = vmmov %vm9487_vm6 }
 0x1a8   : > { %vm9500_vm10 = vmmov %vm9499_vm1 }
 0x1a9   : > { %v1939_v33 = vpop.permute.xlu1 %1938  ;;  %v2515_v12 = vsel %vm9500_vm10, %v2482_v32, %v1886_v63  ;;  %vm9502_vm4 = vmmov %vm9501_vm11 }
 0x1aa   : > { %v1888_v50 = vpop.permute.xlu0 %1887  ;;  %v2548_v47 = vsel %vm9501_vm11, %v2515_v12, %v1939_v33  ;;  %vm9503_vm6 = vmmov %vm9489_vm7 }
 0x1ab   : > { %v2517_v48 = vsel %vm9499_vm1, %v2484_v35, %v1888_v50  ;;  %vm9504_vm15 = vmmov %vm9503_vm6 }
 0x1ac   : > { %vm9505_vm7 = vmmov %vm9490_vm14 }
 0x1ad   : > { %v1941_v5 = vpop.permute.xlu1 %1940  ;;  %vm9506_vm14 = vmmov %vm9505_vm7 }
 0x1ae   : > { %v2386_v45 = vpop.permute.xlu0 %2385  ;;  %v2550_v36 = vsel %vm9502_vm4, %v2517_v48, %v1941_v5  ;;  %vm9511_vm12 = vmmov %vm9510_vm3 }
 0x1af   : > { %v2666_v10 = vsel %vm9492_vm8, %v2633_v31, %v2386_v45  ;;  %vm9507_vm8 = vmmov %vm9491_vm5 }
 0x1b0   : > { %5662 = vmatmul.mubr.msk.bf16.gmra.mrb[12].mxu0 %vm9493_vm2, %v2666_v10  ;;  %vm9508_vm2 = vcmask 523264   ;;  %vm9512_vm1 = vmmov %vm9502_vm4 }
 0x1b1   : > { %v2089_v34 = vpop.permute.xlu1 %2088  ;;  %vm9509_vm9 = vmmov %vm9508_vm2 }
 0x1b2   : > { %v2087_v0 = vpop.permute.xlu0 %2086  ;;  %v2583_v62 = vsel %vm9504_vm15, %v2550_v36, %v2089_v34  ;;  %vm9513_vm10 = vmmov %vm9512_vm1 }
 0x1b3   : > { %v2581_v15 = vsel %vm9503_vm6, %v2548_v47, %v2087_v0  ;;  %vm9514_vm11 = vmmov %vm9512_vm1 }
 0x1b4   : > { %vm9515_vm4 = vmmov %vm9512_vm1 }
 0x1b5   : > { %v2201_v21 = vpop.permute.xlu1 %2200  ;;  %vm9516_vm6 = vmmov %vm9512_vm1 }
 0x1b6   : > { %v2199_v1 = vpop.permute.xlu0 %2198  ;;  %v2616_v58 = vsel %vm9506_vm14, %v2583_v62, %v2201_v21  ;;  %vm9517_vm15 = vmmov %vm9512_vm1 }
 0x1b7   : > { %v2614_v11 = vsel %vm9505_vm7, %v2581_v15, %v2199_v1  ;;  %vm5117_vm7 = vcmask 1042434   ;;  %vm9518_vm14 = vmmov %vm9512_vm1 }
 0x1b9   : > { %v2254_v42 = vpop.permute.xlu1 %2253 }
 0x1ba   : > { %v2252_v27 = vpop.permute.xlu0 %2251  ;;  %v2649_v4 = vsel %vm9507_vm8, %v2616_v58, %v2254_v42  ;;  %vm5119_vm8 = vcmask 1043459  }
 0x1bb   : > { %v2647_v30 = vsel %vm9491_vm5, %v2614_v11, %v2252_v27  ;;  %vm9519_vm5 = vmmov %vm9512_vm1 }
 0x1bd   : > { %v2402_v37 = vpop.permute.xlu1 %2401 }
 0x1be   : > { %v2400_v39 = vpop.permute.xlu0 %2399  ;;  %v2682_v16 = vsel %vm9509_vm9, %v2649_v4, %v2402_v37  ;;  %vm9521_vm9 = vmmov %vm9512_vm1 }
 0x1bf   : > { %v2680_v54 = vsel %vm9508_vm2, %v2647_v30, %v2400_v39  ;;  %vm9520_vm2 = vmmov %vm9512_vm1 }
 0x1c0   : > { %5677 = vmatprep.mubr.msk.bf16.mxu1 %vm9510_vm3, %v2680_v54  ;;  %vm9522_vm3 = vmmov %vm9512_vm1 }
 0x1c1   : > { %5678 = vmatmul.mubr.msk.bf16.gmra.mrb[12].mxu1 %vm9511_vm12, %v2682_v16  ;;  %vm9523_vm12 = vmmov %vm9512_vm1 }
 0x1c2   : > { %v5651_v56 = vpop.f32.mrb[0].mxu0 }
 0x1c3   : > { %v2806_v19 = vadd.f32 %v5651_v56, %v8058_v22  ;;  %v2797_v59 = vpop.f32.mrb[1].mxu0 }
 0x1c4   : > { %v2798_v17 = vadd.f32 %v8058_v22, %v2797_v59  ;;  %v5652_v23 = vpop.f32.mrb[2].mxu0 }
 0x1c5   : > { %v2926_v63 = vmax.f32 %v2806_v19, 0.0  ;;  %v2809_v44 = vadd.f32 %v5652_v23, %v8058_v22  ;;  %v2800_v6 = vpop.f32.mrb[3].mxu0 }
 0x1c6   : > { %v2924_v25 = vmax.f32 %v2798_v17, 0.0  ;;  %v2801_v53 = vadd.f32 %v8058_v22, %v2800_v6 }
 0x1c7   : > { %2958 = vst.msk [vmem:[%s8070_s30 + $0x10] sm:$0xff] %vm9512_vm1, %v2926_v63  ;;  %v3070_v2 = vcombine.high %v2926_v63, %v2926_v63  ;;  %v3077_v14 = vrot.slane %v2926_v63, %v8065_v18  ;;  %v8075_v41 = vmax.f32 %v2809_v44, 0.0 }
 0x1c8   : > { %2956 = vst.msk [vmem:[%s8070_s30] sm:$0xff] %vm9513_vm10, %v2924_v25  ;;  %v3036_v57 = vcombine.high %v2924_v25, %v2924_v25  ;;  %v3043_v38 = vrot.slane %v2924_v25, %v8065_v18  ;;  %v8080_v24 = vmax.f32 %v2801_v53, 0.0  ;;  %vm9524_vm10 = vcmask 1044484  }
 0x1c9   : > { %v3084_v29 = vrot.slane %v3070_v2, %v8065_v18  ;;  %v3085_v40 = vcombine.high %v3077_v14, %v3077_v14  ;;  %v3765_v33 = vsel %vm3708_vm0, %v3077_v14, -inf  ;;  %2959 = vst.msk [vmem:[%s8070_s30 + $0x18] sm:$0xff] %vm9514_vm11, %v8075_v41  ;;  %v3087_v20 = vcombine.high %v8075_v41, %v8075_v41  ;;  %vm9525_vm11 = vmmov %vm9512_vm1 }
 0x1ca   : > { %v3766_v50 = vrot.slane %v3765_v33, 4  ;;  %v3050_v46 = vrot.slane %v3036_v57, %v8065_v18  ;;  %v3051_v55 = vcombine.high %v3043_v38, %v3043_v38  ;;  %v3709_v13 = vsel %vm3708_vm0, %v3043_v38, -inf  ;;  %2957 = vst.msk [vmem:[%s8070_s30 + $0x8] sm:$0xff] %vm9515_vm4, %v8080_v24 }
 0x1cb   : > { %v3086_v5 = vcombine.high %v3084_v29, %v3084_v29  ;;  %v3772_v31 = vsel %vm3708_vm0, %v3085_v40, -inf  ;;  %v3779_v45 = vsel %vm3708_vm0, %v3084_v29, -inf  ;;  %v3710_v10 = vrot.slane %v3709_v13, 4 }
 0x1cc   : > { %v3767_v3 = vmax.f32 %v3765_v33, %v3766_v50  ;;  %v3773_v43 = vrot.slane %v3772_v31, 4  ;;  %v3780_v60 = vrot.slane %v3779_v45, 4  ;;  %v3052_v34 = vcombine.high %v3050_v46, %v3050_v46 }
 0x1cd   : > { %v3786_v0 = vsel %vm3708_vm0, %v3086_v5, -inf  ;;  %v3711_v26 = vmax.f32 %v3709_v13, %v3710_v10  ;;  %v3716_v52 = vsel %vm3708_vm0, %v3051_v55, -inf  ;;  %v3723_v51 = vsel %vm3708_vm0, %v3050_v46, -inf }
 0x1ce   : > { %v3768_v21 = vrot.slane %v3767_v3, 2  ;;  %v3774_v1 = vmax.f32 %v3772_v31, %v3773_v43  ;;  %v3781_v49 = vmax.f32 %v3779_v45, %v3780_v60  ;;  %v3787_v8 = vrot.slane %v3786_v0, 4 }
 0x1cf   : > { %v3712_v35 = vrot.slane %v3711_v26, 2  ;;  %v3717_v32 = vrot.slane %v3716_v52, 4  ;;  %v3724_v48 = vrot.slane %v3723_v51, 4  ;;  %v3730_v42 = vsel %vm3708_vm0, %v3052_v34, -inf }
 0x1d0   : > { %v3769_v12 = vmax.f32 %v3767_v3, %v3768_v21  ;;  %v3775_v27 = vrot.slane %v3774_v1, 2  ;;  %v3782_v47 = vrot.slane %v3781_v49, 2  ;;  %v3788_v9 = vmax.f32 %v3786_v0, %v3787_v8 }
 0x1d1   : > { %v3713_v61 = vmax.f32 %v3711_v26, %v3712_v35  ;;  %v3718_v36 = vmax.f32 %v3716_v52, %v3717_v32  ;;  %v3725_v15 = vmax.f32 %v3723_v51, %v3724_v48  ;;  %v3731_v62 = vrot.slane %v3730_v42, 4 }
 0x1d2   : > { %v3770_v11 = vrot.slane %v3769_v12, 1  ;;  %v3776_v37 = vmax.f32 %v3774_v1, %v3775_v27  ;;  %v3783_v58 = vmax.f32 %v3781_v49, %v3782_v47  ;;  %v3789_v30 = vrot.slane %v3788_v9, 2 }
 0x1d3   : > { %v3714_v39 = vrot.slane %v3713_v61, 1  ;;  %v3719_v4 = vrot.slane %v3718_v36, 2  ;;  %v3726_v54 = vrot.slane %v3725_v15, 2  ;;  %v3732_v28 = vmax.f32 %v3730_v42, %v3731_v62 }
 0x1d4   : > { %v3771_v16 = vmax.f32 %v3769_v12, %v3770_v11  ;;  %v3777_v56 = vrot.slane %v3776_v37, 1  ;;  %v3784_v19 = vrot.slane %v3783_v58, 1  ;;  %v3790_v59 = vmax.f32 %v3788_v9, %v3789_v30 }
 0x1d5   : > { %v3715_v17 = vmax.f32 %v3713_v61, %v3714_v39  ;;  %v3720_v23 = vmax.f32 %v3718_v36, %v3719_v4  ;;  %v3727_v63 = vmax.f32 %v3725_v15, %v3726_v54  ;;  %v3733_v44 = vrot.slane %v3732_v28, 2 }
 0x1d6   : > { %v3778_v6 = vmax.f32 %v3776_v37, %v3777_v56  ;;  %v3785_v25 = vmax.f32 %v3783_v58, %v3784_v19  ;;  %v3791_v53 = vrot.slane %v3790_v59, 1  ;;  %v4606_v2 = vsel %vm9516_vm6, %v3771_v16, -inf }
 0x1d7   : > { %v3721_v14 = vrot.slane %v3720_v23, 1  ;;  %v3728_v57 = vrot.slane %v3727_v63, 1  ;;  %v3734_v38 = vmax.f32 %v3732_v28, %v3733_v44  ;;  %v4605_v29 = vsel %vm9517_vm15, %v3715_v17, -inf  ;;  %vm9526_vm15 = vmmov %vm9512_vm1 }
 0x1d8   : > { %v3792_v40 = vmax.f32 %v3790_v59, %v3791_v53  ;;  %v4609_v33 = vsel %vm9518_vm14, %v3778_v6, -inf  ;;  %v4612_v50 = vsel %vm9519_vm5, %v3785_v25, -inf  ;;  %v4607_v46 = vmax.f32 %v4605_v29, %v4606_v2  ;;  %vm9527_vm5 = vmmov %vm9512_vm1 }
 0x1d9   : > { %v3722_v55 = vmax.f32 %v3720_v23, %v3721_v14  ;;  %v3729_v13 = vmax.f32 %v3727_v63, %v3728_v57  ;;  %v3735_v5 = vrot.slane %v3734_v38, 1  ;;  %v3094_v31 = vrot.slane %v8075_v41, %v8065_v18 }
 0x1da   : > { %v4615_v45 = vsel %vm9520_vm2, %v3792_v40, -inf  ;;  %v5552_v10 = vpack.c.bf16 %v4607_v46, %v4607_v46  ;;  %v3101_v3 = vrot.slane %v3087_v20, %v8065_v18  ;;  %v3053_v43 = vcombine.high %v8080_v24, %v8080_v24  ;;  %vm9528_vm2 = vmmov %vm9512_vm1 }
 0x1db   : > { %v3736_v60 = vmax.f32 %v3734_v38, %v3735_v5  ;;  %v4608_v34 = vsel %vm9521_vm9, %v3722_v55, -inf  ;;  %v4611_v0 = vsel %vm9522_vm3, %v3729_v13, -inf  ;;  %v3102_v26 = vcombine.high %v3094_v31, %v3094_v31  ;;  %vm9529_vm9 = vmmov %vm9512_vm1 }
 0x1dc   : > { %v4610_v52 = vmax.f32 %v4608_v34, %v4609_v33  ;;  %v4613_v51 = vmax.f32 %v4611_v0, %v4612_v50  ;;  %v5053_v21 = vunpack.c.l.b16 %v5552_v10  ;;  %v3103_v1 = vcombine.high %v3101_v3, %v3101_v3  ;;  %vm9530_vm3 = vmmov %vm9512_vm1 }
 0x1dd   : > { %v4614_v49 = vsel %vm9523_vm12, %v3736_v60, -inf  ;;  %v3793_v8 = vsel %vm3708_vm0, %v3094_v31, -inf  ;;  %v3800_v41 = vsel %vm3708_vm0, %v3102_v26, -inf  ;;  %v3807_v20 = vsel %vm3708_vm0, %v3101_v3, -inf  ;;  %vm9531_vm12 = vmmov %vm9512_vm1 }
 0x1de   : > { %v4616_v35 = vmax.f32 %v4614_v49, %v4615_v45  ;;  %v5553_v32 = vpack.c.bf16 %v4610_v52, %v4610_v52  ;;  %v5554_v48 = vpack.c.bf16 %v4613_v51, %v4613_v51  ;;  %v3794_v42 = vrot.slane %v3793_v8, 4 }
 0x1df   : > { %v3801_v12 = vrot.slane %v3800_v41, 4  ;;  %v3808_v27 = vrot.slane %v3807_v20, 4  ;;  %v3814_v47 = vsel %vm3708_vm0, %v3103_v1, -inf  ;;  %v3060_v9 = vrot.slane %v8080_v24, %v8065_v18 }
 0x1e0   : > { %v5555_v61 = vpack.c.bf16 %v4616_v35, %v4616_v35  ;;  %v5054_v36 = vunpack.c.l.b16 %v5553_v32  ;;  %v5055_v15 = vunpack.c.l.b16 %v5554_v48  ;;  %v3795_v62 = vmax.f32 %v3793_v8, %v3794_v42 }
 0x1e1   : > { %v3802_v11 = vmax.f32 %v3800_v41, %v3801_v12  ;;  %v3809_v37 = vmax.f32 %v3807_v20, %v3808_v27  ;;  %v3815_v58 = vrot.slane %v3814_v47, 4  ;;  %v3067_v30 = vrot.slane %v3053_v43, %v8065_v18 }
 0x1e2   : > { %v5056_v39 = vunpack.c.l.b16 %v5555_v61  ;;  %v5118_v4 = vsel %vm5117_vm7, %v5054_v36, %v5053_v21  ;;  %v3796_v54 = vrot.slane %v3795_v62, 2  ;;  %v3068_v28 = vcombine.high %v3060_v9, %v3060_v9 }
 0x1e3   : > { %v5120_v16 = vsel %vm5119_vm8, %v5055_v15, %v5118_v4  ;;  %v3803_v56 = vrot.slane %v3802_v11, 2  ;;  %v3810_v19 = vrot.slane %v3809_v37, 2  ;;  %v3816_v59 = vmax.f32 %v3814_v47, %v3815_v58 }
 0x1e4   : > { %v3797_v24 = vmax.f32 %v3795_v62, %v3796_v54  ;;  %v3069_v17 = vcombine.high %v3067_v30, %v3067_v30  ;;  %v3737_v23 = vsel %vm3708_vm0, %v3060_v9, -inf  ;;  %v3744_v63 = vsel %vm3708_vm0, %v3068_v28, -inf }
 0x1e5   : > { %v3804_v44 = vmax.f32 %v3802_v11, %v3803_v56  ;;  %v3811_v6 = vmax.f32 %v3809_v37, %v3810_v19  ;;  %v3817_v25 = vrot.slane %v3816_v59, 2  ;;  %v3738_v53 = vrot.slane %v3737_v23, 4 }
 0x1e6   : > { %v3798_v2 = vrot.slane %v3797_v24, 1  ;;  %v3745_v14 = vrot.slane %v3744_v63, 4  ;;  %v3751_v57 = vsel %vm3708_vm0, %v3067_v30, -inf  ;;  %v3758_v38 = vsel %vm3708_vm0, %v3069_v17, -inf }
 0x1e7   : > { %v3805_v29 = vrot.slane %v3804_v44, 1  ;;  %v3812_v40 = vrot.slane %v3811_v6, 1  ;;  %v3818_v33 = vmax.f32 %v3816_v59, %v3817_v25  ;;  %v3739_v50 = vmax.f32 %v3737_v23, %v3738_v53 }
 0x1e8   : > { %v3799_v46 = vmax.f32 %v3797_v24, %v3798_v2  ;;  %v3746_v55 = vmax.f32 %v3744_v63, %v3745_v14  ;;  %v3752_v13 = vrot.slane %v3751_v57, 4  ;;  %v3759_v5 = vrot.slane %v3758_v38, 4 }
 0x1e9   : > { %v3806_v31 = vmax.f32 %v3804_v44, %v3805_v29  ;;  %v3819_v45 = vrot.slane %v3818_v33, 1  ;;  %v3740_v10 = vrot.slane %v3739_v50, 2  ;;  %v3813_v0 = vmax.f32 %v3811_v6, %v3812_v40 }
 0x1ea   : > { %v3747_v3 = vrot.slane %v3746_v55, 2  ;;  %v3753_v43 = vmax.f32 %v3751_v57, %v3752_v13  ;;  %v3760_v60 = vmax.f32 %v3758_v38, %v3759_v5  ;;  %v5667_v34 = vpop.f32.mrb[0].mxu1  ;;  %v4618_v52 = vsel %vm9512_vm1, %v3799_v46, -inf }
 0x1eb   : > { %v3820_v26 = vmax.f32 %v3818_v33, %v3819_v45  ;;  %v3741_v51 = vmax.f32 %v3739_v50, %v3740_v10  ;;  %v2861_v21 = vpop.f32.mrb[1].mxu1  ;;  %v5122_v41 = vsel %vm9524_vm10, %v5056_v39, %v5120_v16  ;;  %v4621_v35 = vsel %vm9525_vm11, %v3806_v31, -inf  ;;  %vm9532_vm10 = vmmov %vm9512_vm1 }
 0x1ec   : > { %v3748_v1 = vmax.f32 %v3746_v55, %v3747_v3  ;;  %v3754_v49 = vrot.slane %v3753_v43, 2  ;;  %v3761_v8 = vrot.slane %v3760_v60, 2  ;;  %v5668_v20 = vpop.f32.mrb[2].mxu1  ;;  %vm5123_vm4 = vcmask 1045509   ;;  %vm9533_vm11 = vmmov %vm9512_vm1 }
 0x1ed   : > { %v3742_v32 = vrot.slane %v3741_v51, 1  ;;  %v2870_v48 = vadd.f32 %v5667_v34, %v8058_v22  ;;  %v2862_v42 = vadd.f32 %v8058_v22, %v2861_v21  ;;  %v8134_v12 = vpop.f32.mrb[3].mxu1  ;;  %vm5125_vm6 = vcmask 1046534  }
 0x1ee   : > { %v3749_v27 = vrot.slane %v3748_v1, 1  ;;  %v3755_v47 = vmax.f32 %v3753_v43, %v3754_v49  ;;  %v3762_v9 = vmax.f32 %v3760_v60, %v3761_v8  ;;  %v2873_v61 = vadd.f32 %v5668_v20, %v8058_v22 }
 0x1ef   : > { %v4624_v36 = vsel %vm9526_vm15, %v3813_v0, -inf  ;;  %v3743_v15 = vmax.f32 %v3741_v51, %v3742_v32  ;;  %v2942_v62 = vmax.f32 %v2870_v48, 0.0  ;;  %v2940_v11 = vmax.f32 %v2862_v42, 0.0  ;;  %vm9534_vm15 = vmmov %vm9512_vm1 }
 0x1f0   : > { %v3750_v37 = vmax.f32 %v3748_v1, %v3749_v27  ;;  %v3756_v58 = vrot.slane %v3755_v47, 1  ;;  %v3763_v30 = vrot.slane %v3762_v9, 1  ;;  %vm5127_vm14 = vcmask 1047559  }
 0x1f1   : > { %v8138_v39 = vmax.f32 %v2873_v61, 0.0  ;;  %v4627_v4 = vsel %vm9527_vm5, %v3820_v26, -inf  ;;  %v4617_v54 = vsel %vm9528_vm2, %v3743_v15, -inf  ;;  %2974 = vst.msk [vmem:[%s8070_s30 + $0x90] sm:$0xff] %vm9529_vm9, %v2942_v62  ;;  %v3342_v28 = vcombine.high %v2942_v62, %v2942_v62  ;;  %vm9535_vm5 = vmmov %vm9512_vm1 }
 0x1f2   : > { %v3349_v16 = vrot.slane %v2942_v62, %v8065_v18  ;;  %2972 = vst.msk [vmem:[%s8070_s30 + $0x80] sm:$0xff] %vm9530_vm3, %v2940_v11  ;;  %v3757_v56 = vmax.f32 %v3755_v47, %v3756_v58  ;;  %v3764_v19 = vmax.f32 %v3762_v9, %v3763_v30  ;;  %v4619_v59 = vmax.f32 %v4617_v54, %v4618_v52  ;;  %vm9536_vm2 = vmmov %vm9512_vm1 }
 0x1f3   : > { %v4620_v24 = vsel %vm9531_vm12, %v3750_v37, -inf  ;;  %2975 = vst.msk [vmem:[%s8070_s30 + $0x98] sm:$0xff] %vm9512_vm1, %v8138_v39  ;;  %v3356_v23 = vrot.slane %v3342_v28, %v8065_v18  ;;  %v3308_v31 = vcombine.high %v2940_v11, %v2940_v11  ;;  %v3315_v21 = vrot.slane %v2940_v11, %v8065_v18  ;;  %vm9537_vm9 = vmmov %vm9512_vm1 }
 0x1f4   : > { %v4622_v17 = vmax.f32 %v4620_v24, %v4621_v35  ;;  %v3357_v63 = vcombine.high %v3349_v16, %v3349_v16  ;;  %v4213_v44 = vsel %vm3708_vm0, %v3349_v16, -inf  ;;  %v4623_v6 = vsel %vm9532_vm10, %v3757_v56, -inf  ;;  %vm9538_vm3 = vmmov %vm9512_vm1 }
 0x1f5   : > { %v4626_v25 = vsel %vm9533_vm11, %v3764_v19, -inf  ;;  %v5556_v53 = vpack.c.bf16 %v4619_v59, %v4619_v59  ;;  %v4214_v2 = vrot.slane %v4213_v44, 4  ;;  %v4625_v14 = vmax.f32 %v4623_v6, %v4624_v36  ;;  %vm9539_vm12 = vmmov %vm9512_vm1 }
 0x1f6   : > { %v8155_v57 = vmax.f32 %v4626_v25, %v4627_v4  ;;  %v5557_v38 = vpack.c.bf16 %v4622_v17, %v4622_v17  ;;  %v3358_v29 = vcombine.high %v3356_v23, %v3356_v23  ;;  %v4220_v50 = vsel %vm3708_vm0, %v3357_v63, -inf  ;;  %vm9540_vm10 = vmmov %vm9512_vm1 }
 0x1f7   : > { %v5057_v40 = vunpack.c.l.b16 %v5556_v53  ;;  %v4215_v33 = vmax.f32 %v4213_v44, %v4214_v2  ;;  %v4227_v46 = vsel %vm3708_vm0, %v3356_v23, -inf  ;;  %v5558_v55 = vpack.c.bf16 %v4625_v14, %v4625_v14  ;;  %vm9541_vm11 = vmmov %vm9512_vm1 }
 0x1f8   : > { %v5058_v13 = vunpack.c.l.b16 %v5557_v38  ;;  %v4221_v5 = vrot.slane %v4220_v50, 4  ;;  %v4228_v3 = vrot.slane %v4227_v46, 4  ;;  %v4234_v43 = vsel %vm3708_vm0, %v3358_v29, -inf }
 0x1f9   : > { %v5124_v45 = vsel %vm5123_vm4, %v5057_v40, %v5122_v41  ;;  %v4216_v10 = vrot.slane %v4215_v33, 2  ;;  %v5059_v60 = vunpack.c.l.b16 %v5558_v55  ;;  %v4235_v51 = vrot.slane %v4234_v43, 4 }
 0x1fa   : > { %v5126_v34 = vsel %vm5125_vm6, %v5058_v13, %v5124_v45  ;;  %v4222_v0 = vmax.f32 %v4220_v50, %v4221_v5  ;;  %v4229_v52 = vmax.f32 %v4227_v46, %v4228_v3  ;;  %v3322_v8 = vrot.slane %v3308_v31, %v8065_v18 }
 0x1fb   : > { %v4217_v26 = vmax.f32 %v4215_v33, %v4216_v10  ;;  %v8164_v1 = vsel %vm5127_vm14, %v5059_v60, %v5126_v34  ;;  %v4236_v35 = vmax.f32 %v4234_v43, %v4235_v51  ;;  %v3359_v32 = vcombine.high %v8138_v39, %v8138_v39 }
 0x1fc   : > { %v4223_v49 = vrot.slane %v4222_v0, 2  ;;  %v4230_v20 = vrot.slane %v4229_v52, 2  ;;  %v3323_v42 = vcombine.high %v3315_v21, %v3315_v21  ;;  %v3324_v27 = vcombine.high %v3322_v8, %v3322_v8 }
 0x1fd   : > { %v4218_v41 = vrot.slane %v4217_v26, 1  ;;  %v4157_v47 = vsel %vm3708_vm0, %v3315_v21, -inf  ;;  %v4237_v36 = vrot.slane %v4236_v35, 2  ;;  %v4171_v37 = vsel %vm3708_vm0, %v3322_v8, -inf }
 0x1fe   : > { %v4224_v48 = vmax.f32 %v4222_v0, %v4223_v49  ;;  %v4231_v61 = vmax.f32 %v4229_v52, %v4230_v20  ;;  %v4158_v15 = vrot.slane %v4157_v47, 4  ;;  %v4164_v11 = vsel %vm3708_vm0, %v3323_v42, -inf }
 0x1ff   : > { %v4219_v9 = vmax.f32 %v4217_v26, %v4218_v41  ;;  %v4178_v58 = vsel %vm3708_vm0, %v3324_v27, -inf  ;;  %v4238_v4 = vmax.f32 %v4236_v35, %v4237_v36  ;;  %v4165_v56 = vrot.slane %v4164_v11, 4 }
 0x200   : > { %v4225_v62 = vrot.slane %v4224_v48, 1  ;;  %v4232_v30 = vrot.slane %v4231_v61, 1  ;;  %v4159_v28 = vmax.f32 %v4157_v47, %v4158_v15  ;;  %v4172_v19 = vrot.slane %v4171_v37, 4 }
 0x201   : > { %v4702_v54 = vsel %vm9534_vm15, %v4219_v9, -inf  ;;  %v4179_v59 = vrot.slane %v4178_v58, 4  ;;  %v4239_v17 = vrot.slane %v4238_v4, 1  ;;  %v3366_v63 = vrot.slane %v8138_v39, %v8065_v18  ;;  %vm9542_vm15 = vmmov %vm9512_vm1 }
 0x202   : > { %v4226_v16 = vmax.f32 %v4224_v48, %v4225_v62  ;;  %v4233_v24 = vmax.f32 %v4231_v61, %v4232_v30  ;;  %v4160_v23 = vrot.slane %v4159_v28, 2  ;;  %v8176_v44 = vpop.f32.mrb[4].mxu0  ;;  %v4166_v25 = vmax.f32 %v4164_v11, %v4165_v56 }
 0x203   : > { %v4173_v53 = vmax.f32 %v4171_v37, %v4172_v19  ;;  %v4180_v2 = vmax.f32 %v4178_v58, %v4179_v59  ;;  %v8179_v14 = vpop.f32.mrb[5].mxu0  ;;  %v4240_v38 = vmax.f32 %v4238_v4, %v4239_v17  ;;  %v3373_v33 = vrot.slane %v3359_v32, %v8065_v18 }
 0x204   : > { %v4705_v6 = vsel %vm9535_vm5, %v4226_v16, -inf  ;;  %v4708_v29 = vsel %vm9536_vm2, %v4233_v24, -inf  ;;  %v4161_v40 = vmax.f32 %v4159_v28, %v4160_v23  ;;  %v8183_v50 = vpop.f32.mrb[6].mxu0  ;;  %v4167_v46 = vrot.slane %v4166_v25, 2  ;;  %vm9543_vm5 = vmmov %vm9512_vm1 }
 0x205   : > { %v4174_v55 = vrot.slane %v4173_v53, 2  ;;  %v4181_v39 = vrot.slane %v4180_v2, 2  ;;  %v3374_v13 = vcombine.high %v3366_v63, %v3366_v63  ;;  %v8185_v5 = vpop.f32.mrb[7].mxu0  ;;  %v4711_v31 = vsel %vm9537_vm9, %v4240_v38, -inf  ;;  %vm9544_vm2 = vmmov %vm9512_vm1 }
 0x206   : > { %v4162_v45 = vrot.slane %v4161_v40, 1  ;;  %v3375_v10 = vcombine.high %v3373_v33, %v3373_v33  ;;  %v4241_v3 = vsel %vm3708_vm0, %v3366_v63, -inf  ;;  %v4168_v43 = vmax.f32 %v4166_v25, %v4167_v46  ;;  %vm9545_vm9 = vmmov %vm9512_vm1 }
 0x207   : > { %v4175_v60 = vmax.f32 %v4173_v53, %v4174_v55  ;;  %v4182_v34 = vmax.f32 %v4180_v2, %v4181_v39  ;;  %v4242_v0 = vrot.slane %v4241_v3, 4  ;;  %v4248_v52 = vsel %vm3708_vm0, %v3374_v13, -inf }
 0x208   : > { %v4163_v26 = vmax.f32 %v4161_v40, %v4162_v45  ;;  %v4255_v51 = vsel %vm3708_vm0, %v3373_v33, -inf  ;;  %v4262_v21 = vsel %vm3708_vm0, %v3375_v10, -inf  ;;  %v4169_v49 = vrot.slane %v4168_v43, 1 }
 0x209   : > { %v4176_v8 = vrot.slane %v4175_v60, 1  ;;  %v4183_v41 = vrot.slane %v4182_v34, 1  ;;  %v4243_v20 = vmax.f32 %v4241_v3, %v4242_v0  ;;  %v4249_v32 = vrot.slane %v4248_v52, 4 }
 0x20a   : > { %v4701_v35 = vsel %vm9538_vm3, %v4163_v26, -inf  ;;  %v4256_v48 = vrot.slane %v4255_v51, 4  ;;  %v4263_v42 = vrot.slane %v4262_v21, 4  ;;  %v4170_v27 = vmax.f32 %v4168_v43, %v4169_v49  ;;  %vm9546_vm3 = vmmov %vm9512_vm1 }
 0x20b   : > { %v4177_v47 = vmax.f32 %v4175_v60, %v4176_v8  ;;  %v4184_v9 = vmax.f32 %v4182_v34, %v4183_v41  ;;  %v8193_v61 = vmax.f32 %v4701_v35, %v4702_v54  ;;  %v4244_v36 = vrot.slane %v4243_v20, 2 }
 0x20c   : > { %v4250_v15 = vmax.f32 %v4248_v52, %v4249_v32  ;;  %v4257_v62 = vmax.f32 %v4255_v51, %v4256_v48  ;;  %v4264_v11 = vmax.f32 %v4262_v21, %v4263_v42  ;;  %v4704_v37 = vsel %vm9539_vm12, %v4170_v27, -inf  ;;  %vm9547_vm12 = vmmov %vm9512_vm1 }
 0x20d   : > { %v4707_v58 = vsel %vm9512_vm1, %v4177_v47, -inf  ;;  %v4710_v30 = vsel %vm9540_vm10, %v4184_v9, -inf  ;;  %v2865_v4 = vadd.f32 %v8058_v22, %v8134_v12  ;;  %v8200_v28 = vmax.f32 %v4704_v37, %v4705_v6  ;;  %vm9548_vm10 = vmmov %vm9512_vm1 }
 0x20e   : > { %v8202_v16 = vmax.f32 %v4707_v58, %v4708_v29  ;;  %v8204_v54 = vmax.f32 %v4710_v30, %v4711_v31  ;;  %v4245_v56 = vmax.f32 %v4243_v20, %v4244_v36  ;;  %v4251_v19 = vrot.slane %v4250_v15, 2 }
 0x20f   : > { %v4258_v59 = vrot.slane %v4257_v62, 2  ;;  %v4265_v24 = vrot.slane %v4264_v11, 2  ;;  %v2941_v53 = vmax.f32 %v2865_v4, 0.0  ;;  %v5559_v2 = vpack.c.bf16 %v8155_v57, %v8155_v57 }
 0x210   : > { %v4246_v17 = vrot.slane %v4245_v56, 1  ;;  %v4252_v23 = vmax.f32 %v4250_v15, %v4251_v19  ;;  %v5584_v33 = vpack.c.bf16 %v8193_v61, %v8193_v61  ;;  %v2822_v55 = vadd.f32 %v8176_v44, %v8058_v22 }
 0x211   : > { %v4259_v63 = vmax.f32 %v4257_v62, %v4258_v59  ;;  %v4266_v25 = vmax.f32 %v4264_v11, %v4265_v24  ;;  %2973 = vst.msk [vmem:[%s8070_s30 + $0x88] sm:$0xff] %vm9541_vm11, %v2941_v53  ;;  %v3325_v40 = vcombine.high %v2941_v53, %v2941_v53  ;;  %v3332_v46 = vrot.slane %v2941_v53, %v8065_v18  ;;  %vm9549_vm11 = vmmov %vm9512_vm1 }
 0x212   : > { %v4247_v12 = vmax.f32 %v4245_v56, %v4246_v17  ;;  %v4253_v6 = vrot.slane %v4252_v23, 1  ;;  %v2814_v39 = vadd.f32 %v8058_v22, %v8179_v14  ;;  %v2930_v60 = vmax.f32 %v2822_v55, 0.0 }
 0x213   : > { %v4260_v38 = vrot.slane %v4259_v63, 1  ;;  %v4267_v29 = vrot.slane %v4266_v25, 1  ;;  %v3339_v10 = vrot.slane %v3325_v40, %v8065_v18  ;;  %v3340_v3 = vcombine.high %v3332_v46, %v3332_v46 }
 0x214   : > { %v4254_v13 = vmax.f32 %v4252_v23, %v4253_v6  ;;  %v4185_v43 = vsel %vm3708_vm0, %v3332_v46, -inf  ;;  %v8219_v34 = vmax.f32 %v2814_v39, 0.0  ;;  %v4714_v0 = vsel %vm9542_vm15, %v4247_v12, -inf  ;;  %2962 = vst.msk [vmem:[%s8070_s30 + $0x30] sm:$0xff] %vm9545_vm9, %v2930_v60  ;;  %vm9550_vm15 = vmmov %vm9512_vm1 }
 0x215   : > { %v4261_v31 = vmax.f32 %v4259_v63, %v4260_v38  ;;  %v4268_v45 = vmax.f32 %v4266_v25, %v4267_v29  ;;  %v3341_v14 = vcombine.high %v3339_v10, %v3339_v10  ;;  %v4186_v52 = vrot.slane %v4185_v43, 4  ;;  %vm9553_vm9 = vmmov %vm9512_vm1 }
 0x216   : > { %v4717_v44 = vsel %vm9543_vm5, %v4254_v13, -inf  ;;  %v4192_v51 = vsel %vm3708_vm0, %v3340_v3, -inf  ;;  %v4199_v21 = vsel %vm3708_vm0, %v3339_v10, -inf  ;;  %v3138_v49 = vcombine.high %v2930_v60, %v2930_v60  ;;  %2960 = vst.msk [vmem:[%s8070_s30 + $0x20] sm:$0xff] %vm9546_vm3, %v8219_v34  ;;  %vm9551_vm5 = vmmov %vm9512_vm1 }
 0x217   : > { %v4720_v26 = vsel %vm9544_vm2, %v4261_v31, -inf  ;;  %v4193_v8 = vrot.slane %v4192_v51, 4  ;;  %v4200_v41 = vrot.slane %v4199_v21, 4  ;;  %v4206_v20 = vsel %vm3708_vm0, %v3341_v14, -inf  ;;  %vm9552_vm2 = vmmov %vm9512_vm1 }
 0x218   : > { %v3145_v35 = vrot.slane %v2930_v60, %v8065_v18  ;;  %v4723_v32 = vsel %vm9547_vm12, %v4268_v45, -inf  ;;  %v4187_v48 = vmax.f32 %v4185_v43, %v4186_v52  ;;  %v4207_v42 = vrot.slane %v4206_v20, 4  ;;  %vm9554_vm3 = vmmov %vm9512_vm1 }
 0x219   : > { %v3152_v27 = vrot.slane %v3138_v49, %v8065_v18  ;;  %v4194_v47 = vmax.f32 %v4192_v51, %v4193_v8  ;;  %v4201_v9 = vmax.f32 %v4199_v21, %v4200_v41  ;;  %vm9555_vm12 = vmmov %vm9512_vm1 }
 0x21a   : > { %v3153_v36 = vcombine.high %v3145_v35, %v3145_v35  ;;  %v3877_v15 = vsel %vm3708_vm0, %v3145_v35, -inf  ;;  %v4188_v62 = vrot.slane %v4187_v48, 2  ;;  %v4208_v11 = vmax.f32 %v4206_v20, %v4207_v42 }
 0x21b   : > { %v3154_v37 = vcombine.high %v3152_v27, %v3152_v27  ;;  %v3878_v58 = vrot.slane %v3877_v15, 4  ;;  %v4195_v30 = vrot.slane %v4194_v47, 2  ;;  %v4202_v4 = vrot.slane %v4201_v9, 2 }
 0x21c   : > { %v3884_v56 = vsel %vm3708_vm0, %v3153_v36, -inf  ;;  %v3891_v19 = vsel %vm3708_vm0, %v3152_v27, -inf  ;;  %v4189_v59 = vmax.f32 %v4187_v48, %v4188_v62  ;;  %v4209_v24 = vrot.slane %v4208_v11, 2 }
 0x21d   : > { %v3879_v17 = vmax.f32 %v3877_v15, %v3878_v58  ;;  %v3885_v23 = vrot.slane %v3884_v56, 4  ;;  %v4196_v63 = vmax.f32 %v4194_v47, %v4195_v30  ;;  %v4203_v25 = vmax.f32 %v4201_v9, %v4202_v4 }
 0x21e   : > { %v3892_v53 = vrot.slane %v3891_v19, 4  ;;  %v3898_v12 = vsel %vm3708_vm0, %v3154_v37, -inf  ;;  %v4190_v6 = vrot.slane %v4189_v59, 1  ;;  %v4210_v38 = vmax.f32 %v4208_v11, %v4209_v24 }
 0x21f   : > { %v3880_v29 = vrot.slane %v3879_v17, 2  ;;  %v3886_v40 = vmax.f32 %v3884_v56, %v3885_v23  ;;  %v4197_v46 = vrot.slane %v4196_v63, 1  ;;  %v4204_v55 = vrot.slane %v4203_v25, 1 }
 0x220   : > { %v3893_v39 = vmax.f32 %v3891_v19, %v3892_v53  ;;  %v3899_v13 = vrot.slane %v3898_v12, 4  ;;  %v4191_v31 = vmax.f32 %v4189_v59, %v4190_v6  ;;  %v4211_v45 = vrot.slane %v4210_v38, 1 }
 0x221   : > { %v3881_v10 = vmax.f32 %v3879_v17, %v3880_v29  ;;  %v3887_v3 = vrot.slane %v3886_v40, 2  ;;  %v4198_v43 = vmax.f32 %v4196_v63, %v4197_v46  ;;  %v4205_v60 = vmax.f32 %v4203_v25, %v4204_v55 }
 0x222   : > { %v3894_v14 = vrot.slane %v3893_v39, 2  ;;  %v3900_v52 = vmax.f32 %v3898_v12, %v3899_v13  ;;  %v4212_v51 = vmax.f32 %v4210_v38, %v4211_v45  ;;  %v4713_v21 = vsel %vm9512_vm1, %v4191_v31, -inf }
 0x223   : > { %v3882_v49 = vrot.slane %v3881_v10, 1  ;;  %v3888_v8 = vmax.f32 %v3886_v40, %v3887_v3  ;;  %v8240_v41 = vmax.f32 %v4713_v21, %v4714_v0  ;;  %v4716_v20 = vsel %vm9548_vm10, %v4198_v43, -inf }
 0x224   : > { %v4719_v35 = vsel %vm9549_vm11, %v4205_v60, -inf  ;;  %v3895_v48 = vmax.f32 %v3893_v39, %v3894_v14  ;;  %v8244_v42 = vmax.f32 %v4716_v20, %v4717_v44  ;;  %v4722_v47 = vsel %vm9550_vm15, %v4212_v51, -inf  ;;  %vm9556_vm11 = vmmov %vm9512_vm1 }
 0x225   : > { %v8246_v27 = vmax.f32 %v4719_v35, %v4720_v26  ;;  %v3883_v9 = vmax.f32 %v3881_v10, %v3882_v49  ;;  %v8249_v36 = vmax.f32 %v4722_v47, %v4723_v32  ;;  %v3889_v15 = vrot.slane %v3888_v8, 1  ;;  %vm9557_vm15 = vmmov %vm9512_vm1 }
 0x226   : > { %v3896_v62 = vrot.slane %v3895_v48, 1  ;;  %v3104_v0 = vcombine.high %v8219_v34, %v8219_v34  ;;  %v3901_v11 = vrot.slane %v3900_v52, 2  ;;  %v8256_v37 = vunpack.c.l.b16 %v5559_v2 }
 0x227   : > { %v3890_v44 = vmax.f32 %v3888_v8, %v3889_v15  ;;  %v8261_v26 = vunpack.c.l.b16 %v5584_v33  ;;  %v8264_v30 = vsel %vm9551_vm5, %v3883_v9, -inf  ;;  %v3111_v4 = vrot.slane %v8219_v34, %v8065_v18  ;;  %vm9558_vm5 = vmmov %vm9512_vm1 }
 0x228   : > { %v3897_v58 = vmax.f32 %v3895_v48, %v3896_v62  ;;  %v3902_v32 = vmax.f32 %v3900_v52, %v3901_v11  ;;  %v5591_v57 = vpack.c.bf16 %v8249_v36, %v8249_v36  ;;  %v3118_v61 = vrot.slane %v3104_v0, %v8065_v18 }
 0x229   : > { %v8273_v2 = vsel %vm9552_vm2, %v3890_v44, -inf  ;;  %v3119_v24 = vcombine.high %v3111_v4, %v3111_v4  ;;  %v3821_v17 = vsel %vm3708_vm0, %v3111_v4, -inf  ;;  %v2825_v34 = vadd.f32 %v8183_v50, %v8058_v22  ;;  %vm9559_vm2 = vmmov %vm9512_vm1 }
 0x22a   : > { %v8268_v56 = vpop.f32.mrb[4].mxu1  ;;  %v8276_v19 = vsel %vm9553_vm9, %v3897_v58, -inf  ;;  %v3903_v59 = vrot.slane %v3902_v32, 1  ;;  %v3120_v63 = vcombine.high %v3118_v61, %v3118_v61  ;;  %v3822_v25 = vrot.slane %v3821_v17, 4  ;;  %vm9560_vm9 = vmmov %vm9512_vm1 }
 0x22b   : > { %v8279_v33 = vpop.f32.mrb[5].mxu1  ;;  %v3835_v53 = vsel %vm3708_vm0, %v3118_v61, -inf  ;;  %v2817_v12 = vadd.f32 %v8058_v22, %v8185_v5  ;;  %v3828_v29 = vsel %vm3708_vm0, %v3119_v24, -inf  ;;  %v2931_v46 = vmax.f32 %v2825_v34, 0.0 }
 0x22c   : > { %v8284_v23 = vpop.f32.mrb[6].mxu1  ;;  %v3904_v38 = vmax.f32 %v3902_v32, %v3903_v59  ;;  %v3836_v40 = vrot.slane %v3835_v53, 4  ;;  %v3823_v55 = vmax.f32 %v3821_v17, %v3822_v25  ;;  %v3829_v50 = vrot.slane %v3828_v29, 4 }
 0x22d   : > { %v8289_v6 = vpop.f32.mrb[7].mxu1  ;;  %v3842_v39 = vsel %vm3708_vm0, %v3120_v63, -inf  ;;  %v8293_v13 = vmax.f32 %v2817_v12, 0.0  ;;  %2963 = vst.msk [vmem:[%s8070_s30 + $0x38] sm:$0xff] %vm9555_vm12, %v2931_v46  ;;  %v3155_v22 = vcombine.high %v2931_v46, %v2931_v46  ;;  %v3162_v43 = vrot.slane %v2931_v46, %v8065_v18 }
 0x22e   : > { %v4639_v31 = vsel %vm9554_vm3, %v3904_v38, -inf  ;;  %v3837_v45 = vmax.f32 %v3835_v53, %v3836_v40  ;;  %v3843_v10 = vrot.slane %v3842_v39, 4  ;;  %v3824_v5 = vrot.slane %v3823_v55, 2  ;;  %vm9561_vm3 = vmmov %vm9512_vm1 }
 0x22f   : > { %v3830_v3 = vmax.f32 %v3828_v29, %v3829_v50  ;;  %2961 = vst.msk [vmem:[%s8070_s30 + $0x28] sm:$0xff] %vm9512_vm1, %v8293_v13  ;;  %v3121_v60 = vcombine.high %v8293_v13, %v8293_v13  ;;  %v3169_v51 = vrot.slane %v3155_v22, %v8065_v18  ;;  %v8307_v21 = vrot.slane %v8293_v13, %v8065_v18 }
 0x230   : > { %v3838_v14 = vrot.slane %v3837_v45, 2  ;;  %v3844_v52 = vmax.f32 %v3842_v39, %v3843_v10  ;;  %v3825_v49 = vmax.f32 %v3823_v55, %v3824_v5  ;;  %v3170_v20 = vcombine.high %v3162_v43, %v3162_v43 }
 0x231   : > { %v3831_v8 = vrot.slane %v3830_v3, 2  ;;  %v3905_v35 = vsel %vm3708_vm0, %v3162_v43, -inf  ;;  %v3171_v9 = vcombine.high %v3169_v51, %v3169_v51  ;;  %vm5129_vm10 = vcmask 1041409  }
 0x232   : > { %v3839_v48 = vmax.f32 %v3837_v45, %v3838_v14  ;;  %v3845_v47 = vrot.slane %v3844_v52, 2  ;;  %v3906_v15 = vrot.slane %v3905_v35, 4  ;;  %v3826_v62 = vrot.slane %v3825_v49, 1 }
 0x233   : > { %v3832_v0 = vmax.f32 %v3830_v3, %v3831_v8  ;;  %v3912_v11 = vsel %vm3708_vm0, %v3170_v20, -inf  ;;  %v3919_v44 = vsel %vm3708_vm0, %v3169_v51, -inf  ;;  %v3926_v34 = vsel %vm3708_vm0, %v3171_v9, -inf }
 0x234   : > { %v3840_v58 = vrot.slane %v3839_v48, 1  ;;  %v3846_v32 = vmax.f32 %v3844_v52, %v3845_v47  ;;  %v3907_v4 = vmax.f32 %v3905_v35, %v3906_v15  ;;  %v3913_v61 = vrot.slane %v3912_v11, 4 }
 0x235   : > { %v3827_v59 = vmax.f32 %v3825_v49, %v3826_v62  ;;  %v3833_v24 = vrot.slane %v3832_v0, 1  ;;  %v3920_v17 = vrot.slane %v3919_v44, 4  ;;  %v3927_v46 = vrot.slane %v3926_v34, 4 }
 0x236   : > { %v3841_v63 = vmax.f32 %v3839_v48, %v3840_v58  ;;  %v3847_v25 = vrot.slane %v3846_v32, 1  ;;  %v3908_v53 = vrot.slane %v3907_v4, 2  ;;  %v3914_v12 = vmax.f32 %v3912_v11, %v3913_v61 }
 0x237   : > { %v3834_v38 = vmax.f32 %v3832_v0, %v3833_v24  ;;  %v4629_v29 = vsel %vm9556_vm11, %v3827_v59, -inf  ;;  %v3921_v40 = vmax.f32 %v3919_v44, %v3920_v17  ;;  %v3928_v9 = vmax.f32 %v3926_v34, %v3927_v46  ;;  %vm9563_vm11 = vmmov %vm9512_vm1 }
 0x238   : > { %v3848_v55 = vmax.f32 %v3846_v32, %v3847_v25  ;;  %v4631_v50 = vmax.f32 %v4629_v29, %v8264_v30  ;;  %v4635_v39 = vsel %vm9557_vm15, %v3841_v63, -inf  ;;  %v3909_v45 = vmax.f32 %v3907_v4, %v3908_v53  ;;  %vm9564_vm15 = vmmov %vm9512_vm1 }
 0x239   : > { %v4632_v10 = vsel %vm9558_vm5, %v3834_v38, -inf  ;;  %v4637_v22 = vmax.f32 %v4635_v39, %v8276_v19  ;;  %v3915_v5 = vrot.slane %v3914_v12, 2  ;;  %v3922_v3 = vrot.slane %v3921_v40, 2  ;;  %vm9565_vm5 = vmmov %vm9512_vm1 }
 0x23a   : > { %v4634_v43 = vmax.f32 %v4632_v10, %v8273_v2  ;;  %v4638_v14 = vsel %vm9559_vm2, %v3848_v55, -inf  ;;  %v5560_v52 = vpack.c.bf16 %v4631_v50, %v4631_v50  ;;  %v3910_v51 = vrot.slane %v3909_v45, 1  ;;  %vm9566_vm2 = vmmov %vm9512_vm1 }
 0x23b   : > { %v4640_v49 = vmax.f32 %v4638_v14, %v4639_v31  ;;  %v5562_v8 = vpack.c.bf16 %v4637_v22, %v4637_v22  ;;  %v3916_v20 = vmax.f32 %v3914_v12, %v3915_v5  ;;  %v3923_v35 = vmax.f32 %v3921_v40, %v3922_v3  ;;  %v8360_v22 = vld [vmem:[%s9035_s2] ss:$0 sm:$0xff] }
 0x23c   : > { %v5561_v30 = vpack.c.bf16 %v4634_v43, %v4634_v43  ;;  %v5061_v48 = vunpack.c.l.b16 %v5560_v52  ;;  %v3911_v47 = vmax.f32 %v3909_v45, %v3910_v51  ;;  %v8323_v2 = vunpack.c.l.b16 %v5591_v57 }
 0x23d   : > { %v5563_v15 = vpack.c.bf16 %v4640_v49, %v4640_v49  ;;  %v5063_v62 = vunpack.c.l.b16 %v5562_v8  ;;  %v3917_v0 = vrot.slane %v3916_v20, 1  ;;  %v3924_v19 = vrot.slane %v3923_v35, 1 }
 0x23e   : > { %v5062_v11 = vunpack.c.l.b16 %v5561_v30  ;;  %v5130_v31 = vsel %vm5129_vm10, %v5061_v48, %v8256_v37  ;;  %v3929_v44 = vrot.slane %v3928_v9, 2  ;;  %v8328_v4 = vsel %vm9560_vm9, %v3911_v47, -inf  ;;  %vm9567_vm9 = vmmov %vm9512_vm1 }
 0x23f   : > { %v5064_v58 = vunpack.c.l.b16 %v5563_v15  ;;  %v3918_v32 = vmax.f32 %v3916_v20, %v3917_v0  ;;  %v3135_v61 = vrot.slane %v3121_v60, %v8065_v18  ;;  %v3136_v57 = vcombine.high %v8307_v21, %v8307_v21 }
 0x240   : > { %v5131_v59 = vsel %vm5117_vm7, %v5062_v11, %v5130_v31  ;;  %v3930_v36 = vmax.f32 %v3928_v9, %v3929_v44  ;;  %v3849_v37 = vsel %vm3708_vm0, %v8307_v21, -inf  ;;  %v3925_v34 = vmax.f32 %v3923_v35, %v3924_v19 }
 0x241   : > { %v5132_v17 = vsel %vm5119_vm8, %v5063_v62, %v5131_v59  ;;  %v8343_v63 = vsel %vm9561_vm3, %v3918_v32, -inf  ;;  %v3137_v25 = vcombine.high %v3135_v61, %v3135_v61  ;;  %v3850_v53 = vrot.slane %v3849_v37, 4  ;;  %vm9568_vm3 = vmmov %vm9512_vm1 }
 0x242   : > { %v8339_v24 = vpop.f32.mrb[8].mxu0  ;;  %v3931_v60 = vrot.slane %v3930_v36, 1  ;;  %v3856_v12 = vsel %vm3708_vm0, %v3136_v57, -inf  ;;  %v3863_v38 = vsel %vm3708_vm0, %v3135_v61, -inf  ;;  %vm9562_vm12 = vcmask 1044484  }
 0x243   : > { %v8345_v13 = vpop.f32.mrb[9].mxu0  ;;  %v3857_v21 = vrot.slane %v3856_v12, 4  ;;  %v3864_v40 = vrot.slane %v3863_v38, 4  ;;  %v3870_v46 = vsel %vm3708_vm0, %v3137_v25, -inf  ;;  %v8353_v55 = vsel %vm9562_vm12, %v5064_v58, %v5132_v17  ;;  %vm9569_vm12 = vmmov %vm9512_vm1 }
 0x244   : > { %v8349_v29 = vpop.f32.mrb[10].mxu0  ;;  %v3932_v39 = vmax.f32 %v3930_v36, %v3931_v60  ;;  %v3851_v45 = vmax.f32 %v3849_v37, %v3850_v53  ;;  %v3871_v10 = vrot.slane %v3870_v46, 4  ;;  %v2886_v5 = vadd.f32 %v8360_v22, %v8268_v56 }
 0x245   : > { %v8355_v50 = vpop.f32.mrb[11].mxu0  ;;  %v3858_v3 = vmax.f32 %v3856_v12, %v3857_v21  ;;  %v3865_v43 = vmax.f32 %v3863_v38, %v3864_v40  ;;  %v2878_v14 = vadd.f32 %v8360_v22, %v8279_v33  ;;  %v2889_v52 = vadd.f32 %v8360_v22, %v8284_v23 }
 0x246   : > { %v4648_v51 = vsel %vm9512_vm1, %v3925_v34, -inf  ;;  %v3852_v49 = vrot.slane %v3851_v45, 2  ;;  %v3872_v8 = vmax.f32 %v3870_v46, %v3871_v10  ;;  %v2946_v20 = vmax.f32 %v2886_v5, 0.0 }
 0x247   : > { %v3859_v35 = vrot.slane %v3858_v3, 2  ;;  %v3866_v30 = vrot.slane %v3865_v43, 2  ;;  %v2944_v48 = vmax.f32 %v2878_v14, 0.0  ;;  %v8369_v47 = vmax.f32 %v2889_v52, 0.0 }
 0x248   : > { %v3853_v56 = vmax.f32 %v3851_v45, %v3852_v49  ;;  %v3873_v9 = vrot.slane %v3872_v8, 2  ;;  %2978 = vst.msk [vmem:[%s8070_s30 + $0xb0] sm:$0xff] %vm9563_vm11, %v2946_v20  ;;  %v3410_v33 = vcombine.high %v2946_v20, %v2946_v20  ;;  %v3417_v15 = vrot.slane %v2946_v20, %v8065_v18  ;;  %vm9570_vm11 = vmmov %vm9512_vm1 }
 0x249   : > { %v4651_v23 = vsel %vm9564_vm15, %v3932_v39, -inf  ;;  %v3860_v62 = vmax.f32 %v3858_v3, %v3859_v35  ;;  %v3867_v0 = vmax.f32 %v3865_v43, %v3866_v30  ;;  %2976 = vst.msk [vmem:[%s8070_s30 + $0xa0] sm:$0xff] %vm9565_vm5, %v2944_v48  ;;  %v3376_v19 = vcombine.high %v2944_v48, %v2944_v48  ;;  %vm9571_vm15 = vmmov %vm9512_vm1 }
 0x24a   : > { %2979 = vst.msk [vmem:[%s8070_s30 + $0xb8] sm:$0xff] %vm9566_vm2, %v8369_v47  ;;  %v3854_v11 = vrot.slane %v3853_v56, 1  ;;  %v3874_v31 = vmax.f32 %v3872_v8, %v3873_v9  ;;  %v3424_v44 = vrot.slane %v3410_v33, %v8065_v18  ;;  %v3425_v58 = vcombine.high %v3417_v15, %v3417_v15  ;;  %vm9572_vm5 = vmmov %vm9512_vm1 }
 0x24b   : > { %v3861_v32 = vrot.slane %v3860_v62, 1  ;;  %v3868_v61 = vrot.slane %v3867_v0, 1  ;;  %v4325_v59 = vsel %vm3708_vm0, %v3417_v15, -inf  ;;  %v3383_v36 = vrot.slane %v2944_v48, %v8065_v18  ;;  %vm9573_vm2 = vmmov %vm9512_vm1 }
 0x24c   : > { %v3855_v57 = vmax.f32 %v3853_v56, %v3854_v11  ;;  %v3875_v37 = vrot.slane %v3874_v31, 1  ;;  %v3426_v17 = vcombine.high %v3424_v44, %v3424_v44  ;;  %v4326_v34 = vrot.slane %v4325_v59, 4 }
 0x24d   : > { %v3862_v25 = vmax.f32 %v3860_v62, %v3861_v32  ;;  %v3869_v60 = vmax.f32 %v3867_v0, %v3868_v61  ;;  %v4332_v53 = vsel %vm3708_vm0, %v3425_v58, -inf  ;;  %v4339_v12 = vsel %vm3708_vm0, %v3424_v44, -inf }
 0x24e   : > { %v3876_v38 = vmax.f32 %v3874_v31, %v3875_v37  ;;  %v4641_v21 = vsel %vm9567_vm9, %v3855_v57, -inf  ;;  %v4327_v40 = vmax.f32 %v4325_v59, %v4326_v34  ;;  %v4333_v46 = vrot.slane %v4332_v53, 4  ;;  %vm9574_vm9 = vmmov %vm9512_vm1 }
 0x24f   : > { %v4643_v39 = vmax.f32 %v4641_v21, %v8328_v4  ;;  %v4644_v45 = vsel %vm9568_vm3, %v3862_v25, -inf  ;;  %v4647_v10 = vsel %vm9569_vm12, %v3869_v60, -inf  ;;  %v4340_v5 = vrot.slane %v4339_v12, 4  ;;  %vm9575_vm3 = vmmov %vm9512_vm1 }
 0x250   : > { %v4646_v3 = vmax.f32 %v4644_v45, %v8343_v63  ;;  %v4649_v43 = vmax.f32 %v4647_v10, %v4648_v51  ;;  %v4650_v14 = vsel %vm9512_vm1, %v3876_v38, -inf  ;;  %v4328_v52 = vrot.slane %v4327_v40, 2  ;;  %vm9576_vm12 = vmmov %vm9512_vm1 }
 0x251   : > { %v8391_v49 = vmax.f32 %v4650_v14, %v4651_v23  ;;  %v5564_v8 = vpack.c.bf16 %v4643_v39, %v4643_v39  ;;  %v4334_v20 = vmax.f32 %v4332_v53, %v4333_v46  ;;  %v4341_v35 = vmax.f32 %v4339_v12, %v4340_v5 }
 0x252   : > { %v5565_v30 = vpack.c.bf16 %v4646_v3, %v4646_v3  ;;  %v5566_v48 = vpack.c.bf16 %v4649_v43, %v4649_v43  ;;  %v4329_v56 = vmax.f32 %v4327_v40, %v4328_v52  ;;  %v4346_v4 = vsel %vm3708_vm0, %v3426_v17, -inf }
 0x253   : > { %v5065_v9 = vunpack.c.l.b16 %v5564_v8  ;;  %v4335_v33 = vrot.slane %v4334_v20, 2  ;;  %v4342_v15 = vrot.slane %v4341_v35, 2  ;;  %v3390_v62 = vrot.slane %v3376_v19, %v8065_v18 }
 0x254   : > { %v5567_v63 = vpack.c.bf16 %v8391_v49, %v8391_v49  ;;  %v5066_v51 = vunpack.c.l.b16 %v5565_v30  ;;  %v4330_v0 = vrot.slane %v4329_v56, 1  ;;  %v4347_v23 = vrot.slane %v4346_v4, 4 }
 0x255   : > { %v5067_v11 = vunpack.c.l.b16 %v5566_v48  ;;  %v5134_v31 = vsel %vm5123_vm4, %v5065_v9, %v8353_v55  ;;  %v4336_v44 = vmax.f32 %v4334_v20, %v4335_v33  ;;  %v4343_v58 = vmax.f32 %v4341_v35, %v4342_v15 }
 0x256   : > { %v5135_v32 = vsel %vm5125_vm6, %v5066_v51, %v5134_v31  ;;  %v4331_v61 = vmax.f32 %v4329_v56, %v4330_v0  ;;  %v4348_v59 = vmax.f32 %v4346_v4, %v4347_v23  ;;  %v3391_v57 = vcombine.high %v3383_v36, %v3383_v36 }
 0x257   : > { %v5136_v19 = vsel %vm5127_vm14, %v5067_v11, %v5135_v32  ;;  %v4337_v37 = vrot.slane %v4336_v44, 1  ;;  %v4344_v17 = vrot.slane %v4343_v58, 1  ;;  %v3392_v34 = vcombine.high %v3390_v62, %v3390_v62 }
 0x258   : > { %v5180_v25 = vpack.c.b16 %v5136_v19, %v5136_v19  ;;  %v4349_v60 = vrot.slane %v4348_v59, 2  ;;  %v4726_v53 = vsel %vm9570_vm11, %v4331_v61, -inf  ;;  %v4269_v12 = vsel %vm3708_vm0, %v3383_v36, -inf  ;;  %vm9577_vm11 = vmmov %vm9512_vm1 }
 0x259   : > { %v4338_v55 = vmax.f32 %v4336_v44, %v4337_v37  ;;  %v4345_v38 = vmax.f32 %v4343_v58, %v4344_v17  ;;  %v4270_v21 = vrot.slane %v4269_v12, 4  ;;  %v4276_v40 = vsel %vm3708_vm0, %v3391_v57, -inf }
 0x25a   : > { %5200 = vst.msk [vmem:[%s7993_s22 + $0x8] sm:$0xf] %vm2988_vm13, %v5180_v25  ;;  %v4350_v46 = vmax.f32 %v4348_v59, %v4349_v60  ;;  %v4277_v39 = vrot.slane %v4276_v40, 4  ;;  %v4283_v45 = vsel %vm3708_vm0, %v3390_v62, -inf  ;;  %v4290_v10 = vsel %vm3708_vm0, %v3392_v34, -inf }
 0x25b   : > { %v4729_v5 = vsel %vm9571_vm15, %v4338_v55, -inf  ;;  %v4732_v3 = vsel %vm9572_vm5, %v4345_v38, -inf  ;;  %v4271_v43 = vmax.f32 %v4269_v12, %v4270_v21  ;;  %v4284_v14 = vrot.slane %v4283_v45, 4  ;;  %vm9579_vm5 = vmmov %vm9512_vm1 }
 0x25c   : > { %v4351_v36 = vrot.slane %v4350_v46, 1  ;;  %v4278_v52 = vmax.f32 %v4276_v40, %v4277_v39  ;;  %v4291_v8 = vrot.slane %v4290_v10, 4  ;;  %v3427_v20 = vcombine.high %v8369_v47, %v8369_v47 }
 0x25d   : > { %v4272_v35 = vrot.slane %v4271_v43, 2  ;;  %v4285_v30 = vmax.f32 %v4283_v45, %v4284_v14  ;;  %v3434_v48 = vrot.slane %v8369_v47, %v8065_v18  ;;  %v8416_v56 = vadd.f32 %v8360_v22, %v8289_v6 }
 0x25e   : > { %v4352_v4 = vmax.f32 %v4350_v46, %v4351_v36  ;;  %v4279_v9 = vrot.slane %v4278_v52, 2  ;;  %v4292_v33 = vmax.f32 %v4290_v10, %v4291_v8  ;;  %v3441_v15 = vrot.slane %v3427_v20, %v8065_v18 }
 0x25f   : > { %v4273_v62 = vmax.f32 %v4271_v43, %v4272_v35  ;;  %v4286_v51 = vrot.slane %v4285_v30, 2  ;;  %v3442_v0 = vcombine.high %v3434_v48, %v3434_v48  ;;  %v4353_v23 = vsel %vm3708_vm0, %v3434_v48, -inf }
 0x260   : > { %v4735_v11 = vsel %vm9573_vm2, %v4352_v4, -inf  ;;  %v4280_v31 = vmax.f32 %v4278_v52, %v4279_v9  ;;  %v4293_v44 = vrot.slane %v4292_v33, 2  ;;  %v3443_v58 = vcombine.high %v3441_v15, %v3441_v15  ;;  %vm9580_vm2 = vmmov %vm9512_vm1 }
 0x261   : > { %v4274_v47 = vrot.slane %v4273_v62, 1  ;;  %v4287_v32 = vmax.f32 %v4285_v30, %v4286_v51  ;;  %v4354_v61 = vrot.slane %v4353_v23, 4  ;;  %v4360_v6 = vsel %vm3708_vm0, %v3442_v0, -inf }
 0x262   : > { %v4281_v59 = vrot.slane %v4280_v31, 1  ;;  %v4294_v57 = vmax.f32 %v4292_v33, %v4293_v44  ;;  %v4361_v19 = vrot.slane %v4360_v6, 4  ;;  %v4367_v37 = vsel %vm3708_vm0, %v3441_v15, -inf }
 0x263   : > { %v4275_v17 = vmax.f32 %v4273_v62, %v4274_v47  ;;  %v4288_v34 = vrot.slane %v4287_v32, 1  ;;  %v4355_v25 = vmax.f32 %v4353_v23, %v4354_v61  ;;  %v4368_v60 = vrot.slane %v4367_v37, 4 }
 0x264   : > { %v4282_v12 = vmax.f32 %v4280_v31, %v4281_v59  ;;  %v4295_v55 = vrot.slane %v4294_v57, 1  ;;  %v4362_v38 = vmax.f32 %v4360_v6, %v4361_v19  ;;  %v4374_v21 = vsel %vm3708_vm0, %v3443_v58, -inf }
 0x265   : > { %v4289_v40 = vmax.f32 %v4287_v32, %v4288_v34  ;;  %v4725_v46 = vsel %vm9574_vm9, %v4275_v17, -inf  ;;  %v4356_v39 = vrot.slane %v4355_v25, 2  ;;  %v4369_v45 = vmax.f32 %v4367_v37, %v4368_v60  ;;  %vm9581_vm9 = vmmov %vm9512_vm1 }
 0x266   : > { %v4296_v10 = vmax.f32 %v4294_v57, %v4295_v55  ;;  %v4727_v43 = vmax.f32 %v4725_v46, %v4726_v53  ;;  %v4728_v14 = vsel %vm9575_vm3, %v4282_v12, -inf  ;;  %v4363_v36 = vrot.slane %v4362_v38, 2  ;;  %vm9582_vm3 = vmmov %vm9512_vm1 }
 0x267   : > { %v4730_v52 = vmax.f32 %v4728_v14, %v4729_v5  ;;  %v4731_v8 = vsel %vm9576_vm12, %v4289_v40, -inf  ;;  %v4357_v20 = vmax.f32 %v4355_v25, %v4356_v39  ;;  %v4370_v35 = vrot.slane %v4369_v45, 2  ;;  %vm9583_vm12 = vmmov %vm9512_vm1 }
 0x268   : > { %v4733_v30 = vmax.f32 %v4731_v8, %v4732_v3  ;;  %v4734_v48 = vsel %vm9512_vm1, %v4296_v10, -inf  ;;  %v5592_v4 = vpack.c.bf16 %v4727_v43, %v4727_v43  ;;  %v4364_v9 = vmax.f32 %v4362_v38, %v4363_v36 }
 0x269   : > { %v4736_v15 = vmax.f32 %v4734_v48, %v4735_v11  ;;  %v5593_v62 = vpack.c.bf16 %v4730_v52, %v4730_v52  ;;  %v4358_v51 = vrot.slane %v4357_v20, 1  ;;  %v4371_v0 = vmax.f32 %v4369_v45, %v4370_v35 }
 0x26a   : > { %v8428_v33 = vpop.f32.mrb[8].mxu1  ;;  %v5594_v23 = vpack.c.bf16 %v4733_v30, %v4733_v30  ;;  %v5093_v31 = vunpack.c.l.b16 %v5592_v4  ;;  %v4365_v5 = vrot.slane %v4364_v9, 1  ;;  %v4375_v44 = vrot.slane %v4374_v21, 4 }
 0x26b   : > { %v8430_v53 = vpop.f32.mrb[9].mxu1  ;;  %v5595_v47 = vpack.c.bf16 %v4736_v15, %v4736_v15  ;;  %v5094_v3 = vunpack.c.l.b16 %v5593_v62  ;;  %v4359_v32 = vmax.f32 %v4357_v20, %v4358_v51  ;;  %v4372_v61 = vrot.slane %v4371_v0, 1 }
 0x26c   : > { %v8432_v58 = vpop.f32.mrb[10].mxu1  ;;  %v5095_v59 = vunpack.c.l.b16 %v5594_v23  ;;  %v5158_v11 = vsel %vm5129_vm10, %v5093_v31, %v8323_v2  ;;  %v4366_v57 = vmax.f32 %v4364_v9, %v4365_v5  ;;  %v4376_v19 = vmax.f32 %v4374_v21, %v4375_v44 }
 0x26d   : > { %v8434_v6 = vpop.f32.mrb[11].mxu1  ;;  %v5585_v37 = vpack.c.bf16 %v8200_v28, %v8200_v28  ;;  %v5096_v17 = vunpack.c.l.b16 %v5595_v47  ;;  %v5159_v34 = vsel %vm5117_vm7, %v5094_v3, %v5158_v11  ;;  %v4373_v25 = vmax.f32 %v4371_v0, %v4372_v61 }
 0x26e   : > { %v8444_v60 = vunpack.c.l.b16 %v5567_v63  ;;  %v5160_v12 = vsel %vm5119_vm8, %v5095_v59, %v5159_v34  ;;  %v4377_v55 = vrot.slane %v4376_v19, 2  ;;  %v2945_v2 = vmax.f32 %v8416_v56, 0.0 }
 0x26f   : > { %v8449_v38 = vsel %vm9577_vm11, %v4359_v32, -inf  ;;  %vm9578_vm15 = vcmask 1044484   ;;  %v2838_v40 = vadd.f32 %v8360_v22, %v8339_v24  ;;  %v2830_v49 = vadd.f32 %v8360_v22, %v8345_v13  ;;  %vm9584_vm11 = vmmov %vm9512_vm1 }
 0x270   : > { %v8452_v21 = vsel %vm9578_vm15, %v5096_v17, %v5160_v12  ;;  %v4378_v63 = vmax.f32 %v4376_v19, %v4377_v55  ;;  %v8459_v46 = vsel %vm9579_vm5, %v4366_v57, -inf  ;;  %2977 = vst.msk [vmem:[%s8070_s30 + $0xa8] sm:$0xff] %vm9580_vm2, %v2945_v2  ;;  %v3393_v56 = vcombine.high %v2945_v2, %v2945_v2  ;;  %vm9585_vm15 = vmmov %vm9512_vm1 }
 0x271   : > { %v3400_v39 = vrot.slane %v2945_v2, %v8065_v18  ;;  %v8465_v45 = vsel %vm9581_vm9, %v4373_v25, -inf  ;;  %v2934_v10 = vmax.f32 %v2838_v40, 0.0  ;;  %v8467_v43 = vmax.f32 %v2830_v49, 0.0  ;;  %vm9586_vm5 = vmmov %vm9512_vm1 }
 0x272   : > { %v8471_v24 = vadd.f32 %v8360_v22, %v8349_v29  ;;  %v4379_v13 = vrot.slane %v4378_v63, 1  ;;  %v3407_v14 = vrot.slane %v3393_v56, %v8065_v18  ;;  %vm9587_vm2 = vmmov %vm9512_vm1 }
 0x273   : > { %v3408_v36 = vcombine.high %v3400_v39, %v3400_v39  ;;  %v4297_v52 = vsel %vm3708_vm0, %v3400_v39, -inf  ;;  %2966 = vst.msk [vmem:[%s8070_s30 + $0x50] sm:$0xff] %vm9582_vm3, %v2934_v10  ;;  %v3206_v20 = vcombine.high %v2934_v10, %v2934_v10  ;;  %v3213_v35 = vrot.slane %v2934_v10, %v8065_v18  ;;  %vm9588_vm9 = vmmov %vm9512_vm1 }
 0x274   : > { %v4298_v8 = vrot.slane %v4297_v52, 4  ;;  %2964 = vst.msk [vmem:[%s8070_s30 + $0x40] sm:$0xff] %vm9583_vm12, %v8467_v43  ;;  %v3172_v30 = vcombine.high %v8467_v43, %v8467_v43  ;;  %v4380_v29 = vmax.f32 %v4378_v63, %v4379_v13  ;;  %v3409_v48 = vcombine.high %v3407_v14, %v3407_v14  ;;  %vm9589_vm3 = vmmov %vm9512_vm1 }
 0x275   : > { %v4304_v4 = vsel %vm3708_vm0, %v3408_v36, -inf  ;;  %v4311_v9 = vsel %vm3708_vm0, %v3407_v14, -inf  ;;  %v3220_v0 = vrot.slane %v3206_v20, %v8065_v18  ;;  %v3221_v5 = vcombine.high %v3213_v35, %v3213_v35  ;;  %vm9590_vm12 = vmmov %vm9512_vm1 }
 0x276   : > { %v4299_v15 = vmax.f32 %v4297_v52, %v4298_v8  ;;  %v4305_v62 = vrot.slane %v4304_v4, 4  ;;  %v4312_v51 = vrot.slane %v4311_v9, 4  ;;  %v4747_v23 = vsel %vm9512_vm1, %v4380_v29, -inf }
 0x277   : > { %v4318_v31 = vsel %vm3708_vm0, %v3409_v48, -inf  ;;  %v3989_v44 = vsel %vm3708_vm0, %v3213_v35, -inf  ;;  %v3222_v59 = vcombine.high %v3220_v0, %v3220_v0  ;;  %v3996_v57 = vsel %vm3708_vm0, %v3221_v5, -inf }
 0x278   : > { %v4300_v47 = vrot.slane %v4299_v15, 2  ;;  %v4306_v3 = vmax.f32 %v4304_v4, %v4305_v62  ;;  %v4313_v32 = vmax.f32 %v4311_v9, %v4312_v51  ;;  %v4319_v61 = vrot.slane %v4318_v31, 4 }
 0x279   : > { %v3990_v11 = vrot.slane %v3989_v44, 4  ;;  %v4003_v19 = vsel %vm3708_vm0, %v3220_v0, -inf  ;;  %v3997_v2 = vrot.slane %v3996_v57, 4  ;;  %v4010_v49 = vsel %vm3708_vm0, %v3222_v59, -inf }
 0x27a   : > { %v4301_v17 = vmax.f32 %v4299_v15, %v4300_v47  ;;  %v4307_v34 = vrot.slane %v4306_v3, 2  ;;  %v4314_v25 = vrot.slane %v4313_v32, 2  ;;  %v4320_v12 = vmax.f32 %v4318_v31, %v4319_v61 }
 0x27b   : > { %v3991_v55 = vmax.f32 %v3989_v44, %v3990_v11  ;;  %v4004_v40 = vrot.slane %v4003_v19, 4  ;;  %v3998_v14 = vmax.f32 %v3996_v57, %v3997_v2  ;;  %v4011_v52 = vrot.slane %v4010_v49, 4 }
 0x27c   : > { %v4302_v63 = vrot.slane %v4301_v17, 1  ;;  %v4308_v56 = vmax.f32 %v4306_v3, %v4307_v34  ;;  %v4315_v39 = vmax.f32 %v4313_v32, %v4314_v25  ;;  %v4321_v10 = vrot.slane %v4320_v12, 2 }
 0x27d   : > { %v3992_v13 = vrot.slane %v3991_v55, 2  ;;  %v4005_v36 = vmax.f32 %v4003_v19, %v4004_v40  ;;  %v3999_v4 = vrot.slane %v3998_v14, 2  ;;  %v4012_v15 = vmax.f32 %v4010_v49, %v4011_v52 }
 0x27e   : > { %v4303_v8 = vmax.f32 %v4301_v17, %v4302_v63  ;;  %v4309_v20 = vrot.slane %v4308_v56, 1  ;;  %v4316_v35 = vrot.slane %v4315_v39, 1  ;;  %v4322_v29 = vmax.f32 %v4320_v12, %v4321_v10 }
 0x27f   : > { %v3993_v48 = vmax.f32 %v3991_v55, %v3992_v13  ;;  %v4006_v9 = vrot.slane %v4005_v36, 2  ;;  %v4000_v47 = vmax.f32 %v3998_v14, %v3999_v4  ;;  %v4013_v11 = vrot.slane %v4012_v15, 2 }
 0x280   : > { %v4310_v62 = vmax.f32 %v4308_v56, %v4309_v20  ;;  %v4317_v51 = vmax.f32 %v4315_v39, %v4316_v35  ;;  %v4323_v0 = vrot.slane %v4322_v29, 1  ;;  %v4737_v31 = vsel %vm9584_vm11, %v4303_v8, -inf  ;;  %vm9591_vm11 = vmmov %vm9512_vm1 }
 0x281   : > { %v4739_v5 = vmax.f32 %v4737_v31, %v8449_v38  ;;  %v3994_v44 = vrot.slane %v3993_v48, 1  ;;  %v4007_v3 = vmax.f32 %v4005_v36, %v4006_v9  ;;  %v4001_v55 = vrot.slane %v4000_v47, 1 }
 0x282   : > { %v4324_v32 = vmax.f32 %v4322_v29, %v4323_v0  ;;  %v4740_v61 = vsel %vm9585_vm15, %v4310_v62, -inf  ;;  %v4743_v59 = vsel %vm9586_vm5, %v4317_v51, -inf  ;;  %v4014_v40 = vmax.f32 %v4012_v15, %v4013_v11  ;;  %vm9592_vm15 = vmmov %vm9512_vm1 }
 0x283   : > { %v8496_v57 = vpop.f32.mrb[12].mxu0  ;;  %v4742_v19 = vmax.f32 %v4740_v61, %v8459_v46  ;;  %v4745_v17 = vmax.f32 %v4743_v59, %v8465_v45  ;;  %v5596_v34 = vpack.c.bf16 %v4739_v5, %v4739_v5  ;;  %v3995_v25 = vmax.f32 %v3993_v48, %v3994_v44  ;;  %vm9593_vm5 = vmmov %vm9512_vm1 }
 0x284   : > { %v8500_v12 = vpop.f32.mrb[13].mxu0  ;;  %v4746_v38 = vsel %vm9587_vm2, %v4324_v32, -inf  ;;  %v4008_v2 = vrot.slane %v4007_v3, 1  ;;  %v4002_v46 = vmax.f32 %v4000_v47, %v4001_v55  ;;  %v4015_v14 = vrot.slane %v4014_v40, 1  ;;  %vm9594_vm2 = vmmov %vm9512_vm1 }
 0x285   : > { %v8503_v49 = vpop.f32.mrb[14].mxu0  ;;  %v8505_v63 = vmax.f32 %v4746_v38, %v4747_v23  ;;  %v5597_v56 = vpack.c.bf16 %v4742_v19, %v4742_v19  ;;  %v5598_v39 = vpack.c.bf16 %v4745_v17, %v4745_v17  ;;  %v5097_v10 = vunpack.c.l.b16 %v5596_v34 }
 0x286   : > { %v8507_v13 = vpop.f32.mrb[15].mxu0  ;;  %v4009_v45 = vmax.f32 %v4007_v3, %v4008_v2  ;;  %v2833_v36 = vadd.f32 %v8360_v22, %v8355_v50  ;;  %v8514_v20 = vsel %vm9588_vm9, %v3995_v25, -inf  ;;  %v8518_v23 = vadd.f32 %v8360_v22, %v8428_v33  ;;  %vm9595_vm9 = vmmov %vm9512_vm1 }
 0x287   : > { %v5098_v52 = vunpack.c.l.b16 %v5597_v56  ;;  %v5162_v8 = vsel %vm5123_vm4, %v5097_v10, %v8452_v21  ;;  %v5099_v35 = vunpack.c.l.b16 %v5598_v39  ;;  %v4016_v29 = vmax.f32 %v4014_v40, %v4015_v14 }
 0x288   : > { %v8521_v48 = vsel %vm9589_vm3, %v4002_v46, -inf  ;;  %v3179_v50 = vrot.slane %v8467_v43, %v8065_v18  ;;  %v8527_v21 = vsel %vm9590_vm12, %v4009_v45, -inf  ;;  %v3186_v33 = vrot.slane %v3172_v30, %v8065_v18  ;;  %vm9596_vm3 = vmmov %vm9512_vm1 }
 0x289   : > { %v5163_v4 = vsel %vm5125_vm6, %v5098_v52, %v5162_v8  ;;  %v2935_v9 = vmax.f32 %v8471_v24, 0.0  ;;  %v8536_v62 = vsel %vm9512_vm1, %v4016_v29, -inf  ;;  %v8547_v11 = vmax.f32 %v2833_v36, 0.0  ;;  %vm9597_vm12 = vmmov %vm9512_vm1 }
 0x28a   : > { %v5164_v15 = vsel %vm5127_vm14, %v5099_v35, %v5163_v4  ;;  %v3187_v51 = vcombine.high %v3179_v50, %v3179_v50  ;;  %v3933_v0 = vsel %vm3708_vm0, %v3179_v50, -inf  ;;  %v3188_v5 = vcombine.high %v3186_v33, %v3186_v33 }
 0x28b   : > { %v5184_v31 = vpack.c.b16 %v5164_v15, %v5164_v15  ;;  %v3934_v44 = vrot.slane %v3933_v0, 4  ;;  %v3947_v47 = vsel %vm3708_vm0, %v3186_v33, -inf  ;;  %2967 = vst.msk [vmem:[%s8070_s30 + $0x58] sm:$0xff] %vm9591_vm11, %v2935_v9  ;;  %v3223_v24 = vcombine.high %v2935_v9, %v2935_v9 }
 0x28c   : > { %v3940_v43 = vsel %vm3708_vm0, %v3187_v51, -inf  ;;  %v3948_v30 = vrot.slane %v3947_v47, 4  ;;  %v3230_v3 = vrot.slane %v2935_v9, %v8065_v18  ;;  %v3954_v59 = vsel %vm3708_vm0, %v3188_v5, -inf  ;;  %2965 = vst.msk [vmem:[%s8070_s30 + $0x48] sm:$0xff] %vm9592_vm15, %v8547_v11  ;;  %vm9599_vm15 = vmmov %vm9512_vm1 }
 0x28d   : > { %5204 = vst.msk [vmem:[%s7993_s22 + $0x18] sm:$0xf] %vm2988_vm13, %v5184_v31  ;;  %v3935_v32 = vmax.f32 %v3933_v0, %v3934_v44  ;;  %v3941_v61 = vrot.slane %v3940_v43, 4  ;;  %v3955_v17 = vrot.slane %v3954_v59, 4  ;;  %v3237_v34 = vrot.slane %v3223_v24, %v8065_v18 }
 0x28e   : > { %v3949_v19 = vmax.f32 %v3947_v47, %v3948_v30  ;;  %v3238_v25 = vcombine.high %v3230_v3, %v3230_v3  ;;  %v4017_v2 = vsel %vm3708_vm0, %v3230_v3, -inf  ;;  %v3189_v40 = vcombine.high %v8547_v11, %v8547_v11 }
 0x28f   : > { %v3936_v38 = vrot.slane %v3935_v32, 2  ;;  %v3942_v55 = vmax.f32 %v3940_v43, %v3941_v61  ;;  %v3956_v39 = vmax.f32 %v3954_v59, %v3955_v17  ;;  %v3239_v10 = vcombine.high %v3237_v34, %v3237_v34 }
 0x290   : > { %v3950_v56 = vrot.slane %v3949_v19, 2  ;;  %v4018_v46 = vrot.slane %v4017_v2, 4  ;;  %v4024_v36 = vsel %vm3708_vm0, %v3238_v25, -inf  ;;  %v4031_v52 = vsel %vm3708_vm0, %v3237_v34, -inf }
 0x291   : > { %v3937_v45 = vmax.f32 %v3935_v32, %v3936_v38  ;;  %v3943_v14 = vrot.slane %v3942_v55, 2  ;;  %v3957_v35 = vrot.slane %v3956_v39, 2  ;;  %v4025_v50 = vrot.slane %v4024_v36, 4 }
 0x292   : > { %v3951_v8 = vmax.f32 %v3949_v19, %v3950_v56  ;;  %v4019_v29 = vmax.f32 %v4017_v2, %v4018_v46  ;;  %v4032_v9 = vrot.slane %v4031_v52, 4  ;;  %v4038_v15 = vsel %vm3708_vm0, %v3239_v10, -inf }
 0x293   : > { %v3938_v4 = vrot.slane %v3937_v45, 1  ;;  %v3944_v33 = vmax.f32 %v3942_v55, %v3943_v14  ;;  %v3958_v31 = vmax.f32 %v3956_v39, %v3957_v35  ;;  %v4026_v44 = vmax.f32 %v4024_v36, %v4025_v50 }
 0x294   : > { %v8559_v51 = vpop.f32.mrb[12].mxu1  ;;  %v3952_v0 = vrot.slane %v3951_v8, 1  ;;  %v4020_v5 = vrot.slane %v4019_v29, 2  ;;  %v4033_v24 = vmax.f32 %v4031_v52, %v4032_v9  ;;  %v4039_v3 = vrot.slane %v4038_v15, 4 }
 0x295   : > { %v8561_v47 = vpop.f32.mrb[13].mxu1  ;;  %v3939_v43 = vmax.f32 %v3937_v45, %v3938_v4  ;;  %v3945_v30 = vrot.slane %v3944_v33, 1  ;;  %v3959_v59 = vrot.slane %v3958_v31, 1  ;;  %v4027_v17 = vrot.slane %v4026_v44, 2 }
 0x296   : > { %v8563_v32 = vpop.f32.mrb[14].mxu1  ;;  %v3953_v61 = vmax.f32 %v3951_v8, %v3952_v0  ;;  %v4021_v19 = vmax.f32 %v4019_v29, %v4020_v5  ;;  %v4034_v38 = vrot.slane %v4033_v24, 2  ;;  %v4040_v55 = vmax.f32 %v4038_v15, %v4039_v3 }
 0x297   : > { %v3946_v34 = vmax.f32 %v3944_v33, %v3945_v30  ;;  %v4653_v25 = vsel %vm9593_vm5, %v3939_v43, -inf  ;;  %v3960_v2 = vmax.f32 %v3958_v31, %v3959_v59  ;;  %v4028_v14 = vmax.f32 %v4026_v44, %v4027_v17  ;;  %v8570_v52 = vpop.f32.mrb[15].mxu1  ;;  %vm9600_vm5 = vmmov %vm9512_vm1 }
 0x298   : > { %v4655_v56 = vmax.f32 %v4653_v25, %v8514_v20  ;;  %v4659_v39 = vsel %vm9594_vm2, %v3953_v61, -inf  ;;  %v4022_v10 = vrot.slane %v4021_v19, 1  ;;  %v4035_v36 = vmax.f32 %v4033_v24, %v4034_v38  ;;  %vm9601_vm2 = vmmov %vm9512_vm1 }
 0x299   : > { %v4656_v46 = vsel %vm9595_vm9, %v3946_v34, -inf  ;;  %v4661_v45 = vmax.f32 %v4659_v39, %v8527_v21  ;;  %v4662_v35 = vsel %vm9596_vm3, %v3960_v2, -inf  ;;  %v4029_v33 = vrot.slane %v4028_v14, 1  ;;  %vm9602_vm9 = vmmov %vm9512_vm1 }
 0x29a   : > { %v4658_v8 = vmax.f32 %v4656_v46, %v8521_v48  ;;  %v5568_v29 = vpack.c.bf16 %v4655_v56, %v4655_v56  ;;  %v4023_v50 = vmax.f32 %v4021_v19, %v4022_v10  ;;  %v4664_v4 = vmax.f32 %v4662_v35, %v8536_v62  ;;  %vm9603_vm3 = vmmov %vm9512_vm1 }
 0x29b   : > { %v5570_v20 = vpack.c.bf16 %v4661_v45, %v4661_v45  ;;  %v4036_v9 = vrot.slane %v4035_v36, 1  ;;  %v5599_v15 = vpack.c.bf16 %v8505_v63, %v8505_v63  ;;  %v4041_v31 = vrot.slane %v4040_v55, 2 }
 0x29c   : > { %v5569_v0 = vpack.c.bf16 %v4658_v8, %v4658_v8  ;;  %v5069_v21 = vunpack.c.l.b16 %v5568_v29  ;;  %v5571_v5 = vpack.c.bf16 %v4664_v4, %v4664_v4  ;;  %v4030_v43 = vmax.f32 %v4028_v14, %v4029_v33 }
 0x29d   : > { %v5071_v44 = vunpack.c.l.b16 %v5570_v20  ;;  %v8578_v48 = vsel %vm9597_vm12, %v4023_v50, -inf  ;;  %v4042_v62 = vmax.f32 %v4040_v55, %v4041_v31  ;;  %v3196_v3 = vrot.slane %v8547_v11, %v8065_v18  ;;  %vm9604_vm12 = vmmov %vm9512_vm1 }
 0x29e   : > { %v5070_v30 = vunpack.c.l.b16 %v5569_v0  ;;  %v5137_v24 = vsel %vm5129_vm10, %v5069_v21, %v8444_v60  ;;  %v5072_v61 = vunpack.c.l.b16 %v5571_v5  ;;  %v4037_v59 = vmax.f32 %v4035_v36, %v4036_v9 }
 0x29f   : > { %v8585_v19 = vsel %vm9512_vm1, %v4030_v43, -inf  ;;  %v3203_v17 = vrot.slane %v3189_v40, %v8065_v18  ;;  %v4043_v25 = vrot.slane %v4042_v62, 1  ;;  %v3204_v38 = vcombine.high %v3196_v3, %v3196_v3 }
 0x2a0   : > { %v5138_v34 = vsel %vm5117_vm7, %v5070_v30, %v5137_v24  ;;  %v3961_v60 = vsel %vm3708_vm0, %v3196_v3, -inf  ;;  %vm9598_vm11 = vcmask 1044484   ;;  %v2950_v8 = vmax.f32 %v8518_v23, 0.0 }
 0x2a1   : > { %v5139_v55 = vsel %vm5119_vm8, %v5071_v44, %v5138_v34  ;;  %v3205_v2 = vcombine.high %v3203_v17, %v3203_v17  ;;  %v3962_v56 = vrot.slane %v3961_v60, 4  ;;  %v3975_v39 = vsel %vm3708_vm0, %v3203_v17, -inf }
 0x2a2   : > { %v4044_v10 = vmax.f32 %v4042_v62, %v4043_v25  ;;  %v3968_v46 = vsel %vm3708_vm0, %v3204_v38, -inf  ;;  %v3976_v45 = vrot.slane %v3975_v39, 4  ;;  %v8597_v11 = vsel %vm9598_vm11, %v5072_v61, %v5139_v55  ;;  %2982 = vst.msk [vmem:[%s8070_s30 + $0xd0] sm:$0xff] %vm9600_vm5, %v2950_v8  ;;  %vm9605_vm11 = vmmov %vm9512_vm1 }
 0x2a3   : > { %v3963_v40 = vmax.f32 %v3961_v60, %v3962_v56  ;;  %v3969_v14 = vrot.slane %v3968_v46, 4  ;;  %v3982_v36 = vsel %vm3708_vm0, %v3205_v2, -inf  ;;  %v4672_v35 = vsel %vm9599_vm15, %v4037_v59, -inf  ;;  %vm9606_vm15 = vmmov %vm9512_vm1 }
 0x2a4   : > { %v3977_v29 = vmax.f32 %v3975_v39, %v3976_v45  ;;  %v3983_v50 = vrot.slane %v3982_v36, 4  ;;  %v2894_v4 = vadd.f32 %v8360_v22, %v8430_v53  ;;  %v3478_v9 = vcombine.high %v2950_v8, %v2950_v8  ;;  %vm9607_vm5 = vmmov %vm9512_vm1 }
 0x2a5   : > { %v3964_v20 = vrot.slane %v3963_v40, 2  ;;  %v3970_v33 = vmax.f32 %v3968_v46, %v3969_v14  ;;  %v3485_v0 = vrot.slane %v2950_v8, %v8065_v18  ;;  %v4675_v21 = vsel %vm9601_vm2, %v4044_v10, -inf  ;;  %vm9608_vm2 = vmmov %vm9512_vm1 }
 0x2a6   : > { %v3978_v31 = vrot.slane %v3977_v29, 2  ;;  %v3984_v5 = vmax.f32 %v3982_v36, %v3983_v50  ;;  %v8608_v23 = vmax.f32 %v2894_v4, 0.0  ;;  %v3492_v30 = vrot.slane %v3478_v9, %v8065_v18 }
 0x2a7   : > { %v3965_v44 = vmax.f32 %v3963_v40, %v3964_v20  ;;  %v3971_v43 = vrot.slane %v3970_v33, 2  ;;  %v3493_v24 = vcombine.high %v3485_v0, %v3485_v0  ;;  %v4437_v3 = vsel %vm3708_vm0, %v3485_v0, -inf }
 0x2a8   : > { %v3979_v53 = vmax.f32 %v3977_v29, %v3978_v31  ;;  %v3985_v62 = vrot.slane %v3984_v5, 2  ;;  %2980 = vst.msk [vmem:[%s8070_s30 + $0xc0] sm:$0xff] %vm9602_vm9, %v8608_v23  ;;  %v3444_v61 = vcombine.high %v8608_v23, %v8608_v23  ;;  %v3494_v34 = vcombine.high %v3492_v30, %v3492_v30  ;;  %vm9609_vm9 = vmmov %vm9512_vm1 }
 0x2a9   : > { %v3966_v59 = vrot.slane %v3965_v44, 1  ;;  %v3972_v17 = vmax.f32 %v3970_v33, %v3971_v43  ;;  %v4438_v25 = vrot.slane %v4437_v3, 4  ;;  %v4444_v55 = vsel %vm3708_vm0, %v3493_v24, -inf }
 0x2aa   : > { %v3980_v38 = vrot.slane %v3979_v53, 1  ;;  %v3986_v60 = vmax.f32 %v3984_v5, %v3985_v62  ;;  %v4451_v2 = vsel %vm3708_vm0, %v3492_v30, -inf  ;;  %v4445_v46 = vrot.slane %v4444_v55, 4 }
 0x2ab   : > { %v3967_v56 = vmax.f32 %v3965_v44, %v3966_v59  ;;  %v3973_v39 = vrot.slane %v3972_v17, 1  ;;  %v4439_v10 = vmax.f32 %v4437_v3, %v4438_v25  ;;  %v4452_v14 = vrot.slane %v4451_v2, 4 }
 0x2ac   : > { %v3981_v45 = vmax.f32 %v3979_v53, %v3980_v38  ;;  %v3987_v40 = vrot.slane %v3986_v60, 1  ;;  %v4458_v36 = vsel %vm3708_vm0, %v3494_v34, -inf  ;;  %v4446_v4 = vmax.f32 %v4444_v55, %v4445_v46 }
 0x2ad   : > { %v3974_v8 = vmax.f32 %v3972_v17, %v3973_v39  ;;  %v4665_v29 = vsel %vm9603_vm3, %v3967_v56, -inf  ;;  %v4440_v50 = vrot.slane %v4439_v10, 2  ;;  %v4453_v0 = vmax.f32 %v4451_v2, %v4452_v14  ;;  %vm9610_vm3 = vmmov %vm9512_vm1 }
 0x2ae   : > { %v3988_v20 = vmax.f32 %v3986_v60, %v3987_v40  ;;  %v4667_v33 = vmax.f32 %v4665_v29, %v8578_v48  ;;  %v4671_v9 = vsel %vm9604_vm12, %v3981_v45, -inf  ;;  %v4447_v43 = vrot.slane %v4446_v4, 2  ;;  %vm9611_vm12 = vmmov %vm9512_vm1 }
 0x2af   : > { %v4668_v31 = vsel %vm9512_vm1, %v3974_v8, -inf  ;;  %v4673_v5 = vmax.f32 %v4671_v9, %v4672_v35  ;;  %v4441_v44 = vmax.f32 %v4439_v10, %v4440_v50  ;;  %v4454_v62 = vrot.slane %v4453_v0, 2 }
 0x2b0   : > { %v4670_v30 = vmax.f32 %v4668_v31, %v8585_v19  ;;  %v4674_v24 = vsel %vm9605_vm11, %v3988_v20, -inf  ;;  %v5572_v53 = vpack.c.bf16 %v4667_v33, %v4667_v33  ;;  %v4448_v34 = vmax.f32 %v4446_v4, %v4447_v43  ;;  %vm9612_vm11 = vmmov %vm9512_vm1 }
 0x2b1   : > { %v8626_v3 = vmax.f32 %v4674_v24, %v4675_v21  ;;  %v5574_v59 = vpack.c.bf16 %v4673_v5, %v4673_v5  ;;  %v4442_v17 = vrot.slane %v4441_v44, 1  ;;  %v4455_v38 = vmax.f32 %v4453_v0, %v4454_v62 }
 0x2b2   : > { %v5573_v48 = vpack.c.bf16 %v4670_v30, %v4670_v30  ;;  %v5073_v25 = vunpack.c.l.b16 %v5572_v53  ;;  %v4459_v60 = vrot.slane %v4458_v36, 4  ;;  %v8631_v35 = vunpack.c.l.b16 %v5599_v15 }
 0x2b3   : > { %v4443_v55 = vmax.f32 %v4441_v44, %v4442_v17  ;;  %v4449_v19 = vrot.slane %v4448_v34, 1  ;;  %v2905_v2 = vadd.f32 %v8360_v22, %v8432_v58  ;;  %v4456_v39 = vrot.slane %v4455_v38, 1 }
 0x2b4   : > { %v5074_v56 = vunpack.c.l.b16 %v5573_v48  ;;  %v5141_v21 = vsel %vm5123_vm4, %v5073_v25, %v8597_v11  ;;  %v4460_v10 = vmax.f32 %v4458_v36, %v4459_v60  ;;  %v5075_v46 = vunpack.c.l.b16 %v5574_v59 }
 0x2b5   : > { %v4450_v45 = vmax.f32 %v4448_v34, %v4449_v19  ;;  %v8638_v40 = vsel %vm9606_vm15, %v4443_v55, -inf  ;;  %v3451_v63 = vrot.slane %v8608_v23, %v8065_v18  ;;  %v4457_v14 = vmax.f32 %v4455_v38, %v4456_v39  ;;  %vm9613_vm15 = vmmov %vm9512_vm1 }
 0x2b6   : > { %v5142_v15 = vsel %vm5125_vm6, %v5074_v56, %v5141_v21  ;;  %v4461_v8 = vrot.slane %v4460_v10, 2  ;;  %v3458_v58 = vrot.slane %v3444_v61, %v8065_v18  ;;  %v2951_v61 = vmax.f32 %v2905_v2, 0.0 }
 0x2b7   : > { %v5143_v29 = vsel %vm5127_vm14, %v5075_v46, %v5142_v15  ;;  %v8646_v11 = vsel %vm9607_vm5, %v4450_v45, -inf  ;;  %v3459_v36 = vcombine.high %v3451_v63, %v3451_v63  ;;  %v4381_v50 = vsel %vm3708_vm0, %v3451_v63, -inf  ;;  %vm9614_vm5 = vmmov %vm9512_vm1 }
 0x2b8   : > { %v5181_v4 = vpack.c.b16 %v5143_v29, %v5143_v29  ;;  %v4462_v20 = vmax.f32 %v4460_v10, %v4461_v8  ;;  %v4756_v23 = vsel %vm9608_vm2, %v4457_v14, -inf  ;;  %v3460_v33 = vcombine.high %v3458_v58, %v3458_v58  ;;  %2983 = vst.msk [vmem:[%s8070_s30 + $0xd8] sm:$0xff] %vm9609_vm9, %v2951_v61  ;;  %vm9615_vm2 = vmmov %vm9512_vm1 }
 0x2b9   : > { %v4382_v9 = vrot.slane %v4381_v50, 4  ;;  %v4388_v0 = vsel %vm3708_vm0, %v3459_v36, -inf  ;;  %v4395_v31 = vsel %vm3708_vm0, %v3458_v58, -inf  ;;  %v3495_v62 = vcombine.high %v2951_v61, %v2951_v61 }
 0x2ba   : > { %5201 = vst.msk [vmem:[%s7993_s22 + $0xc] sm:$0xf] %vm2988_vm13, %v5181_v4  ;;  %v4463_v5 = vrot.slane %v4462_v20, 1  ;;  %v4389_v44 = vrot.slane %v4388_v0, 4  ;;  %v4396_v43 = vrot.slane %v4395_v31, 4  ;;  %v4402_v30 = vsel %vm3708_vm0, %v3460_v33, -inf }
 0x2bb   : > { %v4383_v24 = vmax.f32 %v4381_v50, %v4382_v9  ;;  %v4403_v53 = vrot.slane %v4402_v30, 4  ;;  %v3502_v59 = vrot.slane %v2951_v61, %v8065_v18  ;;  %v8660_v25 = vadd.f32 %v8360_v22, %v8434_v6 }
 0x2bc   : > { %v4464_v17 = vmax.f32 %v4462_v20, %v4463_v5  ;;  %v4390_v34 = vmax.f32 %v4388_v0, %v4389_v44  ;;  %v4397_v48 = vmax.f32 %v4395_v31, %v4396_v43  ;;  %v3509_v55 = vrot.slane %v3495_v62, %v8065_v18 }
 0x2bd   : > { %v4384_v38 = vrot.slane %v4383_v24, 2  ;;  %v4404_v60 = vmax.f32 %v4402_v30, %v4403_v53  ;;  %v3510_v19 = vcombine.high %v3502_v59, %v3502_v59  ;;  %v4465_v39 = vsel %vm3708_vm0, %v3502_v59, -inf }
 0x2be   : > { %v4759_v2 = vsel %vm9610_vm3, %v4464_v17, -inf  ;;  %v4391_v56 = vrot.slane %v4390_v34, 2  ;;  %v4398_v21 = vrot.slane %v4397_v48, 2  ;;  %v3511_v45 = vcombine.high %v3509_v55, %v3509_v55  ;;  %vm9617_vm3 = vmmov %vm9512_vm1 }
 0x2bf   : > { %v4385_v10 = vmax.f32 %v4383_v24, %v4384_v38  ;;  %v4405_v46 = vrot.slane %v4404_v60, 2  ;;  %v4466_v63 = vrot.slane %v4465_v39, 4  ;;  %v4472_v22 = vsel %vm3708_vm0, %v3510_v19, -inf }
 0x2c0   : > { %v4392_v15 = vmax.f32 %v4390_v34, %v4391_v56  ;;  %v4399_v14 = vmax.f32 %v4397_v48, %v4398_v21  ;;  %v4479_v6 = vsel %vm3708_vm0, %v3509_v55, -inf  ;;  %v4473_v36 = vrot.slane %v4472_v22, 4 }
 0x2c1   : > { %v4386_v8 = vrot.slane %v4385_v10, 1  ;;  %v4406_v58 = vmax.f32 %v4404_v60, %v4405_v46  ;;  %v4467_v29 = vmax.f32 %v4465_v39, %v4466_v63  ;;  %v4480_v20 = vrot.slane %v4479_v6, 4 }
 0x2c2   : > { %v4393_v50 = vrot.slane %v4392_v15, 1  ;;  %v4400_v4 = vrot.slane %v4399_v14, 1  ;;  %v4486_v33 = vsel %vm3708_vm0, %v3511_v45, -inf  ;;  %v4474_v61 = vmax.f32 %v4472_v22, %v4473_v36 }
 0x2c3   : > { %v4387_v9 = vmax.f32 %v4385_v10, %v4386_v8  ;;  %v4407_v0 = vrot.slane %v4406_v58, 1  ;;  %v4468_v31 = vrot.slane %v4467_v29, 2  ;;  %v4481_v43 = vmax.f32 %v4479_v6, %v4480_v20 }
 0x2c4   : > { %v4394_v5 = vmax.f32 %v4392_v15, %v4393_v50  ;;  %v4401_v44 = vmax.f32 %v4399_v14, %v4400_v4  ;;  %v4487_v30 = vrot.slane %v4486_v33, 4  ;;  %v4475_v59 = vrot.slane %v4474_v61, 2 }
 0x2c5   : > { %v4408_v24 = vmax.f32 %v4406_v58, %v4407_v0  ;;  %v4749_v53 = vsel %vm9611_vm12, %v4387_v9, -inf  ;;  %v4469_v62 = vmax.f32 %v4467_v29, %v4468_v31  ;;  %v4482_v38 = vrot.slane %v4481_v43, 2  ;;  %v8683_v0 = vld [vmem:[%s9035_s2] ss:$0 sm:$0xff]  ;;  %vm9618_vm12 = vmmov %vm9512_vm1 }
 0x2c6   : > { %v4751_v17 = vmax.f32 %v4749_v53, %v8638_v40  ;;  %v4752_v34 = vsel %vm9512_vm1, %v4394_v5, -inf  ;;  %v4755_v48 = vsel %vm9612_vm11, %v4401_v44, -inf  ;;  %v4476_v10 = vmax.f32 %v4474_v61, %v4475_v59  ;;  %vm9619_vm11 = vmmov %vm9512_vm1 }
 0x2c7   : > { %v4754_v60 = vmax.f32 %v4752_v34, %v8646_v11  ;;  %v4757_v55 = vmax.f32 %v4755_v48, %v4756_v23  ;;  %v4758_v19 = vsel %vm9613_vm15, %v4408_v24, -inf  ;;  %v4470_v56 = vrot.slane %v4469_v62, 1  ;;  %vm9620_vm15 = vmmov %vm9512_vm1 }
 0x2c8   : > { %v4760_v21 = vmax.f32 %v4758_v19, %v4759_v2  ;;  %v5600_v39 = vpack.c.bf16 %v4751_v17, %v4751_v17  ;;  %v4483_v46 = vmax.f32 %v4481_v43, %v4482_v38  ;;  %v4488_v14 = vmax.f32 %v4486_v33, %v4487_v30 }
 0x2c9   : > { %v5601_v45 = vpack.c.bf16 %v4754_v60, %v4754_v60  ;;  %v5602_v63 = vpack.c.bf16 %v4757_v55, %v4757_v55  ;;  %v4471_v15 = vmax.f32 %v4469_v62, %v4470_v56  ;;  %v4477_v6 = vrot.slane %v4476_v10, 1 }
 0x2ca   : > { %v5603_v40 = vpack.c.bf16 %v4760_v21, %v4760_v21  ;;  %v5101_v22 = vunpack.c.l.b16 %v5600_v39  ;;  %v4484_v8 = vrot.slane %v4483_v46, 1  ;;  %v5586_v58 = vpack.c.bf16 %v8202_v16, %v8202_v16 }
 0x2cb   : > { %v5102_v11 = vunpack.c.l.b16 %v5601_v45  ;;  %v5103_v23 = vunpack.c.l.b16 %v5602_v63  ;;  %v4489_v29 = vrot.slane %v4488_v14, 2  ;;  %v4478_v50 = vmax.f32 %v4476_v10, %v4477_v6 }
 0x2cc   : > { %v5104_v36 = vunpack.c.l.b16 %v5603_v40  ;;  %v5165_v2 = vsel %vm5129_vm10, %v5101_v22, %v8631_v35  ;;  %v4485_v4 = vmax.f32 %v4483_v46, %v4484_v8  ;;  %v2949_v9 = vmax.f32 %v8660_v25, 0.0 }
 0x2cd   : > { %v5166_v20 = vsel %vm5117_vm7, %v5102_v11, %v5165_v2  ;;  %v4490_v33 = vmax.f32 %v4488_v14, %v4489_v29  ;;  %v2854_v31 = vadd.f32 %v8683_v0, %v8496_v57  ;;  %v5587_v61 = vpack.c.bf16 %v8204_v54, %v8204_v54 }
 0x2ce   : > { %v5167_v35 = vsel %vm5119_vm8, %v5103_v23, %v5166_v20  ;;  %v8691_v5 = vsel %vm9614_vm5, %v4471_v15, -inf  ;;  %v2846_v25 = vadd.f32 %v8683_v0, %v8500_v12  ;;  %2981 = vst.msk [vmem:[%s8070_s30 + $0xc8] sm:$0xff] %vm9615_vm2, %v2949_v9  ;;  %v3461_v43 = vcombine.high %v2949_v9, %v2949_v9  ;;  %vm9621_vm5 = vmmov %vm9512_vm1 }
 0x2cf   : > { %v4491_v44 = vrot.slane %v4490_v33, 1  ;;  %v3468_v30 = vrot.slane %v2949_v9, %v8065_v18  ;;  %vm9616_vm9 = vcmask 1044484   ;;  %v8702_v24 = vsel %vm9617_vm3, %v4478_v50, -inf  ;;  %vm9622_vm2 = vmmov %vm9512_vm1 }
 0x2d0   : > { %v8699_v57 = vsel %vm9616_vm9, %v5104_v36, %v5167_v35  ;;  %v8705_v53 = vsel %vm9618_vm12, %v4485_v4, -inf  ;;  %v2938_v62 = vmax.f32 %v2854_v31, 0.0  ;;  %v8707_v59 = vmax.f32 %v2846_v25, 0.0  ;;  %vm9623_vm9 = vmmov %vm9512_vm1 }
 0x2d1   : > { %v4492_v12 = vmax.f32 %v4490_v33, %v4491_v44  ;;  %v3475_v17 = vrot.slane %v3461_v43, %v8065_v18  ;;  %v3476_v34 = vcombine.high %v3468_v30, %v3468_v30  ;;  %v4409_v48 = vsel %vm3708_vm0, %v3468_v30, -inf  ;;  %vm9624_vm3 = vmmov %vm9512_vm1 }
 0x2d2   : > { %v4410_v38 = vrot.slane %v4409_v48, 4  ;;  %2970 = vst.msk [vmem:[%s8070_s30 + $0x70] sm:$0xff] %vm9512_vm1, %v2938_v62  ;;  %v3274_v60 = vcombine.high %v2938_v62, %v2938_v62  ;;  %v3281_v55 = vrot.slane %v2938_v62, %v8065_v18  ;;  %v3240_v19 = vcombine.high %v8707_v59, %v8707_v59  ;;  %vm9625_vm12 = vmmov %vm9512_vm1 }
 0x2d3   : > { %2968 = vst.msk [vmem:[%s8070_s30 + $0x60] sm:$0xff] %vm9619_vm11, %v8707_v59  ;;  %v8720_v56 = vsel %vm9620_vm15, %v4492_v12, -inf  ;;  %v3477_v21 = vcombine.high %v3475_v17, %v3475_v17  ;;  %v4416_v39 = vsel %vm3708_vm0, %v3476_v34, -inf  ;;  %v4423_v10 = vsel %vm3708_vm0, %v3475_v17, -inf  ;;  %vm9626_vm11 = vmmov %vm9512_vm1 }
 0x2d4   : > { %v4411_v46 = vmax.f32 %v4409_v48, %v4410_v38  ;;  %v4417_v45 = vrot.slane %v4416_v39, 4  ;;  %v4424_v63 = vrot.slane %v4423_v10, 4  ;;  %v3288_v15 = vrot.slane %v3274_v60, %v8065_v18  ;;  %vm9627_vm15 = vmmov %vm9512_vm1 }
 0x2d5   : > { %v4430_v14 = vsel %vm3708_vm0, %v3477_v21, -inf  ;;  %v3289_v40 = vcombine.high %v3281_v55, %v3281_v55  ;;  %v4101_v22 = vsel %vm3708_vm0, %v3281_v55, -inf  ;;  %v8729_v6 = vrot.slane %v8707_v59, %v8065_v18 }
 0x2d6   : > { %v4412_v8 = vrot.slane %v4411_v46, 2  ;;  %v4418_v11 = vmax.f32 %v4416_v39, %v4417_v45  ;;  %v4425_v23 = vmax.f32 %v4423_v10, %v4424_v63  ;;  %v4431_v29 = vrot.slane %v4430_v14, 4 }
 0x2d7   : > { %v3290_v36 = vcombine.high %v3288_v15, %v3288_v15  ;;  %v4102_v2 = vrot.slane %v4101_v22, 4  ;;  %v4108_v50 = vsel %vm3708_vm0, %v3289_v40, -inf  ;;  %v4115_v4 = vsel %vm3708_vm0, %v3288_v15, -inf }
 0x2d8   : > { %v4413_v20 = vmax.f32 %v4411_v46, %v4412_v8  ;;  %v4419_v33 = vrot.slane %v4418_v11, 2  ;;  %v4426_v9 = vrot.slane %v4425_v23, 2  ;;  %v4432_v31 = vmax.f32 %v4430_v14, %v4431_v29 }
 0x2d9   : > { %v4103_v35 = vmax.f32 %v4101_v22, %v4102_v2  ;;  %v4109_v25 = vrot.slane %v4108_v50, 4  ;;  %v4116_v44 = vrot.slane %v4115_v4, 4  ;;  %v4122_v43 = vsel %vm3708_vm0, %v3290_v36, -inf }
 0x2da   : > { %v4414_v30 = vrot.slane %v4413_v20, 1  ;;  %v4420_v62 = vmax.f32 %v4418_v11, %v4419_v33  ;;  %v4427_v12 = vmax.f32 %v4425_v23, %v4426_v9  ;;  %v4433_v17 = vrot.slane %v4432_v31, 2 }
 0x2db   : > { %v4104_v34 = vrot.slane %v4103_v35, 2  ;;  %v4110_v48 = vmax.f32 %v4108_v50, %v4109_v25  ;;  %v4117_v38 = vmax.f32 %v4115_v4, %v4116_v44  ;;  %v4123_v60 = vrot.slane %v4122_v43, 4 }
 0x2dc   : > { %v4415_v55 = vmax.f32 %v4413_v20, %v4414_v30  ;;  %v4421_v21 = vrot.slane %v4420_v62, 1  ;;  %v4428_v39 = vrot.slane %v4427_v12, 1  ;;  %v4434_v10 = vmax.f32 %v4432_v31, %v4433_v17 }
 0x2dd   : > { %v4105_v46 = vmax.f32 %v4103_v35, %v4104_v34  ;;  %v4111_v45 = vrot.slane %v4110_v48, 2  ;;  %v4118_v63 = vrot.slane %v4117_v38, 2  ;;  %v4124_v15 = vmax.f32 %v4122_v43, %v4123_v60 }
 0x2de   : > { %v4422_v14 = vmax.f32 %v4420_v62, %v4421_v21  ;;  %v4429_v40 = vmax.f32 %v4427_v12, %v4428_v39  ;;  %v4435_v22 = vrot.slane %v4434_v10, 1  ;;  %v4761_v8 = vsel %vm9621_vm5, %v4415_v55, -inf  ;;  %vm9628_vm5 = vmmov %vm9512_vm1 }
 0x2df   : > { %v4763_v11 = vmax.f32 %v4761_v8, %v8691_v5  ;;  %v4106_v23 = vrot.slane %v4105_v46, 1  ;;  %v4112_v29 = vmax.f32 %v4110_v48, %v4111_v45  ;;  %v4119_v36 = vmax.f32 %v4117_v38, %v4118_v63 }
 0x2e0   : > { %v4436_v2 = vmax.f32 %v4434_v10, %v4435_v22  ;;  %v4764_v50 = vsel %vm9622_vm2, %v4422_v14, -inf  ;;  %v4767_v4 = vsel %vm9623_vm9, %v4429_v40, -inf  ;;  %v4125_v20 = vrot.slane %v4124_v15, 2  ;;  %vm9629_vm2 = vmmov %vm9512_vm1 }
 0x2e1   : > { %v4766_v33 = vmax.f32 %v4764_v50, %v8702_v24  ;;  %v4769_v9 = vmax.f32 %v4767_v4, %v8705_v53  ;;  %v5604_v31 = vpack.c.bf16 %v4763_v11, %v4763_v11  ;;  %v4107_v35 = vmax.f32 %v4105_v46, %v4106_v23  ;;  %vm9630_vm9 = vmmov %vm9512_vm1 }
 0x2e2   : > { %v4770_v25 = vsel %vm9624_vm3, %v4436_v2, -inf  ;;  %v4113_v44 = vrot.slane %v4112_v29, 1  ;;  %v4120_v43 = vrot.slane %v4119_v36, 1  ;;  %v4126_v5 = vmax.f32 %v4124_v15, %v4125_v20  ;;  %vm9631_vm3 = vmmov %vm9512_vm1 }
 0x2e3   : > { %v8742_v30 = vmax.f32 %v4770_v25, %v8720_v56  ;;  %v5605_v62 = vpack.c.bf16 %v4766_v33, %v4766_v33  ;;  %v5606_v12 = vpack.c.bf16 %v4769_v9, %v4769_v9  ;;  %v5105_v17 = vunpack.c.l.b16 %v5604_v31 }
 0x2e4   : > { %v8747_v34 = vunpack.c.l.b16 %v5585_v37  ;;  %v5575_v24 = vpack.c.bf16 %v8626_v3, %v8626_v3  ;;  %v4114_v53 = vmax.f32 %v4112_v29, %v4113_v44  ;;  %v4127_v48 = vrot.slane %v4126_v5, 1 }
 0x2e5   : > { %v5106_v38 = vunpack.c.l.b16 %v5605_v62  ;;  %v5169_v60 = vsel %vm5123_vm4, %v5105_v17, %v8699_v57  ;;  %v2857_v56 = vadd.f32 %v8683_v0, %v8503_v49  ;;  %v2849_v55 = vadd.f32 %v8683_v0, %v8507_v13 }
 0x2e6   : > { %v5107_v21 = vunpack.c.l.b16 %v5606_v12  ;;  %v4121_v39 = vmax.f32 %v4119_v36, %v4120_v43  ;;  %v4678_v28 = vsel %vm9625_vm12, %v4107_v35, -inf  ;;  %v3254_v37 = vrot.slane %v3240_v19, %v8065_v18  ;;  %vm9632_vm12 = vmmov %vm9512_vm1 }
 0x2e7   : > { %v5170_v10 = vsel %vm5125_vm6, %v5106_v38, %v5169_v60  ;;  %v4128_v46 = vmax.f32 %v4126_v5, %v4127_v48  ;;  %v3255_v57 = vcombine.high %v8729_v6, %v8729_v6  ;;  %v4045_v49 = vsel %vm3708_vm0, %v8729_v6, -inf }
 0x2e8   : > { %v5171_v13 = vsel %vm5127_vm14, %v5107_v21, %v5170_v10  ;;  %v4681_v45 = vsel %vm9512_vm1, %v4114_v53, -inf  ;;  %v3256_v63 = vcombine.high %v3254_v37, %v3254_v37  ;;  %v4046_v15 = vrot.slane %v4045_v49, 4 }
 0x2e9   : > { %v5185_v14 = vpack.c.b16 %v5171_v13, %v5171_v13  ;;  %v4052_v59 = vsel %vm3708_vm0, %v3255_v57, -inf  ;;  %v4059_v19 = vsel %vm3708_vm0, %v3254_v37, -inf  ;;  %v2939_v40 = vmax.f32 %v2857_v56, 0.0 }
 0x2ea   : > { %v4047_v22 = vmax.f32 %v4045_v49, %v4046_v15  ;;  %v4053_v8 = vrot.slane %v4052_v59, 4  ;;  %v4060_v11 = vrot.slane %v4059_v19, 4  ;;  %v4066_v23 = vsel %vm3708_vm0, %v3256_v63, -inf }
 0x2eb   : > { %5205 = vst.msk [vmem:[%s7993_s22 + $0x1c] sm:$0xf] %vm2988_vm13, %v5185_v14  ;;  %v4067_v6 = vrot.slane %v4066_v23, 4  ;;  %v3291_v29 = vcombine.high %v2939_v40, %v2939_v40  ;;  %v3298_v36 = vrot.slane %v2939_v40, %v8065_v18  ;;  %v8777_v2 = vmax.f32 %v2849_v55, 0.0 }
 0x2ec   : > { %2971 = vst.msk [vmem:[%s8070_s30 + $0x78] sm:$0xff] %vm9626_vm11, %v2939_v40  ;;  %v4684_v50 = vsel %vm9627_vm15, %v4121_v39, -inf  ;;  %v4048_v4 = vrot.slane %v4047_v22, 2  ;;  %v4054_v20 = vmax.f32 %v4052_v59, %v4053_v8  ;;  %v4061_v33 = vmax.f32 %v4059_v19, %v4060_v11  ;;  %vm9634_vm15 = vmmov %vm9512_vm1 }
 0x2ed   : > { %v4068_v9 = vmax.f32 %v4066_v23, %v4067_v6  ;;  %v3305_v31 = vrot.slane %v3291_v29, %v8065_v18  ;;  %v3306_v35 = vcombine.high %v3298_v36, %v3298_v36  ;;  %v4129_v25 = vsel %vm3708_vm0, %v3298_v36, -inf  ;;  %2969 = vst.msk [vmem:[%s8070_s30 + $0x68] sm:$0xff] %vm9628_vm5, %v8777_v2  ;;  %vm9635_vm5 = vmmov %vm9512_vm1 }
 0x2ee   : > { %v4049_v44 = vmax.f32 %v4047_v22, %v4048_v4  ;;  %v4055_v43 = vrot.slane %v4054_v20, 2  ;;  %v4062_v5 = vrot.slane %v4061_v33, 2  ;;  %v4130_v62 = vrot.slane %v4129_v25, 4 }
 0x2ef   : > { %v4069_v12 = vrot.slane %v4068_v9, 2  ;;  %v3307_v17 = vcombine.high %v3305_v31, %v3305_v31  ;;  %v4136_v53 = vsel %vm3708_vm0, %v3306_v35, -inf  ;;  %v4143_v48 = vsel %vm3708_vm0, %v3305_v31, -inf }
 0x2f0   : > { %v4050_v38 = vrot.slane %v4049_v44, 1  ;;  %v4056_v60 = vmax.f32 %v4054_v20, %v4055_v43  ;;  %v4063_v56 = vmax.f32 %v4061_v33, %v4062_v5  ;;  %v4131_v55 = vmax.f32 %v4129_v25, %v4130_v62 }
 0x2f1   : > { %v4070_v21 = vmax.f32 %v4068_v9, %v4069_v12  ;;  %v4137_v39 = vrot.slane %v4136_v53, 4  ;;  %v4144_v37 = vrot.slane %v4143_v48, 4  ;;  %v4150_v10 = vsel %vm3708_vm0, %v3307_v17, -inf }
 0x2f2   : > { %v4051_v57 = vmax.f32 %v4049_v44, %v4050_v38  ;;  %v4057_v49 = vrot.slane %v4056_v60, 1  ;;  %v4064_v13 = vrot.slane %v4063_v56, 1  ;;  %v4132_v63 = vrot.slane %v4131_v55, 2 }
 0x2f3   : > { %v4071_v15 = vrot.slane %v4070_v21, 1  ;;  %v4138_v14 = vmax.f32 %v4136_v53, %v4137_v39  ;;  %v4145_v59 = vmax.f32 %v4143_v48, %v4144_v37  ;;  %v4151_v19 = vrot.slane %v4150_v10, 4 }
 0x2f4   : > { %v4687_v40 = vsel %vm9629_vm2, %v4128_v46, -inf  ;;  %v4058_v22 = vmax.f32 %v4056_v60, %v4057_v49  ;;  %v4065_v8 = vmax.f32 %v4063_v56, %v4064_v13  ;;  %v4677_v11 = vsel %vm9630_vm9, %v4051_v57, -inf  ;;  %vm9636_vm2 = vmmov %vm9512_vm1 }
 0x2f5   : > { %v4072_v23 = vmax.f32 %v4070_v21, %v4071_v15  ;;  %v4679_v6 = vmax.f32 %v4677_v11, %v4678_v28  ;;  %v4133_v29 = vmax.f32 %v4131_v55, %v4132_v63  ;;  %v4139_v36 = vrot.slane %v4138_v14, 2  ;;  %vm9637_vm9 = vmmov %vm9512_vm1 }
 0x2f6   : > { %v4680_v4 = vsel %vm9631_vm3, %v4058_v22, -inf  ;;  %v4683_v20 = vsel %vm9632_vm12, %v4065_v8, -inf  ;;  %v4146_v33 = vrot.slane %v4145_v59, 2  ;;  %v4152_v9 = vmax.f32 %v4150_v10, %v4151_v19  ;;  %vm9638_vm3 = vmmov %vm9512_vm1 }
 0x2f7   : > { %v4682_v31 = vmax.f32 %v4680_v4, %v4681_v45  ;;  %v4685_v35 = vmax.f32 %v4683_v20, %v4684_v50  ;;  %v4686_v25 = vsel %vm9512_vm1, %v4072_v23, -inf  ;;  %v5576_v44 = vpack.c.bf16 %v4679_v6, %v4679_v6  ;;  %vm9639_vm12 = vmmov %vm9512_vm1 }
 0x2f8   : > { %v8796_v46 = vunpack.c.l.b16 %v5586_v58  ;;  %v5076_v28 = vunpack.c.l.b16 %v5575_v24  ;;  %v4688_v43 = vmax.f32 %v4686_v25, %v4687_v40  ;;  %v2918_v5 = vadd.f32 %v8683_v0, %v8559_v51 }
 0x2f9   : > { %v5577_v62 = vpack.c.bf16 %v4682_v31, %v4682_v31  ;;  %v5578_v12 = vpack.c.bf16 %v4685_v35, %v4685_v35  ;;  %v5077_v45 = vunpack.c.l.b16 %v5576_v44  ;;  %v4140_v50 = vmax.f32 %v4138_v14, %v4139_v36 }
 0x2fa   : > { %v8806_v17 = vunpack.c.l.b16 %v5587_v61  ;;  %v5579_v16 = vpack.c.bf16 %v4688_v43, %v4688_v43  ;;  %v4134_v58 = vrot.slane %v4133_v29, 1  ;;  %v4147_v53 = vmax.f32 %v4145_v59, %v4146_v33 }
 0x2fb   : > { %v5078_v48 = vunpack.c.l.b16 %v5577_v62  ;;  %v5079_v38 = vunpack.c.l.b16 %v5578_v12  ;;  %v5144_v3 = vsel %vm5129_vm10, %v5077_v45, %v5076_v28  ;;  %v4153_v24 = vrot.slane %v4152_v9, 2 }
 0x2fc   : > { %v5588_v51 = vpack.c.bf16 %v8240_v41, %v8240_v41  ;;  %v5589_v60 = vpack.c.bf16 %v8244_v42, %v8244_v42  ;;  %v5080_v56 = vunpack.c.l.b16 %v5579_v16  ;;  %v3257_v54 = vcombine.high %v8777_v2, %v8777_v2 }
 0x2fd   : > { %v5145_v61 = vsel %vm5117_vm7, %v5078_v48, %v5144_v3  ;;  %v4141_v55 = vrot.slane %v4140_v50, 1  ;;  %v3264_v21 = vrot.slane %v8777_v2, %v8065_v18  ;;  %v2954_v39 = vmax.f32 %v2918_v5, 0.0 }
 0x2fe   : > { %v5146_v37 = vsel %vm5119_vm8, %v5079_v38, %v5145_v61  ;;  %v4135_v10 = vmax.f32 %v4133_v29, %v4134_v58  ;;  %v4148_v57 = vrot.slane %v4147_v53, 1  ;;  %v3271_v49 = vrot.slane %v3257_v54, %v8065_v18 }
 0x2ff   : > { %v4154_v13 = vmax.f32 %v4152_v9, %v4153_v24  ;;  %v3272_v63 = vcombine.high %v3264_v21, %v3264_v21  ;;  %v4073_v15 = vsel %vm3708_vm0, %v3264_v21, -inf  ;;  %vm9633_vm11 = vcmask 1044484   ;;  %2986 = vst.msk [vmem:[%s8070_s30 + $0xf0] sm:$0xff] %vm9634_vm15, %v2954_v39  ;;  %vm9641_vm15 = vmmov %vm9512_vm1 }
 0x300   : > { %v8822_v14 = vsel %vm9633_vm11, %v5080_v56, %v5146_v37  ;;  %v3273_v59 = vcombine.high %v3271_v49, %v3271_v49  ;;  %v4074_v19 = vrot.slane %v4073_v15, 4  ;;  %v4087_v2 = vsel %vm3708_vm0, %v3271_v49, -inf  ;;  %vm9640_vm11 = vmmov %vm9512_vm1 }
 0x301   : > { %v3546_v40 = vcombine.high %v2954_v39, %v2954_v39  ;;  %v4142_v22 = vmax.f32 %v4140_v50, %v4141_v55  ;;  %v4080_v8 = vsel %vm3708_vm0, %v3272_v63, -inf  ;;  %v4088_v11 = vrot.slane %v4087_v2, 4 }
 0x302   : > { %v3553_v23 = vrot.slane %v2954_v39, %v8065_v18  ;;  %v4075_v6 = vmax.f32 %v4073_v15, %v4074_v19  ;;  %v4081_v29 = vrot.slane %v4080_v8, 4  ;;  %v4094_v36 = vsel %vm3708_vm0, %v3273_v59, -inf }
 0x303   : > { %v3560_v4 = vrot.slane %v3546_v40, %v8065_v18  ;;  %v4089_v20 = vmax.f32 %v4087_v2, %v4088_v11  ;;  %v4095_v33 = vrot.slane %v4094_v36, 4  ;;  %v4155_v35 = vrot.slane %v4154_v13, 1 }
 0x304   : > { %v3561_v9 = vcombine.high %v3553_v23, %v3553_v23  ;;  %v4549_v31 = vsel %vm3708_vm0, %v3553_v23, -inf  ;;  %v4076_v25 = vrot.slane %v4075_v6, 2  ;;  %v4082_v44 = vmax.f32 %v4080_v8, %v4081_v29 }
 0x305   : > { %v4550_v28 = vrot.slane %v4549_v31, 4  ;;  %v4090_v43 = vrot.slane %v4089_v20, 2  ;;  %v4096_v5 = vmax.f32 %v4094_v36, %v4095_v33  ;;  %v3562_v62 = vcombine.high %v3560_v4, %v3560_v4 }
 0x306   : > { %v4556_v12 = vsel %vm3708_vm0, %v3561_v9, -inf  ;;  %v4077_v45 = vmax.f32 %v4075_v6, %v4076_v25  ;;  %v4083_v50 = vrot.slane %v4082_v44, 2  ;;  %v4563_v58 = vsel %vm3708_vm0, %v3560_v4, -inf }
 0x307   : > { %v4557_v16 = vrot.slane %v4556_v12, 4  ;;  %v4149_v48 = vmax.f32 %v4147_v53, %v4148_v57  ;;  %v4091_v38 = vmax.f32 %v4089_v20, %v4090_v43  ;;  %v4097_v3 = vrot.slane %v4096_v5, 2 }
 0x308   : > { %v4551_v24 = vmax.f32 %v4549_v31, %v4550_v28  ;;  %v4156_v56 = vmax.f32 %v4154_v13, %v4155_v35  ;;  %v4690_v54 = vsel %vm9635_vm5, %v4135_v10, -inf  ;;  %v4078_v61 = vrot.slane %v4077_v45, 1 }
 0x309   : > { %v4084_v55 = vmax.f32 %v4082_v44, %v4083_v50  ;;  %v4092_v21 = vrot.slane %v4091_v38, 1  ;;  %v4098_v39 = vmax.f32 %v4096_v5, %v4097_v3  ;;  %v4564_v37 = vrot.slane %v4563_v58, 4 }
 0x30a   : > { %v4570_v49 = vsel %vm3708_vm0, %v3562_v62, -inf  ;;  %v4693_v63 = vsel %vm9636_vm2, %v4142_v22, -inf  ;;  %v4079_v15 = vmax.f32 %v4077_v45, %v4078_v61  ;;  %v4558_v19 = vmax.f32 %v4556_v12, %v4557_v16  ;;  %vm9642_vm2 = vmmov %vm9512_vm1 }
 0x30b   : > { %v4085_v59 = vrot.slane %v4084_v55, 1  ;;  %v4696_v53 = vsel %vm9637_vm9, %v4149_v48, -inf  ;;  %v4093_v57 = vmax.f32 %v4091_v38, %v4092_v21  ;;  %v4099_v2 = vrot.slane %v4098_v39, 1  ;;  %vm9643_vm9 = vmmov %vm9512_vm1 }
 0x30c   : > { %v4552_v40 = vrot.slane %v4551_v24, 2  ;;  %v4699_v13 = vsel %vm9638_vm3, %v4156_v56, -inf  ;;  %v4689_v8 = vsel %vm9639_vm12, %v4079_v15, -inf  ;;  %v4571_v11 = vrot.slane %v4570_v49, 4  ;;  %vm9645_vm12 = vmmov %vm9512_vm1 }
 0x30d   : > { %v4086_v10 = vmax.f32 %v4084_v55, %v4085_v59  ;;  %v4100_v23 = vmax.f32 %v4098_v39, %v4099_v2  ;;  %v4691_v6 = vmax.f32 %v4689_v8, %v4690_v54  ;;  %v4695_v29 = vsel %vm9512_vm1, %v4093_v57, -inf }
 0x30e   : > { %v4565_v36 = vmax.f32 %v4563_v58, %v4564_v37  ;;  %v5590_v22 = vpack.c.bf16 %v8246_v27, %v8246_v27  ;;  %v4697_v20 = vmax.f32 %v4695_v29, %v4696_v53  ;;  %v4559_v33 = vrot.slane %v4558_v19, 2 }
 0x30f   : > { %v4692_v4 = vsel %vm9640_vm11, %v4086_v10, -inf  ;;  %v4698_v31 = vsel %vm9641_vm15, %v4100_v23, -inf  ;;  %v5580_v35 = vpack.c.bf16 %v4691_v6, %v4691_v6  ;;  %v8845_v25 = vmax.f32 %v4551_v24, %v4552_v40  ;;  %vm9646_vm11 = vmmov %vm9512_vm1 }
 0x310   : > { %v4694_v9 = vmax.f32 %v4692_v4, %v4693_v63  ;;  %v5089_v44 = vunpack.c.l.b16 %v5588_v51  ;;  %v4700_v28 = vmax.f32 %v4698_v31, %v4699_v13  ;;  %v5582_v43 = vpack.c.bf16 %v4697_v20, %v4697_v20  ;;  %vm9647_vm15 = vmmov %vm9512_vm1 }
 0x311   : > { %v4572_v5 = vmax.f32 %v4570_v49, %v4571_v11  ;;  %v5090_v27 = vunpack.c.l.b16 %v5589_v60  ;;  %v5081_v12 = vunpack.c.l.b16 %v5580_v35  ;;  %v4566_v45 = vrot.slane %v4565_v36, 2 }
 0x312   : > { %v5581_v62 = vpack.c.bf16 %v4694_v9, %v4694_v9  ;;  %v5091_v50 = vunpack.c.l.b16 %v5590_v22  ;;  %v5607_v16 = vpack.c.bf16 %v8742_v30, %v8742_v30  ;;  %v5583_v58 = vpack.c.bf16 %v4700_v28, %v4700_v28 }
 0x313   : > { %v4560_v48 = vmax.f32 %v4558_v19, %v4559_v33  ;;  %v5148_v41 = vsel %vm5123_vm4, %v5081_v12, %v8822_v14  ;;  %v4554_v51 = vrot.slane %v8845_v25, 1  ;;  %v2910_v42 = vadd.f32 %v8683_v0, %v8561_v47 }
 0x314   : > { %v5082_v38 = vunpack.c.l.b16 %v5581_v62  ;;  %v5083_v60 = vunpack.c.l.b16 %v5582_v43  ;;  %v5084_v3 = vunpack.c.l.b16 %v5583_v58  ;;  %v4573_v24 = vrot.slane %v4572_v5, 2 }
 0x315   : > { %v2921_v56 = vadd.f32 %v8683_v0, %v8563_v32  ;;  %v4567_v61 = vmax.f32 %v4565_v36, %v4566_v45  ;;  %v2952_v55 = vmax.f32 %v2910_v42, 0.0  ;;  %vm2990_vm5 = vcmask 253952  }
 0x316   : > { %v5149_v54 = vsel %vm5125_vm6, %v5082_v38, %v5148_v41  ;;  %v5151_v21 = vsel %vm5129_vm10, %v8261_v26, %v5084_v3  ;;  %v4561_v47 = vrot.slane %v4560_v48, 1  ;;  %3003 = vst.msk [vmem:[%s7993_s22 + $0x28] sm:$0x1] %vm2990_vm5, %v9187_v7  ;;  %v4574_v59 = vmax.f32 %v4572_v5, %v4573_v24 }
 0x317   : > { %v5150_v14 = vsel %vm5127_vm14, %v5083_v60, %v5149_v54  ;;  %v2955_v39 = vmax.f32 %v2921_v56, 0.0  ;;  %v5152_v32 = vsel %vm5117_vm7, %v8747_v34, %v5151_v21  ;;  %2984 = vst.msk [vmem:[%s8070_s30 + $0xe0] sm:$0xff] %vm9642_vm2, %v2952_v55  ;;  %v3512_v49 = vcombine.high %v2952_v55, %v2952_v55  ;;  %vm9648_vm2 = vmmov %vm9512_vm1 }
 0x318   : > { %v5182_v37 = vpack.c.b16 %v5150_v14, %v5150_v14  ;;  %v3519_v63 = vrot.slane %v2952_v55, %v8065_v18  ;;  %v5153_v15 = vsel %vm5119_vm8, %v8796_v46, %v5152_v32  ;;  %vm9644_vm3 = vcmask 1044484  }
 0x319   : > { %2987 = vst.msk [vmem:[%s8070_s30 + $0xf8] sm:$0xff] %vm9643_vm9, %v2955_v39  ;;  %v3563_v26 = vcombine.high %v2955_v39, %v2955_v39  ;;  %v3570_v19 = vrot.slane %v2955_v39, %v8065_v18  ;;  %v5154_v7 = vsel %vm9644_vm3, %v8806_v17, %v5153_v15  ;;  %v3526_v34 = vrot.slane %v3512_v49, %v8065_v18  ;;  %vm9649_vm9 = vmmov %vm9512_vm1 }
 0x31a   : > { %5202 = vst.msk [vmem:[%s7993_s22 + $0x10] sm:$0xf] %vm2988_vm13, %v5182_v37  ;;  %v3527_v53 = vcombine.high %v3519_v63, %v3519_v63  ;;  %v4493_v57 = vsel %vm3708_vm0, %v3519_v63, -inf  ;;  %v5155_v2 = vsel %vm5123_vm4, %v5089_v44, %v5154_v7  ;;  %v4568_v4 = vrot.slane %v4567_v61, 1  ;;  %vm9650_vm3 = vmmov %vm9512_vm1 }
 0x31b   : > { %v4494_v40 = vrot.slane %v4493_v57, 4  ;;  %v3577_v46 = vrot.slane %v3563_v26, %v8065_v18  ;;  %v3578_v13 = vcombine.high %v3570_v19, %v3570_v19  ;;  %v5156_v10 = vsel %vm5125_vm6, %v5090_v27, %v5155_v2 }
 0x31c   : > { %v3528_v8 = vcombine.high %v3526_v34, %v3526_v34  ;;  %v4500_v11 = vsel %vm3708_vm0, %v3527_v53, -inf  ;;  %v4507_v17 = vsel %vm3708_vm0, %v3526_v34, -inf  ;;  %v5157_v23 = vsel %vm5127_vm14, %v5091_v50, %v5156_v10 }
 0x31d   : > { %v4495_v6 = vmax.f32 %v4493_v57, %v4494_v40  ;;  %v4501_v29 = vrot.slane %v4500_v11, 4  ;;  %v4508_v36 = vrot.slane %v4507_v17, 4  ;;  %v5183_v22 = vpack.c.b16 %v5157_v23, %v5157_v23 }
 0x31e   : > { %v4514_v20 = vsel %vm3708_vm0, %v3528_v8, -inf  ;;  %v4577_v33 = vsel %vm3708_vm0, %v3570_v19, -inf  ;;  %v4555_v28 = vmax.f32 %v8845_v25, %v4554_v51  ;;  %v4575_v43 = vrot.slane %v4574_v59, 1 }
 0x31f   : > { %v4496_v9 = vrot.slane %v4495_v6, 2  ;;  %v4502_v31 = vmax.f32 %v4500_v11, %v4501_v29  ;;  %v4509_v35 = vmax.f32 %v4507_v17, %v4508_v36  ;;  %v4515_v44 = vrot.slane %v4514_v20, 4  ;;  %5203 = vst.msk [vmem:[%s7993_s22 + $0x14] sm:$0xf] %vm2988_vm13, %v5183_v22 }
 0x320   : > { %v3579_v5 = vcombine.high %v3577_v46, %v3577_v46  ;;  %v4584_v27 = vsel %vm3708_vm0, %v3578_v13, -inf  ;;  %v4562_v58 = vmax.f32 %v4560_v48, %v4561_v47  ;;  %v4569_v38 = vmax.f32 %v4567_v61, %v4568_v4 }
 0x321   : > { %v4497_v62 = vmax.f32 %v4495_v6, %v4496_v9  ;;  %v4503_v12 = vrot.slane %v4502_v31, 2  ;;  %v4510_v45 = vrot.slane %v4509_v35, 2  ;;  %v4516_v50 = vmax.f32 %v4514_v20, %v4515_v44  ;;  %v2993_v20 = vld [vmem:[%s7993_s22 + $0x4] sm:$0x1] }
 0x322   : > { %v4578_v41 = vrot.slane %v4577_v33, 4  ;;  %v4591_v42 = vsel %vm3708_vm0, %v3577_v46, -inf  ;;  %v4576_v54 = vmax.f32 %v4574_v59, %v4575_v43  ;;  %v4774_v25 = vsel %vm9645_vm12, %v4555_v28, -inf  ;;  %v2999_v28 = vld [vmem:[%s7993_s22 + $0x24] sm:$0xf] }
 0x323   : > { %v4498_v60 = vrot.slane %v4497_v62, 1  ;;  %v4504_v3 = vmax.f32 %v4502_v31, %v4503_v12  ;;  %v4511_v24 = vmax.f32 %v4509_v35, %v4510_v45  ;;  %v4517_v56 = vrot.slane %v4516_v50, 2 }
 0x324   : > { %v4585_v51 = vrot.slane %v4584_v27, 4  ;;  %v4598_v55 = vsel %vm3708_vm0, %v3579_v5, -inf  ;;  %v4777_v48 = vsel %vm9512_vm1, %v4562_v58, -inf  ;;  %v4780_v61 = vsel %vm9646_vm11, %v4569_v38, -inf }
 0x325   : > { %v4499_v14 = vmax.f32 %v4497_v62, %v4498_v60  ;;  %v4505_v21 = vrot.slane %v4504_v3, 1  ;;  %v4512_v39 = vrot.slane %v4511_v24, 1  ;;  %v4518_v32 = vmax.f32 %v4516_v50, %v4517_v56 }
 0x326   : > { %v4579_v47 = vmax.f32 %v4577_v33, %v4578_v41  ;;  %v4592_v37 = vrot.slane %v4591_v42, 4  ;;  %v5108_v26 = vunpack.c.l.b16 %v5607_v16  ;;  %v4783_v19 = vsel %vm9648_vm2, %v4576_v54, -inf }
 0x327   : > { %v4506_v49 = vmax.f32 %v4504_v3, %v4505_v21  ;;  %v4513_v63 = vmax.f32 %v4511_v24, %v4512_v39  ;;  %v4519_v15 = vrot.slane %v4518_v32, 1  ;;  %v4773_v59 = vsel %vm9647_vm15, %v4499_v14, -inf }
 0x328   : > { %v4775_v7 = vmax.f32 %v4773_v59, %v4774_v25  ;;  %v4599_v34 = vrot.slane %v4598_v55, 4  ;;  %v4586_v40 = vmax.f32 %v4584_v27, %v4585_v51  ;;  %vm2991_vm12 = vsmask.f32 256 }
 0x329   : > { %v4520_v53 = vmax.f32 %v4518_v32, %v4519_v15  ;;  %v4776_v57 = vsel %vm9649_vm9, %v4506_v49, -inf  ;;  %v4779_v2 = vsel %vm9650_vm3, %v4513_v63, -inf  ;;  %v4580_v16 = vrot.slane %v4579_v47, 2  ;;  %vm8919_vm11 = vmand %vm2990_vm5, %vm2991_vm12 }
 0x32a   : > { %v4778_v46 = vmax.f32 %v4776_v57, %v4777_v48  ;;  %v4781_v13 = vmax.f32 %v4779_v2, %v4780_v61  ;;  %v5608_v10 = vpack.c.bf16 %v4775_v7, %v4775_v7  ;;  %v8910_v8 = vmax.f32 %v4591_v42, %v4592_v37  ;;  %vm9653_vm5 = vmmov %vm9512_vm1 }
 0x32b   : > { %v4782_v30 = vsel %vm9512_vm1, %v4520_v53, -inf  ;;  %v2913_v11 = vadd.f32 %v8683_v0, %v8570_v52  ;;  %v4587_v36 = vrot.slane %v4586_v40, 2  ;;  %v8916_v22 = vmax.f32 %v4598_v55, %v4599_v34 }
 0x32c   : > { %v4784_v17 = vmax.f32 %v4782_v30, %v4783_v19  ;;  %v5609_v23 = vpack.c.bf16 %v4778_v46, %v4778_v46  ;;  %v5610_v6 = vpack.c.bf16 %v4781_v13, %v4781_v13  ;;  %v5109_v29 = vunpack.c.l.b16 %v5608_v10 }
 0x32d   : > { %v8930_v31 = vmax.f32 %v4579_v47, %v4580_v16  ;;  %v4594_v35 = vrot.slane %v8910_v8, 2  ;;  %v2953_v44 = vmax.f32 %v2913_v11, 0.0  ;;  %v2994_v27 = vsel %vm8919_vm11, 0, %v2993_v20 }
 0x32e   : > { %v5611_v33 = vpack.c.bf16 %v4784_v17, %v4784_v17  ;;  %v5110_v9 = vunpack.c.l.b16 %v5609_v23  ;;  %v5111_v52 = vunpack.c.l.b16 %v5610_v6  ;;  %v5172_v0 = vsel %vm5129_vm10, %v5109_v29, %v5108_v26  ;;  %2995 = vst [vmem:[%s7993_s22 + $0x4] sm:$0x1] %v2994_v27 }
 0x32f   : > { %vm2997_vm10 = vsmask.f32 7938  ;;  %v4601_v12 = vrot.slane %v8916_v22, 2  ;;  %2985 = vst.msk [vmem:[%s8070_s30 + $0xe8] sm:$0xff] %vm9653_vm5, %v2953_v44  ;;  %v3529_v50 = vcombine.high %v2953_v44, %v2953_v44  ;;  %v3536_v58 = vrot.slane %v2953_v44, %v8065_v18 }
 0x330   : > { %v5112_v43 = vunpack.c.l.b16 %v5611_v33  ;;  %v5173_v5 = vsel %vm5117_vm7, %v5110_v9, %v5172_v0  ;;  %vm8945_vm15 = vmand %vm2988_vm13, %vm2997_vm10  ;;  %v4588_v38 = vmax.f32 %v4586_v40, %v4587_v36  ;;  %vm9656_vm7 = vcmask 1044484  }
 0x331   : > { %v5174_v62 = vsel %vm5119_vm8, %v5111_v52, %v5173_v5  ;;  %v3000_v41 = vsel %vm8945_vm15, 0, %v2999_v28 }
 0x332   : > { %v8953_v42 = vsel %vm9656_vm7, %v5112_v43, %v5174_v62 }
 0x333   : > { %5842 = shalt.err (!%p5839_p7)
}
 0x334   : > { %s5843_s23 = scalar_lea.hbm %s8928_s13, 4096  ;;  %s5847_s6 = scalar_lea.hbm %s9036_s3, 8192 }
 0x335   : > { %p5844_p8 = scmp.ne.s32.totalorder %s8928_s13, %s5843_s23  ;;  %p5848_p1 = scmp.lt.u32.totalorder %s8928_s13, %s9036_s3 }
 0x336   : > { %p5849_p0 = scmp.lt.u32.totalorder %s5847_s6, %s5843_s23  ;;  %p5851_p6 = scmp.lt.u32.totalorder %s5843_s23, %s8928_s13 }
 0x337   : > { %p5845_p11 = pnand %p5844_p8, %p9657_p9 }
 0x338   : > { %p5850_p5 = por %p5849_p0, %p5848_p1 }
 0x339   : > { %p5846_p13 = pneg %p5845_p11 }
 0x33a   : > { %p5852_p10 = por %p5851_p6, %p5850_p5 }
 0x33c   : > { %p5853_p12 = pnand %p5852_p10, %p5846_p13 }
 0x33e   : > { %5856 = shalt.err (!%p5853_p12)
}
 0x33f   : > { %s5912_s10 = smov 128   ;;  %v4595_v60 = vmax.f32 %v8910_v8, %v4594_v35  ;;  %3001 = vst [vmem:[%s7993_s22 + $0x24] sm:$0xf] %v3000_v41  ;;  %v3543_v3 = vrot.slane %v3529_v50, %v8065_v18  ;;  %v3544_v24 = vcombine.high %v3536_v58, %v3536_v58  ;;  %v4521_v56 = vsel %vm3708_vm0, %v3536_v58, -inf  ;;  %v5197_v59 = vld [vmem:[%s7993_s22 + $0x4] sm:$0xf] }
 0x340   : > { %5699 = dma.vmem_to_hbm [thread:$0]  (%p9657_p9), %s8934_s11, 4096, %s8928_s13, %s8957_s14, %s5912_s10, %s5912_s10, %s5904_s7   ;;  %v5179_v54 = vpack.c.b16 %v8164_v1, %v8164_v1  ;;  %v4582_v25 = vrot.slane %v8930_v31, 1  ;;  %v4522_v51 = vrot.slane %v4521_v56, 4  ;;  %v4602_v55 = vmax.f32 %v8916_v22, %v4601_v12 }
 0x341   : > { %v3545_v14 = vcombine.high %v3543_v3, %v3543_v3  ;;  %v4528_v21 = vsel %vm3708_vm0, %v3544_v24, -inf  ;;  %v4535_v39 = vsel %vm3708_vm0, %v3543_v3, -inf  ;;  %v4589_v61 = vrot.slane %v4588_v38, 1 }
 0x342   : > { %v4523_v32 = vmax.f32 %v4521_v56, %v4522_v51  ;;  %v4529_v48 = vrot.slane %v4528_v21, 4  ;;  %v4536_v18 = vrot.slane %v4535_v39, 4  ;;  %v4596_v47 = vrot.slane %v4595_v60, 1 }
 0x343   : > { %v4542_v37 = vsel %vm3708_vm0, %v3545_v14, -inf  ;;  %v4583_v26 = vmax.f32 %v8930_v31, %v4582_v25  ;;  %v4603_v19 = vrot.slane %v4602_v55, 1  ;;  %v5198_v7 = vsel %vm8945_vm15, %v5179_v54, %v5197_v59  ;;  %vm9658_vm0 = vmmov %vm9512_vm1 }
 0x344   : > { %v4524_v1 = vrot.slane %v4523_v32, 2  ;;  %v4530_v49 = vmax.f32 %v4528_v21, %v4529_v48  ;;  %v4537_v63 = vmax.f32 %v4535_v39, %v4536_v18  ;;  %v4543_v15 = vrot.slane %v4542_v37, 4  ;;  %5199 = vst [vmem:[%s7993_s22 + $0x4] sm:$0xf] %v5198_v7  ;;  %vm9659_vm8 = vmmov %vm9658_vm0 }
 0x345   : > { %v4590_v40 = vmax.f32 %v4588_v38, %v4589_v61  ;;  %v4597_v46 = vmax.f32 %v4595_v60, %v4596_v47  ;;  %v4604_v8 = vmax.f32 %v4602_v55, %v4603_v19  ;;  %v4786_v11 = vsel %vm9658_vm0, %v4583_v26, -inf  ;;  %vm9660_vm2 = vmmov %vm9658_vm0 }
 0x346   : > { %v4525_v34 = vmax.f32 %v4523_v32, %v4524_v1  ;;  %v4531_v53 = vrot.slane %v4530_v49, 2  ;;  %v4538_v57 = vrot.slane %v4537_v63, 2  ;;  %v4544_v2 = vmax.f32 %v4542_v37, %v4543_v15  ;;  %vm9661_vm9 = vmmov %vm9658_vm0  ;;  %v5207_v38 = vld [vmem:[%s7993_s22 + $0x24] sm:$0x1] }
 0x347   : > { %v4789_v36 = vsel %vm9659_vm8, %v4590_v40, -inf  ;;  %v4792_v22 = vsel %vm9660_vm2, %v4597_v46, -inf  ;;  %vm9662_vm3 = vmmov %vm9658_vm0 }
 0x348   : > { %v4526_v13 = vrot.slane %v4525_v34, 1  ;;  %v4532_v10 = vmax.f32 %v4530_v49, %v4531_v53  ;;  %v4539_v30 = vmax.f32 %v4537_v63, %v4538_v57  ;;  %v4545_v16 = vrot.slane %v4544_v2, 2  ;;  %vm9663_vm12 = vmmov %vm9658_vm0 }
 0x349   : > { %v4795_v31 = vsel %vm9662_vm3, %v4604_v8, -inf  ;;  %vm9664_vm1 = vmmov %vm9658_vm0 }
 0x34a   : > { %v4527_v17 = vmax.f32 %v4525_v34, %v4526_v13  ;;  %v4533_v23 = vrot.slane %v4532_v10, 1  ;;  %v4540_v6 = vrot.slane %v4539_v30, 1  ;;  %v4546_v29 = vmax.f32 %v4544_v2, %v4545_v16  ;;  %vm9665_vm10 = vmmov %vm9658_vm0 }
 0x34c   : > { %v4534_v20 = vmax.f32 %v4532_v10, %v4533_v23  ;;  %v4541_v33 = vmax.f32 %v4539_v30, %v4540_v6  ;;  %v4547_v9 = vrot.slane %v4546_v29, 1  ;;  %v4785_v52 = vsel %vm9661_vm9, %v4527_v17, -inf }
 0x34d   : > { %v4787_v0 = vmax.f32 %v4785_v52, %v4786_v11 }
 0x34e   : > { %v4548_v35 = vmax.f32 %v4546_v29, %v4547_v9  ;;  %v4788_v44 = vsel %vm9663_vm12, %v4534_v20, -inf  ;;  %v4791_v28 = vsel %vm9664_vm1, %v4541_v33, -inf }
 0x34f   : > { %v4790_v43 = vmax.f32 %v4788_v44, %v4789_v36  ;;  %v4793_v5 = vmax.f32 %v4791_v28, %v4792_v22  ;;  %v5612_v27 = vpack.c.bf16 %v4787_v0, %v4787_v0 }
 0x350   : > { %v4794_v62 = vsel %vm9665_vm10, %v4548_v35, -inf }
 0x351   : > { %v4796_v12 = vmax.f32 %v4794_v62, %v4795_v31  ;;  %v5613_v45 = vpack.c.bf16 %v4790_v43, %v4790_v43  ;;  %v5614_v50 = vpack.c.bf16 %v4793_v5, %v4793_v5  ;;  %v5113_v58 = vunpack.c.l.b16 %v5612_v27 }
 0x353   : > { %v5114_v41 = vunpack.c.l.b16 %v5613_v45  ;;  %v5176_v60 = vsel %vm5123_vm4, %v5113_v58, %v8953_v42  ;;  %v5616_v3 = vpack.c.bf16 %v4796_v12, %v4796_v12  ;;  %v5115_v24 = vunpack.c.l.b16 %v5614_v50 }
 0x355   : > { %v5177_v56 = vsel %vm5125_vm6, %v5114_v41, %v5176_v60  ;;  %v5208_v54 = vsel %vm8919_vm11, %v5616_v3, %v5207_v38 }
 0x356   : > { %v5178_v25 = vsel %vm5127_vm14, %v5115_v24, %v5177_v56  ;;  %5209 = vst [vmem:[%s7993_s22 + $0x24] sm:$0x1] %v5208_v54 }
 0x357   : > { %v5186_v51 = vpack.c.b16 %v5178_v25, %v5178_v25 }
 0x359   : > { %5206 = vst.msk [vmem:[%s7993_s22 + $0x20] sm:$0xf] %vm2988_vm13, %v5186_v51 }
 0x35a PF: > { %p5711_p9 = scmp.ge.s32.totalorder %s5895_s18, 2  ;;  %s5247_s25 = sand.u32 1, %s5883_s15  }
 0x35b   : > { %p9666_p2 = scmp.ne.s32.totalorder %s9122_s26, 0  ;;  %s5248_s7 = scalar_lea.sflag [#allocation4], %s5247_s25 }
 0x35d   : > { %p5706_p3 = pnand %p5711_p9, %p9666_p2 }
 0x35f   : > { %5878 = dma.done.wait (!%p5706_p3), %s5248_s7, 4096  }
 0x360   : > { %5880 = vsyncadd (!%p5706_p3), %s5248_s7, 4294963200  ;;  %p16_p4 = scmp.ge.s32.totalorder %s5963_s21, 4   ;;  %s9667_s15 = smov %s5887_s16 }
 0x361   : > { %s9668_s16 = smov %s5891_s17  ;;  %s9669_s17 = smov %s5974_s24 }
 0x362   : > { %s9670_s18 = smov %s5963_s21  ;;  %18 = sbr.rel (!%p16_p4) target bundleno = 4 (0x4), region = 84 }
 0x369   :  { %5261 = vsyncpa [#allocation3], 1 }
 0x36a   :  { %5263 = vsyncpa [#allocation3 + $0x1], 1 }
 0x36b   :  { %5264 = vsyncpa [#allocation4], 1 }
 0x36c   :  { %5266 = vsyncpa [#allocation4 + $0x1], 1 }

// kernel: vgg_forward.9
= control target key start
LH: loop header
LB: loop body
LE: loop exit
PB: predicated region body
PF: predicated region fallthrough
CT: control target
= control target key end

     0   :  { %v3138_v36 = vmov 1983009808   ;;  %v34_v38 = vlaneseq  ;;  %s4106_s0 = inlined_call_operand.vmem [shape: f32[2,512], index: 0, kind: input, shape index: {}]   ;;  %s4107_s1 = inlined_call_operand.vmem [shape: bf16[512,512], index: 1, kind: input, shape index: {}]   ;;  %s4108_s2 = inlined_call_operand.vmem [shape: f32[1,512], index: 2, kind: input, shape index: {}, may-alias: {2,4}]   ;;  %s4109_s3 = inlined_call_operand.vmem [shape: bf16[512,512], index: 3, kind: input, shape index: {}]   ;;  %s4110_s4 = inlined_call_operand.vmem [shape: f32[1,512], index: 4, kind: input, shape index: {}, may-alias: {2,4}]   ;;  %s4111_s5 = inlined_call_operand.vmem [shape: bf16[512,10], index: 5, kind: input, shape index: {}]   ;;  %s4112_s6 = inlined_call_operand.vmem [shape: f32[1,10], index: 6, kind: input, shape index: {}]   ;;  %s4113_s7 = inlined_call_operand.hbm [shape: f32[2,10], index: 7, kind: output, shape index: {}]  }
   0x1   :  { %v2697_v0 = vld [vmem:[%s4107_s1 + $0x4] ss:$16 sps:$4 sm:$0xff]   ;;  %v2699_v1 = vld [vmem:[%s4107_s1 + $0xc] ss:$16 sps:$4 sm:$0xff]   ;;  %v2701_v2 = vld [vmem:[%s4107_s1] ss:$16 sps:$4 sm:$0xff]   ;;  %v32_v37 = vunpack.c.l.s4 %v3138_v36 }
   0x2   :  { %845 = vmatprep.subr.bf16.mxu0 %v2697_v0  ;;  %v2702_v3 = vld [vmem:[%s4107_s1 + $0x8] ss:$16 sps:$4 sm:$0xff]   ;;  %927 = vmatprep.subr.bf16.mxu1 %v2699_v1  ;;  %v2703_v4 = vld [vmem:[%s4107_s1 + $0x24] ss:$16 sps:$4 sm:$0xff]   ;;  %v2705_v5 = vld [vmem:[%s4107_s1 + $0x2c] ss:$16 sps:$4 sm:$0xff]  }
   0x3   :  { %846 = vmatpush1.bf16.msra.mxu0 %v2701_v2  ;;  %928 = vmatpush1.bf16.msra.mxu1 %v2702_v3  ;;  %v2707_v6 = vld [vmem:[%s4107_s1 + $0x20] ss:$16 sps:$4 sm:$0xff]   ;;  %v2708_v7 = vld [vmem:[%s4107_s1 + $0x28] ss:$16 sps:$4 sm:$0xff]   ;;  %v2709_v8 = vld [vmem:[%s4107_s1 + $0x44] ss:$16 sps:$4 sm:$0xff]   ;;  %v33_v42 = vunpack.c.0.s8 %v32_v37 }
   0x4   :  { %847 = vmatprep.subr.bf16.mxu0 %v2703_v4  ;;  %929 = vmatprep.subr.bf16.mxu1 %v2705_v5  ;;  %v2711_v9 = vld [vmem:[%s4107_s1 + $0x4c] ss:$16 sps:$4 sm:$0xff]   ;;  %v2713_v10 = vld [vmem:[%s4107_s1 + $0x40] ss:$16 sps:$4 sm:$0xff]   ;;  %v2714_v11 = vld [vmem:[%s4107_s1 + $0x48] ss:$16 sps:$4 sm:$0xff]  }
   0x5   :  { %v2715_v12 = vld [vmem:[%s4107_s1 + $0x64] ss:$16 sps:$4 sm:$0xff]   ;;  %v2717_v13 = vld [vmem:[%s4107_s1 + $0x6c] ss:$16 sps:$4 sm:$0xff]   ;;  %v2719_v14 = vld [vmem:[%s4107_s1 + $0x60] ss:$16 sps:$4 sm:$0xff]  }
   0x6   :  { %v2720_v15 = vld [vmem:[%s4107_s1 + $0x68] ss:$16 sps:$4 sm:$0xff]   ;;  %v2721_v16 = vld [vmem:[%s4107_s1 + $0x84] ss:$16 sps:$4 sm:$0xff]   ;;  %v2723_v17 = vld [vmem:[%s4107_s1 + $0x8c] ss:$16 sps:$4 sm:$0xff]  }
   0x7   :  { %848 = vmatpush1.bf16.msra.mxu0 %v2707_v6  ;;  %930 = vmatpush1.bf16.msra.mxu1 %v2708_v7  ;;  %v2725_v18 = vld [vmem:[%s4107_s1 + $0x80] ss:$16 sps:$4 sm:$0xff]   ;;  %v2726_v19 = vld [vmem:[%s4107_s1 + $0x88] ss:$16 sps:$4 sm:$0xff]   ;;  %v2727_v20 = vld [vmem:[%s4107_s1 + $0xa4] ss:$16 sps:$4 sm:$0xff]  }
   0x8   :  { %849 = vmatprep.subr.bf16.mxu0 %v2709_v8  ;;  %931 = vmatprep.subr.bf16.mxu1 %v2711_v9  ;;  %v2729_v21 = vld [vmem:[%s4107_s1 + $0xac] ss:$16 sps:$4 sm:$0xff]   ;;  %v2731_v22 = vld [vmem:[%s4107_s1 + $0xa0] ss:$16 sps:$4 sm:$0xff]   ;;  %v2732_v23 = vld [vmem:[%s4107_s1 + $0xa8] ss:$16 sps:$4 sm:$0xff]  }
   0x9   :  { %v2733_v24 = vld [vmem:[%s4107_s1 + $0xc4] ss:$16 sps:$4 sm:$0xff]   ;;  %v2735_v25 = vld [vmem:[%s4107_s1 + $0xcc] ss:$16 sps:$4 sm:$0xff]   ;;  %v2737_v26 = vld [vmem:[%s4107_s1 + $0xc0] ss:$16 sps:$4 sm:$0xff]  }
   0xa   :  { %v2738_v27 = vld [vmem:[%s4107_s1 + $0xc8] ss:$16 sps:$4 sm:$0xff]   ;;  %v2739_v28 = vld [vmem:[%s4107_s1 + $0xe4] ss:$16 sps:$4 sm:$0xff]   ;;  %v2741_v29 = vld [vmem:[%s4107_s1 + $0xec] ss:$16 sps:$4 sm:$0xff]  }
   0xb   :  { %850 = vmatpush1.bf16.msra.mxu0 %v2713_v10  ;;  %932 = vmatpush1.bf16.msra.mxu1 %v2714_v11  ;;  %v2743_v30 = vld [vmem:[%s4107_s1 + $0xe0] ss:$16 sps:$4 sm:$0xff]   ;;  %v2744_v31 = vld [vmem:[%s4107_s1 + $0xe8] ss:$16 sps:$4 sm:$0xff]   ;;  %v2745_v32 = vld [vmem:[%s4107_s1 + $0x104] ss:$16 sps:$4 sm:$0xff]  }
   0xc   :  { %851 = vmatprep.subr.bf16.mxu0 %v2715_v12  ;;  %933 = vmatprep.subr.bf16.mxu1 %v2717_v13  ;;  %v2747_v33 = vld [vmem:[%s4107_s1 + $0x10c] ss:$16 sps:$4 sm:$0xff]   ;;  %v2749_v34 = vld [vmem:[%s4107_s1 + $0x100] ss:$16 sps:$4 sm:$0xff]   ;;  %v2750_v35 = vld [vmem:[%s4107_s1 + $0x108] ss:$16 sps:$4 sm:$0xff]  }
   0xd   :  { %v2751_v39 = vld [vmem:[%s4107_s1 + $0x124] ss:$16 sps:$4 sm:$0xff]   ;;  %v2753_v40 = vld [vmem:[%s4107_s1 + $0x12c] ss:$16 sps:$4 sm:$0xff]   ;;  %v2755_v41 = vld [vmem:[%s4107_s1 + $0x120] ss:$16 sps:$4 sm:$0xff]  }
   0xe   :  { %v3297_v43 = vshrl.u32 %v34_v38, 7  ;;  %v2756_v44 = vld [vmem:[%s4107_s1 + $0x128] ss:$16 sps:$4 sm:$0xff]   ;;  %v2757_v45 = vld [vmem:[%s4107_s1 + $0x144] ss:$16 sps:$4 sm:$0xff]  }
   0xf   :  { %852 = vmatpush1.bf16.msra.mxu0 %v2719_v14  ;;  %934 = vmatpush1.bf16.msra.mxu1 %v2720_v15  ;;  %v2759_v46 = vld [vmem:[%s4107_s1 + $0x14c] ss:$16 sps:$4 sm:$0xff]   ;;  %v2761_v47 = vld [vmem:[%s4107_s1 + $0x140] ss:$16 sps:$4 sm:$0xff]   ;;  %v2762_v48 = vld [vmem:[%s4107_s1 + $0x148] ss:$16 sps:$4 sm:$0xff]  }
  0x10   :  { %853 = vmatprep.subr.bf16.mxu0 %v2721_v16  ;;  %935 = vmatprep.subr.bf16.mxu1 %v2723_v17  ;;  %v36_v49 = vsub.s32 %v33_v42, %v3297_v43  ;;  %v2763_v50 = vld [vmem:[%s4107_s1 + $0x164] ss:$16 sps:$4 sm:$0xff]   ;;  %v2765_v51 = vld [vmem:[%s4107_s1 + $0x16c] ss:$16 sps:$4 sm:$0xff]   ;;  %v2767_v53 = vld [vmem:[%s4107_s1 + $0x160] ss:$16 sps:$4 sm:$0xff]  }
  0x11   :  { %v28_v52 = vld [vmem:[%s4106_s0] sm:$0xff]  ;;  %v2768_v55 = vld [vmem:[%s4107_s1 + $0x168] ss:$16 sps:$4 sm:$0xff]   ;;  %v2771_v57 = vld [vmem:[%s4107_s1 + $0x18c] ss:$16 sps:$4 sm:$0xff]  }
  0x12   :  { %v37_v54 = vrot.slane %v28_v52, %v36_v49  ;;  %v2769_v56 = vld [vmem:[%s4107_s1 + $0x184] ss:$16 sps:$4 sm:$0xff]   ;;  %v2773_v59 = vld [vmem:[%s4107_s1 + $0x180] ss:$16 sps:$4 sm:$0xff]   ;;  %v2774_v61 = vld [vmem:[%s4107_s1 + $0x188] ss:$16 sps:$4 sm:$0xff]   ;;  %v30_v4 = vcombine.high %v28_v52, %v28_v52 }
  0x13   :  { %854 = vmatpush1.bf16.msra.mxu0 %v2725_v18  ;;  %936 = vmatpush1.bf16.msra.mxu1 %v2726_v19  ;;  %v2775_v62 = vld [vmem:[%s4107_s1 + $0x1a4] ss:$16 sps:$4 sm:$0xff]   ;;  %v2777_v63 = vld [vmem:[%s4107_s1 + $0x1ac] ss:$16 sps:$4 sm:$0xff]   ;;  %v2779_v0 = vld [vmem:[%s4107_s1 + $0x1a0] ss:$16 sps:$4 sm:$0xff]  }
  0x14   :  { %855 = vmatprep.subr.bf16.mxu0 %v2727_v20  ;;  %937 = vmatprep.subr.bf16.mxu1 %v2729_v21  ;;  %v45_v58 = vcombine.high %v37_v54, %v37_v54  ;;  %v2780_v1 = vld [vmem:[%s4107_s1 + $0x1a8] ss:$16 sps:$4 sm:$0xff]   ;;  %v2781_v2 = vld [vmem:[%s4107_s1 + $0x1c4] ss:$16 sps:$4 sm:$0xff]   ;;  %v2783_v3 = vld [vmem:[%s4107_s1 + $0x1cc] ss:$16 sps:$4 sm:$0xff]   ;;  %v3372_v9 = vrot.slane %v30_v4, %v36_v49  ;;  %v51_v16 = vpack.c.bf16 %v37_v54, %v37_v54 }
  0x15   :  { %v2785_v5 = vld [vmem:[%s4107_s1 + $0x1c0] ss:$16 sps:$4 sm:$0xff]   ;;  %v2786_v6 = vld [vmem:[%s4107_s1 + $0x1c8] ss:$16 sps:$4 sm:$0xff]   ;;  %v2787_v7 = vld [vmem:[%s4107_s1 + $0x1e4] ss:$16 sps:$4 sm:$0xff]  }
  0x16   :  { %v52_v60 = vpack.c.bf16 %v45_v58, %v45_v58  ;;  %v2789_v8 = vld [vmem:[%s4107_s1 + $0x1ec] ss:$16 sps:$4 sm:$0xff]   ;;  %v2791_v10 = vld [vmem:[%s4107_s1 + $0x1e0] ss:$16 sps:$4 sm:$0xff]   ;;  %v2792_v11 = vld [vmem:[%s4107_s1 + $0x1e8] ss:$16 sps:$4 sm:$0xff]   ;;  %v46_v14 = vcombine.high %v3372_v9, %v3372_v9 }
  0x17   :  { %856 = vmatpush1.bf16.msra.mxu0 %v2731_v22  ;;  %938 = vmatpush1.bf16.msra.mxu1 %v2732_v23  ;;  %v2796_v12 = vld [vmem:[%s4107_s1 + $0x204] ss:$16 sps:$4 sm:$0xff]   ;;  %v2799_v13 = vld [vmem:[%s4107_s1 + $0x20c] ss:$16 sps:$4 sm:$0xff]   ;;  %v2794_v15 = vld [vmem:[%s4107_s1 + $0x200] ss:$16 sps:$4 sm:$0xff]  }
  0x18   :  { %857 = vmatprep.subr.bf16.mxu0 %v2733_v24  ;;  %939 = vmatprep.subr.bf16.mxu1 %v2735_v25  ;;  %v2797_v17 = vld [vmem:[%s4107_s1 + $0x208] ss:$16 sps:$4 sm:$0xff]   ;;  %v2802_v18 = vld [vmem:[%s4107_s1 + $0x224] ss:$16 sps:$4 sm:$0xff]   ;;  %v2805_v19 = vld [vmem:[%s4107_s1 + $0x22c] ss:$16 sps:$4 sm:$0xff]   ;;  %v54_v20 = vpack.c.bf16 %v46_v14, %v46_v14 }
  0x19   :  { %877 = vmatprep.mubr.bf16.mxu0 %v52_v60  ;;  %959 = vmatprep.mubr.bf16.mxu1 %v52_v60  ;;  %v2800_v21 = vld [vmem:[%s4107_s1 + $0x220] ss:$16 sps:$4 sm:$0xff]   ;;  %v2803_v22 = vld [vmem:[%s4107_s1 + $0x228] ss:$16 sps:$4 sm:$0xff]   ;;  %v2808_v23 = vld [vmem:[%s4107_s1 + $0x244] ss:$16 sps:$4 sm:$0xff]  }
  0x1a   :  { %v2811_v24 = vld [vmem:[%s4107_s1 + $0x24c] ss:$16 sps:$4 sm:$0xff]   ;;  %v2806_v25 = vld [vmem:[%s4107_s1 + $0x240] ss:$16 sps:$4 sm:$0xff]   ;;  %v2827_v38 = vld [vmem:[%s4107_s1 + $0x2a8] ss:$16 sps:$4 sm:$0xff]  }
  0x1b   :  { %858 = vmatpush1.bf16.msra.mxu0 %v2737_v26  ;;  %940 = vmatpush1.bf16.msra.mxu1 %v2738_v27  ;;  %v2809_v26 = vld [vmem:[%s4107_s1 + $0x248] ss:$16 sps:$4 sm:$0xff]   ;;  %v2814_v27 = vld [vmem:[%s4107_s1 + $0x264] ss:$16 sps:$4 sm:$0xff]   ;;  %v2829_v36 = vld [vmem:[%s4107_s1 + $0x2ac] ss:$16 sps:$4 sm:$0xff]  }
  0x1c   :  { %859 = vmatprep.subr.bf16.mxu0 %v2739_v28  ;;  %941 = vmatprep.subr.bf16.mxu1 %v2741_v29  ;;  %v2817_v28 = vld [vmem:[%s4107_s1 + $0x26c] ss:$16 sps:$4 sm:$0xff]   ;;  %v2812_v29 = vld [vmem:[%s4107_s1 + $0x260] ss:$16 sps:$4 sm:$0xff]   ;;  %v2833_v42 = vld [vmem:[%s4107_s1 + $0x2c8] ss:$16 sps:$4 sm:$0xff]  }
  0x1d   :  { %v2824_v37 = vld [vmem:[%s4107_s1 + $0x2a0] ss:$16 sps:$4 sm:$0xff]   ;;  %v2847_v49 = vld [vmem:[%s4107_s1 + $0x30c] ss:$16 sps:$4 sm:$0xff]   ;;  %v2850_v52 = vld [vmem:[%s4107_s1 + $0x324] ss:$16 sps:$4 sm:$0xff]  }
  0x1e   :  { %v2848_v54 = vld [vmem:[%s4107_s1 + $0x320] ss:$16 sps:$4 sm:$0xff]   ;;  %v2862_v60 = vld [vmem:[%s4107_s1 + $0x364] ss:$16 sps:$4 sm:$0xff]   ;;  %v2889_v14 = vld [vmem:[%s4107_s1 + $0x3ec] ss:$16 sps:$4 sm:$0xff]  }
  0x1f   :  { %860 = vmatpush1.bf16.msra.mxu0 %v2743_v30  ;;  %942 = vmatpush1.bf16.msra.mxu1 %v2744_v31  ;;  %v2815_v30 = vld [vmem:[%s4107_s1 + $0x268] ss:$16 sps:$4 sm:$0xff]   ;;  %v2820_v31 = vld [vmem:[%s4107_s1 + $0x284] ss:$16 sps:$4 sm:$0xff]   ;;  %v2854_v58 = vld [vmem:[%s4107_s1 + $0x340] ss:$16 sps:$4 sm:$0xff]  }
  0x20   :  { %861 = vmatprep.subr.bf16.mxu0 %v2745_v32  ;;  %943 = vmatprep.subr.bf16.mxu1 %v2747_v33  ;;  %v2823_v32 = vld [vmem:[%s4107_s1 + $0x28c] ss:$16 sps:$4 sm:$0xff]   ;;  %v2818_v33 = vld [vmem:[%s4107_s1 + $0x280] ss:$16 sps:$4 sm:$0xff]   ;;  %v2874_v4 = vld [vmem:[%s4107_s1 + $0x3a4] ss:$16 sps:$4 sm:$0xff]  }
  0x23   :  { %862 = vmatpush1.bf16.msra.mxu0 %v2749_v34  ;;  %944 = vmatpush1.bf16.msra.mxu1 %v2750_v35  ;;  %v2821_v34 = vld [vmem:[%s4107_s1 + $0x288] ss:$16 sps:$4 sm:$0xff]   ;;  %v2826_v35 = vld [vmem:[%s4107_s1 + $0x2a4] ss:$16 sps:$4 sm:$0xff]  }
  0x24   :  { %863 = vmatprep.subr.bf16.mxu0 %v2751_v39  ;;  %945 = vmatprep.subr.bf16.mxu1 %v2753_v40  ;;  %v2832_v39 = vld [vmem:[%s4107_s1 + $0x2c4] ss:$16 sps:$4 sm:$0xff]   ;;  %v2835_v40 = vld [vmem:[%s4107_s1 + $0x2cc] ss:$16 sps:$4 sm:$0xff]  }
  0x27   :  { %864 = vmatpush1.bf16.msra.mxu0 %v2755_v41  ;;  %946 = vmatpush1.bf16.msra.mxu1 %v2756_v44  ;;  %v2830_v41 = vld [vmem:[%s4107_s1 + $0x2c0] ss:$16 sps:$4 sm:$0xff]   ;;  %v2838_v44 = vld [vmem:[%s4107_s1 + $0x2e4] ss:$16 sps:$4 sm:$0xff]  }
  0x28   :  { %865 = vmatprep.subr.bf16.mxu0 %v2757_v45  ;;  %947 = vmatprep.subr.bf16.mxu1 %v2759_v46  ;;  %v2841_v45 = vld [vmem:[%s4107_s1 + $0x2ec] ss:$16 sps:$4 sm:$0xff]   ;;  %v2836_v46 = vld [vmem:[%s4107_s1 + $0x2e0] ss:$16 sps:$4 sm:$0xff]  }
  0x2b   :  { %866 = vmatpush1.bf16.msra.mxu0 %v2761_v47  ;;  %948 = vmatpush1.bf16.msra.mxu1 %v2762_v48  ;;  %v2839_v47 = vld [vmem:[%s4107_s1 + $0x2e8] ss:$16 sps:$4 sm:$0xff]   ;;  %v2844_v48 = vld [vmem:[%s4107_s1 + $0x304] ss:$16 sps:$4 sm:$0xff]  }
  0x2c   :  { %867 = vmatprep.subr.bf16.mxu0 %v2763_v50  ;;  %949 = vmatprep.subr.bf16.mxu1 %v2765_v51  ;;  %v2842_v50 = vld [vmem:[%s4107_s1 + $0x300] ss:$16 sps:$4 sm:$0xff]   ;;  %v2845_v51 = vld [vmem:[%s4107_s1 + $0x308] ss:$16 sps:$4 sm:$0xff]  }
  0x2f   :  { %868 = vmatpush1.bf16.msra.mxu0 %v2767_v53  ;;  %950 = vmatpush1.bf16.msra.mxu1 %v2768_v55  ;;  %v2853_v53 = vld [vmem:[%s4107_s1 + $0x32c] ss:$16 sps:$4 sm:$0xff]   ;;  %v2851_v55 = vld [vmem:[%s4107_s1 + $0x328] ss:$16 sps:$4 sm:$0xff]  }
  0x30   :  { %869 = vmatprep.subr.bf16.mxu0 %v2769_v56  ;;  %951 = vmatprep.subr.bf16.mxu1 %v2771_v57  ;;  %v2856_v56 = vld [vmem:[%s4107_s1 + $0x344] ss:$16 sps:$4 sm:$0xff]   ;;  %v2859_v57 = vld [vmem:[%s4107_s1 + $0x34c] ss:$16 sps:$4 sm:$0xff]  }
  0x33   :  { %870 = vmatpush1.bf16.msra.mxu0 %v2773_v59  ;;  %952 = vmatpush1.bf16.msra.mxu1 %v2774_v61  ;;  %v2857_v59 = vld [vmem:[%s4107_s1 + $0x348] ss:$16 sps:$4 sm:$0xff]   ;;  %v2865_v61 = vld [vmem:[%s4107_s1 + $0x36c] ss:$16 sps:$4 sm:$0xff]  }
  0x34   :  { %871 = vmatprep.subr.bf16.mxu0 %v2775_v62  ;;  %953 = vmatprep.subr.bf16.mxu1 %v2777_v63  ;;  %v2860_v62 = vld [vmem:[%s4107_s1 + $0x360] ss:$16 sps:$4 sm:$0xff]   ;;  %v2863_v63 = vld [vmem:[%s4107_s1 + $0x368] ss:$16 sps:$4 sm:$0xff]  }
  0x37   :  { %872 = vmatpush1.bf16.msra.mxu0 %v2779_v0  ;;  %954 = vmatpush1.bf16.msra.mxu1 %v2780_v1  ;;  %v2868_v0 = vld [vmem:[%s4107_s1 + $0x384] ss:$16 sps:$4 sm:$0xff]   ;;  %v2871_v1 = vld [vmem:[%s4107_s1 + $0x38c] ss:$16 sps:$4 sm:$0xff]  }
  0x38   :  { %873 = vmatprep.subr.bf16.mxu0 %v2781_v2  ;;  %955 = vmatprep.subr.bf16.mxu1 %v2783_v3  ;;  %v2866_v2 = vld [vmem:[%s4107_s1 + $0x380] ss:$16 sps:$4 sm:$0xff]   ;;  %v2869_v3 = vld [vmem:[%s4107_s1 + $0x388] ss:$16 sps:$4 sm:$0xff]  }
  0x3b   :  { %874 = vmatpush1.bf16.msra.mxu0 %v2785_v5  ;;  %956 = vmatpush1.bf16.msra.mxu1 %v2786_v6  ;;  %v2877_v5 = vld [vmem:[%s4107_s1 + $0x3ac] ss:$16 sps:$4 sm:$0xff]   ;;  %v2872_v6 = vld [vmem:[%s4107_s1 + $0x3a0] ss:$16 sps:$4 sm:$0xff]  }
  0x3c   :  { %875 = vmatprep.subr.bf16.mxu0 %v2787_v7  ;;  %957 = vmatprep.subr.bf16.mxu1 %v2789_v8  ;;  %v2875_v7 = vld [vmem:[%s4107_s1 + $0x3a8] ss:$16 sps:$4 sm:$0xff]   ;;  %v2880_v8 = vld [vmem:[%s4107_s1 + $0x3c4] ss:$16 sps:$4 sm:$0xff]  }
  0x3f   :  { %876 = vmatpush1.bf16.msra.mxu0 %v2791_v10  ;;  %958 = vmatpush1.bf16.msra.mxu1 %v2792_v11  ;;  %v2883_v10 = vld [vmem:[%s4107_s1 + $0x3cc] ss:$16 sps:$4 sm:$0xff]   ;;  %v2878_v11 = vld [vmem:[%s4107_s1 + $0x3c0] ss:$16 sps:$4 sm:$0xff]  }
  0x40   :  { %886 = vmatprep.subr.bf16.mxu0 %v2796_v12  ;;  %968 = vmatprep.subr.bf16.mxu1 %v2799_v13  ;;  %v2881_v12 = vld [vmem:[%s4107_s1 + $0x3c8] ss:$16 sps:$4 sm:$0xff]   ;;  %v2886_v13 = vld [vmem:[%s4107_s1 + $0x3e4] ss:$16 sps:$4 sm:$0xff]  }
  0x42   :  { %878 = vmatmul.mubr.bf16.vlgmr.msra.gmra.mrb[0].mxu0 %v51_v16  ;;  %960 = vmatmul.mubr.bf16.vlgmr.msra.gmra.mrb[0].mxu1 %v51_v16  ;;  %v2887_v16 = vld [vmem:[%s4107_s1 + $0x3e8] ss:$16 sps:$4 sm:$0xff]  }
  0x43   :  { %887 = vmatpush1.bf16.msra.mxu0 %v2794_v15  ;;  %969 = vmatpush1.bf16.msra.mxu1 %v2797_v17  ;;  %v2884_v15 = vld [vmem:[%s4107_s1 + $0x3e0] ss:$16 sps:$4 sm:$0xff]   ;;  %v2892_v17 = vld [vmem:[%s4109_s3 + $0x4] ss:$16 sps:$4 sm:$0xff]  }
  0x44   :  { %888 = vmatprep.subr.bf16.mxu0 %v2802_v18  ;;  %970 = vmatprep.subr.bf16.mxu1 %v2805_v19  ;;  %v2895_v18 = vld [vmem:[%s4109_s3 + $0xc] ss:$16 sps:$4 sm:$0xff]   ;;  %v2890_v19 = vld [vmem:[%s4109_s3] ss:$16 sps:$4 sm:$0xff]  }
  0x45   :  { %918 = vmatprep.mubr.bf16.mxu0 %v54_v20  ;;  %1000 = vmatprep.mubr.bf16.mxu1 %v54_v20  ;;  %v2893_v20 = vld [vmem:[%s4109_s3 + $0x8] ss:$16 sps:$4 sm:$0xff]  }
  0x47   :  { %889 = vmatpush1.bf16.msra.mxu0 %v2800_v21  ;;  %971 = vmatpush1.bf16.msra.mxu1 %v2803_v22  ;;  %v53_v21 = vpack.c.bf16 %v3372_v9, %v3372_v9  ;;  %v2898_v22 = vld [vmem:[%s4109_s3 + $0x24] ss:$16 sps:$4 sm:$0xff]   ;;  %v2899_v9 = vld [vmem:[%s4109_s3 + $0x28] ss:$16 sps:$4 sm:$0xff]  }
  0x48   :  { %890 = vmatprep.subr.bf16.mxu0 %v2808_v23  ;;  %972 = vmatprep.subr.bf16.mxu1 %v2811_v24  ;;  %v2901_v23 = vld [vmem:[%s4109_s3 + $0x2c] ss:$16 sps:$4 sm:$0xff]   ;;  %v2896_v24 = vld [vmem:[%s4109_s3 + $0x20] ss:$16 sps:$4 sm:$0xff]  }
  0x4b   :  { %891 = vmatpush1.bf16.msra.mxu0 %v2806_v25  ;;  %973 = vmatpush1.bf16.msra.mxu1 %v2809_v26  ;;  %v2904_v25 = vld [vmem:[%s4109_s3 + $0x44] ss:$16 sps:$4 sm:$0xff]   ;;  %v2907_v26 = vld [vmem:[%s4109_s3 + $0x4c] ss:$16 sps:$4 sm:$0xff]  }
  0x4c   :  { %892 = vmatprep.subr.bf16.mxu0 %v2814_v27  ;;  %974 = vmatprep.subr.bf16.mxu1 %v2817_v28  ;;  %v2902_v27 = vld [vmem:[%s4109_s3 + $0x40] ss:$16 sps:$4 sm:$0xff]   ;;  %v2905_v28 = vld [vmem:[%s4109_s3 + $0x48] ss:$16 sps:$4 sm:$0xff]  }
  0x4f   :  { %893 = vmatpush1.bf16.msra.mxu0 %v2812_v29  ;;  %975 = vmatpush1.bf16.msra.mxu1 %v2815_v30  ;;  %v2910_v29 = vld [vmem:[%s4109_s3 + $0x64] ss:$16 sps:$4 sm:$0xff]   ;;  %v2913_v30 = vld [vmem:[%s4109_s3 + $0x6c] ss:$16 sps:$4 sm:$0xff]  }
  0x50   :  { %894 = vmatprep.subr.bf16.mxu0 %v2820_v31  ;;  %976 = vmatprep.subr.bf16.mxu1 %v2823_v32  ;;  %v2908_v31 = vld [vmem:[%s4109_s3 + $0x60] ss:$16 sps:$4 sm:$0xff]   ;;  %v2911_v32 = vld [vmem:[%s4109_s3 + $0x68] ss:$16 sps:$4 sm:$0xff]  }
  0x53   :  { %895 = vmatpush1.bf16.msra.mxu0 %v2818_v33  ;;  %977 = vmatpush1.bf16.msra.mxu1 %v2821_v34  ;;  %v2916_v33 = vld [vmem:[%s4109_s3 + $0x84] ss:$16 sps:$4 sm:$0xff]   ;;  %v2919_v34 = vld [vmem:[%s4109_s3 + $0x8c] ss:$16 sps:$4 sm:$0xff]  }
  0x54   :  { %896 = vmatprep.subr.bf16.mxu0 %v2826_v35  ;;  %978 = vmatprep.subr.bf16.mxu1 %v2829_v36  ;;  %v2914_v35 = vld [vmem:[%s4109_s3 + $0x80] ss:$16 sps:$4 sm:$0xff]   ;;  %v2917_v36 = vld [vmem:[%s4109_s3 + $0x88] ss:$16 sps:$4 sm:$0xff]  }
  0x57   :  { %897 = vmatpush1.bf16.msra.mxu0 %v2824_v37  ;;  %979 = vmatpush1.bf16.msra.mxu1 %v2827_v38  ;;  %v2922_v37 = vld [vmem:[%s4109_s3 + $0xa4] ss:$16 sps:$4 sm:$0xff]   ;;  %v2925_v38 = vld [vmem:[%s4109_s3 + $0xac] ss:$16 sps:$4 sm:$0xff]  }
  0x58   :  { %898 = vmatprep.subr.bf16.mxu0 %v2832_v39  ;;  %980 = vmatprep.subr.bf16.mxu1 %v2835_v40  ;;  %v2920_v39 = vld [vmem:[%s4109_s3 + $0xa0] ss:$16 sps:$4 sm:$0xff]   ;;  %v2923_v40 = vld [vmem:[%s4109_s3 + $0xa8] ss:$16 sps:$4 sm:$0xff]  }
  0x5b   :  { %899 = vmatpush1.bf16.msra.mxu0 %v2830_v41  ;;  %981 = vmatpush1.bf16.msra.mxu1 %v2833_v42  ;;  %v2928_v41 = vld [vmem:[%s4109_s3 + $0xc4] ss:$16 sps:$4 sm:$0xff]   ;;  %v2931_v42 = vld [vmem:[%s4109_s3 + $0xcc] ss:$16 sps:$4 sm:$0xff]  }
  0x5c   :  { %900 = vmatprep.subr.bf16.mxu0 %v2838_v44  ;;  %982 = vmatprep.subr.bf16.mxu1 %v2841_v45  ;;  %v2926_v44 = vld [vmem:[%s4109_s3 + $0xc0] ss:$16 sps:$4 sm:$0xff]   ;;  %v2929_v45 = vld [vmem:[%s4109_s3 + $0xc8] ss:$16 sps:$4 sm:$0xff]  }
  0x5f   :  { %901 = vmatpush1.bf16.msra.mxu0 %v2836_v46  ;;  %983 = vmatpush1.bf16.msra.mxu1 %v2839_v47  ;;  %v2934_v46 = vld [vmem:[%s4109_s3 + $0xe4] ss:$16 sps:$4 sm:$0xff]   ;;  %v2937_v47 = vld [vmem:[%s4109_s3 + $0xec] ss:$16 sps:$4 sm:$0xff]  }
  0x60   :  { %902 = vmatprep.subr.bf16.mxu0 %v2844_v48  ;;  %984 = vmatprep.subr.bf16.mxu1 %v2847_v49  ;;  %v2932_v48 = vld [vmem:[%s4109_s3 + $0xe0] ss:$16 sps:$4 sm:$0xff]   ;;  %v2935_v49 = vld [vmem:[%s4109_s3 + $0xe8] ss:$16 sps:$4 sm:$0xff]  }
  0x63   :  { %903 = vmatpush1.bf16.msra.mxu0 %v2842_v50  ;;  %985 = vmatpush1.bf16.msra.mxu1 %v2845_v51  ;;  %v2940_v50 = vld [vmem:[%s4109_s3 + $0x104] ss:$16 sps:$4 sm:$0xff]   ;;  %v2943_v51 = vld [vmem:[%s4109_s3 + $0x10c] ss:$16 sps:$4 sm:$0xff]  }
  0x64   :  { %904 = vmatprep.subr.bf16.mxu0 %v2850_v52  ;;  %986 = vmatprep.subr.bf16.mxu1 %v2853_v53  ;;  %v2938_v52 = vld [vmem:[%s4109_s3 + $0x100] ss:$16 sps:$4 sm:$0xff]   ;;  %v2941_v53 = vld [vmem:[%s4109_s3 + $0x108] ss:$16 sps:$4 sm:$0xff]  }
  0x67   :  { %905 = vmatpush1.bf16.msra.mxu0 %v2848_v54  ;;  %987 = vmatpush1.bf16.msra.mxu1 %v2851_v55  ;;  %v2946_v54 = vld [vmem:[%s4109_s3 + $0x124] ss:$16 sps:$4 sm:$0xff]   ;;  %v2949_v55 = vld [vmem:[%s4109_s3 + $0x12c] ss:$16 sps:$4 sm:$0xff]  }
  0x68   :  { %906 = vmatprep.subr.bf16.mxu0 %v2856_v56  ;;  %988 = vmatprep.subr.bf16.mxu1 %v2859_v57  ;;  %v2944_v56 = vld [vmem:[%s4109_s3 + $0x120] ss:$16 sps:$4 sm:$0xff]   ;;  %v2947_v57 = vld [vmem:[%s4109_s3 + $0x128] ss:$16 sps:$4 sm:$0xff]  }
  0x6b   :  { %907 = vmatpush1.bf16.msra.mxu0 %v2854_v58  ;;  %989 = vmatpush1.bf16.msra.mxu1 %v2857_v59  ;;  %v2952_v58 = vld [vmem:[%s4109_s3 + $0x144] ss:$16 sps:$4 sm:$0xff]   ;;  %v2955_v59 = vld [vmem:[%s4109_s3 + $0x14c] ss:$16 sps:$4 sm:$0xff]  }
  0x6c   :  { %908 = vmatprep.subr.bf16.mxu0 %v2862_v60  ;;  %990 = vmatprep.subr.bf16.mxu1 %v2865_v61  ;;  %v2950_v60 = vld [vmem:[%s4109_s3 + $0x140] ss:$16 sps:$4 sm:$0xff]   ;;  %v2953_v61 = vld [vmem:[%s4109_s3 + $0x148] ss:$16 sps:$4 sm:$0xff]  }
  0x6f   :  { %909 = vmatpush1.bf16.msra.mxu0 %v2860_v62  ;;  %991 = vmatpush1.bf16.msra.mxu1 %v2863_v63 }
  0x70   :  { %910 = vmatprep.subr.bf16.mxu0 %v2868_v0  ;;  %992 = vmatprep.subr.bf16.mxu1 %v2871_v1 }
  0x73   :  { %911 = vmatpush1.bf16.msra.mxu0 %v2866_v2  ;;  %993 = vmatpush1.bf16.msra.mxu1 %v2869_v3 }
  0x74   :  { %912 = vmatprep.subr.bf16.mxu0 %v2874_v4  ;;  %994 = vmatprep.subr.bf16.mxu1 %v2877_v5 }
  0x77   :  { %913 = vmatpush1.bf16.msra.mxu0 %v2872_v6  ;;  %995 = vmatpush1.bf16.msra.mxu1 %v2875_v7 }
  0x78   :  { %914 = vmatprep.subr.bf16.mxu0 %v2880_v8  ;;  %996 = vmatprep.subr.bf16.mxu1 %v2883_v10 }
  0x7b   :  { %915 = vmatpush1.bf16.msra.mxu0 %v2878_v11  ;;  %997 = vmatpush1.bf16.msra.mxu1 %v2881_v12 }
  0x7c   :  { %916 = vmatprep.subr.bf16.mxu0 %v2886_v13  ;;  %998 = vmatprep.subr.bf16.mxu1 %v2889_v14 }
  0x7f   :  { %917 = vmatpush1.bf16.msra.mxu0 %v2884_v15  ;;  %999 = vmatpush1.bf16.msra.mxu1 %v2887_v16 }
  0x80   :  { %1807 = vmatprep.subr.bf16.mxu0 %v2892_v17  ;;  %1889 = vmatprep.subr.bf16.mxu1 %v2895_v18 }
  0x82   :  { %919 = vmatmul.mubr.bf16.vlgmr.msra.gmra.mrb[0].mxu0 %v53_v21  ;;  %1001 = vmatmul.mubr.bf16.vlgmr.msra.gmra.mrb[0].mxu1 %v53_v21 }
  0x83   :  { %1808 = vmatpush1.bf16.msra.mxu0 %v2890_v19  ;;  %1890 = vmatpush1.bf16.msra.mxu1 %v2893_v20 }
  0x84   :  { %1809 = vmatprep.subr.bf16.mxu0 %v2898_v22  ;;  %1891 = vmatprep.subr.bf16.mxu1 %v2901_v23 }
  0x87   :  { %1810 = vmatpush1.bf16.msra.mxu0 %v2896_v24  ;;  %1892 = vmatpush1.bf16.msra.mxu1 %v2899_v9 }
  0x88   :  { %1811 = vmatprep.subr.bf16.mxu0 %v2904_v25  ;;  %1893 = vmatprep.subr.bf16.mxu1 %v2907_v26 }
  0x8b   :  { %1812 = vmatpush1.bf16.msra.mxu0 %v2902_v27  ;;  %1894 = vmatpush1.bf16.msra.mxu1 %v2905_v28 }
  0x8c   :  { %1813 = vmatprep.subr.bf16.mxu0 %v2910_v29  ;;  %1895 = vmatprep.subr.bf16.mxu1 %v2913_v30 }
  0x8f   :  { %1814 = vmatpush1.bf16.msra.mxu0 %v2908_v31  ;;  %1896 = vmatpush1.bf16.msra.mxu1 %v2911_v32 }
  0x90   :  { %1815 = vmatprep.subr.bf16.mxu0 %v2916_v33  ;;  %1897 = vmatprep.subr.bf16.mxu1 %v2919_v34 }
  0x93   :  { %1816 = vmatpush1.bf16.msra.mxu0 %v2914_v35  ;;  %1898 = vmatpush1.bf16.msra.mxu1 %v2917_v36 }
  0x94   :  { %1817 = vmatprep.subr.bf16.mxu0 %v2922_v37  ;;  %1899 = vmatprep.subr.bf16.mxu1 %v2925_v38 }
  0x97   :  { %1818 = vmatpush1.bf16.msra.mxu0 %v2920_v39  ;;  %1900 = vmatpush1.bf16.msra.mxu1 %v2923_v40 }
  0x98   :  { %1819 = vmatprep.subr.bf16.mxu0 %v2928_v41  ;;  %1901 = vmatprep.subr.bf16.mxu1 %v2931_v42 }
  0x9b   :  { %1820 = vmatpush1.bf16.msra.mxu0 %v2926_v44  ;;  %1902 = vmatpush1.bf16.msra.mxu1 %v2929_v45 }
  0x9c   :  { %1821 = vmatprep.subr.bf16.mxu0 %v2934_v46  ;;  %1903 = vmatprep.subr.bf16.mxu1 %v2937_v47 }
  0x9f   :  { %1822 = vmatpush1.bf16.msra.mxu0 %v2932_v48  ;;  %1904 = vmatpush1.bf16.msra.mxu1 %v2935_v49 }
  0xa0   :  { %1823 = vmatprep.subr.bf16.mxu0 %v2940_v50  ;;  %1905 = vmatprep.subr.bf16.mxu1 %v2943_v51 }
  0xa3   :  { %1824 = vmatpush1.bf16.msra.mxu0 %v2938_v52  ;;  %1906 = vmatpush1.bf16.msra.mxu1 %v2941_v53 }
  0xa4   :  { %1825 = vmatprep.subr.bf16.mxu0 %v2946_v54  ;;  %1907 = vmatprep.subr.bf16.mxu1 %v2949_v55 }
  0xa7   :  { %1826 = vmatpush1.bf16.msra.mxu0 %v2944_v56  ;;  %1908 = vmatpush1.bf16.msra.mxu1 %v2947_v57 }
  0xa8   :  { %12 = vsyncpa [#allocation3], 0  ;;  %1827 = vmatprep.subr.bf16.mxu0 %v2952_v58  ;;  %1909 = vmatprep.subr.bf16.mxu1 %v2955_v59  ;;  %v2958_v62 = vld [vmem:[%s4109_s3 + $0x164] ss:$16 sps:$4 sm:$0xff]   ;;  %v2961_v63 = vld [vmem:[%s4109_s3 + $0x16c] ss:$16 sps:$4 sm:$0xff]  }
  0xa9   :  { %v2956_v0 = vld [vmem:[%s4109_s3 + $0x160] ss:$16 sps:$4 sm:$0xff]   ;;  %v2959_v1 = vld [vmem:[%s4109_s3 + $0x168] ss:$16 sps:$4 sm:$0xff]   ;;  %v2964_v2 = vld [vmem:[%s4109_s3 + $0x184] ss:$16 sps:$4 sm:$0xff]  }
  0xaa   :  { %v2967_v3 = vld [vmem:[%s4109_s3 + $0x18c] ss:$16 sps:$4 sm:$0xff]   ;;  %v2962_v4 = vld [vmem:[%s4109_s3 + $0x180] ss:$16 sps:$4 sm:$0xff]   ;;  %v2965_v5 = vld [vmem:[%s4109_s3 + $0x188] ss:$16 sps:$4 sm:$0xff]  }
  0xab   :  { %1828 = vmatpush1.bf16.msra.mxu0 %v2950_v60  ;;  %1910 = vmatpush1.bf16.msra.mxu1 %v2953_v61  ;;  %v2970_v6 = vld [vmem:[%s4109_s3 + $0x1a4] ss:$16 sps:$4 sm:$0xff]   ;;  %v2973_v7 = vld [vmem:[%s4109_s3 + $0x1ac] ss:$16 sps:$4 sm:$0xff]   ;;  %v2968_v8 = vld [vmem:[%s4109_s3 + $0x1a0] ss:$16 sps:$4 sm:$0xff]  }
  0xac   :  { %1829 = vmatprep.subr.bf16.mxu0 %v2958_v62  ;;  %1911 = vmatprep.subr.bf16.mxu1 %v2961_v63  ;;  %v2971_v10 = vld [vmem:[%s4109_s3 + $0x1a8] ss:$16 sps:$4 sm:$0xff]   ;;  %v2976_v11 = vld [vmem:[%s4109_s3 + $0x1c4] ss:$16 sps:$4 sm:$0xff]   ;;  %v2979_v12 = vld [vmem:[%s4109_s3 + $0x1cc] ss:$16 sps:$4 sm:$0xff]  }
  0xad   :  { %v2974_v13 = vld [vmem:[%s4109_s3 + $0x1c0] ss:$16 sps:$4 sm:$0xff]   ;;  %v2977_v14 = vld [vmem:[%s4109_s3 + $0x1c8] ss:$16 sps:$4 sm:$0xff]   ;;  %v2982_v15 = vld [vmem:[%s4109_s3 + $0x1e4] ss:$16 sps:$4 sm:$0xff]  }
  0xae   :  { %v2985_v16 = vld [vmem:[%s4109_s3 + $0x1ec] ss:$16 sps:$4 sm:$0xff]   ;;  %v2980_v17 = vld [vmem:[%s4109_s3 + $0x1e0] ss:$16 sps:$4 sm:$0xff]   ;;  %v2983_v18 = vld [vmem:[%s4109_s3 + $0x1e8] ss:$16 sps:$4 sm:$0xff]  }
  0xaf   :  { %1830 = vmatpush1.bf16.msra.mxu0 %v2956_v0  ;;  %1912 = vmatpush1.bf16.msra.mxu1 %v2959_v1  ;;  %v2988_v19 = vld [vmem:[%s4109_s3 + $0x204] ss:$16 sps:$4 sm:$0xff]   ;;  %v2991_v20 = vld [vmem:[%s4109_s3 + $0x20c] ss:$16 sps:$4 sm:$0xff]   ;;  %v187_v21 = vsub.s32 0, %v3297_v43  ;;  %v191_v23 = vsub.s32 1, %v3297_v43 }
  0xb0   :  { %1831 = vmatprep.subr.bf16.mxu0 %v2964_v2  ;;  %1913 = vmatprep.subr.bf16.mxu1 %v2967_v3  ;;  %v3778_v22 = vld [vmem:[%s4108_s2] sm:$0xf]  ;;  %v199_v24 = vsub.s32 3, %v3297_v43  ;;  %v2989_v44 = vld [vmem:[%s4109_s3 + $0x208] ss:$16 sps:$4 sm:$0xff]   ;;  %s3139_s0 = smov [#allocation2]  }
  0xb1   :  { %v188_v9 = vrot.slane %v3778_v22, %v187_v21  ;;  %v192_v25 = vrot.slane %v3778_v22, %v191_v23  ;;  %v2986_v42 = vld [vmem:[%s4109_s3 + $0x200] ss:$16 sps:$4 sm:$0xff]   ;;  %v2994_v46 = vld [vmem:[%s4109_s3 + $0x224] ss:$16 sps:$4 sm:$0xff]   ;;  %v2997_v47 = vld [vmem:[%s4109_s3 + $0x22c] ss:$16 sps:$4 sm:$0xff]  }
  0xb2   :  { %v200_v26 = vrot.slane %v3778_v22, %v199_v24  ;;  %v2992_v49 = vld [vmem:[%s4109_s3 + $0x220] ss:$16 sps:$4 sm:$0xff]   ;;  %v2995_v50 = vld [vmem:[%s4109_s3 + $0x228] ss:$16 sps:$4 sm:$0xff]   ;;  %v3000_v51 = vld [vmem:[%s4109_s3 + $0x244] ss:$16 sps:$4 sm:$0xff]  }
  0xb3   :  { %1832 = vmatpush1.bf16.msra.mxu0 %v2962_v4  ;;  %1914 = vmatpush1.bf16.msra.mxu1 %v2965_v5  ;;  %v3003_v52 = vld [vmem:[%s4109_s3 + $0x24c] ss:$16 sps:$4 sm:$0xff]   ;;  %v2998_v53 = vld [vmem:[%s4109_s3 + $0x240] ss:$16 sps:$4 sm:$0xff]   ;;  %v3001_v54 = vld [vmem:[%s4109_s3 + $0x248] ss:$16 sps:$4 sm:$0xff]  }
  0xb4   :  { %1833 = vmatprep.subr.bf16.mxu0 %v2970_v6  ;;  %1915 = vmatprep.subr.bf16.mxu1 %v2973_v7  ;;  %v3006_v55 = vld [vmem:[%s4109_s3 + $0x264] ss:$16 sps:$4 sm:$0xff]   ;;  %v3009_v56 = vld [vmem:[%s4109_s3 + $0x26c] ss:$16 sps:$4 sm:$0xff]   ;;  %v3004_v57 = vld [vmem:[%s4109_s3 + $0x260] ss:$16 sps:$4 sm:$0xff]  }
  0xb5   :  { %v3007_v58 = vld [vmem:[%s4109_s3 + $0x268] ss:$16 sps:$4 sm:$0xff]   ;;  %v3012_v59 = vld [vmem:[%s4109_s3 + $0x284] ss:$16 sps:$4 sm:$0xff]   ;;  %v3015_v60 = vld [vmem:[%s4109_s3 + $0x28c] ss:$16 sps:$4 sm:$0xff]  }
  0xb6   :  { %v3010_v61 = vld [vmem:[%s4109_s3 + $0x280] ss:$16 sps:$4 sm:$0xff]   ;;  %v3013_v62 = vld [vmem:[%s4109_s3 + $0x288] ss:$16 sps:$4 sm:$0xff]   ;;  %v3018_v63 = vld [vmem:[%s4109_s3 + $0x2a4] ss:$16 sps:$4 sm:$0xff]  }
  0xb7   :  { %1834 = vmatpush1.bf16.msra.mxu0 %v2968_v8  ;;  %1916 = vmatpush1.bf16.msra.mxu1 %v2971_v10  ;;  %v3021_v0 = vld [vmem:[%s4109_s3 + $0x2ac] ss:$16 sps:$4 sm:$0xff]   ;;  %v3016_v1 = vld [vmem:[%s4109_s3 + $0x2a0] ss:$16 sps:$4 sm:$0xff]   ;;  %v3019_v2 = vld [vmem:[%s4109_s3 + $0x2a8] ss:$16 sps:$4 sm:$0xff]  }
  0xb8   :  { %1835 = vmatprep.subr.bf16.mxu0 %v2976_v11  ;;  %1917 = vmatprep.subr.bf16.mxu1 %v2979_v12  ;;  %v3024_v3 = vld [vmem:[%s4109_s3 + $0x2c4] ss:$16 sps:$4 sm:$0xff]   ;;  %v3027_v4 = vld [vmem:[%s4109_s3 + $0x2cc] ss:$16 sps:$4 sm:$0xff]   ;;  %v3022_v5 = vld [vmem:[%s4109_s3 + $0x2c0] ss:$16 sps:$4 sm:$0xff]  }
  0xb9   :  { %v3025_v6 = vld [vmem:[%s4109_s3 + $0x2c8] ss:$16 sps:$4 sm:$0xff]   ;;  %v3030_v7 = vld [vmem:[%s4109_s3 + $0x2e4] ss:$16 sps:$4 sm:$0xff]   ;;  %v3033_v8 = vld [vmem:[%s4109_s3 + $0x2ec] ss:$16 sps:$4 sm:$0xff]  }
  0xba   :  { %v3028_v10 = vld [vmem:[%s4109_s3 + $0x2e0] ss:$16 sps:$4 sm:$0xff]   ;;  %v3031_v11 = vld [vmem:[%s4109_s3 + $0x2e8] ss:$16 sps:$4 sm:$0xff]   ;;  %v3036_v12 = vld [vmem:[%s4109_s3 + $0x304] ss:$16 sps:$4 sm:$0xff]  }
  0xbb   :  { %1836 = vmatpush1.bf16.msra.mxu0 %v2974_v13  ;;  %1918 = vmatpush1.bf16.msra.mxu1 %v2977_v14  ;;  %v3039_v13 = vld [vmem:[%s4109_s3 + $0x30c] ss:$16 sps:$4 sm:$0xff]   ;;  %v3034_v14 = vld [vmem:[%s4109_s3 + $0x300] ss:$16 sps:$4 sm:$0xff]   ;;  %s2330_s11 = sshll.u32 %s3139_s0, 4  ;;  %vm2322_vm0 = vcmask 74752   ;;  %s2331_s11 = int_to_ptr.vmem [resolvable:$true] %s2330_s11 }
  0xbc   :  { %1837 = vmatprep.subr.bf16.mxu0 %v2982_v15  ;;  %1919 = vmatprep.subr.bf16.mxu1 %v2985_v16  ;;  %v3037_v15 = vld [vmem:[%s4109_s3 + $0x308] ss:$16 sps:$4 sm:$0xff]   ;;  %v3042_v16 = vld [vmem:[%s4109_s3 + $0x324] ss:$16 sps:$4 sm:$0xff]   ;;  %s3114_s12 = scalar_lea.vmem %s2331_s11, 32  ;;  %p3119_p1 = scmp.lt.s32.totalorder %s2331_s11, %s2331_s11 }
  0xbd   :  { %p3115_p0 = scmp.ne.s32.totalorder %s2331_s11, %s3114_s12  ;;  %p3120_p2 = scmp.lt.s32.totalorder %s3114_s12, %s3114_s12 }
  0xbf   :  { %1838 = vmatpush1.bf16.msra.mxu0 %v2980_v17  ;;  %1920 = vmatpush1.bf16.msra.mxu1 %v2983_v18  ;;  %v3045_v17 = vld [vmem:[%s4109_s3 + $0x32c] ss:$16 sps:$4 sm:$0xff]   ;;  %v3040_v18 = vld [vmem:[%s4109_s3 + $0x320] ss:$16 sps:$4 sm:$0xff]   ;;  %p3121_p3 = por %p3120_p2, %p3119_p1 }
  0xc0   :  { %1848 = vmatprep.subr.bf16.mxu0 %v2988_v19  ;;  %1930 = vmatprep.subr.bf16.mxu1 %v2991_v20  ;;  %v3043_v19 = vld [vmem:[%s4109_s3 + $0x328] ss:$16 sps:$4 sm:$0xff]   ;;  %v3048_v20 = vld [vmem:[%s4109_s3 + $0x344] ss:$16 sps:$4 sm:$0xff]  }
  0xc1   :  { %p3122_p4 = pnand %p3121_p3, %p3115_p0 }
 0x155   :  { %v920_v27 = vpop.f32.mrb[0].mxu0  ;;  %v3791_v28 = vpop.f32.mrb[0].mxu1 }
 0x156   :  { %v2671_v29 = vadd.f32 %v920_v27, %v188_v9  ;;  %v922_v30 = vpop.f32.mrb[1].mxu0  ;;  %v1004_v31 = vpop.f32.mrb[1].mxu1  ;;  %v3051_v9 = vld [vmem:[%s4109_s3 + $0x34c] ss:$16 sps:$4 sm:$0xff]   ;;  %v3054_v27 = vld [vmem:[%s4109_s3 + $0x364] ss:$16 sps:$4 sm:$0xff]  }
 0x157   :  { %v2672_v32 = vadd.f32 %v922_v30, %v192_v25  ;;  %v2674_v33 = vadd.f32 %v1004_v31, %v200_v26  ;;  %v924_v34 = vpop.f32.mrb[2].mxu0  ;;  %v1006_v35 = vpop.f32.mrb[2].mxu1  ;;  %v3046_v25 = vld [vmem:[%s4109_s3 + $0x340] ss:$16 sps:$4 sm:$0xff]   ;;  %v3049_v26 = vld [vmem:[%s4109_s3 + $0x348] ss:$16 sps:$4 sm:$0xff]  }
 0x158   :  { %v1009_v36 = vmax.f32 %v2671_v29, 0.0  ;;  %v925_v37 = vpop.f32.mrb[3].mxu0  ;;  %v1007_v38 = vpop.f32.mrb[3].mxu1  ;;  %v3057_v29 = vld [vmem:[%s4109_s3 + $0x36c] ss:$16 sps:$4 sm:$0xff]  }
 0x159   :  { %v1010_v39 = vmax.f32 %v2672_v32, 0.0  ;;  %v1012_v40 = vmax.f32 %v2674_v33, 0.0  ;;  %v3052_v30 = vld [vmem:[%s4109_s3 + $0x360] ss:$16 sps:$4 sm:$0xff]   ;;  %v3055_v31 = vld [vmem:[%s4109_s3 + $0x368] ss:$16 sps:$4 sm:$0xff]  }
 0x15a   :  { %v1013_v45 = vpack.c.bf16 %v1009_v36, %v1009_v36  ;;  %v3060_v32 = vld [vmem:[%s4109_s3 + $0x384] ss:$16 sps:$4 sm:$0xff]   ;;  %v3063_v33 = vld [vmem:[%s4109_s3 + $0x38c] ss:$16 sps:$4 sm:$0xff]   ;;  %v3058_v34 = vld [vmem:[%s4109_s3 + $0x380] ss:$16 sps:$4 sm:$0xff]  }
 0x15b   :  { %v1014_v41 = vpack.c.bf16 %v1010_v39, %v1010_v39  ;;  %v1016_v48 = vpack.c.bf16 %v1012_v40, %v1012_v40  ;;  %v3061_v35 = vld [vmem:[%s4109_s3 + $0x388] ss:$16 sps:$4 sm:$0xff]   ;;  %v195_v36 = vsub.s32 2, %v3297_v43  ;;  %v3066_v37 = vld [vmem:[%s4109_s3 + $0x3a4] ss:$16 sps:$4 sm:$0xff]  }
 0x15c   :  { %v3069_v38 = vld [vmem:[%s4109_s3 + $0x3ac] ss:$16 sps:$4 sm:$0xff]   ;;  %v3064_v39 = vld [vmem:[%s4109_s3 + $0x3a0] ss:$16 sps:$4 sm:$0xff]   ;;  %v3067_v40 = vld [vmem:[%s4109_s3 + $0x3a8] ss:$16 sps:$4 sm:$0xff]  }
 0x15d   :  { %1839 = vmatprep.mubr.bf16.mxu0 %v1014_v41  ;;  %1921 = vmatprep.mubr.bf16.mxu1 %v1014_v41  ;;  %v196_v41 = vrot.slane %v3778_v22, %v195_v36  ;;  %v3073_v22 = vld [vmem:[%s4109_s3 + $0x3c8] ss:$16 sps:$4 sm:$0xff]  }
 0x15e   :  { %1840 = vmatmul.mubr.bf16.vlgmr.msra.gmra.mrb[4].mxu0 %v1013_v45  ;;  %1922 = vmatmul.mubr.bf16.vlgmr.msra.gmra.mrb[4].mxu1 %v1013_v45  ;;  %v3070_v45 = vld [vmem:[%s4109_s3 + $0x3c0] ss:$16 sps:$4 sm:$0xff]  }
 0x15f   :  { %1849 = vmatpush1.bf16.msra.mxu0 %v2986_v42  ;;  %1931 = vmatpush1.bf16.msra.mxu1 %v2989_v44  ;;  %v3072_v42 = vld [vmem:[%s4109_s3 + $0x3c4] ss:$16 sps:$4 sm:$0xff]   ;;  %v3075_v44 = vld [vmem:[%s4109_s3 + $0x3cc] ss:$16 sps:$4 sm:$0xff]  }
 0x160   :  { %1880 = vmatprep.mubr.bf16.mxu0 %v1016_v48  ;;  %1962 = vmatprep.mubr.bf16.mxu1 %v1016_v48  ;;  %v3081_v48 = vld [vmem:[%s4109_s3 + $0x3ec] ss:$16 sps:$4 sm:$0xff]  }
 0x161   :  { %1850 = vmatprep.subr.bf16.mxu0 %v2994_v46  ;;  %1932 = vmatprep.subr.bf16.mxu1 %v2997_v47  ;;  %v2673_v46 = vadd.f32 %v3791_v28, %v196_v41  ;;  %v3078_v47 = vld [vmem:[%s4109_s3 + $0x3e4] ss:$16 sps:$4 sm:$0xff]   ;;  %v3079_v28 = vld [vmem:[%s4109_s3 + $0x3e8] ss:$16 sps:$4 sm:$0xff]  }
 0x163   :  { %1851 = vmatpush1.bf16.msra.mxu0 %v2992_v49  ;;  %1933 = vmatpush1.bf16.msra.mxu1 %v2995_v50  ;;  %v3076_v49 = vld [vmem:[%s4109_s3 + $0x3e0] ss:$16 sps:$4 sm:$0xff]   ;;  %v1011_v50 = vmax.f32 %v2673_v46, 0.0 }
 0x164   :  { %1852 = vmatprep.subr.bf16.mxu0 %v3000_v51  ;;  %1934 = vmatprep.subr.bf16.mxu1 %v3003_v52  ;;  %v3082_v51 = vld [vmem:[%s4111_s5 + $0x40] sm:$0xff]  }
 0x165   :  { %v3083_v52 = vld [vmem:[%s4111_s5 + $0xc0] sm:$0xff]  }
 0x167   :  { %1853 = vmatpush1.bf16.msra.mxu0 %v2998_v53  ;;  %1935 = vmatpush1.bf16.msra.mxu1 %v3001_v54  ;;  %v3084_v53 = vld [vmem:[%s4111_s5] sm:$0xff]  }
 0x168   :  { %1854 = vmatprep.subr.bf16.mxu0 %v3006_v55  ;;  %1936 = vmatprep.subr.bf16.mxu1 %v3009_v56  ;;  %v3085_v54 = vld [vmem:[%s4111_s5 + $0x80] sm:$0xff]   ;;  %v1015_v55 = vpack.c.bf16 %v1011_v50, %v1011_v50  ;;  %v3086_v56 = vld [vmem:[%s4111_s5 + $0x48] sm:$0xff]  }
 0x16b   :  { %1855 = vmatpush1.bf16.msra.mxu0 %v3004_v57  ;;  %1937 = vmatpush1.bf16.msra.mxu1 %v3007_v58  ;;  %v3087_v57 = vld [vmem:[%s4111_s5 + $0xc8] sm:$0xff]  }
 0x16c   :  { %1856 = vmatprep.subr.bf16.mxu0 %v3012_v59  ;;  %1938 = vmatprep.subr.bf16.mxu1 %v3015_v60  ;;  %v3088_v58 = vld [vmem:[%s4111_s5 + $0x8] sm:$0xff]   ;;  %v3090_v60 = vld [vmem:[%s4111_s5 + $0x50] sm:$0xff]  }
 0x16d   :  { %v3089_v59 = vld [vmem:[%s4111_s5 + $0x88] sm:$0xff]  }
 0x16f   :  { %1857 = vmatpush1.bf16.msra.mxu0 %v3010_v61  ;;  %1939 = vmatpush1.bf16.msra.mxu1 %v3013_v62  ;;  %v3091_v61 = vld [vmem:[%s4111_s5 + $0xd0] sm:$0xff]  }
 0x170   :  { %1858 = vmatprep.subr.bf16.mxu0 %v3018_v63  ;;  %1940 = vmatprep.subr.bf16.mxu1 %v3021_v0  ;;  %v3092_v62 = vld [vmem:[%s4111_s5 + $0x10] sm:$0xff]   ;;  %v3094_v0 = vld [vmem:[%s4111_s5 + $0x58] sm:$0xff]  }
 0x171   :  { %v3093_v63 = vld [vmem:[%s4111_s5 + $0x90] sm:$0xff]  }
 0x173   :  { %1859 = vmatpush1.bf16.msra.mxu0 %v3016_v1  ;;  %1941 = vmatpush1.bf16.msra.mxu1 %v3019_v2  ;;  %v3095_v1 = vld [vmem:[%s4111_s5 + $0xd8] sm:$0xff]  }
 0x174   :  { %1860 = vmatprep.subr.bf16.mxu0 %v3024_v3  ;;  %1942 = vmatprep.subr.bf16.mxu1 %v3027_v4  ;;  %v3096_v2 = vld [vmem:[%s4111_s5 + $0x18] sm:$0xff]   ;;  %v3098_v4 = vld [vmem:[%s4111_s5 + $0x60] sm:$0xff]  }
 0x175   :  { %v3097_v3 = vld [vmem:[%s4111_s5 + $0x98] sm:$0xff]  }
 0x177   :  { %1861 = vmatpush1.bf16.msra.mxu0 %v3022_v5  ;;  %1943 = vmatpush1.bf16.msra.mxu1 %v3025_v6  ;;  %v3099_v5 = vld [vmem:[%s4111_s5 + $0xe0] sm:$0xff]  }
 0x178   :  { %1862 = vmatprep.subr.bf16.mxu0 %v3030_v7  ;;  %1944 = vmatprep.subr.bf16.mxu1 %v3033_v8  ;;  %v3100_v6 = vld [vmem:[%s4111_s5 + $0x20] sm:$0xff]   ;;  %v3102_v8 = vld [vmem:[%s4111_s5 + $0x68] sm:$0xff]  }
 0x179   :  { %v3101_v7 = vld [vmem:[%s4111_s5 + $0xa0] sm:$0xff]  }
 0x17b   :  { %1863 = vmatpush1.bf16.msra.mxu0 %v3028_v10  ;;  %1945 = vmatpush1.bf16.msra.mxu1 %v3031_v11  ;;  %v3103_v10 = vld [vmem:[%s4111_s5 + $0xe8] sm:$0xff]  }
 0x17c   :  { %1864 = vmatprep.subr.bf16.mxu0 %v3036_v12  ;;  %1946 = vmatprep.subr.bf16.mxu1 %v3039_v13  ;;  %v3104_v11 = vld [vmem:[%s4111_s5 + $0x28] sm:$0xff]   ;;  %v3106_v13 = vld [vmem:[%s4111_s5 + $0x70] sm:$0xff]  }
 0x17d   :  { %v3105_v12 = vld [vmem:[%s4111_s5 + $0xa8] sm:$0xff]  }
 0x17f   :  { %1865 = vmatpush1.bf16.msra.mxu0 %v3034_v14  ;;  %1947 = vmatpush1.bf16.msra.mxu1 %v3037_v15  ;;  %v3107_v14 = vld [vmem:[%s4111_s5 + $0xf0] sm:$0xff]  }
 0x180   :  { %1866 = vmatprep.subr.bf16.mxu0 %v3042_v16  ;;  %1948 = vmatprep.subr.bf16.mxu1 %v3045_v17  ;;  %v3108_v15 = vld [vmem:[%s4111_s5 + $0x30] sm:$0xff]   ;;  %v3110_v17 = vld [vmem:[%s4111_s5 + $0x78] sm:$0xff]  }
 0x181   :  { %v3109_v16 = vld [vmem:[%s4111_s5 + $0xb0] sm:$0xff]  }
 0x183   :  { %1867 = vmatpush1.bf16.msra.mxu0 %v3040_v18  ;;  %1949 = vmatpush1.bf16.msra.mxu1 %v3043_v19  ;;  %v3111_v18 = vld [vmem:[%s4111_s5 + $0xf8] sm:$0xff]  }
 0x184   :  { %1868 = vmatprep.subr.bf16.mxu0 %v3048_v20  ;;  %1950 = vmatprep.subr.bf16.mxu1 %v3051_v9  ;;  %v3112_v19 = vld [vmem:[%s4111_s5 + $0x38] sm:$0xff]   ;;  %v1145_v9 = vld [vmem:[%s4110_s4] sm:$0xf] }
 0x185   :  { %v3113_v20 = vld [vmem:[%s4111_s5 + $0xb8] sm:$0xff]  }
 0x187   :  { %1869 = vmatpush1.bf16.msra.mxu0 %v3046_v25  ;;  %1951 = vmatpush1.bf16.msra.mxu1 %v3049_v26  ;;  %v1150_v25 = vrot.slane %v1145_v9, %v187_v21  ;;  %v1158_v26 = vrot.slane %v1145_v9, %v195_v36 }
 0x188   :  { %1870 = vmatprep.subr.bf16.mxu0 %v3054_v27  ;;  %1952 = vmatprep.subr.bf16.mxu1 %v3057_v29  ;;  %v1154_v27 = vrot.slane %v1145_v9, %v191_v23  ;;  %v1162_v29 = vrot.slane %v1145_v9, %v199_v24 }
 0x18b   :  { %1871 = vmatpush1.bf16.msra.mxu0 %v3052_v30  ;;  %1953 = vmatpush1.bf16.msra.mxu1 %v3055_v31 }
 0x18c   :  { %1872 = vmatprep.subr.bf16.mxu0 %v3060_v32  ;;  %1954 = vmatprep.subr.bf16.mxu1 %v3063_v33 }
 0x18f   :  { %1873 = vmatpush1.bf16.msra.mxu0 %v3058_v34  ;;  %1955 = vmatpush1.bf16.msra.mxu1 %v3061_v35 }
 0x190   :  { %1874 = vmatprep.subr.bf16.mxu0 %v3066_v37  ;;  %1956 = vmatprep.subr.bf16.mxu1 %v3069_v38 }
 0x193   :  { %1875 = vmatpush1.bf16.msra.mxu0 %v3064_v39  ;;  %1957 = vmatpush1.bf16.msra.mxu1 %v3067_v40 }
 0x194   :  { %1876 = vmatprep.subr.bf16.mxu0 %v3072_v42  ;;  %1958 = vmatprep.subr.bf16.mxu1 %v3075_v44 }
 0x197   :  { %1877 = vmatpush1.bf16.msra.mxu0 %v3070_v45  ;;  %1959 = vmatpush1.bf16.msra.mxu1 %v3073_v22 }
 0x198   :  { %1878 = vmatprep.subr.bf16.mxu0 %v3078_v47  ;;  %1960 = vmatprep.subr.bf16.mxu1 %v3081_v48  ;;  %v2594_v48 = vld [vmem:[%s4112_s6] ss:$0 sm:$0xff] }
 0x19b   :  { %1879 = vmatpush1.bf16.msra.mxu0 %v3076_v49  ;;  %1961 = vmatpush1.bf16.msra.mxu1 %v3079_v28 }
 0x19c   :  { %2627 = vmatprep.subr.bf16.mxu0 %v3082_v51  ;;  %2649 = vmatprep.subr.bf16.mxu1 %v3083_v52 }
 0x19e   :  { %1881 = vmatmul.mubr.bf16.vlgmr.msra.gmra.mrb[4].mxu0 %v1015_v55  ;;  %1963 = vmatmul.mubr.bf16.vlgmr.msra.gmra.mrb[4].mxu1 %v1015_v55 }
 0x19f   :  { %2628 = vmatpush3.bf16.msra.mxu0 %v3084_v53  ;;  %2650 = vmatpush3.bf16.msra.mxu1 %v3085_v54 }
 0x1a0   :  { %2629 = vmatprep.subr.bf16.mxu0 %v3086_v56  ;;  %2651 = vmatprep.subr.bf16.mxu1 %v3087_v57 }
 0x1a3   :  { %2630 = vmatpush3.bf16.msra.mxu0 %v3088_v58  ;;  %2652 = vmatpush3.bf16.msra.mxu1 %v3089_v59 }
 0x1a4   :  { %2631 = vmatprep.subr.bf16.mxu0 %v3090_v60  ;;  %2653 = vmatprep.subr.bf16.mxu1 %v3091_v61 }
 0x1a7   :  { %2632 = vmatpush3.bf16.msra.mxu0 %v3092_v62  ;;  %2654 = vmatpush3.bf16.msra.mxu1 %v3093_v63 }
 0x1a8   :  { %2633 = vmatprep.subr.bf16.mxu0 %v3094_v0  ;;  %2655 = vmatprep.subr.bf16.mxu1 %v3095_v1 }
 0x1ab   :  { %2634 = vmatpush3.bf16.msra.mxu0 %v3096_v2  ;;  %2656 = vmatpush3.bf16.msra.mxu1 %v3097_v3 }
 0x1ac   :  { %2635 = vmatprep.subr.bf16.mxu0 %v3098_v4  ;;  %2657 = vmatprep.subr.bf16.mxu1 %v3099_v5 }
 0x1af   :  { %2636 = vmatpush3.bf16.msra.mxu0 %v3100_v6  ;;  %2658 = vmatpush3.bf16.msra.mxu1 %v3101_v7 }
 0x1b0   :  { %2637 = vmatprep.subr.bf16.mxu0 %v3102_v8  ;;  %2659 = vmatprep.subr.bf16.mxu1 %v3103_v10 }
 0x1b3   :  { %2638 = vmatpush3.bf16.msra.mxu0 %v3104_v11  ;;  %2660 = vmatpush3.bf16.msra.mxu1 %v3105_v12 }
 0x1b4   :  { %2639 = vmatprep.subr.bf16.mxu0 %v3106_v13  ;;  %2661 = vmatprep.subr.bf16.mxu1 %v3107_v14 }
 0x1b7   :  { %2640 = vmatpush3.bf16.msra.mxu0 %v3108_v15  ;;  %2662 = vmatpush3.bf16.msra.mxu1 %v3109_v16 }
 0x1b8   :  { %2641 = vmatprep.subr.bf16.mxu0 %v3110_v17  ;;  %2663 = vmatprep.subr.bf16.mxu1 %v3111_v18 }
 0x1bb   :  { %2642 = vmatpush3.bf16.msra.mxu0 %v3112_v19  ;;  %2664 = vmatpush3.bf16.msra.mxu1 %v3113_v20 }
 0x271   :  { %v1882_v30 = vpop.f32.mrb[4].mxu0  ;;  %v1964_v31 = vpop.f32.mrb[4].mxu1 }
 0x272   :  { %v2675_v32 = vadd.f32 %v1882_v30, %v1150_v25  ;;  %v2677_v33 = vadd.f32 %v1964_v31, %v1158_v26  ;;  %v1884_v34 = vpop.f32.mrb[5].mxu0  ;;  %v1966_v35 = vpop.f32.mrb[5].mxu1 }
 0x273   :  { %v2676_v37 = vadd.f32 %v1884_v34, %v1154_v27  ;;  %v2678_v38 = vadd.f32 %v1966_v35, %v1162_v29  ;;  %v1886_v39 = vpop.f32.mrb[6].mxu0  ;;  %v1968_v40 = vpop.f32.mrb[6].mxu1 }
 0x274   :  { %v1971_v21 = vmax.f32 %v2675_v32, 0.0  ;;  %v1973_v41 = vmax.f32 %v2677_v33, 0.0  ;;  %v1887_v42 = vpop.f32.mrb[7].mxu0  ;;  %v1969_v36 = vpop.f32.mrb[7].mxu1 }
 0x275   :  { %v1972_v44 = vmax.f32 %v2676_v37, 0.0  ;;  %v1974_v45 = vmax.f32 %v2678_v38, 0.0 }
 0x276   :  { %v1975_v43 = vpack.c.bf16 %v1971_v21, %v1971_v21  ;;  %v1977_v24 = vpack.c.bf16 %v1973_v41, %v1973_v41 }
 0x277   :  { %v1976_v23 = vpack.c.bf16 %v1972_v44, %v1972_v44  ;;  %v1978_v22 = vpack.c.bf16 %v1974_v45, %v1974_v45 }
 0x279   :  { %2274 = vmatprep.mubr.bf16.mxu0 %v1976_v23  ;;  %2314 = vmatprep.mubr.bf16.mxu1 %v1978_v22 }
 0x27a   :  { %2275 = vmatmul.mubr.bf16.vlgmr.msra.gmra.mrb[8].mxu0 %v1975_v43  ;;  %2315 = vmatmul.mubr.bf16.vlgmr.msra.gmra.mrb[8].mxu1 %v1977_v24 }
 0x34d   :  { %v2643_v46 = vpop.f32.mrb[8].mxu0  ;;  %v2665_v47 = vpop.f32.mrb[8].mxu1 }
 0x34e   :  { %v2644_v49 = vpop.f32.mrb[9].mxu0  ;;  %v2666_v28 = vpop.f32.mrb[9].mxu1 }
 0x34f   :  { %v2645_v50 = vadd.f32 %v2644_v49, %v2643_v46  ;;  %v2667_v51 = vadd.f32 %v2666_v28, %v2665_v47  ;;  %v2646_v52 = vpop.f32.mrb[10].mxu0  ;;  %v2668_v53 = vpop.f32.mrb[10].mxu1 }
 0x350   :  { %v2647_v54 = vpop.f32.mrb[11].mxu0  ;;  %v2669_v55 = vpop.f32.mrb[11].mxu1 }
 0x351   :  { %v2277_v56 = vadd.f32 %v2645_v50, %v2594_v48 }
 0x353   :  { %v2317_v57 = vadd.f32 %v2667_v51, %v2277_v56 }
 0x355   :  { %2323 = vst.msk [vmem:[#allocation2] sm:$0x3] %vm2322_vm0, %v2317_v57 }
 0x356   :  { %3125 = shalt.err (!%p3122_p4)
}
 0x357   :  { %s3126_s14 = scalar_lea.hbm %s4113_s7, 32 }
 0x358   :  { %p3127_p5 = scmp.ne.s32.totalorder %s4113_s7, %s3126_s14  ;;  %p3130_p6 = scmp.lt.u32.totalorder %s3126_s14, %s4113_s7 }
 0x35a   :  { %p3132_p7 = pnand %p3130_p6, %p3127_p5 }
 0x35c   :  { %3135 = shalt.err (!%p3132_p7)
}
 0x35d   :  { %2333 = dma.vmem_to_hbm [thread:$0]  %s2331_s11, 32, %s4113_s7, [#allocation3]  }
 0x35e   :  { %3136 = dma.done.wait [#allocation3], 32  }
 0x35f   :  { %3137 = vsyncadd [#allocation3], 4294967264 }
 0x360   :  { %2337 = vsyncpa [#allocation3], 1 }

</bundles_post_ra>
